<compile_context>
chip_gen: v7x
topology: tpu7x:2x2x1
jax: 0.10.0
libtpu: 0.0.40
codegen_flags: <defaults>
</compile_context>

<pallas_src>
import functools

import jax
import jax.numpy as jnp
from jax import lax
from jax.experimental import pallas as pl
from jax.experimental.pallas import tpu as pltpu

_VMEM = pl.BlockSpec(memory_space=pltpu.MemorySpace.VMEM)
_VMEM_LIMIT = 32 * 1024 * 1024          # conservative: fits v5e/v6e/v7x budgets


# ------------------------------- kernels ------------------------------------

def _swish(y):
    # y * sigmoid(y); reciprocal on the EUP (free slot), exp already on EUP.
    return y * pl.reciprocal(1.0 + jnp.exp(-y), approx=True)


def _gn_swish_kernel(x_ref, g_ref, b_ref, o_ref):
    # x block: (1, G, Cg, S) f32 ; gamma/beta: (G, Cg, 1).
    x = x_ref[0]                                                    # (G, Cg, S)
    mean = jnp.mean(jnp.mean(x, axis=2, keepdims=True), axis=1, keepdims=True)
    xc = x - mean
    var = jnp.mean(jnp.mean(xc * xc, axis=2, keepdims=True), axis=1,
                   keepdims=True)
    y = xc * lax.rsqrt(var + 1e-5) * g_ref[...] + b_ref[...]
    o_ref[0] = _swish(y)


def _conv3x3_bias_kernel(p_ref, w_ref, b_ref, e_ref, o_ref, acc_ref):
    # grid = (B, S//ts, taps);  one 3x3 tap per step (K streaming).
    # p: (1,1,Cin,ts) bf16, w: (1,Cout,Cin) bf16, b: (Cout,1), e: (1,Cout,1)
    k = pl.program_id(2)

    @pl.when(k == 0)
    def _init():
        acc_ref[...] = jnp.zeros_like(acc_ref)

    acc_ref[...] += jnp.dot(w_ref[0], p_ref[0, 0],
                            preferred_element_type=jnp.float32)

    @pl.when(k == pl.num_programs(2) - 1)
    def _fin():
        # fused epilogue: conv bias + per-(batch, channel) time-embedding bias
        o_ref[0] = acc_ref[...] + b_ref[...] + e_ref[0]


def _conv3x3_res_kernel(p_ref, w_ref, b_ref, r_ref, o_ref, acc_ref):
    # Same as above, epilogue fuses the shortcut/residual add (r: (1,Cout,ts)).
    k = pl.program_id(2)

    @pl.when(k == 0)
    def _init():
        acc_ref[...] = jnp.zeros_like(acc_ref)

    acc_ref[...] += jnp.dot(w_ref[0], p_ref[0, 0],
                            preferred_element_type=jnp.float32)

    @pl.when(k == pl.num_programs(2) - 1)
    def _fin():
        o_ref[0] = acc_ref[...] + b_ref[...] + r_ref[0]


def _conv1x1_kernel(x_ref, w_ref, b_ref, o_ref):
    # Weights-on-left 1x1 conv: (Cout,Cin) @ (Cin,ts) -> lane-dense (Cout,ts).
    o_ref[0] = jnp.dot(w_ref[...], x_ref[0],
                       preferred_element_type=jnp.float32) + b_ref[...]


def _time_mlp_kernel(t_ref, w_ref, b_ref, o_ref):
    # emb = Swish(t @ W^T + b); tiny (B x 256 x Cout), single launch.
    h = lax.dot_general(t_ref[...], w_ref[...], (((1,), (1,)), ((), ())),
                        preferred_element_type=jnp.float32) + b_ref[...]
    o_ref[...] = _swish(h)


# ------------------------------ wrappers -------------------------------------

def _pick_spatial_tile(s, max_tile=512):
    """Largest spatial tile <= max_tile that is a multiple of 128 and divides S."""
    if s <= max_tile:
        return s
    for ts in range(max_tile, 0, -128):
        if s % ts == 0:
            return ts
    return s


def gn_swish(x, gamma, beta, num_groups):
    # x: (B, C, S) f32  ->  Swish(GroupNorm(x))  (B, C, S) f32
    b, c, s = x.shape
    g = num_groups
    cg = c // g
    xg = x.reshape(b, g, cg, s)                       # metadata-only reshape
    gam = gamma.reshape(g, cg, 1).astype(jnp.float32)
    bet = beta.reshape(g, cg, 1).astype(jnp.float32)
    x_spec = pl.BlockSpec((1, g, cg, s), lambda i: (i, 0, 0, 0))
    p_spec = pl.BlockSpec((g, cg, 1), lambda i: (0, 0, 0))
    out = pl.pallas_call(
        _gn_swish_kernel,
        grid=(b,),
        in_specs=[x_spec, p_spec, p_spec],
        out_specs=x_spec,
        out_shape=jax.ShapeDtypeStruct((b, g, cg, s), jnp.float32),
        compiler_params=pltpu.CompilerParams(
            dimension_semantics=("parallel",),
            vmem_limit_bytes=_VMEM_LIMIT),
    )(xg, gam, bet)
    return out.reshape(b, c, s)


def _im2col_taps(x):
    # x: (B, C, H, W) -> (B, 9, C, H*W); tap k = dy*3+dx of the zero-padded 3x3.
    # TODO(synk): stream the 9 taps straight from the padded HBM tensor with
    # manual DMA to avoid this 9x materialization at production sizes.
    b, c, h, w = x.shape
    xp = jnp.pad(x, ((0, 0), (0, 0), (1, 1), (1, 1)))
    taps = [xp[:, :, dy:dy + h, dx:dx + w] for dy in range(3) for dx in range(3)]
    return jnp.stack(taps, axis=1).reshape(b, 9, c, h * w)


def conv3x3(x, w, bias, *, channel_bias=None, residual=None):
    """3x3/pad=1 conv on NCHW x, fused epilogue.  Returns (B, Cout, S) f32.

    channel_bias: (B, Cout) added per (batch, channel)   (time embedding)
    residual:     (B, Cout, S) added elementwise          (shortcut)
    """
    b, cin, h, wdt = x.shape
    cout = w.shape[0]
    s = h * wdt
    ts = _pick_spatial_tile(s)

    patches = _im2col_taps(x.astype(jnp.bfloat16))                 # (B,9,Cin,S)
    wr = jnp.transpose(w, (2, 3, 0, 1)).reshape(9, cout, cin).astype(jnp.bfloat16)
    br = bias.reshape(cout, 1).astype(jnp.float32)

    grid = (b, s // ts, 9)
    p_spec = pl.BlockSpec((1, 1, cin, ts), lambda bi, si, ki: (bi, ki, 0, si))
    w_spec = pl.BlockSpec((1, cout, cin), lambda bi, si, ki: (ki, 0, 0))
    b_spec = pl.BlockSpec((cout, 1), lambda bi, si, ki: (0, 0))
    o_spec = pl.BlockSpec((1, cout, ts), lambda bi, si, ki: (bi, 0, si))
    cp = pltpu.CompilerParams(
        dimension_semantics=("parallel", "parallel", "arbitrary"),
        vmem_limit_bytes=_VMEM_LIMIT)
    scratch = [pltpu.VMEM((cout, ts), jnp.float32)]
    out_shape = jax.ShapeDtypeStruct((b, cout, s), jnp.float32)

    if residual is not None:
        r_spec = pl.BlockSpec((1, cout, ts), lambda bi, si, ki: (bi, 0, si))
        return pl.pallas_call(
            _conv3x3_res_kernel, grid=grid,
            in_specs=[p_spec, w_spec, b_spec, r_spec], out_specs=o_spec,
            out_shape=out_shape, scratch_shapes=scratch, compiler_params=cp,
        )(patches, wr, br, residual.astype(jnp.float32))

    if channel_bias is None:
        channel_bias = jnp.zeros((b, cout), jnp.float32)
    e = channel_bias.reshape(b, cout, 1).astype(jnp.float32)
    e_spec = pl.BlockSpec((1, cout, 1), lambda bi, si, ki: (bi, 0, 0))
    return pl.pallas_call(
        _conv3x3_bias_kernel, grid=grid,
        in_specs=[p_spec, w_spec, b_spec, e_spec], out_specs=o_spec,
        out_shape=out_shape, scratch_shapes=scratch, compiler_params=cp,
    )(patches, wr, br, e)


def conv1x1(x, w, bias):
    # x: (B, Cin, S);  w: (Cout, Cin, 1, 1)  ->  (B, Cout, S) f32
    b, cin, s = x.shape
    cout = w.shape[0]
    ts = _pick_spatial_tile(s)
    w2 = w.reshape(cout, cin).astype(jnp.bfloat16)
    x_spec = pl.BlockSpec((1, cin, ts), lambda bi, si: (bi, 0, si))
    w_spec = pl.BlockSpec((cout, cin), lambda bi, si: (0, 0))
    b_spec = pl.BlockSpec((cout, 1), lambda bi, si: (0, 0))
    o_spec = pl.BlockSpec((1, cout, ts), lambda bi, si: (bi, 0, si))
    return pl.pallas_call(
        _conv1x1_kernel,
        grid=(b, s // ts),
        in_specs=[x_spec, w_spec, b_spec],
        out_specs=o_spec,
        out_shape=jax.ShapeDtypeStruct((b, cout, s), jnp.float32),
        compiler_params=pltpu.CompilerParams(
            dimension_semantics=("parallel", "parallel"),
            vmem_limit_bytes=_VMEM_LIMIT),
    )(x.astype(jnp.bfloat16), w2, bias.reshape(cout, 1).astype(jnp.float32))


def time_mlp(t, w, bias):
    # TimeEmbeddings(256, dim_out) with out_channels set -> Swish(Linear(t)).
    b = t.shape[0]
    cout = w.shape[0]
    return pl.pallas_call(
        _time_mlp_kernel,
        out_shape=jax.ShapeDtypeStruct((b, cout), jnp.float32),
        in_specs=[_VMEM, _VMEM, _VMEM],
        out_specs=_VMEM,
    )(t.astype(jnp.float32), w.astype(jnp.float32),
      bias.reshape(1, cout).astype(jnp.float32))


# --------------------------- ResidualBlock forward ---------------------------

def residual_block_forward(inputs, t, params, *, num_groups=32,
                           ad_group_norm=False):
    """Mirrors ResidualBlock.forward (ad_group_norm=False default path)."""
    if ad_group_norm:
        # TODO(synk): ad_group_norm=True (scale/shift GroupNorm from a 2*dim_out
        # time embedding) not implemented; default constructor path only.
        raise NotImplementedError("ad_group_norm=True path not implemented")

    b, cin, h, w = inputs.shape
    cout = params["conv1_w"].shape[0]
    s = h * w
    x0 = inputs.reshape(b, cin, s)                         # NCHW-flat, free

    # x = swish(gn1(inputs))
    hx = gn_swish(x0, params["gn1_w"], params["gn1_b"], num_groups)

    # emb = Swish(Linear(256 -> dim_out)(t))
    emb = time_mlp(t, params["time_w"], params["time_b"])  # (B, Cout)

    # x = conv1(x);  x += emb.view(B, Cout, 1, 1)          (fused epilogue)
    hx = conv3x3(hx.reshape(b, cin, h, w), params["conv1_w"],
                 params["conv1_b"], channel_bias=emb)      # (B, Cout, S)

    # x = swish(gn2(x))
    hx = gn_swish(hx, params["gn2_w"], params["gn2_b"], num_groups)

    # shortcut(inputs)
    if cin != cout:
        skip = conv1x1(x0, params["skip_w"], params["skip_b"])
    else:
        skip = x0

    # x = conv2(x) + shortcut(inputs)                      (fused epilogue)
    out = conv3x3(hx.reshape(b, cout, h, w), params["conv2_w"],
                  params["conv2_b"], residual=skip)
    return out.reshape(b, cout, h, w)


# ------------------------------ parameter init -------------------------------

def init_params(key, dim_in, dim_out, time_in=256):
    ks = iter(jax.random.split(key, 16))

    def nrm(shape, scale=0.05):
        return (scale * jax.random.normal(next(ks), shape)).astype(jnp.float32)

    p = {
        "gn1_w": jnp.ones((dim_in,), jnp.float32),
        "gn1_b": jnp.zeros((dim_in,), jnp.float32),
        "gn2_w": jnp.ones((dim_out,), jnp.float32),
        "gn2_b": jnp.zeros((dim_out,), jnp.float32),
        "conv1_w": nrm((dim_out, dim_in, 3, 3)), "conv1_b": nrm((dim_out,)),
        "conv2_w": nrm((dim_out, dim_out, 3, 3)), "conv2_b": nrm((dim_out,)),
        "time_w": nrm((dim_out, time_in)), "time_b": nrm((dim_out,)),
    }
    if dim_in != dim_out:
        p["skip_w"] = nrm((dim_out, dim_in, 1, 1))
        p["skip_b"] = nrm((dim_out,))
    return p


# ----------------------------------- main ------------------------------------

if __name__ == "__main__":
    key = jax.random.PRNGKey(0)
    kx, kt, kp = jax.random.split(key, 3)

    # GroupNorm(32, .) requires channel counts that are multiples of 32;
    # TimeEmbeddings hard-codes a 256-dim time input.
    B, DIM_IN, DIM_OUT, H, W, TIME_IN = 2, 32, 64, 16, 16, 256

    x = jax.random.normal(kx, (B, DIM_IN, H, W), jnp.float32)
    t = jax.random.normal(kt, (B, TIME_IN), jnp.float32)
    params = init_params(kp, DIM_IN, DIM_OUT, TIME_IN)

    fwd = jax.jit(functools.partial(residual_block_forward, num_groups=32))
    out = fwd(x, t, params)
    jax.block_until_ready(out)

    assert out.shape == (B, DIM_OUT, H, W)
    assert bool(jnp.all(jnp.isfinite(out)))
    print("KERNEL_OK")
</pallas_src>

<mosaic_0001>
module attributes {stable_mosaic.version = 11 : i64} {
  func.func @_gn_swish_kernel(%arg0: i32, %arg1: memref<1x32x1x256xf32, #tpu.memory_space<vmem>>, %arg2: memref<32x1x1xf32, #tpu.memory_space<vmem>>, %arg3: memref<32x1x1xf32, #tpu.memory_space<vmem>>, %arg4: memref<1x32x1x256xf32, #tpu.memory_space<vmem>>) attributes {dimension_semantics = [#tpu.dimension_semantics<parallel>], iteration_bounds = array<i64: 2>, scalar_prefetch = 0 : i64, scratch_operands = 0 : i64, tpu.core_type = #tpu.core_type<tc>, window_params = [{transform_indices = @transform_0, window_bounds = array<i64: 1, 32, 1, 256>}, {pipeline_mode = #tpu.pipeline_mode<synchronous>, transform_indices = @transform_1, window_bounds = array<i64: 32, 1, 1>}, {pipeline_mode = #tpu.pipeline_mode<synchronous>, transform_indices = @transform_2, window_bounds = array<i64: 32, 1, 1>}, {transform_indices = @transform_3, window_bounds = array<i64: 1, 32, 1, 256>}]} {
    %c0 = arith.constant 0 : index
    %c0_0 = arith.constant 0 : index
    %c0_1 = arith.constant 0 : index
    %c0_2 = arith.constant 0 : index
    %0 = vector.load %arg1[%c0, %c0_0, %c0_1, %c0_2] : memref<1x32x1x256xf32, #tpu.memory_space<vmem>>, vector<1x32x1x256xf32>
    %1 = vector.shape_cast %0 : vector<1x32x1x256xf32> to vector<32x1x256xf32>
    %cst = arith.constant dense<0.000000e+00> : vector<32x1xf32>
    %2 = vector.multi_reduction <add>, %1, %cst [2] : vector<32x1x256xf32> to vector<32x1xf32>
    %3 = vector.shape_cast %2 : vector<32x1xf32> to vector<32x1x1xf32>
    %cst_3 = arith.constant 2.560000e+02 : f32
    %4 = vector.broadcast %cst_3 : f32 to vector<32x1x1xf32>
    %5 = arith.divf %3, %4 : vector<32x1x1xf32>
    %cst_4 = arith.constant dense<0.000000e+00> : vector<32x1xf32>
    %6 = vector.multi_reduction <add>, %5, %cst_4 [1] : vector<32x1x1xf32> to vector<32x1xf32>
    %7 = vector.shape_cast %6 : vector<32x1xf32> to vector<32x1x1xf32>
    %cst_5 = arith.constant 1.000000e+00 : f32
    %8 = vector.broadcast %cst_5 : f32 to vector<32x1x1xf32>
    %9 = arith.divf %7, %8 : vector<32x1x1xf32>
    %10 = vector.broadcast %9 : vector<32x1x1xf32> to vector<32x1x256xf32>
    %11 = arith.subf %1, %10 : vector<32x1x256xf32>
    %12 = arith.mulf %11, %11 : vector<32x1x256xf32>
    %cst_6 = arith.constant dense<0.000000e+00> : vector<32x1xf32>
    %13 = vector.multi_reduction <add>, %12, %cst_6 [2] : vector<32x1x256xf32> to vector<32x1xf32>
    %14 = vector.shape_cast %13 : vector<32x1xf32> to vector<32x1x1xf32>
    %cst_7 = arith.constant 2.560000e+02 : f32
    %15 = vector.broadcast %cst_7 : f32 to vector<32x1x1xf32>
    %16 = arith.divf %14, %15 : vector<32x1x1xf32>
    %cst_8 = arith.constant dense<0.000000e+00> : vector<32x1xf32>
    %17 = vector.multi_reduction <add>, %16, %cst_8 [1] : vector<32x1x1xf32> to vector<32x1xf32>
    %18 = vector.shape_cast %17 : vector<32x1xf32> to vector<32x1x1xf32>
    %cst_9 = arith.constant 1.000000e+00 : f32
    %19 = vector.broadcast %cst_9 : f32 to vector<32x1x1xf32>
    %20 = arith.divf %18, %19 : vector<32x1x1xf32>
    %cst_10 = arith.constant 9.99999974E-6 : f32
    %21 = vector.broadcast %cst_10 : f32 to vector<32x1x1xf32>
    %22 = arith.addf %20, %21 : vector<32x1x1xf32>
    %23 = math.rsqrt %22 : vector<32x1x1xf32>
    %24 = vector.broadcast %23 : vector<32x1x1xf32> to vector<32x1x256xf32>
    %25 = arith.mulf %11, %24 : vector<32x1x256xf32>
    %c0_11 = arith.constant 0 : index
    %c0_12 = arith.constant 0 : index
    %c0_13 = arith.constant 0 : index
    %26 = vector.load %arg2[%c0_11, %c0_12, %c0_13] : memref<32x1x1xf32, #tpu.memory_space<vmem>>, vector<32x1x1xf32>
    %27 = vector.broadcast %26 : vector<32x1x1xf32> to vector<32x1x256xf32>
    %28 = arith.mulf %25, %27 : vector<32x1x256xf32>
    %c0_14 = arith.constant 0 : index
    %c0_15 = arith.constant 0 : index
    %c0_16 = arith.constant 0 : index
    %29 = vector.load %arg3[%c0_14, %c0_15, %c0_16] : memref<32x1x1xf32, #tpu.memory_space<vmem>>, vector<32x1x1xf32>
    %30 = vector.broadcast %29 : vector<32x1x1xf32> to vector<32x1x256xf32>
    %31 = arith.addf %28, %30 : vector<32x1x256xf32>
    %cst_17 = arith.constant 0.000000e+00 : f32
    %32 = vector.broadcast %cst_17 : f32 to vector<32x1x256xf32>
    %33 = arith.subf %32, %31 : vector<32x1x256xf32>
    %34 = math.exp %33 : vector<32x1x256xf32>
    %cst_18 = arith.constant 1.000000e+00 : f32
    %35 = vector.broadcast %cst_18 : f32 to vector<32x1x256xf32>
    %36 = arith.addf %35, %34 : vector<32x1x256xf32>
    %37 = tpu.reciprocal %36 {approx = true} : vector<32x1x256xf32> -> vector<32x1x256xf32>
    %38 = arith.mulf %31, %37 : vector<32x1x256xf32>
    %c0_19 = arith.constant 0 : index
    %c0_20 = arith.constant 0 : index
    %c0_21 = arith.constant 0 : index
    %c0_22 = arith.constant 0 : index
    %39 = vector.load %arg4[%c0_19, %c0_20, %c0_21, %c0_22] : memref<1x32x1x256xf32, #tpu.memory_space<vmem>>, vector<1x32x1x256xf32>
    %40 = vector.shape_cast %39 : vector<1x32x1x256xf32> to vector<32x1x256xf32>
    %41 = vector.shape_cast %38 : vector<32x1x256xf32> to vector<1x32x1x256xf32>
    tpu.vector_store %arg4[%c0_19, %c0_20, %c0_21, %c0_22], %41 {strides = array<i32>} : memref<1x32x1x256xf32, #tpu.memory_space<vmem>>, vector<1x32x1x256xf32>,
    return
  }
  func.func @transform_0(%arg0: i32) -> (i32, i32, i32, i32) {
    %c0_i32 = arith.constant 0 : i32
    %c0_i32_0 = arith.constant 0 : i32
    %c0_i32_1 = arith.constant 0 : i32
    %c0_i32_2 = arith.constant 0 : i32
    return %arg0, %c0_i32, %c0_i32_0, %c0_i32_1 : i32, i32, i32, i32
  }
  func.func @transform_1(%arg0: i32) -> (i32, i32, i32) {
    %c0_i32 = arith.constant 0 : i32
    %c0_i32_0 = arith.constant 0 : i32
    %c0_i32_1 = arith.constant 0 : i32
    %c0_i32_2 = arith.constant 0 : i32
    return %c0_i32, %c0_i32_0, %c0_i32_1 : i32, i32, i32
  }
  func.func @transform_2(%arg0: i32) -> (i32, i32, i32) {
    %c0_i32 = arith.constant 0 : i32
    %c0_i32_0 = arith.constant 0 : i32
    %c0_i32_1 = arith.constant 0 : i32
    %c0_i32_2 = arith.constant 0 : i32
    return %c0_i32, %c0_i32_0, %c0_i32_1 : i32, i32, i32
  }
  func.func @transform_3(%arg0: i32) -> (i32, i32, i32, i32) {
    %c0_i32 = arith.constant 0 : i32
    %c0_i32_0 = arith.constant 0 : i32
    %c0_i32_1 = arith.constant 0 : i32
    %c0_i32_2 = arith.constant 0 : i32
    return %arg0, %c0_i32, %c0_i32_0, %c0_i32_1 : i32, i32, i32, i32
  }
}

module attributes {stable_mosaic.version = 11 : i64} {
  func.func @_time_mlp_kernel(%arg0: memref<2x256xf32, #tpu.memory_space<vmem>>, %arg1: memref<64x256xf32, #tpu.memory_space<vmem>>, %arg2: memref<1x64xf32, #tpu.memory_space<vmem>>, %arg3: memref<2x64xf32, #tpu.memory_space<vmem>>) attributes {dimension_semantics = [], scalar_prefetch = 0 : i64, scratch_operands = 0 : i64, tpu.core_type = #tpu.core_type<tc>} {
    %c0 = arith.constant 0 : index
    %c0_0 = arith.constant 0 : index
    %0 = vector.load %arg0[%c0, %c0_0] : memref<2x256xf32, #tpu.memory_space<vmem>>, vector<2x256xf32>
    %c0_1 = arith.constant 0 : index
    %c0_2 = arith.constant 0 : index
    %1 = vector.load %arg1[%c0_1, %c0_2] : memref<64x256xf32, #tpu.memory_space<vmem>>, vector<64x256xf32>
    %cst = arith.constant dense<0.000000e+00> : vector<2x64xf32>
    %2 = tpu.matmul %0, %1, %cst {dimension_numbers = #tpu.dot_dimension_numbers<[1], [1], [0], [0], [0, 0, 1, 0], [], []>} : vector<2x256xf32>, vector<64x256xf32>, vector<2x64xf32> -> vector<2x64xf32>
    %c0_3 = arith.constant 0 : index
    %c0_4 = arith.constant 0 : index
    %3 = vector.load %arg2[%c0_3, %c0_4] : memref<1x64xf32, #tpu.memory_space<vmem>>, vector<1x64xf32>
    %4 = vector.broadcast %3 : vector<1x64xf32> to vector<2x64xf32>
    %5 = arith.addf %2, %4 : vector<2x64xf32>
    %cst_5 = arith.constant 0.000000e+00 : f32
    %6 = vector.broadcast %cst_5 : f32 to vector<2x64xf32>
    %7 = arith.subf %6, %5 : vector<2x64xf32>
    %8 = math.exp %7 : vector<2x64xf32>
    %cst_6 = arith.constant 1.000000e+00 : f32
    %9 = vector.broadcast %cst_6 : f32 to vector<2x64xf32>
    %10 = arith.addf %9, %8 : vector<2x64xf32>
    %11 = tpu.reciprocal %10 {approx = true} : vector<2x64xf32> -> vector<2x64xf32>
    %12 = arith.mulf %5, %11 : vector<2x64xf32>
    %c0_7 = arith.constant 0 : index
    %c0_8 = arith.constant 0 : index
    %13 = vector.load %arg3[%c0_7, %c0_8] : memref<2x64xf32, #tpu.memory_space<vmem>>, vector<2x64xf32>
    tpu.vector_store %arg3[%c0_7, %c0_8], %12 {strides = array<i32>} : memref<2x64xf32, #tpu.memory_space<vmem>>, vector<2x64xf32>,
    return
  }
}

module attributes {stable_mosaic.version = 11 : i64} {
  func.func @_conv3x3_bias_kernel(%arg0: i32, %arg1: i32, %arg2: i32, %arg3: memref<1x1x32x256xbf16, #tpu.memory_space<vmem>>, %arg4: memref<1x64x32xbf16, #tpu.memory_space<vmem>>, %arg5: memref<64x1xf32, #tpu.memory_space<vmem>>, %arg6: memref<1x64x1xf32, #tpu.memory_space<vmem>>, %arg7: memref<1x64x256xf32, #tpu.memory_space<vmem>>, %arg8: memref<64x256xf32, #tpu.memory_space<vmem>>) attributes {dimension_semantics = [#tpu.dimension_semantics<parallel>, #tpu.dimension_semantics<parallel>, #tpu.dimension_semantics<arbitrary>], iteration_bounds = array<i64: 2, 1, 9>, scalar_prefetch = 0 : i64, scratch_operands = 1 : i64, tpu.core_type = #tpu.core_type<tc>, window_params = [{transform_indices = @transform_0, window_bounds = array<i64: 1, 1, 32, 256>}, {transform_indices = @transform_1, window_bounds = array<i64: 1, 64, 32>}, {pipeline_mode = #tpu.pipeline_mode<synchronous>, transform_indices = @transform_2, window_bounds = array<i64: 64, 1>}, {transform_indices = @transform_3, window_bounds = array<i64: 1, 64, 1>}, {transform_indices = @transform_4, window_bounds = array<i64: 1, 64, 256>}]} {
    %c0_i32 = arith.constant 0 : i32
    %0 = arith.cmpi eq, %arg2, %c0_i32 : i32
    %1 = arith.extui %0 : i1 to i32
    %c0_i32_0 = arith.constant 0 : i32
    %2 = arith.cmpi ne, %1, %c0_i32_0 : i32
    scf.if %2 {
      %cst_12 = arith.constant 0.000000e+00 : f32
      %14 = vector.broadcast %cst_12 : f32 to vector<64x256xf32>
      %c0_13 = arith.constant 0 : index
      %c0_14 = arith.constant 0 : index
      %15 = vector.load %arg8[%c0_13, %c0_14] : memref<64x256xf32, #tpu.memory_space<vmem>>, vector<64x256xf32>
      tpu.vector_store %arg8[%c0_13, %c0_14], %14 {strides = array<i32>} : memref<64x256xf32, #tpu.memory_space<vmem>>, vector<64x256xf32>,
    } else {
    }
    %c0 = arith.constant 0 : index
    %c0_1 = arith.constant 0 : index
    %3 = vector.load %arg8[%c0, %c0_1] : memref<64x256xf32, #tpu.memory_space<vmem>>, vector<64x256xf32>
    %c0_2 = arith.constant 0 : index
    %c0_3 = arith.constant 0 : index
    %c0_4 = arith.constant 0 : index
    %4 = vector.load %arg4[%c0_2, %c0_3, %c0_4] : memref<1x64x32xbf16, #tpu.memory_space<vmem>>, vector<1x64x32xbf16>
    %5 = vector.shape_cast %4 : vector<1x64x32xbf16> to vector<64x32xbf16>
    %c0_5 = arith.constant 0 : index
    %c0_6 = arith.constant 0 : index
    %c0_7 = arith.constant 0 : index
    %c0_8 = arith.constant 0 : index
    %6 = vector.load %arg3[%c0_5, %c0_6, %c0_7, %c0_8] : memref<1x1x32x256xbf16, #tpu.memory_space<vmem>>, vector<1x1x32x256xbf16>
    %7 = vector.shape_cast %6 : vector<1x1x32x256xbf16> to vector<32x256xbf16>
    %cst = arith.constant dense<0.000000e+00> : vector<64x256xf32>
    %8 = tpu.matmul %5, %7, %cst {dimension_numbers = #tpu.dot_dimension_numbers<[1], [0], [0], [1], [0, 0, 1, 1], [], []>} : vector<64x32xbf16>, vector<32x256xbf16>, vector<64x256xf32> -> vector<64x256xf32>
    %9 = arith.addf %3, %8 : vector<64x256xf32>
    %c0_9 = arith.constant 0 : index
    %c0_10 = arith.constant 0 : index
    %10 = vector.load %arg8[%c0_9, %c0_10] : memref<64x256xf32, #tpu.memory_space<vmem>>, vector<64x256xf32>
    tpu.vector_store %arg8[%c0_9, %c0_10], %9 {strides = array<i32>} : memref<64x256xf32, #tpu.memory_space<vmem>>, vector<64x256xf32>,
    %c8_i32 = arith.constant 8 : i32
    %11 = arith.cmpi eq, %arg2, %c8_i32 : i32
    %12 = arith.extui %11 : i1 to i32
    %c0_i32_11 = arith.constant 0 : i32
    %13 = arith.cmpi ne, %12, %c0_i32_11 : i32
    scf.if %13 {
      %c0_12 = arith.constant 0 : index
      %c0_13 = arith.constant 0 : index
      %14 = vector.load %arg8[%c0_12, %c0_13] : memref<64x256xf32, #tpu.memory_space<vmem>>, vector<64x256xf32>
      %c0_14 = arith.constant 0 : index
      %c0_15 = arith.constant 0 : index
      %15 = vector.load %arg5[%c0_14, %c0_15] : memref<64x1xf32, #tpu.memory_space<vmem>>, vector<64x1xf32>
      %16 = vector.broadcast %15 : vector<64x1xf32> to vector<64x256xf32>
      %17 = arith.addf %14, %16 : vector<64x256xf32>
      %c0_16 = arith.constant 0 : index
      %c0_17 = arith.constant 0 : index
      %c0_18 = arith.constant 0 : index
      %18 = vector.load %arg6[%c0_16, %c0_17, %c0_18] : memref<1x64x1xf32, #tpu.memory_space<vmem>>, vector<1x64x1xf32>
      %19 = vector.shape_cast %18 : vector<1x64x1xf32> to vector<64x1xf32>
      %20 = vector.broadcast %19 : vector<64x1xf32> to vector<64x256xf32>
      %21 = arith.addf %17, %20 : vector<64x256xf32>
      %c0_19 = arith.constant 0 : index
      %c0_20 = arith.constant 0 : index
      %c0_21 = arith.constant 0 : index
      %22 = vector.load %arg7[%c0_19, %c0_20, %c0_21] : memref<1x64x256xf32, #tpu.memory_space<vmem>>, vector<1x64x256xf32>
      %23 = vector.shape_cast %22 : vector<1x64x256xf32> to vector<64x256xf32>
      %24 = vector.shape_cast %21 : vector<64x256xf32> to vector<1x64x256xf32>
      tpu.vector_store %arg7[%c0_19, %c0_20, %c0_21], %24 {strides = array<i32>} : memref<1x64x256xf32, #tpu.memory_space<vmem>>, vector<1x64x256xf32>,
    } else {
    }
    return
  }
  func.func @transform_0(%arg0: i32, %arg1: i32, %arg2: i32) -> (i32, i32, i32, i32) {
    %c0_i32 = arith.constant 0 : i32
    %c0_i32_0 = arith.constant 0 : i32
    return %arg0, %arg2, %c0_i32, %arg1 : i32, i32, i32, i32
  }
  func.func @transform_1(%arg0: i32, %arg1: i32, %arg2: i32) -> (i32, i32, i32) {
    %c0_i32 = arith.constant 0 : i32
    %c0_i32_0 = arith.constant 0 : i32
    %c0_i32_1 = arith.constant 0 : i32
    return %arg2, %c0_i32, %c0_i32_0 : i32, i32, i32
  }
  func.func @transform_2(%arg0: i32, %arg1: i32, %arg2: i32) -> (i32, i32) {
    %c0_i32 = arith.constant 0 : i32
    %c0_i32_0 = arith.constant 0 : i32
    %c0_i32_1 = arith.constant 0 : i32
    return %c0_i32, %c0_i32_0 : i32, i32
  }
  func.func @transform_3(%arg0: i32, %arg1: i32, %arg2: i32) -> (i32, i32, i32) {
    %c0_i32 = arith.constant 0 : i32
    %c0_i32_0 = arith.constant 0 : i32
    %c0_i32_1 = arith.constant 0 : i32
    return %arg0, %c0_i32, %c0_i32_0 : i32, i32, i32
  }
  func.func @transform_4(%arg0: i32, %arg1: i32, %arg2: i32) -> (i32, i32, i32) {
    %c0_i32 = arith.constant 0 : i32
    %c0_i32_0 = arith.constant 0 : i32
    return %arg0, %c0_i32, %arg1 : i32, i32, i32
  }
}

module attributes {stable_mosaic.version = 11 : i64} {
  func.func @_gn_swish_kernel(%arg0: i32, %arg1: memref<1x32x2x256xf32, #tpu.memory_space<vmem>>, %arg2: memref<32x2x1xf32, #tpu.memory_space<vmem>>, %arg3: memref<32x2x1xf32, #tpu.memory_space<vmem>>, %arg4: memref<1x32x2x256xf32, #tpu.memory_space<vmem>>) attributes {dimension_semantics = [#tpu.dimension_semantics<parallel>], iteration_bounds = array<i64: 2>, scalar_prefetch = 0 : i64, scratch_operands = 0 : i64, tpu.core_type = #tpu.core_type<tc>, window_params = [{transform_indices = @transform_0, window_bounds = array<i64: 1, 32, 2, 256>}, {pipeline_mode = #tpu.pipeline_mode<synchronous>, transform_indices = @transform_1, window_bounds = array<i64: 32, 2, 1>}, {pipeline_mode = #tpu.pipeline_mode<synchronous>, transform_indices = @transform_2, window_bounds = array<i64: 32, 2, 1>}, {transform_indices = @transform_3, window_bounds = array<i64: 1, 32, 2, 256>}]} {
    %c0 = arith.constant 0 : index
    %c0_0 = arith.constant 0 : index
    %c0_1 = arith.constant 0 : index
    %c0_2 = arith.constant 0 : index
    %0 = vector.load %arg1[%c0, %c0_0, %c0_1, %c0_2] : memref<1x32x2x256xf32, #tpu.memory_space<vmem>>, vector<1x32x2x256xf32>
    %1 = vector.shape_cast %0 : vector<1x32x2x256xf32> to vector<32x2x256xf32>
    %cst = arith.constant dense<0.000000e+00> : vector<32x2xf32>
    %2 = vector.multi_reduction <add>, %1, %cst [2] : vector<32x2x256xf32> to vector<32x2xf32>
    %3 = vector.shape_cast %2 : vector<32x2xf32> to vector<32x2x1xf32>
    %cst_3 = arith.constant 2.560000e+02 : f32
    %4 = vector.broadcast %cst_3 : f32 to vector<32x2x1xf32>
    %5 = arith.divf %3, %4 : vector<32x2x1xf32>
    %cst_4 = arith.constant dense<0.000000e+00> : vector<32x1xf32>
    %6 = vector.multi_reduction <add>, %5, %cst_4 [1] : vector<32x2x1xf32> to vector<32x1xf32>
    %7 = vector.shape_cast %6 : vector<32x1xf32> to vector<32x1x1xf32>
    %cst_5 = arith.constant 2.000000e+00 : f32
    %8 = vector.broadcast %cst_5 : f32 to vector<32x1x1xf32>
    %9 = arith.divf %7, %8 : vector<32x1x1xf32>
    %10 = vector.broadcast %9 : vector<32x1x1xf32> to vector<32x2x256xf32>
    %11 = arith.subf %1, %10 : vector<32x2x256xf32>
    %12 = arith.mulf %11, %11 : vector<32x2x256xf32>
    %cst_6 = arith.constant dense<0.000000e+00> : vector<32x2xf32>
    %13 = vector.multi_reduction <add>, %12, %cst_6 [2] : vector<32x2x256xf32> to vector<32x2xf32>
    %14 = vector.shape_cast %13 : vector<32x2xf32> to vector<32x2x1xf32>
    %cst_7 = arith.constant 2.560000e+02 : f32
    %15 = vector.broadcast %cst_7 : f32 to vector<32x2x1xf32>
    %16 = arith.divf %14, %15 : vector<32x2x1xf32>
    %cst_8 = arith.constant dense<0.000000e+00> : vector<32x1xf32>
    %17 = vector.multi_reduction <add>, %16, %cst_8 [1] : vector<32x2x1xf32> to vector<32x1xf32>
    %18 = vector.shape_cast %17 : vector<32x1xf32> to vector<32x1x1xf32>
    %cst_9 = arith.constant 2.000000e+00 : f32
    %19 = vector.broadcast %cst_9 : f32 to vector<32x1x1xf32>
    %20 = arith.divf %18, %19 : vector<32x1x1xf32>
    %cst_10 = arith.constant 9.99999974E-6 : f32
    %21 = vector.broadcast %cst_10 : f32 to vector<32x1x1xf32>
    %22 = arith.addf %20, %21 : vector<32x1x1xf32>
    %23 = math.rsqrt %22 : vector<32x1x1xf32>
    %24 = vector.broadcast %23 : vector<32x1x1xf32> to vector<32x2x256xf32>
    %25 = arith.mulf %11, %24 : vector<32x2x256xf32>
    %c0_11 = arith.constant 0 : index
    %c0_12 = arith.constant 0 : index
    %c0_13 = arith.constant 0 : index
    %26 = vector.load %arg2[%c0_11, %c0_12, %c0_13] : memref<32x2x1xf32, #tpu.memory_space<vmem>>, vector<32x2x1xf32>
    %27 = vector.broadcast %26 : vector<32x2x1xf32> to vector<32x2x256xf32>
    %28 = arith.mulf %25, %27 : vector<32x2x256xf32>
    %c0_14 = arith.constant 0 : index
    %c0_15 = arith.constant 0 : index
    %c0_16 = arith.constant 0 : index
    %29 = vector.load %arg3[%c0_14, %c0_15, %c0_16] : memref<32x2x1xf32, #tpu.memory_space<vmem>>, vector<32x2x1xf32>
    %30 = vector.broadcast %29 : vector<32x2x1xf32> to vector<32x2x256xf32>
    %31 = arith.addf %28, %30 : vector<32x2x256xf32>
    %cst_17 = arith.constant 0.000000e+00 : f32
    %32 = vector.broadcast %cst_17 : f32 to vector<32x2x256xf32>
    %33 = arith.subf %32, %31 : vector<32x2x256xf32>
    %34 = math.exp %33 : vector<32x2x256xf32>
    %cst_18 = arith.constant 1.000000e+00 : f32
    %35 = vector.broadcast %cst_18 : f32 to vector<32x2x256xf32>
    %36 = arith.addf %35, %34 : vector<32x2x256xf32>
    %37 = tpu.reciprocal %36 {approx = true} : vector<32x2x256xf32> -> vector<32x2x256xf32>
    %38 = arith.mulf %31, %37 : vector<32x2x256xf32>
    %c0_19 = arith.constant 0 : index
    %c0_20 = arith.constant 0 : index
    %c0_21 = arith.constant 0 : index
    %c0_22 = arith.constant 0 : index
    %39 = vector.load %arg4[%c0_19, %c0_20, %c0_21, %c0_22] : memref<1x32x2x256xf32, #tpu.memory_space<vmem>>, vector<1x32x2x256xf32>
    %40 = vector.shape_cast %39 : vector<1x32x2x256xf32> to vector<32x2x256xf32>
    %41 = vector.shape_cast %38 : vector<32x2x256xf32> to vector<1x32x2x256xf32>
    tpu.vector_store %arg4[%c0_19, %c0_20, %c0_21, %c0_22], %41 {strides = array<i32>} : memref<1x32x2x256xf32, #tpu.memory_space<vmem>>, vector<1x32x2x256xf32>,
    return
  }
  func.func @transform_0(%arg0: i32) -> (i32, i32, i32, i32) {
    %c0_i32 = arith.constant 0 : i32
    %c0_i32_0 = arith.constant 0 : i32
    %c0_i32_1 = arith.constant 0 : i32
    %c0_i32_2 = arith.constant 0 : i32
    return %arg0, %c0_i32, %c0_i32_0, %c0_i32_1 : i32, i32, i32, i32
  }
  func.func @transform_1(%arg0: i32) -> (i32, i32, i32) {
    %c0_i32 = arith.constant 0 : i32
    %c0_i32_0 = arith.constant 0 : i32
    %c0_i32_1 = arith.constant 0 : i32
    %c0_i32_2 = arith.constant 0 : i32
    return %c0_i32, %c0_i32_0, %c0_i32_1 : i32, i32, i32
  }
  func.func @transform_2(%arg0: i32) -> (i32, i32, i32) {
    %c0_i32 = arith.constant 0 : i32
    %c0_i32_0 = arith.constant 0 : i32
    %c0_i32_1 = arith.constant 0 : i32
    %c0_i32_2 = arith.constant 0 : i32
    return %c0_i32, %c0_i32_0, %c0_i32_1 : i32, i32, i32
  }
  func.func @transform_3(%arg0: i32) -> (i32, i32, i32, i32) {
    %c0_i32 = arith.constant 0 : i32
    %c0_i32_0 = arith.constant 0 : i32
    %c0_i32_1 = arith.constant 0 : i32
    %c0_i32_2 = arith.constant 0 : i32
    return %arg0, %c0_i32, %c0_i32_0, %c0_i32_1 : i32, i32, i32, i32
  }
}

module attributes {stable_mosaic.version = 11 : i64} {
  func.func @_conv1x1_kernel(%arg0: i32, %arg1: i32, %arg2: memref<1x32x256xbf16, #tpu.memory_space<vmem>>, %arg3: memref<64x32xbf16, #tpu.memory_space<vmem>>, %arg4: memref<64x1xf32, #tpu.memory_space<vmem>>, %arg5: memref<1x64x256xf32, #tpu.memory_space<vmem>>) attributes {dimension_semantics = [#tpu.dimension_semantics<parallel>, #tpu.dimension_semantics<parallel>], iteration_bounds = array<i64: 2, 1>, scalar_prefetch = 0 : i64, scratch_operands = 0 : i64, tpu.core_type = #tpu.core_type<tc>, window_params = [{transform_indices = @transform_0, window_bounds = array<i64: 1, 32, 256>}, {pipeline_mode = #tpu.pipeline_mode<synchronous>, transform_indices = @transform_1, window_bounds = array<i64: 64, 32>}, {pipeline_mode = #tpu.pipeline_mode<synchronous>, transform_indices = @transform_2, window_bounds = array<i64: 64, 1>}, {transform_indices = @transform_3, window_bounds = array<i64: 1, 64, 256>}]} {
    %c0 = arith.constant 0 : index
    %c0_0 = arith.constant 0 : index
    %0 = vector.load %arg3[%c0, %c0_0] : memref<64x32xbf16, #tpu.memory_space<vmem>>, vector<64x32xbf16>
    %c0_1 = arith.constant 0 : index
    %c0_2 = arith.constant 0 : index
    %c0_3 = arith.constant 0 : index
    %1 = vector.load %arg2[%c0_1, %c0_2, %c0_3] : memref<1x32x256xbf16, #tpu.memory_space<vmem>>, vector<1x32x256xbf16>
    %2 = vector.shape_cast %1 : vector<1x32x256xbf16> to vector<32x256xbf16>
    %cst = arith.constant dense<0.000000e+00> : vector<64x256xf32>
    %3 = tpu.matmul %0, %2, %cst {dimension_numbers = #tpu.dot_dimension_numbers<[1], [0], [0], [1], [0, 0, 1, 1], [], []>} : vector<64x32xbf16>, vector<32x256xbf16>, vector<64x256xf32> -> vector<64x256xf32>
    %c0_4 = arith.constant 0 : index
    %c0_5 = arith.constant 0 : index
    %4 = vector.load %arg4[%c0_4, %c0_5] : memref<64x1xf32, #tpu.memory_space<vmem>>, vector<64x1xf32>
    %5 = vector.broadcast %4 : vector<64x1xf32> to vector<64x256xf32>
    %6 = arith.addf %3, %5 : vector<64x256xf32>
    %c0_6 = arith.constant 0 : index
    %c0_7 = arith.constant 0 : index
    %c0_8 = arith.constant 0 : index
    %7 = vector.load %arg5[%c0_6, %c0_7, %c0_8] : memref<1x64x256xf32, #tpu.memory_space<vmem>>, vector<1x64x256xf32>
    %8 = vector.shape_cast %7 : vector<1x64x256xf32> to vector<64x256xf32>
    %9 = vector.shape_cast %6 : vector<64x256xf32> to vector<1x64x256xf32>
    tpu.vector_store %arg5[%c0_6, %c0_7, %c0_8], %9 {strides = array<i32>} : memref<1x64x256xf32, #tpu.memory_space<vmem>>, vector<1x64x256xf32>,
    return
  }
  func.func @transform_0(%arg0: i32, %arg1: i32) -> (i32, i32, i32) {
    %c0_i32 = arith.constant 0 : i32
    %c0_i32_0 = arith.constant 0 : i32
    return %arg0, %c0_i32, %arg1 : i32, i32, i32
  }
  func.func @transform_1(%arg0: i32, %arg1: i32) -> (i32, i32) {
    %c0_i32 = arith.constant 0 : i32
    %c0_i32_0 = arith.constant 0 : i32
    %c0_i32_1 = arith.constant 0 : i32
    return %c0_i32, %c0_i32_0 : i32, i32
  }
  func.func @transform_2(%arg0: i32, %arg1: i32) -> (i32, i32) {
    %c0_i32 = arith.constant 0 : i32
    %c0_i32_0 = arith.constant 0 : i32
    %c0_i32_1 = arith.constant 0 : i32
    return %c0_i32, %c0_i32_0 : i32, i32
  }
  func.func @transform_3(%arg0: i32, %arg1: i32) -> (i32, i32, i32) {
    %c0_i32 = arith.constant 0 : i32
    %c0_i32_0 = arith.constant 0 : i32
    return %arg0, %c0_i32, %arg1 : i32, i32, i32
  }
}

module attributes {stable_mosaic.version = 11 : i64} {
  func.func @_conv3x3_res_kernel(%arg0: i32, %arg1: i32, %arg2: i32, %arg3: memref<1x1x64x256xbf16, #tpu.memory_space<vmem>>, %arg4: memref<1x64x64xbf16, #tpu.memory_space<vmem>>, %arg5: memref<64x1xf32, #tpu.memory_space<vmem>>, %arg6: memref<1x64x256xf32, #tpu.memory_space<vmem>>, %arg7: memref<1x64x256xf32, #tpu.memory_space<vmem>>, %arg8: memref<64x256xf32, #tpu.memory_space<vmem>>) attributes {dimension_semantics = [#tpu.dimension_semantics<parallel>, #tpu.dimension_semantics<parallel>, #tpu.dimension_semantics<arbitrary>], iteration_bounds = array<i64: 2, 1, 9>, scalar_prefetch = 0 : i64, scratch_operands = 1 : i64, tpu.core_type = #tpu.core_type<tc>, window_params = [{transform_indices = @transform_0, window_bounds = array<i64: 1, 1, 64, 256>}, {transform_indices = @transform_1, window_bounds = array<i64: 1, 64, 64>}, {pipeline_mode = #tpu.pipeline_mode<synchronous>, transform_indices = @transform_2, window_bounds = array<i64: 64, 1>}, {transform_indices = @transform_3, window_bounds = array<i64: 1, 64, 256>}, {transform_indices = @transform_4, window_bounds = array<i64: 1, 64, 256>}]} {
    %c0_i32 = arith.constant 0 : i32
    %0 = arith.cmpi eq, %arg2, %c0_i32 : i32
    %1 = arith.extui %0 : i1 to i32
    %c0_i32_0 = arith.constant 0 : i32
    %2 = arith.cmpi ne, %1, %c0_i32_0 : i32
    scf.if %2 {
      %cst_12 = arith.constant 0.000000e+00 : f32
      %14 = vector.broadcast %cst_12 : f32 to vector<64x256xf32>
      %c0_13 = arith.constant 0 : index
      %c0_14 = arith.constant 0 : index
      %15 = vector.load %arg8[%c0_13, %c0_14] : memref<64x256xf32, #tpu.memory_space<vmem>>, vector<64x256xf32>
      tpu.vector_store %arg8[%c0_13, %c0_14], %14 {strides = array<i32>} : memref<64x256xf32, #tpu.memory_space<vmem>>, vector<64x256xf32>,
    } else {
    }
    %c0 = arith.constant 0 : index
    %c0_1 = arith.constant 0 : index
    %3 = vector.load %arg8[%c0, %c0_1] : memref<64x256xf32, #tpu.memory_space<vmem>>, vector<64x256xf32>
    %c0_2 = arith.constant 0 : index
    %c0_3 = arith.constant 0 : index
    %c0_4 = arith.constant 0 : index
    %4 = vector.load %arg4[%c0_2, %c0_3, %c0_4] : memref<1x64x64xbf16, #tpu.memory_space<vmem>>, vector<1x64x64xbf16>
    %5 = vector.shape_cast %4 : vector<1x64x64xbf16> to vector<64x64xbf16>
    %c0_5 = arith.constant 0 : index
    %c0_6 = arith.constant 0 : index
    %c0_7 = arith.constant 0 : index
    %c0_8 = arith.constant 0 : index
    %6 = vector.load %arg3[%c0_5, %c0_6, %c0_7, %c0_8] : memref<1x1x64x256xbf16, #tpu.memory_space<vmem>>, vector<1x1x64x256xbf16>
    %7 = vector.shape_cast %6 : vector<1x1x64x256xbf16> to vector<64x256xbf16>
    %cst = arith.constant dense<0.000000e+00> : vector<64x256xf32>
    %8 = tpu.matmul %5, %7, %cst {dimension_numbers = #tpu.dot_dimension_numbers<[1], [0], [0], [1], [0, 0, 1, 1], [], []>} : vector<64x64xbf16>, vector<64x256xbf16>, vector<64x256xf32> -> vector<64x256xf32>
    %9 = arith.addf %3, %8 : vector<64x256xf32>
    %c0_9 = arith.constant 0 : index
    %c0_10 = arith.constant 0 : index
    %10 = vector.load %arg8[%c0_9, %c0_10] : memref<64x256xf32, #tpu.memory_space<vmem>>, vector<64x256xf32>
    tpu.vector_store %arg8[%c0_9, %c0_10], %9 {strides = array<i32>} : memref<64x256xf32, #tpu.memory_space<vmem>>, vector<64x256xf32>,
    %c8_i32 = arith.constant 8 : i32
    %11 = arith.cmpi eq, %arg2, %c8_i32 : i32
    %12 = arith.extui %11 : i1 to i32
    %c0_i32_11 = arith.constant 0 : i32
    %13 = arith.cmpi ne, %12, %c0_i32_11 : i32
    scf.if %13 {
      %c0_12 = arith.constant 0 : index
      %c0_13 = arith.constant 0 : index
      %14 = vector.load %arg8[%c0_12, %c0_13] : memref<64x256xf32, #tpu.memory_space<vmem>>, vector<64x256xf32>
      %c0_14 = arith.constant 0 : index
      %c0_15 = arith.constant 0 : index
      %15 = vector.load %arg5[%c0_14, %c0_15] : memref<64x1xf32, #tpu.memory_space<vmem>>, vector<64x1xf32>
      %16 = vector.broadcast %15 : vector<64x1xf32> to vector<64x256xf32>
      %17 = arith.addf %14, %16 : vector<64x256xf32>
      %c0_16 = arith.constant 0 : index
      %c0_17 = arith.constant 0 : index
      %c0_18 = arith.constant 0 : index
      %18 = vector.load %arg6[%c0_16, %c0_17, %c0_18] : memref<1x64x256xf32, #tpu.memory_space<vmem>>, vector<1x64x256xf32>
      %19 = vector.shape_cast %18 : vector<1x64x256xf32> to vector<64x256xf32>
      %20 = arith.addf %17, %19 : vector<64x256xf32>
      %c0_19 = arith.constant 0 : index
      %c0_20 = arith.constant 0 : index
      %c0_21 = arith.constant 0 : index
      %21 = vector.load %arg7[%c0_19, %c0_20, %c0_21] : memref<1x64x256xf32, #tpu.memory_space<vmem>>, vector<1x64x256xf32>
      %22 = vector.shape_cast %21 : vector<1x64x256xf32> to vector<64x256xf32>
      %23 = vector.shape_cast %20 : vector<64x256xf32> to vector<1x64x256xf32>
      tpu.vector_store %arg7[%c0_19, %c0_20, %c0_21], %23 {strides = array<i32>} : memref<1x64x256xf32, #tpu.memory_space<vmem>>, vector<1x64x256xf32>,
    } else {
    }
    return
  }
  func.func @transform_0(%arg0: i32, %arg1: i32, %arg2: i32) -> (i32, i32, i32, i32) {
    %c0_i32 = arith.constant 0 : i32
    %c0_i32_0 = arith.constant 0 : i32
    return %arg0, %arg2, %c0_i32, %arg1 : i32, i32, i32, i32
  }
  func.func @transform_1(%arg0: i32, %arg1: i32, %arg2: i32) -> (i32, i32, i32) {
    %c0_i32 = arith.constant 0 : i32
    %c0_i32_0 = arith.constant 0 : i32
    %c0_i32_1 = arith.constant 0 : i32
    return %arg2, %c0_i32, %c0_i32_0 : i32, i32, i32
  }
  func.func @transform_2(%arg0: i32, %arg1: i32, %arg2: i32) -> (i32, i32) {
    %c0_i32 = arith.constant 0 : i32
    %c0_i32_0 = arith.constant 0 : i32
    %c0_i32_1 = arith.constant 0 : i32
    return %c0_i32, %c0_i32_0 : i32, i32
  }
  func.func @transform_3(%arg0: i32, %arg1: i32, %arg2: i32) -> (i32, i32, i32) {
    %c0_i32 = arith.constant 0 : i32
    %c0_i32_0 = arith.constant 0 : i32
    return %arg0, %c0_i32, %arg1 : i32, i32, i32
  }
  func.func @transform_4(%arg0: i32, %arg1: i32, %arg2: i32) -> (i32, i32, i32) {
    %c0_i32 = arith.constant 0 : i32
    %c0_i32_0 = arith.constant 0 : i32
    return %arg0, %c0_i32, %arg1 : i32, i32, i32
  }
}

</mosaic_0001>

<bundles_post_ra>
// kernel: residual_block_forward.6
= control target key start
LH: loop header
LB: loop body
LE: loop exit
PB: predicated region body
PF: predicated region fallthrough
CT: control target
= control target key end

     0   :  { %s3122_s12 = smov 0   ;;  %s4490_s0 = inlined_call_operand.vmem [shape: f32[2,32,1,256], index: 0, kind: input, shape index: {}]   ;;  %s4491_s1 = inlined_call_operand.vmem [shape: f32[32,1,1], index: 1, kind: input, shape index: {}]   ;;  %s4492_s2 = inlined_call_operand.vmem [shape: f32[32,1,1], index: 2, kind: input, shape index: {}]   ;;  %s4493_s3 = inlined_call_operand.vmem [shape: f32[2,32,1,256], index: 3, kind: output, shape index: {}]  }
   0x1 LB: > { %s2881_s13 = sadd.s32 4294967295, %s3099_s12   ;;  %p2885_p0 = scmp.ge.s32.totalorder %s3099_s12, 1  ;;  %s3099_s12 = sphi %s3122_s12, %s13_s12  }
   0x2   : > { %p136_p1 = scmp.lt.s32.totalorder %s3099_s12, 3 }
   0x4   : > { %p137_p2 = pnand %p2885_p0, %p136_p1 }
   0x6   : > { %140 = sbr.rel (%p137_p2) target bundleno = 614 (0x266), region = 32 }
   0xd   : > { %p158_p3 = scmp.lt.s32.totalorder %s2881_s13, 1  ;;  %v4494_v0 = vlaneseq  ;;  %vm550_vm0 = vcmask 1040384  }
   0xf   : > { %s4553_s13 = smov (!%p158_p3, %s2881_s13), 1  ;;  %v231_v1 = vshrl.u32 %v4494_v0, 7 }
  0x10   : > { %s2886_s14 = sshll.u32 %s4553_s13, 6 }
  0x11   : > { %v3134_v2 = vsub.s32 0, %v231_v1  ;;  %v3136_v3 = vsub.s32 1, %v231_v1  ;;  %s3143_s17 = scalar_lea.vmem %s4490_s0, %s2886_s14  ;;  %s4159_s28 = scalar_lea.vmem %s4493_s3, %s2886_s14 }
  0x12   : > { %v3146_v4 = vld [vmem:[%s3143_s17] sm:$0x3]  ;;  %v3149_v5 = vld [vmem:[%s3143_s17 + $0x4] sm:$0x3]  ;;  %v3152_v6 = vld [vmem:[%s3143_s17 + $0x2] sm:$0x3] }
  0x13   : > { %v233_v7 = vrot.slane %v3146_v4, %v3134_v2  ;;  %v237_v8 = vrot.slane %v3146_v4, %v3136_v3  ;;  %v249_v9 = vrot.slane %v3149_v5, %v3134_v2  ;;  %v253_v10 = vrot.slane %v3149_v5, %v3136_v3  ;;  %v3163_v11 = vld [vmem:[%s3143_s17 + $0x6] sm:$0x3]  ;;  %v3174_v16 = vld [vmem:[%s3143_s17 + $0x8] sm:$0x3]  ;;  %v3181_v21 = vld [vmem:[%s3143_s17 + $0xa] sm:$0x3] }
  0x14   : > { %v241_v12 = vrot.slane %v3152_v6, %v3134_v2  ;;  %v245_v13 = vrot.slane %v3152_v6, %v3136_v3  ;;  %v257_v14 = vrot.slane %v3163_v11, %v3134_v2  ;;  %v261_v15 = vrot.slane %v3163_v11, %v3136_v3  ;;  %v3186_v26 = vld [vmem:[%s3143_s17 + $0xc] sm:$0x3]  ;;  %v3193_v31 = vld [vmem:[%s3143_s17 + $0xe] sm:$0x3]  ;;  %v3213_v43 = vld [vmem:[%s3143_s17 + $0x10] sm:$0x3] }
  0x15   : > { %v551_v17 = vsel %vm550_vm0, %v233_v7, 0.0  ;;  %v552_v18 = vsel %vm550_vm0, %v237_v8, 0.0  ;;  %v561_v19 = vsel %vm550_vm0, %v249_v9, 0.0  ;;  %v562_v20 = vsel %vm550_vm0, %v253_v10, 0.0  ;;  %v3216_v44 = vld [vmem:[%s3143_s17 + $0x12] sm:$0x3] }
  0x16   : > { %v553_v22 = vadd.f32 %v552_v18, %v551_v17  ;;  %v563_v23 = vadd.f32 %v562_v20, %v561_v19  ;;  %v556_v24 = vsel %vm550_vm0, %v241_v12, 0.0  ;;  %v557_v25 = vsel %vm550_vm0, %v245_v13, 0.0  ;;  %v3230_v55 = vld [vmem:[%s3143_s17 + $0x14] sm:$0x3]  ;;  %v3233_v56 = vld [vmem:[%s3143_s17 + $0x16] sm:$0x3] }
  0x17   : > { %v558_v27 = vadd.f32 %v557_v25, %v556_v24  ;;  %v566_v28 = vsel %vm550_vm0, %v257_v14, 0.0  ;;  %v567_v29 = vsel %vm550_vm0, %v261_v15, 0.0  ;;  %v265_v30 = vrot.slane %v3174_v16, %v3134_v2  ;;  %v3245_v1 = vld [vmem:[%s3143_s17 + $0x18] sm:$0x3]  ;;  %v3253_v12 = vld [vmem:[%s3143_s17 + $0x1a] sm:$0x3] }
  0x18   : > { %554 = vadd.xlane.f32.xlu0 %v553_v22  ;;  %564 = vadd.xlane.f32.xlu1 %v563_v23  ;;  %v568_v32 = vadd.f32 %v567_v29, %v566_v28  ;;  %v269_v33 = vrot.slane %v3174_v16, %v3136_v3  ;;  %v273_v34 = vrot.slane %v3181_v21, %v3134_v2  ;;  %v3262_v20 = vld [vmem:[%s3143_s17 + $0x1c] sm:$0x3] }
  0x19   : > { %v571_v35 = vsel %vm550_vm0, %v265_v30, 0.0  ;;  %v277_v36 = vrot.slane %v3181_v21, %v3136_v3  ;;  %v281_v37 = vrot.slane %v3186_v26, %v3134_v2  ;;  %v285_v38 = vrot.slane %v3186_v26, %v3136_v3 }
  0x1a   : > { %v572_v39 = vsel %vm550_vm0, %v269_v33, 0.0  ;;  %v576_v40 = vsel %vm550_vm0, %v273_v34, 0.0  ;;  %v289_v41 = vrot.slane %v3193_v31, %v3134_v2  ;;  %v293_v42 = vrot.slane %v3193_v31, %v3136_v3 }
  0x1b   : > { %v573_v45 = vadd.f32 %v572_v39, %v571_v35  ;;  %v577_v46 = vsel %vm550_vm0, %v277_v36, 0.0  ;;  %v581_v47 = vsel %vm550_vm0, %v281_v37, 0.0  ;;  %v582_v49 = vsel %vm550_vm0, %v285_v38, 0.0  ;;  %v3280_v35 = vld [vmem:[%s3143_s17 + $0x20] sm:$0x3] }
  0x1c   : > { %559 = vadd.xlane.f32.xlu0 %v558_v27  ;;  %569 = vadd.xlane.f32.xlu1 %v568_v32  ;;  %v578_v48 = vadd.f32 %v577_v46, %v576_v40  ;;  %v586_v50 = vsel %vm550_vm0, %v289_v41, 0.0  ;;  %v587_v51 = vsel %vm550_vm0, %v293_v42, 0.0  ;;  %v297_v52 = vrot.slane %v3213_v43, %v3134_v2  ;;  %v3271_v27 = vld [vmem:[%s3143_s17 + $0x1e] sm:$0x3]  ;;  %v3289_v40 = vld [vmem:[%s3143_s17 + $0x22] sm:$0x3] }
  0x1d   : > { %v301_v53 = vrot.slane %v3213_v43, %v3136_v3  ;;  %v305_v54 = vrot.slane %v3216_v44, %v3134_v2  ;;  %v309_v57 = vrot.slane %v3216_v44, %v3136_v3  ;;  %v583_v58 = vadd.f32 %v582_v49, %v581_v47 }
  0x1e   : > { %v588_v59 = vadd.f32 %v587_v51, %v586_v50  ;;  %v591_v60 = vsel %vm550_vm0, %v297_v52, 0.0  ;;  %v313_v61 = vrot.slane %v3230_v55, %v3134_v2  ;;  %v317_v62 = vrot.slane %v3230_v55, %v3136_v3  ;;  %v3305_v52 = vld [vmem:[%s3143_s17 + $0x26] sm:$0x3] }
  0x1f   : > { %v321_v63 = vrot.slane %v3233_v56, %v3134_v2  ;;  %v592_v7 = vsel %vm550_vm0, %v301_v53, 0.0  ;;  %v596_v8 = vsel %vm550_vm0, %v305_v54, 0.0  ;;  %v597_v9 = vsel %vm550_vm0, %v309_v57, 0.0 }
  0x20   : > { %574 = vadd.xlane.f32.xlu0 %v573_v45  ;;  %579 = vadd.xlane.f32.xlu1 %v578_v48  ;;  %v325_v10 = vrot.slane %v3233_v56, %v3136_v3  ;;  %v329_v13 = vrot.slane %v3245_v1, %v3134_v2  ;;  %v333_v14 = vrot.slane %v3245_v1, %v3136_v3  ;;  %v601_v18 = vsel %vm550_vm0, %v313_v61, 0.0  ;;  %v3298_v48 = vld [vmem:[%s3143_s17 + $0x24] sm:$0x3] }
  0x21   : > { %v593_v15 = vadd.f32 %v592_v7, %v591_v60  ;;  %v598_v17 = vadd.f32 %v597_v9, %v596_v8  ;;  %v602_v19 = vsel %vm550_vm0, %v317_v62, 0.0  ;;  %v606_v22 = vsel %vm550_vm0, %v321_v63, 0.0 }
  0x22   : > { %v607_v23 = vsel %vm550_vm0, %v325_v10, 0.0  ;;  %v337_v24 = vrot.slane %v3253_v12, %v3134_v2  ;;  %v341_v25 = vrot.slane %v3253_v12, %v3136_v3  ;;  %v611_v28 = vsel %vm550_vm0, %v329_v13, 0.0  ;;  %v3322_v10 = vld [vmem:[%s3143_s17 + $0x28] sm:$0x3]  ;;  %v3325_v13 = vld [vmem:[%s3143_s17 + $0x2a] sm:$0x3] }
  0x23   : > { %v612_v29 = vsel %vm550_vm0, %v333_v14, 0.0  ;;  %v345_v30 = vrot.slane %v3262_v20, %v3134_v2  ;;  %v349_v32 = vrot.slane %v3262_v20, %v3136_v3  ;;  %v603_v33 = vadd.f32 %v602_v19, %v601_v18 }
  0x24   : > { %584 = vadd.xlane.f32.xlu0 %v583_v58  ;;  %589 = vadd.xlane.f32.xlu1 %v588_v59  ;;  %v608_v34 = vadd.f32 %v607_v23, %v606_v22  ;;  %v616_v36 = vsel %vm550_vm0, %v337_v24, 0.0  ;;  %v617_v37 = vsel %vm550_vm0, %v341_v25, 0.0  ;;  %v353_v38 = vrot.slane %v3271_v27, %v3134_v2 }
  0x25   : > { %v357_v39 = vrot.slane %v3271_v27, %v3136_v3  ;;  %v613_v41 = vadd.f32 %v612_v29, %v611_v28  ;;  %v621_v42 = vsel %vm550_vm0, %v345_v30, 0.0  ;;  %v622_v45 = vsel %vm550_vm0, %v349_v32, 0.0  ;;  %v3340_v29 = vld [vmem:[%s3143_s17 + $0x2c] sm:$0x3]  ;;  %v3343_v30 = vld [vmem:[%s3143_s17 + $0x2e] sm:$0x3] }
  0x26   : > { %v361_v46 = vrot.slane %v3280_v35, %v3134_v2  ;;  %v365_v47 = vrot.slane %v3280_v35, %v3136_v3  ;;  %v618_v49 = vadd.f32 %v617_v37, %v616_v36  ;;  %v369_v50 = vrot.slane %v3289_v40, %v3134_v2 }
  0x27   : > { %v373_v51 = vrot.slane %v3289_v40, %v3136_v3  ;;  %v626_v53 = vsel %vm550_vm0, %v353_v38, 0.0  ;;  %v627_v54 = vsel %vm550_vm0, %v357_v39, 0.0  ;;  %v623_v57 = vadd.f32 %v622_v45, %v621_v42  ;;  %v3354_v42 = vld [vmem:[%s3143_s17 + $0x30] sm:$0x3] }
  0x28   : > { %594 = vadd.xlane.f32.xlu0 %v593_v15  ;;  %599 = vadd.xlane.f32.xlu1 %v598_v17  ;;  %v377_v58 = vrot.slane %v3298_v48, %v3134_v2  ;;  %v631_v59 = vsel %vm550_vm0, %v361_v46, 0.0  ;;  %v632_v60 = vsel %vm550_vm0, %v365_v47, 0.0  ;;  %v381_v61 = vrot.slane %v3298_v48, %v3136_v3  ;;  %v3361_v47 = vld [vmem:[%s3143_s17 + $0x32] sm:$0x3] }
  0x29   : > { %v385_v62 = vrot.slane %v3305_v52, %v3134_v2  ;;  %v628_v63 = vadd.f32 %v627_v54, %v626_v53  ;;  %v636_v7 = vsel %vm550_vm0, %v369_v50, 0.0  ;;  %v637_v8 = vsel %vm550_vm0, %v373_v51, 0.0 }
  0x2a   : > { %v389_v9 = vrot.slane %v3305_v52, %v3136_v3  ;;  %v633_v14 = vadd.f32 %v632_v60, %v631_v59  ;;  %v641_v15 = vsel %vm550_vm0, %v377_v58, 0.0  ;;  %v638_v17 = vadd.f32 %v637_v8, %v636_v7  ;;  %v3374_v60 = vld [vmem:[%s3143_s17 + $0x34] sm:$0x3] }
  0x2b   : > { %v642_v18 = vsel %vm550_vm0, %v381_v61, 0.0  ;;  %v646_v19 = vsel %vm550_vm0, %v385_v62, 0.0  ;;  %v393_v22 = vrot.slane %v3322_v10, %v3134_v2  ;;  %v397_v24 = vrot.slane %v3322_v10, %v3136_v3 }
  0x2c   : > { %604 = vadd.xlane.f32.xlu0 %v603_v33  ;;  %609 = vadd.xlane.f32.xlu1 %v608_v34  ;;  %v647_v23 = vsel %vm550_vm0, %v389_v9, 0.0  ;;  %v401_v25 = vrot.slane %v3325_v13, %v3134_v2  ;;  %v405_v28 = vrot.slane %v3325_v13, %v3136_v3  ;;  %v643_v32 = vadd.f32 %v642_v18, %v641_v15 }
  0x2d   : > { %v648_v33 = vadd.f32 %v647_v23, %v646_v19  ;;  %v409_v34 = vrot.slane %v3340_v29, %v3134_v2  ;;  %v413_v36 = vrot.slane %v3340_v29, %v3136_v3  ;;  %v651_v37 = vsel %vm550_vm0, %v393_v22, 0.0 }
  0x2e   : > { %v652_v38 = vsel %vm550_vm0, %v397_v24, 0.0  ;;  %v656_v39 = vsel %vm550_vm0, %v401_v25, 0.0  ;;  %v417_v45 = vrot.slane %v3343_v30, %v3134_v2  ;;  %v421_v46 = vrot.slane %v3343_v30, %v3136_v3  ;;  %v3394_v24 = vld [vmem:[%s3143_s17 + $0x38] sm:$0x3]  ;;  %v3397_v25 = vld [vmem:[%s3143_s17 + $0x3a] sm:$0x3] }
  0x2f   : > { %v661_v51 = vsel %vm550_vm0, %v409_v34, 0.0  ;;  %v425_v53 = vrot.slane %v3354_v42, %v3134_v2  ;;  %v662_v54 = vsel %vm550_vm0, %v413_v36, 0.0  ;;  %v433_v58 = vrot.slane %v3361_v47, %v3134_v2 }
  0x30   : > { %614 = vadd.xlane.f32.xlu0 %v613_v41  ;;  %619 = vadd.xlane.f32.xlu1 %v618_v49  ;;  %v657_v41 = vsel %vm550_vm0, %v405_v28, 0.0  ;;  %v653_v49 = vadd.f32 %v652_v38, %v651_v37  ;;  %v437_v59 = vrot.slane %v3361_v47, %v3136_v3  ;;  %v666_v61 = vsel %vm550_vm0, %v417_v45, 0.0 }
  0x31   : > { %v658_v50 = vadd.f32 %v657_v41, %v656_v39  ;;  %v667_v62 = vsel %vm550_vm0, %v421_v46, 0.0  ;;  %v663_v7 = vadd.f32 %v662_v54, %v661_v51  ;;  %v671_v8 = vsel %vm550_vm0, %v425_v53, 0.0  ;;  %v3408_v39 = vld [vmem:[%s3143_s17 + $0x3c] sm:$0x3] }
  0x32   : > { %v441_v9 = vrot.slane %v3374_v60, %v3134_v2  ;;  %v668_v15 = vadd.f32 %v667_v62, %v666_v61  ;;  %v676_v18 = vsel %vm550_vm0, %v433_v58, 0.0  ;;  %v677_v19 = vsel %vm550_vm0, %v437_v59, 0.0 }
  0x33   : > { %v457_v36 = vrot.slane %v3394_v24, %v3134_v2  ;;  %v461_v37 = vrot.slane %v3394_v24, %v3136_v3  ;;  %v465_v38 = vrot.slane %v3397_v25, %v3134_v2  ;;  %v469_v46 = vrot.slane %v3397_v25, %v3136_v3 }
  0x34   : > { %624 = vadd.xlane.f32.xlu0 %v623_v57  ;;  %629 = vadd.xlane.f32.xlu1 %v628_v63  ;;  %v429_v57 = vrot.slane %v3354_v42, %v3136_v3  ;;  %v3379_v63 = vld [vmem:[%s3143_s17 + $0x36] sm:$0x3]  ;;  %v473_v51 = vrot.slane %v3408_v39, %v3134_v2  ;;  %v477_v61 = vrot.slane %v3408_v39, %v3136_v3 }
  0x35   : > { %v449_v22 = vrot.slane %v3379_v63, %v3134_v2  ;;  %v453_v23 = vrot.slane %v3379_v63, %v3136_v3  ;;  %v691_v54 = vsel %vm550_vm0, %v457_v36, 0.0  ;;  %v696_v58 = vsel %vm550_vm0, %v465_v38, 0.0 }
  0x36   : > { %v697_v59 = vsel %vm550_vm0, %v469_v46, 0.0 }
  0x37   : > { %v686_v41 = vsel %vm550_vm0, %v449_v22, 0.0  ;;  %v687_v45 = vsel %vm550_vm0, %v453_v23, 0.0  ;;  %v3101_v23 = vmov 0  }
  0x38   : > { %634 = vadd.xlane.f32.xlu0 %v633_v14  ;;  %639 = vadd.xlane.f32.xlu1 %v638_v17  ;;  %v445_v14 = vrot.slane %v3374_v60, %v3136_v3  ;;  %v672_v17 = vsel %vm550_vm0, %v429_v57, 0.0  ;;  %v688_v53 = vadd.f32 %v687_v45, %v686_v41  ;;  %v692_v57 = vsel %vm550_vm0, %v461_v37, 0.0 }
  0x39   : > { %v673_v28 = vadd.f32 %v672_v17, %v671_v8  ;;  %v693_v8 = vadd.f32 %v692_v57, %v691_v54  ;;  %2900 = vset.pattern.permute.xlu1 %v3101_v23  ;;  %2899 = vset.pattern.permute.xlu0 %v3101_v23 }
  0x3a   : > { %v682_v34 = vsel %vm550_vm0, %v445_v14, 0.0  ;;  %v701_v14 = vsel %vm550_vm0, %v473_v51, 0.0 }
  0x3c   : > { %644 = vadd.xlane.f32.xlu0 %v643_v32  ;;  %649 = vadd.xlane.f32.xlu1 %v648_v33  ;;  %v678_v32 = vadd.f32 %v677_v19, %v676_v18  ;;  %v681_v33 = vsel %vm550_vm0, %v441_v9, 0.0  ;;  %v698_v9 = vadd.f32 %v697_v59, %v696_v58 }
  0x40   : > { %654 = vadd.xlane.f32.xlu0 %v653_v49  ;;  %659 = vadd.xlane.f32.xlu1 %v658_v50  ;;  %v3415_v49 = vld [vmem:[%s3143_s17 + $0x3e] sm:$0x3]  ;;  %v683_v50 = vadd.f32 %v682_v34, %v681_v33 }
  0x41   : > { %v481_v62 = vrot.slane %v3415_v49, %v3134_v2 }
  0x43   : > { %v706_v17 = vsel %vm550_vm0, %v481_v62, 0.0 }
  0x44   : > { %664 = vadd.xlane.f32.xlu0 %v663_v7  ;;  %669 = vadd.xlane.f32.xlu1 %v668_v15  ;;  %v485_v7 = vrot.slane %v3415_v49, %v3136_v3  ;;  %v702_v15 = vsel %vm550_vm0, %v477_v61, 0.0 }
  0x45   : > { %v703_v19 = vadd.f32 %v702_v15, %v701_v14 }
  0x46   : > { %v707_v18 = vsel %vm550_vm0, %v485_v7, 0.0 }
  0x47   : > { %v708_v22 = vadd.f32 %v707_v18, %v706_v17 }
  0x48   : > { %674 = vadd.xlane.f32.xlu0 %v673_v28  ;;  %679 = vadd.xlane.f32.xlu1 %v678_v32 }
  0x4c   : > { %684 = vadd.xlane.f32.xlu0 %v683_v50  ;;  %689 = vadd.xlane.f32.xlu1 %v688_v53 }
  0x50   : > { %694 = vadd.xlane.f32.xlu0 %v693_v8  ;;  %699 = vadd.xlane.f32.xlu1 %v698_v9 }
  0x54   : > { %704 = vadd.xlane.f32.xlu0 %v703_v19  ;;  %709 = vadd.xlane.f32.xlu1 %v708_v22 }
  0xa5   : > { %v555_v28 = vpop.xlane.xlu0 %554  ;;  %v565_v32 = vpop.xlane.xlu1 %564 }
  0xa6   : > { %v712_v33 = vmul.f32 0.00390625, %v555_v28  ;;  %v714_v34 = vmul.f32 0.00390625, %v565_v32 }
  0xa8   : > { %v811_v36 = vrot.slane %v712_v33, %v3134_v2  ;;  %v819_v37 = vrot.slane %v714_v34, %v3134_v2 }
  0xa9   : > { %v560_v38 = vpop.xlane.xlu0 %559  ;;  %v570_v41 = vpop.xlane.xlu1 %569 }
  0xaa   : > { %v3436_v45 = vsub.f32 %v3146_v4, %v811_v36  ;;  %v3439_v46 = vsub.f32 %v3149_v5, %v819_v37  ;;  %v713_v50 = vmul.f32 0.00390625, %v560_v38  ;;  %v715_v51 = vmul.f32 0.00390625, %v570_v41 }
  0xac   : > { %v815_v53 = vrot.slane %v713_v50, %v3134_v2  ;;  %v823_v54 = vrot.slane %v715_v51, %v3134_v2  ;;  %v1000_v57 = vmul.f32 %v3436_v45, %v3436_v45  ;;  %v1002_v58 = vmul.f32 %v3439_v46, %v3439_v46 }
  0xad   : > { %v575_v59 = vpop.xlane.xlu0 %574  ;;  %v580_v61 = vpop.xlane.xlu1 %579 }
  0xae   : > { %v3448_v4 = vsub.f32 %v3152_v6, %v815_v53  ;;  %v3451_v5 = vsub.f32 %v3163_v11, %v823_v54  ;;  %v716_v62 = vmul.f32 0.00390625, %v575_v59  ;;  %v717_v7 = vmul.f32 0.00390625, %v580_v61 }
  0xaf   : > { %v1067_v8 = vrot.slane %v1000_v57, %v3134_v2  ;;  %v1071_v9 = vrot.slane %v1000_v57, %v3136_v3  ;;  %v1083_v14 = vrot.slane %v1002_v58, %v3134_v2  ;;  %v1087_v15 = vrot.slane %v1002_v58, %v3136_v3 }
  0xb0   : > { %v827_v17 = vrot.slane %v716_v62, %v3134_v2  ;;  %v831_v18 = vrot.slane %v717_v7, %v3134_v2  ;;  %v1001_v6 = vmul.f32 %v3448_v4, %v3448_v4  ;;  %v1003_v11 = vmul.f32 %v3451_v5, %v3451_v5 }
  0xb1   : > { %v585_v19 = vpop.xlane.xlu0 %584  ;;  %v1384_v22 = vsel %vm550_vm0, %v1067_v8, 0.0  ;;  %v1385_v23 = vsel %vm550_vm0, %v1071_v9, 0.0  ;;  %v590_v28 = vpop.xlane.xlu1 %589  ;;  %v1394_v32 = vsel %vm550_vm0, %v1083_v14, 0.0  ;;  %v1395_v33 = vsel %vm550_vm0, %v1087_v15, 0.0 }
  0xb2   : > { %v3468_v34 = vsub.f32 %v3174_v16, %v827_v17  ;;  %v3471_v36 = vsub.f32 %v3181_v21, %v831_v18  ;;  %v718_v37 = vmul.f32 0.00390625, %v585_v19  ;;  %v1386_v38 = vadd.f32 %v1385_v23, %v1384_v22 }
  0xb3   : > { %v719_v41 = vmul.f32 0.00390625, %v590_v28  ;;  %v1396_v50 = vadd.f32 %v1395_v33, %v1394_v32  ;;  %v1075_v51 = vrot.slane %v1001_v6, %v3134_v2  ;;  %v1079_v53 = vrot.slane %v1001_v6, %v3136_v3 }
  0xb4   : > { %v835_v54 = vrot.slane %v718_v37, %v3134_v2  ;;  %1387 = vadd.xlane.f32.xlu0 %v1386_v38  ;;  %v1091_v57 = vrot.slane %v1003_v11, %v3134_v2  ;;  %v1095_v58 = vrot.slane %v1003_v11, %v3136_v3  ;;  %v1004_v16 = vmul.f32 %v3468_v34, %v3468_v34 }
  0xb5   : > { %v839_v21 = vrot.slane %v719_v41, %v3134_v2  ;;  %v595_v59 = vpop.xlane.xlu0 %594  ;;  %v1389_v61 = vsel %vm550_vm0, %v1075_v51, 0.0  ;;  %v1390_v62 = vsel %vm550_vm0, %v1079_v53, 0.0  ;;  %v600_v7 = vpop.xlane.xlu1 %599  ;;  %v1005_v8 = vmul.f32 %v3471_v36, %v3471_v36 }
  0xb6   : > { %v3486_v9 = vsub.f32 %v3186_v26, %v835_v54  ;;  %v720_v14 = vmul.f32 0.00390625, %v595_v59  ;;  %v1391_v15 = vadd.f32 %v1390_v62, %v1389_v61  ;;  %v721_v17 = vmul.f32 0.00390625, %v600_v7 }
  0xb7   : > { %v3489_v18 = vsub.f32 %v3193_v31, %v839_v21  ;;  %v1399_v6 = vsel %vm550_vm0, %v1091_v57, 0.0  ;;  %v1400_v11 = vsel %vm550_vm0, %v1095_v58, 0.0  ;;  %v1099_v19 = vrot.slane %v1004_v16, %v3134_v2 }
  0xb8   : > { %v843_v22 = vrot.slane %v720_v14, %v3134_v2  ;;  %1397 = vadd.xlane.f32.xlu0 %v1396_v50  ;;  %1392 = vadd.xlane.f32.xlu1 %v1391_v15  ;;  %v847_v23 = vrot.slane %v721_v17, %v3134_v2  ;;  %v1401_v26 = vadd.f32 %v1400_v11, %v1399_v6 }
  0xb9   : > { %v605_v28 = vpop.xlane.xlu0 %604  ;;  %v1103_v32 = vrot.slane %v1004_v16, %v3136_v3  ;;  %v1404_v33 = vsel %vm550_vm0, %v1099_v19, 0.0  ;;  %v610_v31 = vpop.xlane.xlu1 %609  ;;  %v1107_v37 = vrot.slane %v1005_v8, %v3134_v2  ;;  %v1111_v38 = vrot.slane %v1005_v8, %v3136_v3 }
  0xba   : > { %v3501_v41 = vsub.f32 %v3213_v43, %v843_v22  ;;  %v3504_v51 = vsub.f32 %v3216_v44, %v847_v23  ;;  %v722_v50 = vmul.f32 0.00390625, %v605_v28  ;;  %v723_v53 = vmul.f32 0.00390625, %v610_v31 }
  0xbb   : > { %v1405_v54 = vsel %vm550_vm0, %v1103_v32, 0.0  ;;  %v1409_v57 = vsel %vm550_vm0, %v1107_v37, 0.0  ;;  %v1410_v58 = vsel %vm550_vm0, %v1111_v38, 0.0  ;;  %v1006_v16 = vmul.f32 %v3486_v9, %v3486_v9 }
  0xbc   : > { %4507 = vst [vmem:[#allocation2_spill] sm:$0xff] %v3501_v41  ;;  %v851_v21 = vrot.slane %v722_v50, %v3134_v2  ;;  %1402 = vadd.xlane.f32.xlu1 %v1401_v26  ;;  %v1406_v59 = vadd.f32 %v1405_v54, %v1404_v33  ;;  %v855_v43 = vrot.slane %v723_v53, %v3134_v2 }
  0xbd   : > { %v1411_v61 = vadd.f32 %v1410_v58, %v1409_v57  ;;  %v615_v44 = vpop.xlane.xlu0 %614  ;;  %v1115_v62 = vrot.slane %v1006_v16, %v3134_v2  ;;  %v1119_v7 = vrot.slane %v1006_v16, %v3136_v3  ;;  %v620_v8 = vpop.xlane.xlu1 %619  ;;  %v1007_v14 = vmul.f32 %v3489_v18, %v3489_v18 }
  0xbe   : > { %v1008_v15 = vmul.f32 %v3501_v41, %v3501_v41  ;;  %v3520_v17 = vsub.f32 %v3230_v55, %v851_v21  ;;  %1407 = vadd.xlane.f32.xlu0 %v1406_v59  ;;  %v3523_v6 = vsub.f32 %v3233_v56, %v855_v43  ;;  %v724_v11 = vmul.f32 0.00390625, %v615_v44 }
  0xbf   : > { %v725_v19 = vmul.f32 0.00390625, %v620_v8  ;;  %v1414_v22 = vsel %vm550_vm0, %v1115_v62, 0.0  ;;  %v1415_v23 = vsel %vm550_vm0, %v1119_v7, 0.0  ;;  %v1123_v26 = vrot.slane %v1007_v14, %v3134_v2 }
  0xc0   : > { %4508 = vst [vmem:[#allocation3_spill] sm:$0xff] %v3520_v17  ;;  %v1127_v28 = vrot.slane %v1007_v14, %v3136_v3  ;;  %v859_v32 = vrot.slane %v724_v11, %v3134_v2  ;;  %1412 = vadd.xlane.f32.xlu1 %v1411_v61  ;;  %v1416_v33 = vadd.f32 %v1415_v23, %v1414_v22 }
  0xc1   : > { %v863_v55 = vrot.slane %v725_v19, %v3134_v2  ;;  %v1131_v31 = vrot.slane %v1008_v15, %v3134_v2  ;;  %v625_v56 = vpop.xlane.xlu0 %624  ;;  %v1419_v37 = vsel %vm550_vm0, %v1123_v26, 0.0  ;;  %v1135_v50 = vrot.slane %v1008_v15, %v3136_v3  ;;  %v630_v53 = vpop.xlane.xlu1 %629 }
  0xc2   : > { %v1420_v38 = vsel %vm550_vm0, %v1127_v28, 0.0  ;;  %v1009_v54 = vmul.f32 %v3504_v51, %v3504_v51  ;;  %v3538_v57 = vsub.f32 %v3245_v1, %v859_v32  ;;  %1417 = vadd.xlane.f32.xlu0 %v1416_v33  ;;  %v726_v16 = vmul.f32 0.00390625, %v625_v56 }
  0xc3   : > { %v3541_v58 = vsub.f32 %v3253_v12, %v863_v55  ;;  %v1421_v21 = vadd.f32 %v1420_v38, %v1419_v37  ;;  %v1424_v59 = vsel %vm550_vm0, %v1131_v31, 0.0  ;;  %v1425_v43 = vsel %vm550_vm0, %v1135_v50, 0.0 }
  0xc4   : > { %4509 = vst [vmem:[#allocation4_spill] sm:$0xff] %v3538_v57  ;;  %v727_v61 = vmul.f32 0.00390625, %v630_v53  ;;  %v1139_v44 = vrot.slane %v1009_v54, %v3134_v2  ;;  %v867_v62 = vrot.slane %v726_v16, %v3134_v2  ;;  %v1426_v7 = vadd.f32 %v1425_v43, %v1424_v59 }
  0xc5   : > { %1422 = vadd.xlane.f32.xlu1 %v1421_v21  ;;  %v1143_v1 = vrot.slane %v1009_v54, %v3136_v3  ;;  %v1010_v8 = vmul.f32 %v3520_v17, %v3520_v17  ;;  %v635_v14 = vpop.xlane.xlu0 %634  ;;  %v640_v11 = vpop.xlane.xlu1 %639  ;;  %v1011_v19 = vmul.f32 %v3523_v6, %v3523_v6  ;;  %v1012_v22 = vmul.f32 %v3538_v57, %v3538_v57 }
  0xc6   : > { %v871_v12 = vrot.slane %v727_v61, %v3134_v2  ;;  %v1429_v15 = vsel %vm550_vm0, %v1139_v44, 0.0  ;;  %v3557_v23 = vsub.f32 %v3262_v20, %v867_v62  ;;  %1427 = vadd.xlane.f32.xlu0 %v1426_v7  ;;  %v728_v26 = vmul.f32 0.00390625, %v635_v14 }
  0xc7   : > { %v1430_v28 = vsel %vm550_vm0, %v1143_v1, 0.0  ;;  %v1147_v32 = vrot.slane %v1010_v8, %v3134_v2  ;;  %v1151_v31 = vrot.slane %v1010_v8, %v3136_v3  ;;  %v729_v56 = vmul.f32 0.00390625, %v640_v11 }
  0xc8   : > { %4510 = vst [vmem:[#allocation5_spill] sm:$0xff] %v3557_v23  ;;  %v3562_v33 = vsub.f32 %v3271_v27, %v871_v12  ;;  %v1431_v55 = vadd.f32 %v1430_v28, %v1429_v15  ;;  %v875_v37 = vrot.slane %v728_v26, %v3134_v2  ;;  %v1155_v20 = vrot.slane %v1011_v19, %v3134_v2 }
  0xc9   : > { %v1434_v38 = vsel %vm550_vm0, %v1147_v32, 0.0  ;;  %v1159_v50 = vrot.slane %v1011_v19, %v3136_v3  ;;  %v1435_v53 = vsel %vm550_vm0, %v1151_v31, 0.0  ;;  %v879_v54 = vrot.slane %v729_v56, %v3134_v2  ;;  %v645_v16 = vpop.xlane.xlu0 %644  ;;  %v650_v59 = vpop.xlane.xlu1 %649 }
  0xca   : > { %1432 = vadd.xlane.f32.xlu1 %v1431_v55  ;;  %v1163_v27 = vrot.slane %v1012_v22, %v3134_v2  ;;  %v1167_v21 = vrot.slane %v1012_v22, %v3136_v3  ;;  %v3574_v43 = vsub.f32 %v3280_v35, %v875_v37  ;;  %v1436_v61 = vadd.f32 %v1435_v53, %v1434_v38 }
  0xcb   : > { %v730_v44 = vmul.f32 0.00390625, %v645_v16  ;;  %v1439_v62 = vsel %vm550_vm0, %v1155_v20, 0.0  ;;  %v3578_v7 = vsub.f32 %v3289_v40, %v879_v54  ;;  %v1440_v1 = vsel %vm550_vm0, %v1159_v50, 0.0 }
  0xcc   : > { %4511 = vst [vmem:[#allocation6_spill] sm:$0xff] %v3574_v43  ;;  %v1444_v8 = vsel %vm550_vm0, %v1163_v27, 0.0  ;;  %v1445_v12 = vsel %vm550_vm0, %v1167_v21, 0.0  ;;  %1437 = vadd.xlane.f32.xlu0 %v1436_v61  ;;  %v1441_v15 = vadd.f32 %v1440_v1, %v1439_v62  ;;  %v731_v35 = vmul.f32 0.00390625, %v650_v59 }
  0xcd   : > { %v883_v14 = vrot.slane %v730_v44, %v3134_v2  ;;  %v1446_v11 = vadd.f32 %v1445_v12, %v1444_v8  ;;  %v655_v19 = vpop.xlane.xlu0 %654  ;;  %v1013_v22 = vmul.f32 %v3541_v58, %v3541_v58  ;;  %v1014_v40 = vmul.f32 %v3557_v23, %v3557_v23  ;;  %v660_v26 = vpop.xlane.xlu1 %659 }
  0xce   : > { %v1015_v28 = vmul.f32 %v3562_v33, %v3562_v33  ;;  %v1016_v32 = vmul.f32 %v3574_v43, %v3574_v43  ;;  %1442 = vadd.xlane.f32.xlu1 %v1441_v15  ;;  %v887_v31 = vrot.slane %v731_v35, %v3134_v2  ;;  %v732_v56 = vmul.f32 0.00390625, %v655_v19 }
  0xcf   : > { %v3593_v55 = vsub.f32 %v3298_v48, %v883_v14  ;;  %v733_v37 = vmul.f32 0.00390625, %v660_v26  ;;  %v1171_v38 = vrot.slane %v1013_v22, %v3134_v2  ;;  %v1175_v20 = vrot.slane %v1013_v22, %v3136_v3 }
  0xd0   : > { %v1179_v50 = vrot.slane %v1014_v40, %v3134_v2  ;;  %v1183_v53 = vrot.slane %v1014_v40, %v3136_v3  ;;  %1447 = vadd.xlane.f32.xlu0 %v1446_v11  ;;  %v3601_v54 = vsub.f32 %v3305_v52, %v887_v31  ;;  %v891_v48 = vrot.slane %v732_v56, %v3134_v2 }
  0xd1   : > { %4512 = vst [vmem:[#allocation7_spill] sm:$0xff] %v3593_v55  ;;  %v895_v16 = vrot.slane %v733_v37, %v3134_v2  ;;  %v1187_v27 = vrot.slane %v1015_v28, %v3134_v2  ;;  %v1449_v21 = vsel %vm550_vm0, %v1171_v38, 0.0  ;;  %v1450_v59 = vsel %vm550_vm0, %v1175_v20, 0.0  ;;  %v665_v62 = vpop.xlane.xlu0 %664  ;;  %v670_v1 = vpop.xlane.xlu1 %669 }
  0xd2   : > { %v1454_v61 = vsel %vm550_vm0, %v1179_v50, 0.0  ;;  %v1455_v44 = vsel %vm550_vm0, %v1183_v53, 0.0  ;;  %v3611_v8 = vsub.f32 %v3322_v10, %v891_v48  ;;  %v1451_v52 = vadd.f32 %v1450_v59, %v1449_v21 }
  0xd3   : > { %v1456_v12 = vadd.f32 %v1455_v44, %v1454_v61  ;;  %v3614_v14 = vsub.f32 %v3325_v13, %v895_v16  ;;  %v734_v15 = vmul.f32 0.00390625, %v665_v62  ;;  %v1191_v11 = vrot.slane %v1015_v28, %v3136_v3 }
  0xd4   : > { %4513 = vst [vmem:[#allocation8_spill] sm:$0xff] %v3611_v8  ;;  %v1459_v35 = vsel %vm550_vm0, %v1187_v27, 0.0  ;;  %v1195_v19 = vrot.slane %v1016_v32, %v3134_v2  ;;  %1452 = vadd.xlane.f32.xlu1 %v1451_v52  ;;  %v1199_v22 = vrot.slane %v1016_v32, %v3136_v3  ;;  %v735_v40 = vmul.f32 0.00390625, %v670_v1 }
  0xd5   : > { %1457 = vadd.xlane.f32.xlu0 %v1456_v12  ;;  %v1017_v10 = vmul.f32 %v3578_v7, %v3578_v7  ;;  %v1018_v26 = vmul.f32 %v3593_v55, %v3593_v55  ;;  %v899_v13 = vrot.slane %v734_v15, %v3134_v2  ;;  %v1460_v31 = vsel %vm550_vm0, %v1191_v11, 0.0  ;;  %v675_v56 = vpop.xlane.xlu0 %674  ;;  %v680_v37 = vpop.xlane.xlu1 %679 }
  0xd6   : > { %v1464_v28 = vsel %vm550_vm0, %v1195_v19, 0.0  ;;  %v1019_v38 = vmul.f32 %v3601_v54, %v3601_v54  ;;  %v1461_v20 = vadd.f32 %v1460_v31, %v1459_v35  ;;  %v1465_v32 = vsel %vm550_vm0, %v1199_v22, 0.0 }
  0xd7   : > { %v903_v50 = vrot.slane %v735_v40, %v3134_v2  ;;  %v736_v53 = vmul.f32 0.00390625, %v675_v56  ;;  %v3632_v48 = vsub.f32 %v3340_v29, %v899_v13  ;;  %v1466_v16 = vadd.f32 %v1465_v32, %v1464_v28 }
  0xd8   : > { %v1203_v27 = vrot.slane %v1017_v10, %v3134_v2  ;;  %v1207_v21 = vrot.slane %v1017_v10, %v3136_v3  ;;  %1462 = vadd.xlane.f32.xlu1 %v1461_v20  ;;  %v1211_v44 = vrot.slane %v1018_v26, %v3134_v2  ;;  %v1215_v62 = vrot.slane %v1018_v26, %v3136_v3 }
  0xd9   : > { %4514 = vst [vmem:[#allocation9_spill] sm:$0xff] %v3632_v48  ;;  %v3637_v59 = vsub.f32 %v3343_v30, %v903_v50  ;;  %v907_v61 = vrot.slane %v736_v53, %v3134_v2  ;;  %1467 = vadd.xlane.f32.xlu0 %v1466_v16  ;;  %v737_v52 = vmul.f32 0.00390625, %v680_v37  ;;  %v685_v12 = vpop.xlane.xlu0 %684  ;;  %v1219_v15 = vrot.slane %v1019_v38, %v3134_v2  ;;  %v690_v11 = vpop.xlane.xlu1 %689 }
  0xda   : > { %v1469_v1 = vsel %vm550_vm0, %v1203_v27, 0.0  ;;  %v1470_v29 = vsel %vm550_vm0, %v1207_v21, 0.0  ;;  %v1474_v19 = vsel %vm550_vm0, %v1211_v44, 0.0  ;;  %v1475_v22 = vsel %vm550_vm0, %v1215_v62, 0.0 }
  0xdb   : > { %v3646_v35 = vsub.f32 %v3354_v42, %v907_v61  ;;  %v1471_v30 = vadd.f32 %v1470_v29, %v1469_v1  ;;  %v1476_v40 = vadd.f32 %v1475_v22, %v1474_v19  ;;  %v911_v10 = vrot.slane %v737_v52, %v3134_v2 }
  0xdc   : > { %v738_v26 = vmul.f32 0.00390625, %v685_v12  ;;  %v1223_v13 = vrot.slane %v1019_v38, %v3136_v3  ;;  %v1479_v31 = vsel %vm550_vm0, %v1219_v15, 0.0  ;;  %v1020_v28 = vmul.f32 %v3611_v8, %v3611_v8 }
  0xdd   : > { %4515 = vst [vmem:[#allocation10_spill] sm:$0xff] %v3646_v35  ;;  %1472 = vadd.xlane.f32.xlu1 %v1471_v30  ;;  %v739_v56 = vmul.f32 0.00390625, %v690_v11  ;;  %v1021_v42 = vmul.f32 %v3614_v14, %v3614_v14  ;;  %1477 = vadd.xlane.f32.xlu0 %v1476_v40  ;;  %v3658_v37 = vsub.f32 %v3361_v47, %v911_v10  ;;  %v695_v50 = vpop.xlane.xlu0 %694  ;;  %v700_v1 = vpop.xlane.xlu1 %699 }
  0xde   : > { %v915_v20 = vrot.slane %v738_v26, %v3134_v2  ;;  %v1480_v32 = vsel %vm550_vm0, %v1223_v13, 0.0  ;;  %v1022_v38 = vmul.f32 %v3632_v48, %v3632_v48  ;;  %v1227_v16 = vrot.slane %v1020_v28, %v3134_v2 }
  0xdf   : > { %v1481_v53 = vadd.f32 %v1480_v32, %v1479_v31  ;;  %v1231_v27 = vrot.slane %v1020_v28, %v3136_v3  ;;  %v919_v21 = vrot.slane %v739_v56, %v3134_v2  ;;  %v740_v47 = vmul.f32 0.00390625, %v695_v50 }
  0xe0   : > { %v3668_v61 = vsub.f32 %v3374_v60, %v915_v20  ;;  %v1235_v44 = vrot.slane %v1021_v42, %v3134_v2  ;;  %v1239_v62 = vrot.slane %v1021_v42, %v3136_v3  ;;  %v1484_v29 = vsel %vm550_vm0, %v1227_v16, 0.0 }
  0xe1   : > { %1482 = vadd.xlane.f32.xlu1 %v1481_v53  ;;  %v1485_v52 = vsel %vm550_vm0, %v1231_v27, 0.0  ;;  %v3675_v12 = vsub.f32 %v3379_v63, %v919_v21  ;;  %v1243_v15 = vrot.slane %v1022_v38, %v3134_v2  ;;  %v923_v60 = vrot.slane %v740_v47, %v3134_v2  ;;  %v705_v22 = vpop.xlane.xlu0 %704 }
  0xe2   : > { %4516 = vst [vmem:[#allocation11_spill] sm:$0xff] %v3668_v61  ;;  %v1486_v11 = vadd.f32 %v1485_v52, %v1484_v29  ;;  %v1489_v30 = vsel %vm550_vm0, %v1235_v44, 0.0  ;;  %v1490_v19 = vsel %vm550_vm0, %v1239_v62, 0.0  ;;  %v1247_v10 = vrot.slane %v1022_v38, %v3136_v3 }
  0xe3   : > { %v1491_v40 = vadd.f32 %v1490_v19, %v1489_v30  ;;  %v1494_v26 = vsel %vm550_vm0, %v1243_v15, 0.0  ;;  %v741_v13 = vmul.f32 0.00390625, %v700_v1  ;;  %v3684_v63 = vsub.f32 %v3394_v24, %v923_v60 }
  0xe4   : > { %1487 = vadd.xlane.f32.xlu0 %v1486_v11  ;;  %v742_v31 = vmul.f32 0.00390625, %v705_v22  ;;  %v1023_v28 = vmul.f32 %v3637_v59, %v3637_v59  ;;  %v1024_v56 = vmul.f32 %v3646_v35, %v3646_v35  ;;  %v1495_v42 = vsel %vm550_vm0, %v1247_v10, 0.0 }
  0xe5   : > { %4517 = vst [vmem:[#allocation12_spill] sm:$0xff] %v3684_v63  ;;  %1492 = vadd.xlane.f32.xlu1 %v1491_v40  ;;  %v927_v20 = vrot.slane %v741_v13, %v3134_v2  ;;  %v1025_v32 = vmul.f32 %v3658_v37, %v3658_v37  ;;  %v1026_v50 = vmul.f32 %v3668_v61, %v3668_v61 }
  0xe6   : > { %v1496_v24 = vadd.f32 %v1495_v42, %v1494_v26  ;;  %v931_v38 = vrot.slane %v742_v31, %v3134_v2  ;;  %v1251_v53 = vrot.slane %v1023_v28, %v3134_v2  ;;  %v1255_v16 = vrot.slane %v1023_v28, %v3136_v3 }
  0xe7   : > { %v3700_v27 = vsub.f32 %v3397_v25, %v927_v20  ;;  %v1259_v21 = vrot.slane %v1024_v56, %v3134_v2  ;;  %v1263_v47 = vrot.slane %v1024_v56, %v3136_v3  ;;  %v1267_v44 = vrot.slane %v1025_v32, %v3134_v2 }
  0xe8   : > { %1497 = vadd.xlane.f32.xlu0 %v1496_v24  ;;  %v3706_v62 = vsub.f32 %v3408_v39, %v931_v38  ;;  %v1499_v1 = vsel %vm550_vm0, %v1251_v53, 0.0  ;;  %v1500_v29 = vsel %vm550_vm0, %v1255_v16, 0.0  ;;  %v1271_v52 = vrot.slane %v1025_v32, %v3136_v3 }
  0xe9   : > { %v1501_v15 = vadd.f32 %v1500_v29, %v1499_v1  ;;  %v1504_v25 = vsel %vm550_vm0, %v1259_v21, 0.0  ;;  %v1505_v11 = vsel %vm550_vm0, %v1263_v47, 0.0  ;;  %v1509_v60 = vsel %vm550_vm0, %v1267_v44, 0.0 }
  0xea   : > { %4518 = vst [vmem:[#allocation13_spill] sm:$0xff] %v3706_v62  ;;  %v1506_v30 = vadd.f32 %v1505_v11, %v1504_v25  ;;  %v1510_v19 = vsel %vm550_vm0, %v1271_v52, 0.0  ;;  %v1275_v22 = vrot.slane %v1026_v50, %v3134_v2  ;;  %v1279_v39 = vrot.slane %v1026_v50, %v3136_v3 }
  0xeb   : > { %1502 = vadd.xlane.f32.xlu1 %v1501_v15  ;;  %v1511_v40 = vadd.f32 %v1510_v19, %v1509_v60  ;;  %v1027_v10 = vmul.f32 %v3675_v12, %v3675_v12  ;;  %v1028_v26 = vmul.f32 %v3684_v63, %v3684_v63  ;;  %v1029_v13 = vmul.f32 %v3700_v27, %v3700_v27 }
  0xec   : > { %1507 = vadd.xlane.f32.xlu0 %v1506_v30  ;;  %v1514_v31 = vsel %vm550_vm0, %v1275_v22, 0.0  ;;  %v1515_v28 = vsel %vm550_vm0, %v1279_v39, 0.0  ;;  %v1030_v56 = vmul.f32 %v3706_v62, %v3706_v62  ;;  %v1897_v39 = vld [vmem:[%s4491_s1 + $0x1] sm:$0x1] }
  0xed   : > { %v1516_v42 = vadd.f32 %v1515_v28, %v1514_v31  ;;  %v1283_v20 = vrot.slane %v1027_v10, %v3134_v2  ;;  %v1287_v32 = vrot.slane %v1027_v10, %v3136_v3  ;;  %v1291_v50 = vrot.slane %v1028_v26, %v3134_v2  ;;  %v1896_v10 = vld [vmem:[%s4491_s1] sm:$0x1]  ;;  %v1900_v31 = vld [vmem:[%s4491_s1 + $0x4] sm:$0x1]  ;;  %v1907_v28 = vld [vmem:[%s4491_s1 + $0xb] sm:$0x1] }
  0xee   : > { %v1295_v24 = vrot.slane %v1028_v26, %v3136_v3  ;;  %v1299_v38 = vrot.slane %v1029_v13, %v3134_v2  ;;  %v1303_v53 = vrot.slane %v1029_v13, %v3136_v3  ;;  %v1307_v16 = vrot.slane %v1030_v56, %v3134_v2  ;;  %v1899_v26 = vld [vmem:[%s4491_s1 + $0x3] sm:$0x1]  ;;  %v1905_v13 = vld [vmem:[%s4491_s1 + $0x9] sm:$0x1] }
  0xef   : > { %1512 = vadd.xlane.f32.xlu1 %v1511_v40  ;;  %v1519_v21 = vsel %vm550_vm0, %v1283_v20, 0.0  ;;  %v1520_v47 = vsel %vm550_vm0, %v1287_v32, 0.0  ;;  %v1524_v44 = vsel %vm550_vm0, %v1291_v50, 0.0  ;;  %v1311_v1 = vrot.slane %v1030_v56, %v3136_v3  ;;  %v1898_v40 = vld [vmem:[%s4491_s1 + $0x2] sm:$0x1] }
  0xf0   : > { %1517 = vadd.xlane.f32.xlu0 %v1516_v42  ;;  %v1521_v29 = vadd.f32 %v1520_v47, %v1519_v21  ;;  %v1525_v52 = vsel %vm550_vm0, %v1295_v24, 0.0  ;;  %v1529_v15 = vsel %vm550_vm0, %v1299_v38, 0.0  ;;  %v1530_v25 = vsel %vm550_vm0, %v1303_v53, 0.0  ;;  %v1901_v56 = vld [vmem:[%s4491_s1 + $0x5] sm:$0x1]  ;;  %v710_v53 = vpop.xlane.xlu1 %709 }
  0xf1   : > { %v1526_v11 = vadd.f32 %v1525_v52, %v1524_v44  ;;  %v1534_v60 = vsel %vm550_vm0, %v1307_v16, 0.0  ;;  %v1535_v30 = vsel %vm550_vm0, %v1311_v1, 0.0  ;;  %v1531_v19 = vadd.f32 %v1530_v25, %v1529_v15  ;;  %v1909_v42 = vld [vmem:[%s4491_s1 + $0xd] sm:$0x1]  ;;  %v1902_v20 = vld [vmem:[%s4491_s1 + $0x6] sm:$0x1] }
  0xf2   : > { %v1536_v22 = vadd.f32 %v1535_v30, %v1534_v60  ;;  %v1911_v32 = vld [vmem:[%s4491_s1 + $0xf] sm:$0x1]  ;;  %v1903_v50 = vld [vmem:[%s4491_s1 + $0x7] sm:$0x1]  ;;  %v1913_v24 = vld [vmem:[%s4491_s1 + $0x11] sm:$0x1] }
  0xf3   : > { %1522 = vadd.xlane.f32.xlu1 %v1521_v29  ;;  %v1915_v38 = vld [vmem:[%s4491_s1 + $0x13] sm:$0x1]  ;;  %v1917_v16 = vld [vmem:[%s4491_s1 + $0x15] sm:$0x1]  ;;  %v743_v21 = vmul.f32 0.00390625, %v710_v53 }
  0xf4   : > { %1527 = vadd.xlane.f32.xlu0 %v1526_v11  ;;  %v1919_v47 = vld [vmem:[%s4491_s1 + $0x17] sm:$0x1]  ;;  %v1921_v1 = vld [vmem:[%s4491_s1 + $0x19] sm:$0x1]  ;;  %v1923_v52 = vld [vmem:[%s4491_s1 + $0x1b] sm:$0x1] }
  0xf5   : > { %v935_v44 = vrot.slane %v743_v21, %v3134_v2  ;;  %v1925_v25 = vld [vmem:[%s4491_s1 + $0x1d] sm:$0x1]  ;;  %v2261_v21 = vld [vmem:[%s4492_s2 + $0xd] sm:$0x1] }
  0xf7   : > { %1532 = vadd.xlane.f32.xlu1 %v1531_v19  ;;  %v3796_v29 = vsub.f32 %v3415_v49, %v935_v44  ;;  %v1927_v49 = vld [vmem:[%s4491_s1 + $0x1f] sm:$0x1] }
  0xf8   : > { %1537 = vadd.xlane.f32.xlu0 %v1536_v22  ;;  %v2249_v22 = vld [vmem:[%s4492_s2 + $0x1] sm:$0x1] }
  0xf9   : > { %v1031_v15 = vmul.f32 %v3796_v29, %v3796_v29 }
  0xfb   : > { %v1315_v11 = vrot.slane %v1031_v15, %v3134_v2  ;;  %v1319_v60 = vrot.slane %v1031_v15, %v3136_v3  ;;  %v2251_v3 = vld [vmem:[%s4492_s2 + $0x3] sm:$0x1] }
  0xfd   : > { %v1539_v30 = vsel %vm550_vm0, %v1315_v11, 0.0  ;;  %v1540_v19 = vsel %vm550_vm0, %v1319_v60, 0.0  ;;  %v1910_v11 = vld [vmem:[%s4491_s1 + $0xe] sm:$0x1]  ;;  %v2265_v60 = vld [vmem:[%s4492_s2 + $0x11] sm:$0x1] }
 0x108   : > { %1939 = vperm.xlu1 %2900, %v1897_v39   ;;  %v1541_v39 = vadd.f32 %v1540_v19, %v1539_v30  ;;  %v1912_v19 = vld [vmem:[%s4491_s1 + $0x10] sm:$0x1] }
 0x10c   : > { %1948 = vperm.xlu1 %2900, %v1898_v40  }
 0x10e   : > { %1930 = vperm.xlu0 %2899, %v1896_v10  }
 0x110   : > { %1957 = vperm.xlu1 %2900, %v1899_v26  }
 0x112   : > { %2011 = vperm.xlu0 %2899, %v1905_v13   ;;  %v2253_v13 = vld [vmem:[%s4492_s2 + $0x5] sm:$0x1] }
 0x114   : > { %1966 = vperm.xlu1 %2900, %v1900_v31  }
 0x116   : > { %2029 = vperm.xlu0 %2899, %v1907_v28   ;;  %v2255_v28 = vld [vmem:[%s4492_s2 + $0x7] sm:$0x1] }
 0x118   : > { %1975 = vperm.xlu1 %2900, %v1901_v56  }
 0x11a   : > { %2047 = vperm.xlu0 %2899, %v1909_v42  }
 0x11c   : > { %1984 = vperm.xlu1 %2900, %v1902_v20   ;;  %v2257_v20 = vld [vmem:[%s4492_s2 + $0x9] sm:$0x1] }
 0x11e   : > { %2065 = vperm.xlu0 %2899, %v1911_v32  }
 0x120   : > { %1993 = vperm.xlu1 %2900, %v1903_v50   ;;  %v1904_v50 = vld [vmem:[%s4491_s1 + $0x8] sm:$0x1] }
 0x122   : > { %2083 = vperm.xlu0 %2899, %v1913_v24  }
 0x126   : > { %2101 = vperm.xlu0 %2899, %v1915_v38   ;;  %v2259_v38 = vld [vmem:[%s4492_s2 + $0xb] sm:$0x1] }
 0x12a   : > { %2119 = vperm.xlu0 %2899, %v1917_v16   ;;  %v1906_v16 = vld [vmem:[%s4491_s1 + $0xa] sm:$0x1] }
 0x12e   : > { %2137 = vperm.xlu0 %2899, %v1919_v47  }
 0x132   : > { %2155 = vperm.xlu0 %2899, %v1921_v1   ;;  %v1908_v1 = vld [vmem:[%s4491_s1 + $0xc] sm:$0x1] }
 0x136   : > { %2173 = vperm.xlu0 %2899, %v1923_v52   ;;  %v2263_v52 = vld [vmem:[%s4492_s2 + $0xf] sm:$0x1] }
 0x13a   : > { %2191 = vperm.xlu0 %2899, %v1925_v25  }
 0x13e   : > { %2209 = vperm.xlu0 %2899, %v1927_v49  }
 0x141   : > { %v3816_v40 = vpop.xlane.xlu0 %1387 }
 0x142   : > { %2291 = vperm.xlu0 %2899, %v2249_v22   ;;  %v2267_v22 = vld [vmem:[%s4492_s2 + $0x13] sm:$0x1] }
 0x144   : > { %1542 = vadd.xlane.f32.xlu1 %v1541_v39 }
 0x145   : > { %v3821_v10 = vpop.xlane.xlu1 %1392  ;;  %v1398_v26 = vpop.xlane.xlu0 %1397 }
 0x146   : > { %2309 = vperm.xlu0 %2899, %v2251_v3   ;;  %v1914_v3 = vld [vmem:[%s4491_s1 + $0x12] sm:$0x1] }
 0x149   : > { %v3826_v31 = vpop.xlane.xlu1 %1402 }
 0x14a   : > { %2327 = vperm.xlu0 %2899, %v2253_v13  }
 0x14b   : > { %v3831_v56 = vpop.xlane.xlu0 %1407 }
 0x14d   : > { %v3833_v42 = vpop.xlane.xlu1 %1412 }
 0x14e   : > { %2345 = vperm.xlu0 %2899, %v2255_v28   ;;  %v2269_v28 = vld [vmem:[%s4492_s2 + $0x15] sm:$0x1] }
 0x14f   : > { %v3838_v32 = vpop.xlane.xlu0 %1417 }
 0x152   : > { %2363 = vperm.xlu0 %2899, %v2257_v20   ;;  %v3843_v24 = vpop.xlane.xlu1 %1422 }
 0x153   : > { %v3848_v53 = vpop.xlane.xlu0 %1427 }
 0x155   : > { %2002 = vperm.xlu1 %2900, %v1904_v50   ;;  %v1916_v50 = vld [vmem:[%s4491_s1 + $0x14] sm:$0x1] }
 0x156   : > { %2381 = vperm.xlu0 %2899, %v2259_v38  }
 0x157   : > { %v3856_v47 = vpop.xlane.xlu1 %1432 }
 0x159   : > { %2020 = vperm.xlu1 %2900, %v1906_v16   ;;  %v3858_v44 = vpop.xlane.xlu0 %1437  ;;  %v2271_v16 = vld [vmem:[%s4492_s2 + $0x17] sm:$0x1] }
 0x15a   : > { %2399 = vperm.xlu0 %2899, %v2261_v21  }
 0x15b   : > { %v3866_v15 = vpop.xlane.xlu1 %1442 }
 0x15d   : > { %2038 = vperm.xlu1 %2900, %v1908_v1   ;;  %v3868_v25 = vpop.xlane.xlu0 %1447  ;;  %v1918_v1 = vld [vmem:[%s4491_s1 + $0x16] sm:$0x1] }
 0x15e   : > { %2417 = vperm.xlu0 %2899, %v2263_v52   ;;  %v2273_v52 = vld [vmem:[%s4492_s2 + $0x19] sm:$0x1] }
 0x161   : > { %2056 = vperm.xlu1 %2900, %v1910_v11   ;;  %v3876_v49 = vpop.xlane.xlu1 %1452 }
 0x162   : > { %2435 = vperm.xlu0 %2899, %v2265_v60   ;;  %v3878_v30 = vpop.xlane.xlu0 %1457 }
 0x165   : > { %2074 = vperm.xlu1 %2900, %v1912_v19   ;;  %v3886_v39 = vpop.xlane.xlu1 %1462  ;;  %v1920_v19 = vld [vmem:[%s4491_s1 + $0x18] sm:$0x1] }
 0x166   : > { %2453 = vperm.xlu0 %2899, %v2267_v22   ;;  %v3891_v13 = vpop.xlane.xlu0 %1467  ;;  %v2275_v22 = vld [vmem:[%s4492_s2 + $0x1b] sm:$0x1] }
 0x169   : > { %2092 = vperm.xlu1 %2900, %v1914_v3   ;;  %v1546_v3 = vmul.f32 0.00390625, %v1398_v26  ;;  %v2279_v26 = vld [vmem:[%s4492_s2 + $0x1f] sm:$0x1] }
 0x16a   : > { %2471 = vperm.xlu0 %2899, %v2269_v28   ;;  %v3896_v20 = vpop.xlane.xlu1 %1472  ;;  %v3901_v38 = vpop.xlane.xlu0 %1477  ;;  %v1544_v28 = vmul.f32 0.00390625, %v3816_v40  ;;  %v1924_v40 = vld [vmem:[%s4491_s1 + $0x1c] sm:$0x1] }
 0x16b   : > { %4519 = vst [vmem:[#allocation14_spill] sm:$0xff] %v3901_v38 }
 0x16c   : > { %v1608_v62 = vadd.f32 1e-05, %v1544_v28  ;;  %v1926_v28 = vld [vmem:[%s4491_s1 + $0x1e] sm:$0x1] }
 0x16d   : > { %2110 = vperm.xlu1 %2900, %v1916_v50  }
 0x16e   : > { %2489 = vperm.xlu0 %2899, %v2271_v16   ;;  %v3906_v21 = vpop.xlane.xlu1 %1482  ;;  %v1922_v16 = vld [vmem:[%s4491_s1 + $0x1a] sm:$0x1] }
 0x171   : > { %v3914_v11 = vpop.xlane.xlu0 %1487  ;;  %2128 = vperm.xlu1 %2900, %v1918_v1   ;;  %v2277_v1 = vld [vmem:[%s4492_s2 + $0x1d] sm:$0x1] }
 0x172   : > { %4520 = vst [vmem:[#allocation15_spill] sm:$0xff] %v3914_v11  ;;  %2507 = vperm.xlu0 %2899, %v2273_v52   ;;  %v3916_v60 = vpop.xlane.xlu1 %1492  ;;  %v1610_v52 = vadd.f32 1e-05, %v1546_v3 }
 0x174   : > { %2901 = vrsqrt.f32 %v1610_v52  ;;  %v2248_v52 = vld [vmem:[%s4492_s2] sm:$0x1] }
 0x175   : > { %v3925_v50 = vpop.xlane.xlu0 %1497  ;;  %2146 = vperm.xlu1 %2900, %v1920_v19   ;;  %v1548_v19 = vmul.f32 0.00390625, %v3831_v56  ;;  %2903 = vrsqrt.f32 %v1608_v62  ;;  %v1550_v62 = vmul.f32 0.00390625, %v3838_v32  ;;  %v2252_v32 = vld [vmem:[%s4492_s2 + $0x4] sm:$0x1] }
 0x176   : > { %4521 = vst [vmem:[#allocation16_spill] sm:$0xff] %v3925_v50  ;;  %2525 = vperm.xlu0 %2899, %v2275_v22  }
 0x177   : > { %v1614_v35 = vadd.f32 1e-05, %v1550_v62 }
 0x178   : > { %v3933_v0 = vpop.xlane.xlu1 %1502 }
 0x179   : > { %v3935_v63 = vpop.xlane.xlu0 %1507  ;;  %2164 = vperm.xlu1 %2900, %v1922_v16   ;;  %v1612_v16 = vadd.f32 1e-05, %v1548_v19 }
 0x17a   : > { %4522 = vst [vmem:[#allocation17_spill] sm:$0xff] %v3935_v63  ;;  %2543 = vperm.xlu0 %2899, %v2277_v1   ;;  %v2270_v63 = vld [vmem:[%s4492_s2 + $0x16] sm:$0x1] }
 0x17b   : > { %2905 = vrsqrt.f32 %v1612_v16 }
 0x17c   : > { %v3944_v22 = vpop.xlane.xlu1 %1512  ;;  %2907 = vrsqrt.f32 %v1614_v35 }
 0x17d   : > { %v3946_v3 = vpop.xlane.xlu0 %1517  ;;  %2182 = vperm.xlu1 %2900, %v1924_v40  }
 0x17e   : > { %4523 = vst [vmem:[#allocation18_spill] sm:$0xff] %v3946_v3  ;;  %2561 = vperm.xlu0 %2899, %v2279_v26   ;;  %v2902_v40 = vpop.eup %2901  ;;  %v2250_v26 = vld [vmem:[%s4492_s2 + $0x2] sm:$0x1] }
 0x17f   : > { %v2904_v19 = vpop.eup %2903  ;;  %v1715_v8 = vrot.slane %v2902_v40, %v3134_v2  ;;  %v2254_v40 = vld [vmem:[%s4492_s2 + $0x6] sm:$0x1] }
 0x180   : > { %v3951_v1 = vpop.xlane.xlu1 %1522  ;;  %v1707_v16 = vrot.slane %v2904_v19, %v3134_v2 }
 0x181   : > { %2200 = vperm.xlu1 %2900, %v1926_v28   ;;  %v3956_v56 = vpop.xlane.xlu0 %1527  ;;  %v1866_v55 = vmul.f32 %v1715_v8, %v3439_v46 }
 0x182   : > { %4524 = vst [vmem:[#allocation19_spill] sm:$0xff] %v3956_v56 }
 0x184   : > { %v3959_v61 = vpop.xlane.xlu1 %1532 }
 0x185   : > { %2282 = vperm.xlu1 %2900, %v2248_v52   ;;  %v3966_v48 = vpop.xlane.xlu0 %1537  ;;  %v2906_v56 = vpop.eup %2905 }
 0x186   : > { %4525 = vst [vmem:[#allocation20_spill] sm:$0xff] %v3966_v48  ;;  %v1864_v48 = vmul.f32 %v1707_v16, %v3436_v45  ;;  %v1723_v8 = vrot.slane %v2906_v56, %v3134_v2  ;;  %v2256_v45 = vld [vmem:[%s4492_s2 + $0x8] sm:$0x1] }
 0x188   : > { %v3964_v28 = vpop.permute.xlu1 %1939 }
 0x189   : > { %2300 = vperm.xlu1 %2900, %v2250_v26  }
 0x18c   : > { %v1949_v52 = vpop.permute.xlu1 %1948 }
 0x18d   : > { %v1954_v43 = vrot.slane %v1949_v52, %v3134_v2  ;;  %v1931_v62 = vpop.permute.xlu0 %1930  ;;  %2318 = vperm.xlu1 %2900, %v2252_v32   ;;  %v1868_v32 = vmul.f32 %v1723_v8, %v3468_v34  ;;  %v2260_v34 = vld [vmem:[%s4492_s2 + $0xc] sm:$0x1] }
 0x18e   : > { %v1936_v26 = vrot.slane %v1931_v62, %v3134_v2 }
 0x18f   : > { %v3980_v19 = vmul.f32 %v1954_v43, %v1866_v55  ;;  %v2908_v55 = vpop.eup %2907 }
 0x190   : > { %v3982_v23 = vmul.f32 %v1936_v26, %v1864_v48  ;;  %v3984_v35 = vpop.permute.xlu1 %1957  ;;  %v2258_v48 = vld [vmem:[%s4492_s2 + $0xa] sm:$0x1] }
 0x191   : > { %v3986_v46 = vpop.permute.xlu0 %2011  ;;  %2336 = vperm.xlu1 %2900, %v2254_v40   ;;  %v1731_v40 = vrot.slane %v2908_v55, %v3134_v2  ;;  %v2264_v55 = vld [vmem:[%s4492_s2 + $0x10] sm:$0x1] }
 0x194   : > { %v1967_v16 = vpop.permute.xlu1 %1966 }
 0x195   : > { %v1972_v52 = vrot.slane %v1967_v16, %v3134_v2  ;;  %v3994_v43 = vpop.permute.xlu0 %2029  ;;  %2354 = vperm.xlu1 %2900, %v2256_v45   ;;  %v1870_v45 = vmul.f32 %v1731_v40, %v3486_v9  ;;  %v2266_v9 = vld [vmem:[%s4492_s2 + $0x12] sm:$0x1]  ;;  %v1545_v40 = vmul.f32 0.00390625, %v3821_v10 }
 0x197   : > { %v3999_v62 = vmul.f32 %v1972_v52, %v1868_v32  ;;  %v2262_v32 = vld [vmem:[%s4492_s2 + $0xe] sm:$0x1] }
 0x198   : > { %v4001_v56 = vpop.permute.xlu1 %1975 }
 0x199   : > { %4526 = vst [vmem:[#allocation21_spill] sm:$0xff] %v3999_v62  ;;  %v4003_v26 = vpop.permute.xlu0 %2047  ;;  %2372 = vperm.xlu1 %2900, %v2258_v48  }
 0x19c   : > { %v1985_v8 = vpop.permute.xlu1 %1984 }
 0x19d   : > { %v1990_v16 = vrot.slane %v1985_v8, %v3134_v2  ;;  %v4011_v3 = vpop.permute.xlu0 %2065  ;;  %2390 = vperm.xlu1 %2900, %v2260_v34   ;;  %v2268_v8 = vld [vmem:[%s4492_s2 + $0x14] sm:$0x1] }
 0x19f   : > { %v4016_v52 = vmul.f32 %v1990_v16, %v1870_v45  ;;  %v1609_v45 = vadd.f32 1e-05, %v1545_v40  ;;  %v1547_v16 = vmul.f32 0.00390625, %v3826_v31  ;;  %v2272_v40 = vld [vmem:[%s4492_s2 + $0x18] sm:$0x1]  ;;  %v1551_v31 = vmul.f32 0.00390625, %v3843_v24 }
 0x1a0   : > { %v2276_v24 = vld [vmem:[%s4492_s2 + $0x1c] sm:$0x1] }
 0x1a1   : > { %4527 = vst [vmem:[#allocation22_spill] sm:$0xff] %v4016_v52  ;;  %v4018_v48 = vpop.permute.xlu0 %2083  ;;  %2408 = vperm.xlu1 %2900, %v2262_v32   ;;  %2909 = vrsqrt.f32 %v1609_v45  ;;  %v1611_v10 = vadd.f32 1e-05, %v1547_v16  ;;  %v2274_v45 = vld [vmem:[%s4492_s2 + $0x1a] sm:$0x1] }
 0x1a2   : > { %v1615_v16 = vadd.f32 1e-05, %v1551_v31  ;;  %v1557_v31 = vmul.f32 0.00390625, %v3876_v49  ;;  %v1963_v49 = vrot.slane %v3984_v35, %v3134_v2 }
 0x1a3   : > { %2911 = vrsqrt.f32 %v1611_v10  ;;  %v1555_v10 = vmul.f32 0.00390625, %v3866_v15 }
 0x1a4   : > { %v1621_v62 = vadd.f32 1e-05, %v1557_v31 }
 0x1a5   : > { %v4023_v57 = vpop.permute.xlu0 %2101  ;;  %2426 = vperm.xlu1 %2900, %v2264_v55   ;;  %v1549_v55 = vmul.f32 0.00390625, %v3833_v42  ;;  %v1553_v42 = vmul.f32 0.00390625, %v3856_v47  ;;  %v1619_v50 = vadd.f32 1e-05, %v1555_v10 }
 0x1a7   : > { %v1617_v52 = vadd.f32 1e-05, %v1553_v42  ;;  %v2278_v42 = vld [vmem:[%s4492_s2 + $0x1e] sm:$0x1] }
 0x1a9   : > { %v4029_v34 = vpop.permute.xlu0 %2119  ;;  %2444 = vperm.xlu1 %2900, %v2266_v9   ;;  %v1613_v9 = vadd.f32 1e-05, %v1549_v55 }
 0x1ab   : > { %2913 = vrsqrt.f32 %v1613_v9 }
 0x1ac   : > { %2915 = vrsqrt.f32 %v1615_v16 }
 0x1ad   : > { %v4035_v32 = vpop.permute.xlu0 %2137  ;;  %2462 = vperm.xlu1 %2900, %v2268_v8   ;;  %2917 = vrsqrt.f32 %v1617_v52 }
 0x1ae   : > { %2919 = vrsqrt.f32 %v1619_v50 }
 0x1af   : > { %2921 = vrsqrt.f32 %v1621_v62 }
 0x1b1   : > { %v4041_v17 = vpop.permute.xlu0 %2155  ;;  %2480 = vperm.xlu1 %2900, %v2270_v63   ;;  %v2910_v63 = vpop.eup %2909 }
 0x1b2   : > { %v1711_v9 = vrot.slane %v2910_v63, %v3134_v2  ;;  %v2912_v47 = vpop.eup %2911 }
 0x1b3   : > { %v1719_v63 = vrot.slane %v2912_v47, %v3134_v2  ;;  %v1981_v47 = vrot.slane %v4001_v56, %v3134_v2  ;;  %v1563_v56 = vmul.f32 0.00390625, %v3906_v21 }
 0x1b4   : > { %v1865_v15 = vmul.f32 %v1711_v9, %v3448_v4  ;;  %v1561_v9 = vmul.f32 0.00390625, %v3896_v20 }
 0x1b5   : > { %v4047_v8 = vpop.permute.xlu0 %2173  ;;  %2498 = vperm.xlu1 %2900, %v2272_v40   ;;  %v2914_v16 = vpop.eup %2913  ;;  %v1867_v10 = vmul.f32 %v1719_v63, %v3451_v5 }
 0x1b6   : > { %v1727_v11 = vrot.slane %v2914_v16, %v3134_v2  ;;  %v2916_v4 = vpop.eup %2915  ;;  %v1625_v20 = vadd.f32 1e-05, %v1561_v9 }
 0x1b7   : > { %v2219_v35 = vmul.f32 %v1963_v49, %v1867_v10  ;;  %v2918_v5 = vpop.eup %2917  ;;  %v1735_v16 = vrot.slane %v2916_v4, %v3134_v2 }
 0x1b8   : > { %v2920_v21 = vpop.eup %2919 }
 0x1b9   : > { %v4053_v55 = vpop.permute.xlu0 %2191  ;;  %2516 = vperm.xlu1 %2900, %v2274_v45   ;;  %v1945_v45 = vrot.slane %v3964_v28, %v3134_v2  ;;  %v1559_v28 = vmul.f32 0.00390625, %v3886_v39  ;;  %v1871_v10 = vmul.f32 %v1735_v16, %v3489_v18 }
 0x1bb   : > { %v1623_v39 = vadd.f32 1e-05, %v1559_v28 }
 0x1bd   : > { %v4060_v40 = vpop.permute.xlu0 %2209  ;;  %2534 = vperm.xlu1 %2900, %v2276_v24   ;;  %v2217_v24 = vmul.f32 %v1945_v45, %v1865_v15  ;;  %v1869_v45 = vmul.f32 %v1727_v11, %v3471_v36  ;;  %v1743_v36 = vrot.slane %v2918_v5, %v3134_v2  ;;  %v1565_v11 = vmul.f32 0.00390625, %v3916_v60 }
 0x1bf   : > { %v1873_v60 = vmul.f32 %v1743_v36, %v3504_v51  ;;  %v1629_v18 = vadd.f32 1e-05, %v1565_v11 }
 0x1c1   : > { %v2292_v41 = vpop.permute.xlu0 %2291  ;;  %2552 = vperm.xlu1 %2900, %v2278_v42   ;;  %v1994_v42 = vpop.permute.xlu1 %1993 }
 0x1c2   : > { %v2297_v52 = vrot.slane %v2292_v41, %v3134_v2  ;;  %v1999_v49 = vrot.slane %v1994_v42, %v3134_v2  ;;  %v1751_v42 = vrot.slane %v2920_v21, %v3134_v2 }
 0x1c4   : > { %v4076_v38 = vadd.f32 %v2297_v52, %v2217_v24  ;;  %v2221_v24 = vmul.f32 %v1981_v47, %v1869_v45  ;;  %v1627_v47 = vadd.f32 1e-05, %v1563_v56  ;;  %v2922_v45 = vpop.eup %2921 }
 0x1c5   : > { %v2310_v31 = vpop.permute.xlu0 %2309 }
 0x1c6   : > { %v2601_v41 = vsub.f32 0.0, %v4076_v38  ;;  %v2315_v50 = vrot.slane %v2310_v31, %v3134_v2  ;;  %v2017_v31 = vrot.slane %v3986_v46, %v3134_v2 }
 0x1c8   : > { %v2634_v15 = vmul.f32 1.442695, %v2601_v41  ;;  %v4085_v63 = vadd.f32 %v2315_v50, %v2219_v35  ;;  %v2223_v41 = vmul.f32 %v1999_v49, %v1871_v10  ;;  %v2225_v46 = vmul.f32 %v2017_v31, %v1873_v60 }
 0x1c9   : > { %v2328_v62 = vpop.permute.xlu0 %2327  ;;  %v1759_v49 = vrot.slane %v2922_v45, %v3134_v2 }
 0x1ca   : > { %2923 = vpow2.f32 %v2634_v15  ;;  %v2603_v52 = vsub.f32 0.0, %v4085_v63  ;;  %v2333_v28 = vrot.slane %v2328_v62, %v3134_v2  ;;  %v1567_v15 = vmul.f32 0.00390625, %v3933_v0 }
 0x1cb   : > { %2925 = vrsqrt.f32 %v1623_v39 }
 0x1cc   : > { %v2638_v4 = vmul.f32 1.442695, %v2603_v52  ;;  %v4094_v9 = vadd.f32 %v2333_v28, %v2221_v24  ;;  %2927 = vrsqrt.f32 %v1625_v20  ;;  %v2035_v24 = vrot.slane %v3994_v43, %v3134_v2 }
 0x1cd   : > { %v2346_v35 = vpop.permute.xlu0 %2345  ;;  %v1875_v28 = vmul.f32 %v1751_v42, %v3523_v6  ;;  %v1631_v10 = vadd.f32 1e-05, %v1567_v15  ;;  %v2053_v43 = vrot.slane %v4003_v26, %v3134_v2 }
 0x1ce   : > { %2929 = vpow2.f32 %v2638_v4  ;;  %v2605_v50 = vsub.f32 0.0, %v4094_v9  ;;  %v2351_v39 = vrot.slane %v2346_v35, %v3134_v2  ;;  %v1569_v4 = vmul.f32 0.00390625, %v3944_v22 }
 0x1cf   : > { %2931 = vrsqrt.f32 %v1627_v47  ;;  %v2227_v35 = vmul.f32 %v2035_v24, %v1875_v28  ;;  %v1571_v22 = vmul.f32 0.00390625, %v3951_v1  ;;  %v2071_v24 = vrot.slane %v4011_v3, %v3134_v2 }
 0x1d0   : > { %v2642_v5 = vmul.f32 1.442695, %v2605_v50  ;;  %v4102_v16 = vadd.f32 %v2351_v39, %v2223_v41  ;;  %v1877_v39 = vmul.f32 %v1759_v49, %v3541_v58  ;;  %v1633_v42 = vadd.f32 1e-05, %v1569_v4 }
 0x1d1   : > { %v2364_v20 = vpop.permute.xlu0 %2363  ;;  %v4105_v56 = vpop.xlane.xlu1 %1542  ;;  %v2089_v3 = vrot.slane %v4018_v48, %v3134_v2 }
 0x1d2   : > { %2933 = vpow2.f32 %v2642_v5  ;;  %v2607_v51 = vsub.f32 0.0, %v4102_v16  ;;  %v2369_v62 = vrot.slane %v2364_v20, %v3134_v2  ;;  %v2229_v5 = vmul.f32 %v2053_v43, %v1877_v39 }
 0x1d3   : > { %2935 = vrsqrt.f32 %v1629_v18 }
 0x1d4   : > { %v2924_v52 = vpop.eup %2923  ;;  %v2646_v36 = vmul.f32 1.442695, %v2607_v51  ;;  %v4113_v0 = vadd.f32 %v2369_v62, %v2225_v46 }
 0x1d5   : > { %v2926_v11 = vpop.eup %2925  ;;  %v2697_v21 = vadd.f32 1.0, %v2924_v52  ;;  %v2382_v47 = vpop.permute.xlu0 %2381  ;;  %v1635_v52 = vadd.f32 1e-05, %v1571_v22 }
 0x1d6   : > { %v4118_v31 = vpop.permute.xlu1 %2002  ;;  %2937 = vpow2.f32 %v2646_v36  ;;  %v2609_v41 = vsub.f32 0.0, %v4113_v0  ;;  %v2387_v6 = vrot.slane %v2382_v47, %v3134_v2  ;;  %v2928_v50 = vpop.eup %2927  ;;  %v1767_v45 = vrot.slane %v2926_v11, %v3134_v2 }
 0x1d7   : > { %2939 = vrcp.f32 %v2697_v21  ;;  %v1775_v62 = vrot.slane %v2928_v50, %v3134_v2 }
 0x1d8   : > { %v2930_v60 = vpop.eup %2929  ;;  %v2650_v26 = vmul.f32 1.442695, %v2609_v41  ;;  %v4125_v18 = vadd.f32 %v2387_v6, %v2227_v35  ;;  %2941 = vrsqrt.f32 %v1631_v10  ;;  %v1879_v28 = vmul.f32 %v1767_v45, %v3562_v33 }
 0x1d9   : > { %v2699_v15 = vadd.f32 1.0, %v2930_v60  ;;  %v2400_v46 = vpop.permute.xlu0 %2399  ;;  %v2932_v51 = vpop.eup %2931  ;;  %v1573_v10 = vmul.f32 0.00390625, %v3959_v61  ;;  %v1881_v6 = vmul.f32 %v1775_v62, %v3578_v7  ;;  %v4528_v61 = vlaneseq }
 0x1da   : > { %v4127_v20 = vpop.permute.xlu1 %2020  ;;  %2943 = vpow2.f32 %v2650_v26  ;;  %v2611_v58 = vsub.f32 0.0, %v4125_v18  ;;  %v2405_v1 = vrot.slane %v2400_v46, %v3134_v2  ;;  %v2231_v35 = vmul.f32 %v2071_v24, %v1879_v28 }
 0x1db   : > { %2945 = vrcp.f32 %v2699_v15  ;;  %v1783_v50 = vrot.slane %v2932_v51, %v3134_v2  ;;  %vm4147_vm1 = vcmp.lt.s32.totalorder %v4528_v61, 256  ;;  %v1575_v60 = vmul.f32 0.00390625, %v4105_v56 }
 0x1dc   : > { %v2934_v49 = vpop.eup %2933  ;;  %v2654_v36 = vmul.f32 1.442695, %v2611_v58  ;;  %v4135_v11 = vadd.f32 %v2405_v1, %v2229_v5  ;;  %2947 = vrsqrt.f32 %v1633_v42  ;;  %v1637_v7 = vadd.f32 1e-05, %v1573_v10 }
 0x1dd   : > { %v2701_v4 = vadd.f32 1.0, %v2934_v49  ;;  %v2418_v43 = vpop.permute.xlu0 %2417  ;;  %v2936_v47 = vpop.eup %2935  ;;  %v2233_v42 = vmul.f32 %v2089_v3, %v1881_v6  ;;  %v2107_v5 = vrot.slane %v4023_v57, %v3134_v2  ;;  %v1883_v62 = vmul.f32 %v1783_v50, %v3601_v54 }
 0x1de   : > { %v4140_v21 = vpop.permute.xlu1 %2038  ;;  %2949 = vpow2.f32 %v2654_v36  ;;  %v2613_v41 = vsub.f32 0.0, %v4135_v11  ;;  %v2423_v33 = vrot.slane %v2418_v43, %v3134_v2  ;;  %v1791_v49 = vrot.slane %v2936_v47, %v3134_v2 }
 0x1df   : > { %2951 = vrcp.f32 %v2701_v4  ;;  %v1639_v57 = vadd.f32 1e-05, %v1575_v60  ;;  %v2235_v10 = vmul.f32 %v2107_v5, %v1883_v62  ;;  %v2125_v3 = vrot.slane %v4029_v34, %v3134_v2 }
 0x1e0   : > { %v2938_v48 = vpop.eup %2937  ;;  %2953 = vrsqrt.f32 %v1635_v52  ;;  %v2658_v22 = vmul.f32 1.442695, %v2613_v41  ;;  %v4152_v45 = vadd.f32 %v2423_v33, %v2231_v35  ;;  %v1885_v6 = vmul.f32 %v1791_v49, %v3614_v14 }
 0x1e1   : > { %v2940_v26 = vpop.eup %2939  ;;  %v2703_v15 = vadd.f32 1.0, %v2938_v48  ;;  %v2436_v46 = vpop.permute.xlu0 %2435  ;;  %v2161_v49 = vrot.slane %v4041_v17, %v3134_v2 }
 0x1e2   : > { %v4163_v24 = vpop.permute.xlu1 %2056  ;;  %v2761_v56 = vmul.f32 %v2940_v26, %v4076_v38  ;;  %2955 = vpow2.f32 %v2658_v22  ;;  %v2615_v58 = vsub.f32 0.0, %v4152_v45  ;;  %v2441_v1 = vrot.slane %v2436_v46, %v3134_v2  ;;  %v2942_v51 = vpop.eup %2941 }
 0x1e3   : > { %2957 = vrcp.f32 %v2703_v15  ;;  %v1799_v50 = vrot.slane %v2942_v51, %v3134_v2  ;;  %v2237_v60 = vmul.f32 %v2125_v3, %v1885_v6  ;;  %v2143_v22 = vrot.slane %v4035_v32, %v3134_v2 }
 0x1e4   : > { %v2944_v52 = vpop.eup %2943  ;;  %2797 = vst.msk [vmem:[%s4159_s28 + $0x2] sm:$0x3] %vm4147_vm1, %v2761_v56  ;;  %v2662_v28 = vmul.f32 1.442695, %v2615_v58  ;;  %v4173_v36 = vadd.f32 %v2441_v1, %v2233_v42  ;;  %2959 = vrsqrt.f32 %v1637_v7 }
 0x1e5   : > { %v2946_v38 = vpop.eup %2945  ;;  %v2705_v4 = vadd.f32 1.0, %v2944_v52  ;;  %v2454_v54 = vpop.permute.xlu0 %2453  ;;  %v1887_v56 = vmul.f32 %v1799_v50, %v3637_v59 }
 0x1e6   : > { %v4177_v43 = vpop.permute.xlu1 %2074  ;;  %v2763_v47 = vmul.f32 %v2946_v38, %v4085_v63  ;;  %2961 = vpow2.f32 %v2662_v28  ;;  %v2617_v35 = vsub.f32 0.0, %v4173_v36  ;;  %v2459_v41 = vrot.slane %v2454_v54, %v3134_v2  ;;  %v2948_v33 = vpop.eup %2947 }
 0x1e7   : > { %2963 = vrcp.f32 %v2705_v4  ;;  %v1807_v58 = vrot.slane %v2948_v33, %v3134_v2  ;;  %v2179_v33 = vrot.slane %v4047_v8, %v3134_v2 }
 0x1e8   : > { %v2950_v61 = vpop.eup %2949  ;;  %2799 = vst.msk [vmem:[%s4159_s28 + $0x6] sm:$0x3] %vm4147_vm1, %v2763_v47  ;;  %2965 = vrsqrt.f32 %v1639_v57  ;;  %v2666_v34 = vmul.f32 1.442695, %v2617_v35  ;;  %v4187_v48 = vadd.f32 %v2459_v41, %v2235_v10 }
 0x1e9   : > { %v2952_v63 = vpop.eup %2951  ;;  %v2707_v26 = vadd.f32 1.0, %v2950_v61  ;;  %v2472_v7 = vpop.permute.xlu0 %2471  ;;  %v1889_v4 = vmul.f32 %v1807_v58, %v3658_v37 }
 0x1ea   : > { %v4191_v14 = vpop.permute.xlu1 %2092  ;;  %v2954_v42 = vpop.eup %2953  ;;  %v2765_v5 = vmul.f32 %v2952_v63, %v4094_v9  ;;  %2967 = vpow2.f32 %v2666_v34  ;;  %v2619_v15 = vsub.f32 0.0, %v4187_v48  ;;  %v2477_v46 = vrot.slane %v2472_v7, %v3134_v2 }
 0x1eb   : > { %2969 = vrcp.f32 %v2707_v26  ;;  %v2239_v9 = vmul.f32 %v2143_v22, %v1887_v56  ;;  %v1815_v54 = vrot.slane %v2954_v42, %v3134_v2  ;;  %v2241_v41 = vmul.f32 %v2161_v49, %v1889_v4 }
 0x1ec   : > { %v2956_v1 = vpop.eup %2955  ;;  %2801 = vst.msk [vmem:[%s4159_s28 + $0xa] sm:$0x3] %vm4147_vm1, %v2765_v5  ;;  %v2670_v32 = vmul.f32 1.442695, %v2619_v15  ;;  %v4201_v51 = vadd.f32 %v2477_v46, %v2237_v60  ;;  %v2197_v15 = vrot.slane %v4053_v55, %v3134_v2 }
 0x1ed   : > { %v2958_v62 = vpop.eup %2957  ;;  %v2709_v52 = vadd.f32 1.0, %v2956_v1  ;;  %v2490_v57 = vpop.permute.xlu0 %2489  ;;  %v1891_v22 = vmul.f32 %v1815_v54, %v3675_v12 }
 0x1ee   : > { %v4205_v28 = vpop.permute.xlu1 %2110  ;;  %v2767_v59 = vmul.f32 %v2958_v62, %v4102_v16  ;;  %2971 = vpow2.f32 %v2670_v32  ;;  %v2621_v38 = vsub.f32 0.0, %v4201_v51  ;;  %v2495_v10 = vrot.slane %v2490_v57, %v3134_v2  ;;  %v2960_v3 = vpop.eup %2959 }
 0x1ef   : > { %2973 = vrcp.f32 %v2709_v52  ;;  %v1823_v26 = vrot.slane %v2960_v3, %v3134_v2 }
 0x1f0   : > { %v2962_v47 = vpop.eup %2961  ;;  %2803 = vst.msk [vmem:[%s4159_s28 + $0xe] sm:$0x3] %vm4147_vm1, %v2767_v59  ;;  %v2674_v17 = vmul.f32 1.442695, %v2621_v38  ;;  %v4215_v35 = vadd.f32 %v2495_v10, %v2239_v9  ;;  %v1552_v59 = vmul.f32 0.00390625, %v3848_v53 }
 0x1f1   : > { %v2964_v16 = vpop.eup %2963  ;;  %v2711_v6 = vadd.f32 1.0, %v2962_v47  ;;  %v2508_v50 = vpop.permute.xlu0 %2507  ;;  %v1893_v9 = vmul.f32 %v1823_v26, %v3700_v27 }
 0x1f2   : > { %v4219_v61 = vpop.permute.xlu1 %2128  ;;  %v2966_v37 = vpop.eup %2965  ;;  %v2769_v34 = vmul.f32 %v2964_v16, %v4113_v0  ;;  %2975 = vpow2.f32 %v2674_v17  ;;  %v2623_v63 = vsub.f32 0.0, %v4215_v35  ;;  %v2513_v60 = vrot.slane %v2508_v50, %v3134_v2 }
 0x1f3   : > { %2977 = vrcp.f32 %v2711_v6  ;;  %v2243_v0 = vmul.f32 %v2179_v33, %v1891_v22  ;;  %v1831_v12 = vrot.slane %v2966_v37, %v3134_v2  ;;  %v2215_v17 = vrot.slane %v4060_v40, %v3134_v2 }
 0x1f4   : > { %v2968_v7 = vpop.eup %2967  ;;  %2805 = vst.msk [vmem:[%s4159_s28 + $0x12] sm:$0x3] %vm4147_vm1, %v2769_v34  ;;  %v2678_v8 = vmul.f32 1.442695, %v2623_v63  ;;  %v4229_v42 = vadd.f32 %v2513_v60, %v2241_v41  ;;  %v1616_v33 = vadd.f32 1e-05, %v1552_v59 }
 0x1f5   : > { %v2970_v5 = vpop.eup %2969  ;;  %v2713_v46 = vadd.f32 1.0, %v2968_v7  ;;  %v2526_v56 = vpop.permute.xlu0 %2525  ;;  %v1895_v4 = vmul.f32 %v1831_v12, %v3796_v29 }
 0x1f6   : > { %v4233_v58 = vpop.permute.xlu1 %2146  ;;  %v2771_v1 = vmul.f32 %v2970_v5, %v4125_v18  ;;  %2979 = vpow2.f32 %v2678_v8  ;;  %v2625_v32 = vsub.f32 0.0, %v4229_v42  ;;  %v2531_v62 = vrot.slane %v2526_v56, %v3134_v2 }
 0x1f7   : > { %2981 = vrcp.f32 %v2713_v46  ;;  %v2245_v18 = vmul.f32 %v2197_v15, %v1893_v9  ;;  %v2247_v50 = vmul.f32 %v2215_v17, %v1895_v4 }
 0x1f8   : > { %v2972_v49 = vpop.eup %2971  ;;  %2807 = vst.msk [vmem:[%s4159_s28 + $0x16] sm:$0x3] %vm4147_vm1, %v2771_v1  ;;  %v2682_v55 = vmul.f32 1.442695, %v2625_v32  ;;  %v4243_v52 = vadd.f32 %v2531_v62, %v2243_v0  ;;  %v1558_v32 = vmul.f32 0.00390625, %v3878_v30  ;;  %v1560_v30 = vmul.f32 0.00390625, %v3891_v13 }
 0x1f9   : > { %v2974_v57 = vpop.eup %2973  ;;  %v2715_v38 = vadd.f32 1.0, %v2972_v49  ;;  %v2544_v10 = vpop.permute.xlu0 %2543 }
 0x1fa   : > { %v4246_v3 = vpop.permute.xlu1 %2164  ;;  %v2773_v27 = vmul.f32 %v2974_v57, %v4135_v11  ;;  %2983 = vpow2.f32 %v2682_v55  ;;  %v2627_v54 = vsub.f32 0.0, %v4243_v52  ;;  %v2549_v47 = vrot.slane %v2544_v10, %v3134_v2 }
 0x1fb   : > { %2985 = vrcp.f32 %v2715_v38  ;;  %v1554_v11 = vmul.f32 0.00390625, %v3858_v44 }
 0x1fc   : > { %v2976_v16 = vpop.eup %2975  ;;  %2809 = vst.msk [vmem:[%s4159_s28 + $0x1a] sm:$0x3] %vm4147_vm1, %v2773_v27  ;;  %v2686_v53 = vmul.f32 1.442695, %v2627_v54  ;;  %v4257_v41 = vadd.f32 %v2549_v47, %v2245_v18  ;;  %v1622_v18 = vadd.f32 1e-05, %v1558_v32 }
 0x1fd   : > { %v2978_v29 = vpop.eup %2977  ;;  %v2717_v6 = vadd.f32 1.0, %v2976_v16  ;;  %v2562_v37 = vpop.permute.xlu0 %2561  ;;  %v1618_v8 = vadd.f32 1e-05, %v1554_v11  ;;  %v1624_v16 = vadd.f32 1e-05, %v1560_v30  ;;  %v2026_v30 = vrot.slane %v4127_v20, %v3134_v2 }
 0x1fe   : > { %v4260_v34 = vpop.permute.xlu1 %2182  ;;  %v2775_v40 = vmul.f32 %v2978_v29, %v4152_v45  ;;  %2987 = vpow2.f32 %v2686_v53  ;;  %v2629_v63 = vsub.f32 0.0, %v4257_v41  ;;  %v2567_v60 = vrot.slane %v2562_v37, %v3134_v2  ;;  %v4531_v53 = vld [vmem:[#allocation14_spill] sm:$0xff] }
 0x1ff   : > { %2989 = vrcp.f32 %v2717_v6  ;;  %v1556_v45 = vmul.f32 0.00390625, %v3868_v25 }
 0x200   : > { %v2980_v22 = vpop.eup %2979  ;;  %2811 = vst.msk [vmem:[%s4159_s28 + $0x1e] sm:$0x3] %vm4147_vm1, %v2775_v40  ;;  %v2690_v26 = vmul.f32 1.442695, %v2629_v63  ;;  %v4268_v44 = vadd.f32 %v2567_v60, %v2247_v50  ;;  %2991 = vrsqrt.f32 %v1616_v33  ;;  %v4532_v63 = vld [vmem:[#allocation15_spill] sm:$0xff] }
 0x201   : > { %v2982_v7 = vpop.eup %2981  ;;  %v2719_v5 = vadd.f32 1.0, %v2980_v22  ;;  %v1620_v49 = vadd.f32 1e-05, %v1556_v45  ;;  %v1564_v60 = vmul.f32 0.00390625, %v4532_v63 }
 0x202   : > { %v4270_v0 = vpop.permute.xlu1 %2200  ;;  %v2777_v15 = vmul.f32 %v2982_v7, %v4173_v36  ;;  %2993 = vpow2.f32 %v2690_v26  ;;  %v2631_v46 = vsub.f32 0.0, %v4268_v44  ;;  %v4533_v26 = vld [vmem:[#allocation21_spill] sm:$0xff] }
 0x203   : > { %2995 = vrcp.f32 %v2719_v5  ;;  %v2008_v5 = vrot.slane %v4118_v31, %v3134_v2 }
 0x204   : > { %v2984_v56 = vpop.eup %2983  ;;  %2813 = vst.msk [vmem:[%s4159_s28 + $0x22] sm:$0x3] %vm4147_vm1, %v2777_v15  ;;  %v2694_v12 = vmul.f32 1.442695, %v2631_v46  ;;  %2997 = vrsqrt.f32 %v1618_v8 }
 0x205   : > { %v2986_v1 = vpop.eup %2985  ;;  %v2721_v62 = vadd.f32 1.0, %v2984_v56 }
 0x206   : > { %v2283_v9 = vpop.permute.xlu1 %2282  ;;  %v2779_v25 = vmul.f32 %v2986_v1, %v4187_v48  ;;  %2999 = vpow2.f32 %v2694_v12  ;;  %v4534_v1 = vld [vmem:[#allocation2_spill] sm:$0xff] }
 0x207   : > { %v2288_v36 = vrot.slane %v2283_v9, %v3134_v2  ;;  %3001 = vrcp.f32 %v2721_v62 }
 0x208   : > { %v2988_v55 = vpop.eup %2987  ;;  %2815 = vst.msk [vmem:[%s4159_s28 + $0x26] sm:$0x3] %vm4147_vm1, %v2779_v25  ;;  %3003 = vrsqrt.f32 %v1620_v49  ;;  %v1628_v49 = vadd.f32 1e-05, %v1564_v60  ;;  %v4535_v25 = vld [vmem:[#allocation16_spill] sm:$0xff] }
 0x209   : > { %v4285_v57 = vadd.f32 %v2288_v36, %v3982_v23  ;;  %v2990_v59 = vpop.eup %2989  ;;  %v2723_v38 = vadd.f32 1.0, %v2988_v55  ;;  %v1566_v36 = vmul.f32 0.00390625, %v4535_v25  ;;  %v4536_v55 = vld [vmem:[#allocation22_spill] sm:$0xff]  ;;  %v4539_v60 = vld [vmem:[#allocation4_spill] sm:$0xff]  ;;  %v4541_v25 = vld [vmem:[#allocation5_spill] sm:$0xff] }
 0x20a   : > { %v2301_v10 = vpop.permute.xlu1 %2300  ;;  %v2781_v48 = vmul.f32 %v2990_v59, %v4201_v51  ;;  %v2992_v54 = vpop.eup %2991  ;;  %v1562_v51 = vmul.f32 0.00390625, %v4531_v53 }
 0x20b   : > { %v2600_v4 = vsub.f32 0.0, %v4285_v57  ;;  %v2306_v27 = vrot.slane %v2301_v10, %v3134_v2  ;;  %3005 = vrcp.f32 %v2723_v38  ;;  %v1739_v40 = vrot.slane %v2992_v54, %v3134_v2  ;;  %v4537_v54 = vld [vmem:[#allocation3_spill] sm:$0xff] }
 0x20c   : > { %v2994_v47 = vpop.eup %2993  ;;  %2817 = vst.msk [vmem:[%s4159_s28 + $0x2a] sm:$0x3] %vm4147_vm1, %v2781_v48  ;;  %3007 = vrsqrt.f32 %v1622_v18  ;;  %v1626_v8 = vadd.f32 1e-05, %v1562_v51  ;;  %v4538_v51 = vld [vmem:[#allocation17_spill] sm:$0xff] }
 0x20d   : > { %v2632_v23 = vmul.f32 1.442695, %v2600_v4  ;;  %v4295_v17 = vadd.f32 %v2306_v27, %v3980_v19  ;;  %v2996_v13 = vpop.eup %2995  ;;  %v2725_v29 = vadd.f32 1.0, %v2994_v47  ;;  %v1872_v32 = vmul.f32 %v1739_v40, %v4534_v1 }
 0x20e   : > { %v2319_v33 = vpop.permute.xlu1 %2318  ;;  %v2783_v11 = vmul.f32 %v2996_v13, %v4215_v35  ;;  %v2998_v37 = vpop.eup %2997 }
 0x20f   : > { %3009 = vpow2.f32 %v2632_v23  ;;  %v2602_v6 = vsub.f32 0.0, %v4295_v17  ;;  %v2324_v50 = vrot.slane %v2319_v33, %v3134_v2  ;;  %v1747_v62 = vrot.slane %v2998_v37, %v3134_v2 }
 0x210   : > { %3011 = vrcp.f32 %v2725_v29  ;;  %v3000_v19 = vpop.eup %2999  ;;  %2819 = vst.msk [vmem:[%s4159_s28 + $0x2e] sm:$0x3] %vm4147_vm1, %v2783_v11  ;;  %v2224_v18 = vmul.f32 %v2008_v5, %v1872_v32  ;;  %v1568_v29 = vmul.f32 0.00390625, %v4538_v51  ;;  %v2044_v11 = vrot.slane %v4140_v21, %v3134_v2 }
 0x211   : > { %v2636_v22 = vmul.f32 1.442695, %v2602_v6  ;;  %v4307_v7 = vadd.f32 %v2324_v50, %v4533_v26  ;;  %v3002_v35 = vpop.eup %3001  ;;  %3013 = vrsqrt.f32 %v1624_v16  ;;  %v2727_v45 = vadd.f32 1.0, %v3000_v19 }
 0x212   : > { %v2337_v15 = vpop.permute.xlu1 %2336  ;;  %v2785_v46 = vmul.f32 %v3002_v35, %v4229_v42  ;;  %v3004_v9 = vpop.eup %3003  ;;  %v1874_v47 = vmul.f32 %v1747_v62, %v4537_v54  ;;  %v1630_v16 = vadd.f32 1e-05, %v1566_v36 }
 0x213   : > { %3015 = vpow2.f32 %v2636_v22  ;;  %v2604_v56 = vsub.f32 0.0, %v4307_v7  ;;  %v2342_v12 = vrot.slane %v2337_v15, %v3134_v2  ;;  %v1755_v23 = vrot.slane %v3004_v9, %v3134_v2 }
 0x214   : > { %3017 = vrcp.f32 %v2727_v45  ;;  %2821 = vst.msk [vmem:[%s4159_s28 + $0x32] sm:$0x3] %vm4147_vm1, %v2785_v46  ;;  %v2226_v33 = vmul.f32 %v2026_v30, %v1874_v47  ;;  %v1632_v15 = vadd.f32 1e-05, %v1568_v29 }
 0x215   : > { %v2640_v31 = vmul.f32 1.442695, %v2604_v56  ;;  %v4321_v42 = vadd.f32 %v2342_v12, %v4536_v55  ;;  %v3006_v59 = vpop.eup %3005  ;;  %3019 = vrsqrt.f32 %v1626_v8  ;;  %v1876_v22 = vmul.f32 %v1755_v23, %v4539_v60  ;;  %v4540_v8 = vld [vmem:[#allocation18_spill] sm:$0xff] }
 0x216   : > { %v2355_v38 = vpop.permute.xlu1 %2354  ;;  %v2787_v10 = vmul.f32 %v3006_v59, %v4243_v52  ;;  %v3008_v27 = vpop.eup %3007  ;;  %v1570_v5 = vmul.f32 0.00390625, %v4540_v8  ;;  %v2062_v56 = vrot.slane %v4163_v24, %v3134_v2  ;;  %v4543_v23 = vld [vmem:[#allocation6_spill] sm:$0xff] }
 0x217   : > { %3021 = vpow2.f32 %v2640_v31  ;;  %v2606_v48 = vsub.f32 0.0, %v4321_v42  ;;  %v2360_v4 = vrot.slane %v2355_v38, %v3134_v2  ;;  %v1763_v26 = vrot.slane %v3008_v27, %v3134_v2 }
 0x218   : > { %3023 = vrsqrt.f32 %v1628_v49  ;;  %2823 = vst.msk [vmem:[%s4159_s28 + $0x36] sm:$0x3] %vm4147_vm1, %v2787_v10  ;;  %v2228_v46 = vmul.f32 %v2044_v11, %v1876_v22  ;;  %v1634_v59 = vadd.f32 1e-05, %v1570_v5  ;;  %v2080_v38 = vrot.slane %v4177_v43, %v3134_v2 }
 0x219   : > { %v3010_v13 = vpop.eup %3009  ;;  %v2644_v20 = vmul.f32 1.442695, %v2606_v48  ;;  %v4333_v53 = vadd.f32 %v2360_v4, %v2224_v18  ;;  %v1878_v36 = vmul.f32 %v1763_v26, %v4541_v25  ;;  %v4542_v18 = vld [vmem:[#allocation19_spill] sm:$0xff] }
 0x21a   : > { %v3012_v52 = vpop.eup %3011  ;;  %v2696_v6 = vadd.f32 1.0, %v3010_v13  ;;  %v2373_v50 = vpop.permute.xlu1 %2372  ;;  %v1572_v30 = vmul.f32 0.00390625, %v4542_v18  ;;  %v4545_v26 = vld [vmem:[#allocation7_spill] sm:$0xff]  ;;  %v2134_v18 = vrot.slane %v4219_v61, %v3134_v2 }
 0x21b   : > { %v2789_v37 = vmul.f32 %v3012_v52, %v4257_v41  ;;  %3025 = vpow2.f32 %v2644_v20  ;;  %v2608_v40 = vsub.f32 0.0, %v4333_v53  ;;  %v2378_v19 = vrot.slane %v2373_v50, %v3134_v2  ;;  %v3014_v63 = vpop.eup %3013 }
 0x21c   : > { %3027 = vrcp.f32 %v2696_v6  ;;  %v1771_v31 = vrot.slane %v3014_v63, %v3134_v2  ;;  %v2230_v27 = vmul.f32 %v2062_v56, %v1878_v36  ;;  %v1636_v52 = vadd.f32 1e-05, %v1572_v30 }
 0x21d   : > { %v3016_v35 = vpop.eup %3015  ;;  %3029 = vrsqrt.f32 %v1630_v16  ;;  %2825 = vst.msk [vmem:[%s4159_s28 + $0x3a] sm:$0x3] %vm4147_vm1, %v2789_v37  ;;  %v2648_v21 = vmul.f32 1.442695, %v2608_v40  ;;  %v4347_v41 = vadd.f32 %v2378_v19, %v2226_v33  ;;  %v4544_v33 = vld [vmem:[#allocation20_spill] sm:$0xff]  ;;  %v2098_v50 = vrot.slane %v4191_v14, %v3134_v2 }
 0x21e   : > { %v3018_v45 = vpop.eup %3017  ;;  %v2698_v12 = vadd.f32 1.0, %v3016_v35  ;;  %v2391_v1 = vpop.permute.xlu1 %2390  ;;  %v1880_v13 = vmul.f32 %v1771_v31, %v4543_v23  ;;  %v1574_v11 = vmul.f32 0.00390625, %v4544_v33 }
 0x21f   : > { %v2791_v32 = vmul.f32 %v3018_v45, %v4268_v44  ;;  %3031 = vpow2.f32 %v2648_v21  ;;  %v2610_v62 = vsub.f32 0.0, %v4347_v41  ;;  %v2396_v9 = vrot.slane %v2391_v1, %v3134_v2  ;;  %v3020_v49 = vpop.eup %3019 }
 0x220   : > { %3033 = vrcp.f32 %v2698_v12  ;;  %v1779_v16 = vrot.slane %v3020_v49, %v3134_v2  ;;  %v2232_v6 = vmul.f32 %v2080_v38, %v1880_v13  ;;  %v1638_v45 = vadd.f32 1e-05, %v1574_v11  ;;  %v4546_v49 = vld [vmem:[#allocation8_spill] sm:$0xff] }
 0x221   : > { %v3022_v55 = vpop.eup %3021  ;;  %2827 = vst.msk [vmem:[%s4159_s28 + $0x3e] sm:$0x3] %vm4147_vm1, %v2791_v32  ;;  %v2652_v24 = vmul.f32 1.442695, %v2610_v62  ;;  %v4360_v44 = vadd.f32 %v2396_v9, %v2228_v46  ;;  %3035 = vrsqrt.f32 %v1632_v15  ;;  %v2116_v46 = vrot.slane %v4205_v28, %v3134_v2 }
 0x222   : > { %v2700_v10 = vadd.f32 1.0, %v3022_v55  ;;  %v2409_v48 = vpop.permute.xlu1 %2408  ;;  %v3024_v4 = vpop.eup %3023  ;;  %v1882_v35 = vmul.f32 %v1779_v16, %v4545_v26 }
 0x223   : > { %3037 = vpow2.f32 %v2652_v24  ;;  %v2612_v54 = vsub.f32 0.0, %v4360_v44  ;;  %v2414_v47 = vrot.slane %v2409_v48, %v3134_v2  ;;  %v1787_v8 = vrot.slane %v3024_v4, %v3134_v2 }
 0x224   : > { %3039 = vrcp.f32 %v2700_v10  ;;  %v2234_v15 = vmul.f32 %v2098_v50, %v1882_v35  ;;  %v4548_v50 = vld [vmem:[#allocation10_spill] sm:$0xff] }
 0x225   : > { %v3026_v20 = vpop.eup %3025  ;;  %3041 = vrsqrt.f32 %v1634_v59  ;;  %v2656_v51 = vmul.f32 1.442695, %v2612_v54  ;;  %v4368_v29 = vadd.f32 %v2414_v47, %v2230_v27  ;;  %v1884_v25 = vmul.f32 %v1787_v8, %v4546_v49  ;;  %v4547_v27 = vld [vmem:[#allocation9_spill] sm:$0xff] }
 0x226   : > { %v3028_v43 = vpop.eup %3027  ;;  %v2702_v37 = vadd.f32 1.0, %v3026_v20  ;;  %v2427_v40 = vpop.permute.xlu1 %2426  ;;  %v2152_v20 = vrot.slane %v4233_v58, %v3134_v2 }
 0x227   : > { %v3030_v19 = vpop.eup %3029  ;;  %v2760_v63 = vmul.f32 %v3028_v43, %v4285_v57  ;;  %3043 = vpow2.f32 %v2656_v51  ;;  %v2614_v60 = vsub.f32 0.0, %v4368_v29  ;;  %v2432_v22 = vrot.slane %v2427_v40, %v3134_v2 }
 0x228   : > { %3045 = vrcp.f32 %v2702_v37  ;;  %v1795_v36 = vrot.slane %v3030_v19, %v3134_v2  ;;  %v2236_v59 = vmul.f32 %v2116_v46, %v1884_v25 }
 0x229   : > { %v3032_v5 = vpop.eup %3031  ;;  %3047 = vrsqrt.f32 %v1636_v52  ;;  %2796 = vst.msk [vmem:[%s4159_s28] sm:$0x3] %vm4147_vm1, %v2760_v63  ;;  %v2660_v14 = vmul.f32 1.442695, %v2614_v60  ;;  %v4381_v21 = vadd.f32 %v2432_v22, %v2232_v6  ;;  %v2170_v22 = vrot.slane %v4246_v3, %v3134_v2 }
 0x22a   : > { %v3034_v57 = vpop.eup %3033  ;;  %v2704_v56 = vadd.f32 1.0, %v3032_v5  ;;  %v2445_v12 = vpop.permute.xlu1 %2444  ;;  %v1886_v54 = vmul.f32 %v1795_v36, %v4547_v27 }
 0x22b   : > { %v2762_v1 = vmul.f32 %v3034_v57, %v4295_v17  ;;  %3049 = vpow2.f32 %v2660_v14  ;;  %v2616_v32 = vsub.f32 0.0, %v4381_v21  ;;  %v2450_v62 = vrot.slane %v2445_v12, %v3134_v2  ;;  %v3036_v9 = vpop.eup %3035 }
 0x22c   : > { %3051 = vrcp.f32 %v2704_v56  ;;  %v1803_v47 = vrot.slane %v3036_v9, %v3134_v2 }
 0x22d   : > { %v3038_v31 = vpop.eup %3037  ;;  %2798 = vst.msk [vmem:[%s4159_s28 + $0x4] sm:$0x3] %vm4147_vm1, %v2762_v1  ;;  %v2664_v28 = vmul.f32 1.442695, %v2616_v32  ;;  %v4393_v55 = vadd.f32 %v2450_v62, %v2234_v15  ;;  %3053 = vrsqrt.f32 %v1638_v45  ;;  %v4549_v45 = vld [vmem:[#allocation11_spill] sm:$0xff]  ;;  %v2188_v32 = vrot.slane %v4260_v34, %v3134_v2 }
 0x22e   : > { %v3040_v17 = vpop.eup %3039  ;;  %v2706_v30 = vadd.f32 1.0, %v3038_v31  ;;  %v2463_v24 = vpop.permute.xlu1 %2462  ;;  %v1888_v37 = vmul.f32 %v1803_v47, %v4548_v50  ;;  %v4550_v31 = vld [vmem:[#allocation12_spill] sm:$0xff] }
 0x22f   : > { %v3042_v38 = vpop.eup %3041  ;;  %v2764_v10 = vmul.f32 %v3040_v17, %v4307_v7  ;;  %3055 = vpow2.f32 %v2664_v28  ;;  %v2618_v48 = vsub.f32 0.0, %v4393_v55  ;;  %v2468_v4 = vrot.slane %v2463_v24, %v3134_v2 }
 0x230   : > { %3057 = vrcp.f32 %v2706_v30  ;;  %v2238_v7 = vmul.f32 %v2134_v18, %v1886_v54  ;;  %v1811_v40 = vrot.slane %v3042_v38, %v3134_v2  ;;  %v2206_v24 = vrot.slane %v4270_v0, %v3134_v2  ;;  %v4551_v54 = vld [vmem:[#allocation13_spill] sm:$0xff] }
 0x231   : > { %v3044_v23 = vpop.eup %3043  ;;  %2800 = vst.msk [vmem:[%s4159_s28 + $0x8] sm:$0x3] %vm4147_vm1, %v2764_v10  ;;  %v2668_v61 = vmul.f32 1.442695, %v2618_v48  ;;  %v4405_v13 = vadd.f32 %v2468_v4, %v2236_v59 }
 0x232   : > { %v3046_v16 = vpop.eup %3045  ;;  %v2708_v52 = vadd.f32 1.0, %v3044_v23  ;;  %v2481_v51 = vpop.permute.xlu1 %2480  ;;  %v1890_v15 = vmul.f32 %v1811_v40, %v4549_v45 }
 0x233   : > { %v3048_v43 = vpop.eup %3047  ;;  %v2766_v33 = vmul.f32 %v3046_v16, %v4321_v42  ;;  %3059 = vpow2.f32 %v2668_v61  ;;  %v2620_v11 = vsub.f32 0.0, %v4405_v13  ;;  %v2486_v6 = vrot.slane %v2481_v51, %v3134_v2 }
 0x234   : > { %3061 = vrcp.f32 %v2708_v52  ;;  %v2240_v42 = vmul.f32 %v2152_v20, %v1888_v37  ;;  %v1819_v46 = vrot.slane %v3048_v43, %v3134_v2  ;;  %v2242_v1 = vmul.f32 %v2170_v22, %v1890_v15 }
 0x235   : > { %v3050_v19 = vpop.eup %3049  ;;  %2802 = vst.msk [vmem:[%s4159_s28 + $0xc] sm:$0x3] %vm4147_vm1, %v2766_v33  ;;  %v2672_v58 = vmul.f32 1.442695, %v2620_v11  ;;  %v4417_v63 = vadd.f32 %v2486_v6, %v2238_v7 }
 0x236   : > { %v3052_v60 = vpop.eup %3051  ;;  %v2710_v26 = vadd.f32 1.0, %v3050_v19  ;;  %v2499_v35 = vpop.permute.xlu1 %2498  ;;  %v1892_v28 = vmul.f32 %v1819_v46, %v4550_v31 }
 0x237   : > { %v2768_v8 = vmul.f32 %v3052_v60, %v4333_v53  ;;  %3063 = vpow2.f32 %v2672_v58  ;;  %v2622_v5 = vsub.f32 0.0, %v4417_v63  ;;  %v2504_v14 = vrot.slane %v2499_v35, %v3134_v2  ;;  %v3054_v57 = vpop.eup %3053 }
 0x238   : > { %3065 = vrcp.f32 %v2710_v26  ;;  %v1827_v17 = vrot.slane %v3054_v57, %v3134_v2 }
 0x239   : > { %v3056_v56 = vpop.eup %3055  ;;  %2804 = vst.msk [vmem:[%s4159_s28 + $0x10] sm:$0x3] %vm4147_vm1, %v2768_v8  ;;  %v2676_v3 = vmul.f32 1.442695, %v2622_v5  ;;  %v4429_v12 = vadd.f32 %v2504_v14, %v2240_v42 }
 0x23a   : > { %v3058_v53 = vpop.eup %3057  ;;  %v2712_v62 = vadd.f32 1.0, %v3056_v56  ;;  %v2517_v9 = vpop.permute.xlu1 %2516  ;;  %v1894_v47 = vmul.f32 %v1827_v17, %v4551_v54 }
 0x23b   : > { %v2770_v49 = vmul.f32 %v3058_v53, %v4347_v41  ;;  %3067 = vpow2.f32 %v2676_v3  ;;  %v2624_v25 = vsub.f32 0.0, %v4429_v12  ;;  %v2522_v36 = vrot.slane %v2517_v9, %v3134_v2 }
 0x23c   : > { %3069 = vrcp.f32 %v2712_v62  ;;  %v2244_v41 = vmul.f32 %v2188_v32, %v1892_v28  ;;  %v2246_v7 = vmul.f32 %v2206_v24, %v1894_v47 }
 0x23d   : > { %v3060_v59 = vpop.eup %3059  ;;  %2806 = vst.msk [vmem:[%s4159_s28 + $0x14] sm:$0x3] %vm4147_vm1, %v2770_v49  ;;  %v2680_v34 = vmul.f32 1.442695, %v2624_v25  ;;  %v4441_v18 = vadd.f32 %v2522_v36, %v2242_v1 }
 0x23e   : > { %v3062_v30 = vpop.eup %3061  ;;  %v2714_v38 = vadd.f32 1.0, %v3060_v59  ;;  %v2535_v10 = vpop.permute.xlu1 %2534 }
 0x23f   : > { %v2772_v48 = vmul.f32 %v3062_v30, %v4360_v44  ;;  %3071 = vpow2.f32 %v2680_v34  ;;  %v2626_v4 = vsub.f32 0.0, %v4441_v18  ;;  %v2540_v27 = vrot.slane %v2535_v10, %v3134_v2 }
 0x240   : > { %3073 = vrcp.f32 %v2714_v38 }
 0x241   : > { %v3064_v23 = vpop.eup %3063  ;;  %2808 = vst.msk [vmem:[%s4159_s28 + $0x18] sm:$0x3] %vm4147_vm1, %v2772_v48  ;;  %v2684_v61 = vmul.f32 1.442695, %v2626_v4  ;;  %v2596_v16 = vadd.f32 %v2540_v27, %v2244_v41 }
 0x242   : > { %v3066_v0 = vpop.eup %3065  ;;  %v2716_v20 = vadd.f32 1.0, %v3064_v23  ;;  %v2553_v52 = vpop.permute.xlu1 %2552 }
 0x243   : > { %v2774_v44 = vmul.f32 %v3066_v0, %v4368_v29  ;;  %3075 = vpow2.f32 %v2684_v61  ;;  %v2628_v51 = vsub.f32 0.0, %v2596_v16  ;;  %v2558_v43 = vrot.slane %v2553_v52, %v3134_v2 }
 0x244   : > { %3077 = vrcp.f32 %v2716_v20 }
 0x245   : > { %v3068_v33 = vpop.eup %3067  ;;  %2810 = vst.msk [vmem:[%s4159_s28 + $0x1c] sm:$0x3] %vm4147_vm1, %v2774_v44  ;;  %v2688_v11 = vmul.f32 1.442695, %v2628_v51  ;;  %v2598_v6 = vadd.f32 %v2558_v43, %v2246_v7 }
 0x246   : > { %v3070_v50 = vpop.eup %3069  ;;  %v2718_v37 = vadd.f32 1.0, %v3068_v33 }
 0x247   : > { %v2776_v40 = vmul.f32 %v3070_v50, %v4381_v21  ;;  %3079 = vpow2.f32 %v2688_v11  ;;  %v2630_v19 = vsub.f32 0.0, %v2598_v6 }
 0x248   : > { %3081 = vrcp.f32 %v2718_v37 }
 0x249   : > { %v3072_v29 = vpop.eup %3071  ;;  %2812 = vst.msk [vmem:[%s4159_s28 + $0x20] sm:$0x3] %vm4147_vm1, %v2776_v40  ;;  %v2692_v2 = vmul.f32 1.442695, %v2630_v19 }
 0x24a   : > { %v3074_v58 = vpop.eup %3073  ;;  %v2720_v60 = vadd.f32 1.0, %v3072_v29 }
 0x24b   : > { %v2778_v42 = vmul.f32 %v3074_v58, %v4393_v55  ;;  %3083 = vpow2.f32 %v2692_v2 }
 0x24c   : > { %3085 = vrcp.f32 %v2720_v60 }
 0x24d   : > { %v3076_v22 = vpop.eup %3075  ;;  %2814 = vst.msk [vmem:[%s4159_s28 + $0x24] sm:$0x3] %vm4147_vm1, %v2778_v42 }
 0x24e   : > { %v3078_v21 = vpop.eup %3077  ;;  %v2722_v26 = vadd.f32 1.0, %v3076_v22 }
 0x24f   : > { %v2780_v35 = vmul.f32 %v3078_v21, %v4405_v13 }
 0x250   : > { %3087 = vrcp.f32 %v2722_v26 }
 0x251   : > { %v3080_v8 = vpop.eup %3079  ;;  %2816 = vst.msk [vmem:[%s4159_s28 + $0x28] sm:$0x3] %vm4147_vm1, %v2780_v35 }
 0x252   : > { %v3082_v5 = vpop.eup %3081  ;;  %v2724_v55 = vadd.f32 1.0, %v3080_v8 }
 0x253   : > { %v2782_v14 = vmul.f32 %v3082_v5, %v4417_v63 }
 0x254   : > { %3089 = vrcp.f32 %v2724_v55 }
 0x255   : > { %v3084_v57 = vpop.eup %3083  ;;  %2818 = vst.msk [vmem:[%s4159_s28 + $0x2c] sm:$0x3] %vm4147_vm1, %v2782_v14 }
 0x256   : > { %v3086_v45 = vpop.eup %3085  ;;  %v2726_v15 = vadd.f32 1.0, %v3084_v57 }
 0x257   : > { %v2784_v13 = vmul.f32 %v3086_v45, %v4429_v12 }
 0x258   : > { %3091 = vrcp.f32 %v2726_v15 }
 0x259   : > { %2820 = vst.msk [vmem:[%s4159_s28 + $0x30] sm:$0x3] %vm4147_vm1, %v2784_v13 }
 0x25a   : > { %v3088_v46 = vpop.eup %3087 }
 0x25b   : > { %v2786_v56 = vmul.f32 %v3088_v46, %v4441_v18 }
 0x25d   : > { %2822 = vst.msk [vmem:[%s4159_s28 + $0x34] sm:$0x3] %vm4147_vm1, %v2786_v56 }
 0x25e   : > { %v3090_v63 = vpop.eup %3089 }
 0x25f   : > { %v2788_v3 = vmul.f32 %v3090_v63, %v2596_v16 }
 0x261   : > { %2824 = vst.msk [vmem:[%s4159_s28 + $0x38] sm:$0x3] %vm4147_vm1, %v2788_v3 }
 0x262   : > { %v3092_v53 = vpop.eup %3091 }
 0x263   : > { %v2790_v1 = vmul.f32 %v3092_v53, %v2598_v6 }
 0x265   : > { %2826 = vst.msk [vmem:[%s4159_s28 + $0x3c] sm:$0x3] %vm4147_vm1, %v2790_v1 }
 0x266 PF: > { %s13_s12 = sadd.s32 1, %s3099_s12  }
 0x267   : > { %p10_p4 = scmp.ge.s32.totalorder %s13_s12, 4  }
 0x269   :  { %12 = sbr.rel (!%p10_p4) target bundleno = 1 (0x1), region = 62 }

// kernel: residual_block_forward.7
= control target key start
LH: loop header
LB: loop body
LE: loop exit
PB: predicated region body
PF: predicated region fallthrough
CT: control target
= control target key end

     0   :  { %vm125_vm0 = vcmask 517120   ;;  %s230_s1 = inlined_call_operand.vmem [shape: f32[64,256], index: 1, kind: input, shape index: {}]   ;;  %s231_s0 = inlined_call_operand.vmem [shape: f32[2,256], index: 0, kind: input, shape index: {}]   ;;  %s232_s2 = inlined_call_operand.vmem [shape: f32[1,64], index: 2, kind: input, shape index: {}]   ;;  %s233_s3 = inlined_call_operand.vmem [shape: f32[2,64], index: 3, kind: output, shape index: {}]  }
   0x1   :  { %v16_v0 = vld [vmem:[%s230_s1 + $0x8] sm:$0xff]  ;;  %v18_v1 = vld [vmem:[%s230_s1 + $0x18] sm:$0xff]  ;;  %v15_v2 = vld [vmem:[%s230_s1] sm:$0xff] }
   0x2   :  { %v133_v3 = vpack.c.bf16 %v18_v1, %v16_v0  ;;  %v17_v4 = vld [vmem:[%s230_s1 + $0x10] sm:$0xff]  ;;  %v20_v5 = vld [vmem:[%s230_s1 + $0x28] sm:$0xff]  ;;  %v22_v6 = vld [vmem:[%s230_s1 + $0x38] sm:$0xff] }
   0x3   :  { %v135_v7 = vpack.c.bf16 %v17_v4, %v15_v2  ;;  %v137_v8 = vpack.c.bf16 %v22_v6, %v20_v5  ;;  %v19_v9 = vld [vmem:[%s230_s1 + $0x20] sm:$0xff]  ;;  %v21_v10 = vld [vmem:[%s230_s1 + $0x30] sm:$0xff]  ;;  %v24_v12 = vld [vmem:[%s230_s1 + $0x48] sm:$0xff] }
   0x4   :  { %134 = vmatprep.subr.bf16.mxu0 %v133_v3  ;;  %v132_v11 = vld.sshfl [vmem:[%s231_s0] sm:$0x33 pattern:$0x76325410]  ;;  %v26_v13 = vld [vmem:[%s230_s1 + $0x58] sm:$0xff]  ;;  %v139_v15 = vpack.c.bf16 %v21_v10, %v19_v9  ;;  %v25_v18 = vld [vmem:[%s230_s1 + $0x50] sm:$0xff] }
   0x5   :  { %136 = vmatpush1.bf16.xpose.msra.mxu0 %v135_v7  ;;  %v46_v14 = vcombine.high %v132_v11, %v132_v11  ;;  %v141_v16 = vpack.c.bf16 %v26_v13, %v24_v12  ;;  %v23_v17 = vld [vmem:[%s230_s1 + $0x40] sm:$0xff]  ;;  %v28_v19 = vld [vmem:[%s230_s1 + $0x68] sm:$0xff]  ;;  %v30_v20 = vld [vmem:[%s230_s1 + $0x78] sm:$0xff] }
   0x6   :  { %138 = vmatprep.subr.bf16.mxu0 %v137_v8  ;;  %v143_v21 = vpack.c.bf16 %v25_v18, %v23_v17  ;;  %v145_v22 = vpack.c.bf16 %v30_v20, %v28_v19  ;;  %v27_v23 = vld [vmem:[%s230_s1 + $0x60] sm:$0xff]  ;;  %v29_v24 = vld [vmem:[%s230_s1 + $0x70] sm:$0xff] }
   0x7   :  { %113 = vmatprep.mubr.f32.mxu0 %v46_v14  ;;  %v147_v25 = vpack.c.bf16 %v29_v24, %v27_v23  ;;  %v131_v26 = vld [vmem:[%s232_s2] ss:$0 sm:$0xff] }
   0xd   :  { %140 = vmatpush1.bf16.xpose.msra.mxu0 %v139_v15 }
   0xe   :  { %142 = vmatprep.subr.bf16.mxu0 %v141_v16 }
  0x15   :  { %144 = vmatpush1.bf16.xpose.msra.mxu0 %v143_v21 }
  0x16   :  { %146 = vmatprep.subr.bf16.mxu0 %v145_v22 }
  0x1d   :  { %148 = vmatpush1.bf16.xpose.msra.mxu0 %v147_v25 }
  0x24   :  { %114 = vmatmul.mubr.f32.vlgmr.msra.gmra.mrb[0].mxu0 %v132_v11 }
  0xf7   :  { %v115_v27 = vpop.f32.mrb[0].mxu0 }
  0xf8   :  { %v116_v28 = vadd.f32 %v131_v26, %v115_v27  ;;  %v117_v29 = vpop.f32.mrb[1].mxu0 }
  0xfa   :  { %v119_v30 = vsub.f32 0.0, %v116_v28 }
  0xfc   :  { %v120_v31 = vmul.f32 1.442695, %v119_v30 }
  0xfe   :  { %149 = vpow2.f32 %v120_v31 }
 0x108   :  { %v150_v32 = vpop.eup %149 }
 0x109   :  { %v122_v33 = vadd.f32 1.0, %v150_v32 }
 0x10b   :  { %151 = vrcp.f32 %v122_v33 }
 0x115   :  { %v152_v34 = vpop.eup %151 }
 0x116   :  { %v124_v35 = vmul.f32 %v152_v34, %v116_v28 }
 0x118   :  { %126 = vst.msk [vmem:[%s233_s3] sm:$0x3] %vm125_vm0, %v124_v35 }

// kernel: residual_block_forward.8
= control target key start
LH: loop header
LB: loop body
LE: loop exit
PB: predicated region body
PF: predicated region fallthrough
CT: control target
= control target key end

     0   :  { %s952_s15 = smov 0   ;;  %s954_s16 = smov 0   ;;  %s1079_s0 = inlined_call_operand.vmem [shape: bf16[2,9,32,256], index: 0, kind: input, shape index: {}]   ;;  %s1080_s1 = inlined_call_operand.vmem [shape: bf16[9,64,32], index: 1, kind: input, shape index: {}]   ;;  %s1081_s2 = inlined_call_operand.vmem [shape: f32[64,1], index: 2, kind: input, shape index: {}]   ;;  %s1082_s3 = inlined_call_operand.vmem [shape: f32[2,64,1], index: 3, kind: input, shape index: {}]   ;;  %s1083_s4 = inlined_call_operand.vmem [shape: f32[2,64,256], index: 4, kind: output, shape index: {}]  }
   0x1   :  { %s956_s17 = smov 0   ;;  %s958_s18 = smov 0  }
   0x2   :  { %s960_s19 = smov 0  }
   0x3 LB: > { %s26_s20 = sadd.s32 1, %s914_s17  ;;  %s33_s21 = sadd.s32 1, %s918_s18  ;;  %s922_s19 = sphi %s960_s19, %s14_s19   ;;  %s918_s18 = sphi %s958_s18, %s1087_s18   ;;  %s914_s17 = sphi %s956_s17, %s1086_s17   ;;  %s910_s16 = sphi %s954_s16, %s1085_s16   ;;  %s906_s15 = sphi %s952_s15, %s1084_s15  }
   0x4   : > { %p27_p0 = scmp.ge.s32.totalorder %s26_s20, 9  ;;  %p796_p1 = scmp.ge.s32.totalorder %s922_s19, 1 }
   0x5   : > { %p216_p2 = scmp.lt.s32.totalorder %s922_s19, 19 }
   0x6   : > { %s1089_s20 = smov (%p27_p0, %s26_s20), 0  ;;  %s1091_s21 = smov (!%p27_p0, %s33_s21), %s918_s18 }
   0x7   : > { %p217_p3 = pnand %p796_p1, %p216_p2  ;;  %p35_p4 = scmp.ge.s32.totalorder %s1091_s21, 2 }
   0x8   : > { %p265_p5 = scmp.lt.s32.totalorder (!%p217_p3), %s910_s16, 1  ;;  %p267_p6 = scmp.lt.s32.totalorder (!%p217_p3), %s906_s15, 8 }
   0x9   : > { %s1093_s21 = smov (%p35_p4, %s1091_s21), 0  ;;  %220 = sbr.rel (%p217_p3) target bundleno = 384 (0x180), region = 36 }
   0xa   : > { %p805_p7 = scmp.ne.s32.totalorder (!%p217_p3), %s906_s15, 0 }
  0x10   : > { %s1095_s16 = smov (!%p265_p5, %s910_s16), 1  ;;  %v924_v0 = vmov (!%p805_p7), 0.0  }
  0x11   : > { %s268_s22 = scalar_select %p267_p6, %s906_s15, 8 }
  0x12   : > { %s828_s23 = smul.u32 72, %s1095_s16  ;;  %s822_s24 = sshll.u32 %s1095_s16, 6  ;;  %303 = vst [vmem:[#allocation2] sm:$0xff] (!%p805_p7), %v924_v0  ;;  %304 = vst [vmem:[#allocation2 + $0x8] sm:$0xff] (!%p805_p7), %v924_v0 }
  0x13   : > { %s797_s25 = sshll.u32 %s268_s22, 3  ;;  %s821_s26 = sshll.u32 %s268_s22, 5  ;;  %305 = vst [vmem:[#allocation2 + $0x10] sm:$0xff] (!%p805_p7), %v924_v0  ;;  %306 = vst [vmem:[#allocation2 + $0x18] sm:$0xff] (!%p805_p7), %v924_v0 }
  0x14   : > { %s274_s27 = sadd.s32 %s828_s23, %s797_s25  ;;  %s989_s30 = scalar_lea.vmem %s1080_s1, %s821_s26  ;;  %307 = vst [vmem:[#allocation2 + $0x20] sm:$0xff] (!%p805_p7), %v924_v0  ;;  %308 = vst [vmem:[#allocation2 + $0x28] sm:$0xff] (!%p805_p7), %v924_v0 }
  0x15   : > { %s798_s5 = sshll.u32 %s274_s27, 2  ;;  %s994_s8 = scalar_lea.vmem %s1082_s3, %s822_s24  ;;  %309 = vst [vmem:[#allocation2 + $0x30] sm:$0xff] (!%p805_p7), %v924_v0  ;;  %310 = vst [vmem:[#allocation2 + $0x38] sm:$0xff] (!%p805_p7), %v924_v0 }
  0x16   : > { %s999_s11 = scalar_lea.vmem %s1079_s0, %s798_s5  ;;  %s823_s12 = sshll.u32 %s1095_s16, 7  ;;  %311 = vst [vmem:[#allocation2 + $0x40] sm:$0xff] (!%p805_p7), %v924_v0  ;;  %312 = vst [vmem:[#allocation2 + $0x48] sm:$0xff] (!%p805_p7), %v924_v0 }
  0x17   : > { %s1004_s22 = scalar_lea.vmem %s1083_s4, %s823_s12  ;;  %302 = sbr.rel (%p805_p7) target bundleno = 30 (0x1e), region = 40  ;;  %313 = vst [vmem:[#allocation2 + $0x50] sm:$0xff] (!%p805_p7), %v924_v0  ;;  %314 = vst [vmem:[#allocation2 + $0x58] sm:$0xff] (!%p805_p7), %v924_v0 }
  0x18   : > { %315 = vst [vmem:[#allocation2 + $0x60] sm:$0xff] (!%p805_p7), %v924_v0  ;;  %316 = vst [vmem:[#allocation2 + $0x68] sm:$0xff] (!%p805_p7), %v924_v0 }
  0x19   : > { %317 = vst [vmem:[#allocation2 + $0x70] sm:$0xff] (!%p805_p7), %v924_v0  ;;  %318 = vst [vmem:[#allocation2 + $0x78] sm:$0xff] (!%p805_p7), %v924_v0 }
  0x1e PF: > { %v872_v1 = vld [vmem:[%s999_s11 + $0x4] ss:$8 sps:$4 sm:$0xff]   ;;  %v874_v2 = vld [vmem:[%s999_s11] ss:$8 sps:$4 sm:$0xff]   ;;  %v925_v3 = vmov 0   ;;  %v879_v7 = vld [vmem:[%s989_s30 + $0x10] sm:$0xff]  }
  0x1f   : > { %432 = vmatprep.mubr.bf16.mxu0 %v925_v3  ;;  %452 = vmatprep.mubr.bf16.mxu1 %v925_v3  ;;  %v875_v4 = vld [vmem:[%s999_s11 + $0x14] ss:$8 sps:$4 sm:$0xff]   ;;  %v877_v5 = vld [vmem:[%s999_s11 + $0x10] ss:$8 sps:$4 sm:$0xff]   ;;  %v878_v6 = vld [vmem:[%s989_s30] sm:$0xff]   ;;  %vm387_vm0 = vcmask 261120  }
  0x20   : > { %400 = vmatprep.subr.bf16.mxu0 %v872_v1  ;;  %824 = vmatprep.subr.bf16.mxu1 %v872_v1  ;;  %v880_v8 = vld [vmem:[%s989_s30 + $0x8] sm:$0xff]   ;;  %v881_v9 = vld [vmem:[%s989_s30 + $0x18] sm:$0xff]   ;;  %v319_v10 = vld [vmem:[#allocation2] sm:$0xff]  ;;  %p818_p8 = scmp.ne.s32.totalorder %s906_s15, 8 }
  0x21   : > { %401 = vmatpush1.bf16.msra.mxu0 %v874_v2  ;;  %826 = vmatpush1.bf16.msra.mxu1 %v874_v2  ;;  %v327_v11 = vld [vmem:[#allocation2 + $0x40] sm:$0xff]  ;;  %v320_v12 = vld [vmem:[#allocation2 + $0x8] sm:$0xff]  ;;  %v321_v16 = vld [vmem:[#allocation2 + $0x10] sm:$0xff]  ;;  %v926_v60 = vmov (!%p818_p8), 0  }
  0x22   : > { %402 = vmatprep.subr.bf16.mxu0 %v875_v4  ;;  %825 = vmatprep.subr.bf16.mxu1 %v875_v4  ;;  %v328_v13 = vld [vmem:[#allocation2 + $0x48] sm:$0xff]  ;;  %v329_v17 = vld [vmem:[#allocation2 + $0x50] sm:$0xff]  ;;  %v322_v22 = vld [vmem:[#allocation2 + $0x18] sm:$0xff] }
  0x23   : > { %v330_v23 = vld [vmem:[#allocation2 + $0x58] sm:$0xff]  ;;  %v323_v34 = vld [vmem:[#allocation2 + $0x20] sm:$0xff]  ;;  %v324_v36 = vld [vmem:[#allocation2 + $0x28] sm:$0xff]  ;;  %883 = vset.pattern.permute.xlu1 (!%p818_p8), %v926_v60  ;;  %882 = vset.pattern.permute.xlu0 (!%p818_p8), %v926_v60 }
  0x24   : > { %v331_v35 = vld [vmem:[#allocation2 + $0x60] sm:$0xff]  ;;  %v332_v37 = vld [vmem:[#allocation2 + $0x68] sm:$0xff]  ;;  %v325_v40 = vld [vmem:[#allocation2 + $0x30] sm:$0xff] }
  0x25   : > { %403 = vmatpush1.bf16.msra.mxu0 %v877_v5  ;;  %827 = vmatpush1.bf16.msra.mxu1 %v877_v5  ;;  %v333_v41 = vld [vmem:[#allocation2 + $0x70] sm:$0xff]  ;;  %v326_v46 = vld [vmem:[#allocation2 + $0x38] sm:$0xff]  ;;  %v525_v59 = vld [vmem:[%s1081_s2] sm:$0xff] (!%p818_p8) }
  0x26   : > { %v334_v47 = vld [vmem:[#allocation2 + $0x78] sm:$0xff]  ;;  %v527_v58 = vld [vmem:[%s1081_s2 + $0x10] sm:$0xff] (!%p818_p8)  ;;  %535 = vperm.xlu0 (!%p818_p8), %882, %v525_v59   ;;  %v526_v62 = vld [vmem:[%s1081_s2 + $0x8] sm:$0xff] (!%p818_p8) }
  0x27   : > { %545 = vperm.xlu1 (!%p818_p8), %883, %v527_v58   ;;  %v528_v61 = vld [vmem:[%s1081_s2 + $0x18] sm:$0xff] (!%p818_p8)  ;;  %v530_v63 = vld [vmem:[%s1081_s2 + $0x28] sm:$0xff] (!%p818_p8)  ;;  %v529_v0 = vld [vmem:[%s1081_s2 + $0x20] sm:$0xff] (!%p818_p8) }
  0x28   : > { %814 = vmatmul.mubr.msk.bf16.vlgmr.msra.gmra.mrb[0].mxu0 %vm387_vm0, %v878_v6  ;;  %816 = vmatmul.mubr.msk.bf16.vlgmr.msra.gmra.mrb[0].mxu1 %vm387_vm0, %v879_v7  ;;  %v532_v1 = vld [vmem:[%s1081_s2 + $0x38] sm:$0xff] (!%p818_p8)  ;;  %v531_v2 = vld [vmem:[%s1081_s2 + $0x30] sm:$0xff] (!%p818_p8)  ;;  %v589_v4 = vld [vmem:[%s994_s8] sm:$0xff] (!%p818_p8) }
  0x29   : > { %442 = vmatprep.mubr.bf16.mxu0 %v925_v3  ;;  %462 = vmatprep.mubr.bf16.mxu1 %v925_v3  ;;  %v590_v3 = vld [vmem:[%s994_s8 + $0x8] sm:$0xff] (!%p818_p8)  ;;  %v592_v5 = vld [vmem:[%s994_s8 + $0x18] sm:$0xff] (!%p818_p8)  ;;  %v591_v6 = vld [vmem:[%s994_s8 + $0x10] sm:$0xff] (!%p818_p8) }
  0x2a   : > { %540 = vperm.xlu0 (!%p818_p8), %882, %v526_v62   ;;  %v594_v7 = vld [vmem:[%s994_s8 + $0x28] sm:$0xff] (!%p818_p8) }
  0x2b   : > { %550 = vperm.xlu1 (!%p818_p8), %883, %v528_v61  }
  0x2e   : > { %555 = vperm.xlu0 (!%p818_p8), %882, %v529_v0  }
  0x2f   : > { %560 = vperm.xlu1 (!%p818_p8), %883, %v530_v63  }
  0x30   : > { %815 = vmatmul.mubr.msk.bf16.gmra.mrb[4].mxu0 %vm387_vm0, %v880_v8  ;;  %817 = vmatmul.mubr.msk.bf16.gmra.mrb[4].mxu1 %vm387_vm0, %v881_v9  ;;  %v593_v8 = vld [vmem:[%s994_s8 + $0x20] sm:$0xff] (!%p818_p8)  ;;  %v596_v9 = vld [vmem:[%s994_s8 + $0x38] sm:$0xff] (!%p818_p8) }
  0x32   : > { %565 = vperm.xlu0 (!%p818_p8), %882, %v531_v2  }
  0x33   : > { %570 = vperm.xlu1 (!%p818_p8), %883, %v532_v1  }
  0x36   : > { %599 = vperm.xlu0 (!%p818_p8), %882, %v589_v4  }
  0x37   : > { %604 = vperm.xlu1 (!%p818_p8), %883, %v590_v3  }
  0x3a   : > { %609 = vperm.xlu0 (!%p818_p8), %882, %v591_v6  }
  0x3b   : > { %614 = vperm.xlu1 (!%p818_p8), %883, %v592_v5  }
  0x3e   : > { %619 = vperm.xlu0 (!%p818_p8), %882, %v593_v8  }
  0x3f   : > { %624 = vperm.xlu1 (!%p818_p8), %883, %v594_v7  }
  0x43   : > { %634 = vperm.xlu1 (!%p818_p8), %883, %v596_v9  }
  0xfb   : > { %v434_v14 = vpop.f32.mrb[0].mxu0  ;;  %v454_v15 = vpop.f32.mrb[0].mxu1 }
  0xfc   : > { %v473_v18 = vadd.f32 %v434_v14, %v319_v10  ;;  %v481_v19 = vadd.f32 %v454_v15, %v327_v11  ;;  %v436_v20 = vpop.f32.mrb[1].mxu0  ;;  %v456_v21 = vpop.f32.mrb[1].mxu1  ;;  %v595_v10 = vld [vmem:[%s994_s8 + $0x30] sm:$0xff] (!%p818_p8) }
  0xfd   : > { %v474_v24 = vadd.f32 %v436_v20, %v320_v12  ;;  %v482_v25 = vadd.f32 %v456_v21, %v328_v13  ;;  %v438_v26 = vpop.f32.mrb[2].mxu0  ;;  %v458_v27 = vpop.f32.mrb[2].mxu1  ;;  %629 = vperm.xlu0 (!%p818_p8), %882, %v595_v10  }
  0xfe   : > { %489 = vst [vmem:[#allocation2] sm:$0xff] %v473_v18  ;;  %497 = vst [vmem:[#allocation2 + $0x40] sm:$0xff] %v481_v19  ;;  %v475_v28 = vadd.f32 %v438_v26, %v321_v16  ;;  %v483_v29 = vadd.f32 %v458_v27, %v329_v17  ;;  %v440_v30 = vpop.f32.mrb[3].mxu0  ;;  %v460_v31 = vpop.f32.mrb[3].mxu1 }
  0xff   : > { %490 = vst [vmem:[#allocation2 + $0x8] sm:$0xff] %v474_v24  ;;  %498 = vst [vmem:[#allocation2 + $0x48] sm:$0xff] %v482_v25  ;;  %v476_v32 = vadd.f32 %v440_v30, %v322_v22  ;;  %v484_v33 = vadd.f32 %v460_v31, %v330_v23  ;;  %v546_v11 = vpop.permute.xlu1 (!%p818_p8), %545  ;;  %v536_v12 = vpop.permute.xlu0 (!%p818_p8), %535 }
 0x100   : > { %491 = vst [vmem:[#allocation2 + $0x10] sm:$0xff] %v475_v28  ;;  %499 = vst [vmem:[#allocation2 + $0x50] sm:$0xff] %v483_v29 }
 0x101   : > { %492 = vst [vmem:[#allocation2 + $0x18] sm:$0xff] %v476_v32  ;;  %500 = vst [vmem:[#allocation2 + $0x58] sm:$0xff] %v484_v33 }
 0x103   : > { %v444_v38 = vpop.f32.mrb[4].mxu0  ;;  %v464_v39 = vpop.f32.mrb[4].mxu1  ;;  %508 = sbr.rel (%p818_p8) target bundleno = 384 (0x180), region = 44 }
 0x104   : > { %v477_v42 = vadd.f32 %v444_v38, %v323_v34  ;;  %v485_v43 = vadd.f32 %v464_v39, %v331_v35  ;;  %v446_v44 = vpop.f32.mrb[5].mxu0  ;;  %v466_v45 = vpop.f32.mrb[5].mxu1 }
 0x105   : > { %v478_v48 = vadd.f32 %v446_v44, %v324_v36  ;;  %v486_v49 = vadd.f32 %v466_v45, %v332_v37  ;;  %v448_v50 = vpop.f32.mrb[6].mxu0  ;;  %v468_v51 = vpop.f32.mrb[6].mxu1  ;;  %v509_v17 = vld [vmem:[#allocation2] sm:$0xff] (!%p818_p8) }
 0x106   : > { %493 = vst [vmem:[#allocation2 + $0x20] sm:$0xff] %v477_v42  ;;  %501 = vst [vmem:[#allocation2 + $0x60] sm:$0xff] %v485_v43  ;;  %v479_v52 = vadd.f32 %v448_v50, %v325_v40  ;;  %v487_v53 = vadd.f32 %v468_v51, %v333_v41  ;;  %v450_v54 = vpop.f32.mrb[7].mxu0  ;;  %v470_v55 = vpop.f32.mrb[7].mxu1  ;;  %v510_v18 = vld [vmem:[#allocation2 + $0x8] sm:$0xff] (!%p818_p8)  ;;  %v573_v24 = vadd.f32 (!%p818_p8), %v536_v12, %v509_v17  ;;  %v517_v43 = vld [vmem:[#allocation2 + $0x40] sm:$0xff] (!%p818_p8) }
 0x107   : > { %494 = vst [vmem:[#allocation2 + $0x28] sm:$0xff] %v478_v48  ;;  %502 = vst [vmem:[#allocation2 + $0x68] sm:$0xff] %v486_v49  ;;  %v480_v56 = vadd.f32 %v450_v54, %v326_v46  ;;  %v488_v57 = vadd.f32 %v470_v55, %v334_v47  ;;  %v551_v13 = vpop.permute.xlu1 (!%p818_p8), %550  ;;  %v541_v14 = vpop.permute.xlu0 (!%p818_p8), %540  ;;  %v511_v19 = vld [vmem:[#allocation2 + $0x10] sm:$0xff] (!%p818_p8)  ;;  %v574_v25 = vadd.f32 (!%p818_p8), %v536_v12, %v510_v18  ;;  %v518_v44 = vld [vmem:[#allocation2 + $0x48] sm:$0xff] (!%p818_p8) }
 0x108   : > { %495 = vst [vmem:[#allocation2 + $0x30] sm:$0xff] %v479_v52  ;;  %503 = vst [vmem:[#allocation2 + $0x70] sm:$0xff] %v487_v53  ;;  %v512_v20 = vld [vmem:[#allocation2 + $0x18] sm:$0xff] (!%p818_p8)  ;;  %v575_v26 = vadd.f32 (!%p818_p8), %v541_v14, %v511_v19  ;;  %v519_v41 = vld [vmem:[#allocation2 + $0x50] sm:$0xff] (!%p818_p8) }
 0x109   : > { %496 = vst [vmem:[#allocation2 + $0x38] sm:$0xff] %v480_v56  ;;  %504 = vst [vmem:[#allocation2 + $0x78] sm:$0xff] %v488_v57  ;;  %v576_v27 = vadd.f32 (!%p818_p8), %v541_v14, %v512_v20  ;;  %v520_v42 = vld [vmem:[#allocation2 + $0x58] sm:$0xff] (!%p818_p8) }
 0x10b   : > { %v561_v15 = vpop.permute.xlu1 %560  ;;  %v556_v16 = vpop.permute.xlu0 %555 }
 0x10c   : > { %v583_v51 = vadd.f32 %v561_v15, %v519_v41  ;;  %v584_v52 = vadd.f32 %v561_v15, %v520_v42  ;;  %v581_v53 = vadd.f32 %v556_v16, %v517_v43  ;;  %v582_v54 = vadd.f32 %v556_v16, %v518_v44 }
 0x10d   : > { %v513_v23 = vld [vmem:[#allocation2 + $0x20] sm:$0xff] }
 0x10e   : > { %v514_v28 = vld [vmem:[#allocation2 + $0x28] sm:$0xff]  ;;  %v577_v37 = vadd.f32 %v546_v11, %v513_v23  ;;  %v521_v57 = vld [vmem:[#allocation2 + $0x60] sm:$0xff] }
 0x10f   : > { %v571_v21 = vpop.permute.xlu1 %570  ;;  %v566_v22 = vpop.permute.xlu0 %565  ;;  %v515_v29 = vld [vmem:[#allocation2 + $0x30] sm:$0xff]  ;;  %v578_v38 = vadd.f32 %v546_v11, %v514_v28  ;;  %v522_v58 = vld [vmem:[#allocation2 + $0x68] sm:$0xff] }
 0x110   : > { %v516_v30 = vld [vmem:[#allocation2 + $0x38] sm:$0xff]  ;;  %v579_v39 = vadd.f32 %v551_v13, %v515_v29  ;;  %v523_v55 = vld [vmem:[#allocation2 + $0x70] sm:$0xff]  ;;  %v585_v3 = vadd.f32 %v566_v22, %v521_v57  ;;  %v586_v4 = vadd.f32 %v566_v22, %v522_v58 }
 0x111   : > { %v580_v40 = vadd.f32 %v551_v13, %v516_v30  ;;  %v524_v56 = vld [vmem:[#allocation2 + $0x78] sm:$0xff]  ;;  %v587_v1 = vadd.f32 %v571_v21, %v523_v55 }
 0x112   : > { %v588_v2 = vadd.f32 %v571_v21, %v524_v56 }
 0x113   : > { %v605_v31 = vpop.permute.xlu1 %604  ;;  %v600_v32 = vpop.permute.xlu0 %599 }
 0x114   : > { %v639_v33 = vadd.f32 %v605_v31, %v575_v26  ;;  %v640_v34 = vadd.f32 %v605_v31, %v576_v27  ;;  %v637_v35 = vadd.f32 %v600_v32, %v573_v24  ;;  %v638_v36 = vadd.f32 %v600_v32, %v574_v25 }
 0x116   : > { %655 = vst [vmem:[%s1004_s22 + $0x10] sm:$0xff] %v639_v33  ;;  %656 = vst [vmem:[%s1004_s22 + $0x18] sm:$0xff] %v640_v34 }
 0x117   : > { %653 = vst [vmem:[%s1004_s22] sm:$0xff] %v637_v35  ;;  %654 = vst [vmem:[%s1004_s22 + $0x8] sm:$0xff] %v638_v36  ;;  %v615_v45 = vpop.permute.xlu1 %614  ;;  %v610_v46 = vpop.permute.xlu0 %609 }
 0x118   : > { %v643_v47 = vadd.f32 %v615_v45, %v579_v39  ;;  %v644_v48 = vadd.f32 %v615_v45, %v580_v40  ;;  %v641_v49 = vadd.f32 %v610_v46, %v577_v37  ;;  %v642_v50 = vadd.f32 %v610_v46, %v578_v38 }
 0x11a   : > { %659 = vst [vmem:[%s1004_s22 + $0x30] sm:$0xff] %v643_v47  ;;  %660 = vst [vmem:[%s1004_s22 + $0x38] sm:$0xff] %v644_v48 }
 0x11b   : > { %657 = vst [vmem:[%s1004_s22 + $0x20] sm:$0xff] %v641_v49  ;;  %658 = vst [vmem:[%s1004_s22 + $0x28] sm:$0xff] %v642_v50  ;;  %v625_v59 = vpop.permute.xlu1 %624  ;;  %v620_v60 = vpop.permute.xlu0 %619 }
 0x11c   : > { %v647_v61 = vadd.f32 %v625_v59, %v583_v51  ;;  %v648_v62 = vadd.f32 %v625_v59, %v584_v52  ;;  %v645_v63 = vadd.f32 %v620_v60, %v581_v53  ;;  %v646_v0 = vadd.f32 %v620_v60, %v582_v54 }
 0x11e   : > { %663 = vst [vmem:[%s1004_s22 + $0x50] sm:$0xff] %v647_v61  ;;  %664 = vst [vmem:[%s1004_s22 + $0x58] sm:$0xff] %v648_v62 }
 0x11f   : > { %661 = vst [vmem:[%s1004_s22 + $0x40] sm:$0xff] %v645_v63  ;;  %662 = vst [vmem:[%s1004_s22 + $0x48] sm:$0xff] %v646_v0  ;;  %v635_v5 = vpop.permute.xlu1 %634 }
 0x120   : > { %v651_v7 = vadd.f32 %v635_v5, %v587_v1  ;;  %v652_v8 = vadd.f32 %v635_v5, %v588_v2 }
 0x122   : > { %667 = vst [vmem:[%s1004_s22 + $0x70] sm:$0xff] %v651_v7  ;;  %668 = vst [vmem:[%s1004_s22 + $0x78] sm:$0xff] %v652_v8 }
 0x17c   : > { %v630_v6 = vpop.permute.xlu0 %629 }
 0x17d   : > { %v649_v9 = vadd.f32 %v630_v6, %v585_v3  ;;  %v650_v10 = vadd.f32 %v630_v6, %v586_v4 }
 0x17f   : > { %665 = vst [vmem:[%s1004_s22 + $0x60] sm:$0xff] %v649_v9  ;;  %666 = vst [vmem:[%s1004_s22 + $0x68] sm:$0xff] %v650_v10 }
 0x180 PF: > { %s14_s19 = sadd.s32 1, %s922_s19   ;;  %s1084_s15 = smov %s914_s17 }
 0x181   : > { %p11_p9 = scmp.ge.s32.totalorder %s14_s19, 20   ;;  %s1085_s16 = smov %s918_s18 }
 0x182   : > { %s1086_s17 = smov %s1089_s20  ;;  %s1087_s18 = smov %s1093_s21 }
 0x183   :  { %13 = sbr.rel (!%p11_p9) target bundleno = 3 (0x3), region = 80 }

// kernel: residual_block_forward.9
= control target key start
LH: loop header
LB: loop body
LE: loop exit
PB: predicated region body
PF: predicated region fallthrough
CT: control target
= control target key end

     0   :  { %s3434_s12 = smov 0   ;;  %s4670_s0 = inlined_call_operand.vmem [shape: f32[2,32,2,256], index: 0, kind: input, shape index: {}]   ;;  %s4671_s1 = inlined_call_operand.vmem [shape: f32[32,2,1], index: 1, kind: input, shape index: {}]   ;;  %s4672_s2 = inlined_call_operand.vmem [shape: f32[32,2,1], index: 2, kind: input, shape index: {}]   ;;  %s4673_s3 = inlined_call_operand.vmem [shape: f32[2,32,2,256], index: 3, kind: output, shape index: {}]  }
   0x1 LB: > { %s3141_s13 = sadd.s32 4294967295, %s3409_s12   ;;  %p3145_p0 = scmp.ge.s32.totalorder %s3409_s12, 1  ;;  %s3409_s12 = sphi %s3434_s12, %s13_s12  }
   0x2   : > { %p137_p1 = scmp.lt.s32.totalorder %s3409_s12, 3 }
   0x4   : > { %p138_p2 = pnand %p3145_p0, %p137_p1 }
   0x6   : > { %141 = sbr.rel (%p138_p2) target bundleno = 589 (0x24d), region = 32 }
   0xd   : > { %p161_p3 = scmp.lt.s32.totalorder %s3141_s13, 1  ;;  %v238_v0 = vlaneseq  ;;  %v3411_v1 = vmov 1983009808   ;;  %v3412_v3 = vmov 0   ;;  %vm555_vm0 = vcmask 1041408  }
   0xe   : > { %v236_v2 = vunpack.c.l.s4 %v3411_v1  ;;  %3166 = vset.pattern.permute.xlu1 %v3412_v3  ;;  %3165 = vset.pattern.permute.xlu0 %v3412_v3 }
   0xf   : > { %s4749_s13 = smov (!%p161_p3, %s3141_s13), 1  ;;  %v3444_v4 = vshrl.u32 %v238_v0, 7 }
  0x10   : > { %v237_v5 = vunpack.c.0.s8 %v236_v2  ;;  %s3152_s14 = sshll.u32 %s4749_s13, 7 }
  0x11   : > { %s3452_s17 = scalar_lea.vmem %s4670_s0, %s3152_s14  ;;  %s4508_s28 = scalar_lea.vmem %s4673_s3, %s3152_s14 }
  0x12   : > { %v3455_v6 = vsub.s32 %v237_v5, %v3444_v4  ;;  %v3458_v7 = vld [vmem:[%s3452_s17 + $0x8] sm:$0xf]  ;;  %v3461_v8 = vld [vmem:[%s3452_s17] sm:$0xf]  ;;  %v3464_v9 = vld [vmem:[%s3452_s17 + $0xc] sm:$0xf] }
  0x13   : > { %v3473_v13 = vld [vmem:[%s3452_s17 + $0x4] sm:$0xf]  ;;  %v3476_v14 = vld [vmem:[%s3452_s17 + $0x14] sm:$0xf]  ;;  %v3479_v15 = vld [vmem:[%s3452_s17 + $0x10] sm:$0xf] }
  0x14   : > { %v257_v10 = vrot.slane %v3458_v7, %v3455_v6  ;;  %v241_v11 = vrot.slane %v3461_v8, %v3455_v6  ;;  %v265_v12 = vrot.slane %v3464_v9, %v3455_v6  ;;  %v249_v16 = vrot.slane %v3473_v13, %v3455_v6  ;;  %v3494_v30 = vld [vmem:[%s3452_s17 + $0x1c] sm:$0xf]  ;;  %v3497_v31 = vld [vmem:[%s3452_s17 + $0x18] sm:$0xf]  ;;  %v3503_v37 = vld [vmem:[%s3452_s17 + $0x20] sm:$0xf] }
  0x15   : > { %v281_v17 = vrot.slane %v3476_v14, %v3455_v6  ;;  %v273_v18 = vrot.slane %v3479_v15, %v3455_v6  ;;  %v3381_v36 = vld.sshfl [vmem:[%s3452_s17 + $0x24] sm:$0x33 pattern:$0x76325410]  ;;  %v297_v44 = vrot.slane %v3494_v30, %v3455_v6  ;;  %v289_v45 = vrot.slane %v3497_v31, %v3455_v6  ;;  %v3519_v57 = vld [vmem:[%s3452_s17 + $0x28] sm:$0xf] }
  0x16   : > { %v258_v19 = vcombine.high %v257_v10, %v257_v10  ;;  %v566_v20 = vsel %vm555_vm0, %v257_v10, 0.0  ;;  %v242_v21 = vcombine.high %v241_v11, %v241_v11  ;;  %v556_v22 = vsel %vm555_vm0, %v241_v11, 0.0  ;;  %v3382_v46 = vld.sshfl [vmem:[%s3452_s17 + $0x2c] sm:$0x33 pattern:$0x76325410] }
  0x17   : > { %v266_v23 = vcombine.high %v265_v12, %v265_v12  ;;  %v571_v24 = vsel %vm555_vm0, %v265_v12, 0.0  ;;  %v250_v25 = vcombine.high %v249_v16, %v249_v16  ;;  %v561_v26 = vsel %vm555_vm0, %v249_v16, 0.0  ;;  %v3383_v60 = vld.sshfl [vmem:[%s3452_s17 + $0x34] sm:$0x33 pattern:$0x76325410] }
  0x18   : > { %v567_v27 = vsel %vm555_vm0, %v258_v19, 0.0  ;;  %v557_v28 = vsel %vm555_vm0, %v242_v21, 0.0  ;;  %v282_v29 = vcombine.high %v281_v17, %v281_v17  ;;  %v581_v40 = vsel %vm555_vm0, %v281_v17, 0.0 }
  0x19   : > { %v568_v32 = vadd.f32 %v567_v27, %v566_v20  ;;  %v558_v33 = vadd.f32 %v557_v28, %v556_v22  ;;  %v572_v34 = vsel %vm555_vm0, %v266_v23, 0.0  ;;  %v562_v35 = vsel %vm555_vm0, %v250_v25, 0.0  ;;  %v3384_v62 = vld.sshfl [vmem:[%s3452_s17 + $0x30] sm:$0x33 pattern:$0x76325410] }
  0x1a   : > { %v573_v38 = vadd.f32 %v572_v34, %v571_v24  ;;  %v563_v39 = vadd.f32 %v562_v35, %v561_v26  ;;  %v274_v41 = vcombine.high %v273_v18, %v273_v18  ;;  %v582_v42 = vsel %vm555_vm0, %v282_v29, 0.0  ;;  %v3385_v11 = vld.sshfl [vmem:[%s3452_s17 + $0x3c] sm:$0x33 pattern:$0x76325410] }
  0x1b   : > { %569 = vadd.xlane.f32.xlu1 %v568_v32  ;;  %559 = vadd.xlane.f32.xlu0 %v558_v33  ;;  %v576_v43 = vsel %vm555_vm0, %v273_v18, 0.0  ;;  %v305_v48 = vrot.slane %v3503_v37, %v3455_v6  ;;  %v298_v49 = vcombine.high %v297_v44, %v297_v44  ;;  %v290_v50 = vcombine.high %v289_v45, %v289_v45  ;;  %v3386_v16 = vld.sshfl [vmem:[%s3452_s17 + $0x38] sm:$0x33 pattern:$0x76325410] }
  0x1c   : > { %v577_v47 = vsel %vm555_vm0, %v274_v41, 0.0  ;;  %v583_v51 = vadd.f32 %v582_v42, %v581_v40  ;;  %v591_v53 = vsel %vm555_vm0, %v297_v44, 0.0  ;;  %v314_v55 = vcombine.high %v3381_v36, %v3381_v36  ;;  %v3387_v22 = vld.sshfl [vmem:[%s3452_s17 + $0x44] sm:$0x33 pattern:$0x76325410] }
  0x1d   : > { %v578_v52 = vadd.f32 %v577_v47, %v576_v43  ;;  %v592_v54 = vsel %vm555_vm0, %v298_v49, 0.0  ;;  %v306_v56 = vcombine.high %v305_v48, %v305_v48  ;;  %v586_v58 = vsel %vm555_vm0, %v289_v45, 0.0  ;;  %v3388_v26 = vld.sshfl [vmem:[%s3452_s17 + $0x40] sm:$0x33 pattern:$0x76325410] }
  0x1e   : > { %v587_v59 = vsel %vm555_vm0, %v290_v50, 0.0  ;;  %v601_v61 = vsel %vm555_vm0, %v3381_v36, 0.0  ;;  %v593_v63 = vadd.f32 %v592_v54, %v591_v53  ;;  %v596_v0 = vsel %vm555_vm0, %v305_v48, 0.0 }
  0x1f   : > { %574 = vadd.xlane.f32.xlu1 %v573_v38  ;;  %564 = vadd.xlane.f32.xlu0 %v563_v39  ;;  %v330_v1 = vcombine.high %v3382_v46, %v3382_v46  ;;  %v321_v2 = vrot.slane %v3519_v57, %v3455_v6  ;;  %v588_v3 = vadd.f32 %v587_v59, %v586_v58  ;;  %v602_v5 = vsel %vm555_vm0, %v314_v55, 0.0  ;;  %v3389_v38 = vld.sshfl [vmem:[%s3452_s17 + $0x4c] sm:$0x33 pattern:$0x76325410] }
  0x20   : > { %v597_v10 = vsel %vm555_vm0, %v306_v56, 0.0  ;;  %v603_v17 = vadd.f32 %v602_v5, %v601_v61  ;;  %v611_v19 = vsel %vm555_vm0, %v3382_v46, 0.0  ;;  %v346_v21 = vcombine.high %v3383_v60, %v3383_v60  ;;  %v3390_v39 = vld.sshfl [vmem:[%s3452_s17 + $0x48] sm:$0x33 pattern:$0x76325410] }
  0x21   : > { %v322_v12 = vcombine.high %v321_v2, %v321_v2  ;;  %v598_v18 = vadd.f32 %v597_v10, %v596_v0  ;;  %v612_v20 = vsel %vm555_vm0, %v330_v1, 0.0  ;;  %v606_v23 = vsel %vm555_vm0, %v321_v2, 0.0  ;;  %v3391_v47 = vld.sshfl [vmem:[%s3452_s17 + $0x54] sm:$0x33 pattern:$0x76325410] }
  0x22   : > { %v338_v25 = vcombine.high %v3384_v62, %v3384_v62  ;;  %v613_v27 = vadd.f32 %v612_v20, %v611_v19  ;;  %v362_v28 = vcombine.high %v3385_v11, %v3385_v11  ;;  %v621_v32 = vsel %vm555_vm0, %v3383_v60, 0.0  ;;  %v3392_v49 = vld.sshfl [vmem:[%s3452_s17 + $0x50] sm:$0x33 pattern:$0x76325410] }
  0x23   : > { %584 = vadd.xlane.f32.xlu1 %v583_v51  ;;  %579 = vadd.xlane.f32.xlu0 %v578_v52  ;;  %v607_v24 = vsel %vm555_vm0, %v322_v12, 0.0  ;;  %v622_v33 = vsel %vm555_vm0, %v346_v21, 0.0  ;;  %v354_v34 = vcombine.high %v3386_v16, %v3386_v16  ;;  %v616_v35 = vsel %vm555_vm0, %v3384_v62, 0.0 }
  0x24   : > { %v608_v29 = vadd.f32 %v607_v24, %v606_v23  ;;  %v617_v36 = vsel %vm555_vm0, %v338_v25, 0.0  ;;  %v623_v40 = vadd.f32 %v622_v33, %v621_v32  ;;  %v631_v41 = vsel %vm555_vm0, %v3385_v11, 0.0  ;;  %v3393_v59 = vld.sshfl [vmem:[%s3452_s17 + $0x5c] sm:$0x33 pattern:$0x76325410] }
  0x25   : > { %v632_v42 = vsel %vm555_vm0, %v362_v28, 0.0  ;;  %v626_v43 = vsel %vm555_vm0, %v3386_v16, 0.0  ;;  %v618_v44 = vadd.f32 %v617_v36, %v616_v35  ;;  %v627_v45 = vsel %vm555_vm0, %v354_v34, 0.0 }
  0x26   : > { %v378_v46 = vcombine.high %v3387_v22, %v3387_v22  ;;  %v370_v48 = vcombine.high %v3388_v26, %v3388_v26  ;;  %v633_v50 = vadd.f32 %v632_v42, %v631_v41  ;;  %v628_v51 = vadd.f32 %v627_v45, %v626_v43  ;;  %v3394_v60 = vld.sshfl [vmem:[%s3452_s17 + $0x58] sm:$0x33 pattern:$0x76325410] }
  0x27   : > { %594 = vadd.xlane.f32.xlu1 %v593_v63  ;;  %589 = vadd.xlane.f32.xlu0 %v588_v3  ;;  %v641_v52 = vsel %vm555_vm0, %v3387_v22, 0.0  ;;  %v394_v54 = vcombine.high %v3389_v38, %v3389_v38  ;;  %v636_v55 = vsel %vm555_vm0, %v3388_v26, 0.0  ;;  %v386_v58 = vcombine.high %v3390_v39, %v3390_v39  ;;  %v3395_v10 = vld.sshfl [vmem:[%s3452_s17 + $0x64] sm:$0x33 pattern:$0x76325410] }
  0x28   : > { %v642_v53 = vsel %vm555_vm0, %v378_v46, 0.0  ;;  %v637_v56 = vsel %vm555_vm0, %v370_v48, 0.0  ;;  %v410_v62 = vcombine.high %v3391_v47, %v3391_v47  ;;  %v651_v0 = vsel %vm555_vm0, %v3389_v38, 0.0 }
  0x29   : > { %v643_v61 = vadd.f32 %v642_v53, %v641_v52  ;;  %v638_v63 = vadd.f32 %v637_v56, %v636_v55  ;;  %v652_v1 = vsel %vm555_vm0, %v394_v54, 0.0  ;;  %v402_v2 = vcombine.high %v3392_v49, %v3392_v49  ;;  %v3396_v11 = vld.sshfl [vmem:[%s3452_s17 + $0x60] sm:$0x33 pattern:$0x76325410] }
  0x2a   : > { %v646_v3 = vsel %vm555_vm0, %v3390_v39, 0.0  ;;  %v647_v5 = vsel %vm555_vm0, %v386_v58, 0.0  ;;  %v653_v12 = vadd.f32 %v652_v1, %v651_v0  ;;  %v661_v16 = vsel %vm555_vm0, %v3391_v47, 0.0 }
  0x2b   : > { %604 = vadd.xlane.f32.xlu1 %v603_v17  ;;  %599 = vadd.xlane.f32.xlu0 %v598_v18  ;;  %v662_v17 = vsel %vm555_vm0, %v410_v62, 0.0  ;;  %v648_v18 = vadd.f32 %v647_v5, %v646_v3  ;;  %v656_v19 = vsel %vm555_vm0, %v3392_v49, 0.0  ;;  %v657_v20 = vsel %vm555_vm0, %v402_v2, 0.0 }
  0x2c   : > { %v426_v21 = vcombine.high %v3393_v59, %v3393_v59  ;;  %v418_v22 = vcombine.high %v3394_v60, %v3394_v60  ;;  %v3397_v23 = vld.sshfl [vmem:[%s3452_s17 + $0x6c] sm:$0x33 pattern:$0x76325410]  ;;  %v663_v25 = vadd.f32 %v662_v17, %v661_v16  ;;  %v658_v26 = vadd.f32 %v657_v20, %v656_v19  ;;  %v1967_v17 = vld [vmem:[%s4671_s1 + $0x2] sm:$0x3] }
  0x2d   : > { %v3398_v24 = vld.sshfl [vmem:[%s3452_s17 + $0x68] sm:$0x33 pattern:$0x76325410]  ;;  %v442_v28 = vcombine.high %v3395_v10, %v3395_v10  ;;  %v666_v33 = vsel %vm555_vm0, %v3394_v60, 0.0  ;;  %v434_v35 = vcombine.high %v3396_v11, %v3396_v11  ;;  %v681_v38 = vsel %vm555_vm0, %v3395_v10, 0.0 }
  0x2e   : > { %v672_v32 = vsel %vm555_vm0, %v426_v21, 0.0  ;;  %v667_v34 = vsel %vm555_vm0, %v418_v22, 0.0  ;;  %v3400_v36 = vld.sshfl [vmem:[%s3452_s17 + $0x70] sm:$0x33 pattern:$0x76325410]  ;;  %v458_v42 = vcombine.high %v3397_v23, %v3397_v23  ;;  %v450_v45 = vcombine.high %v3398_v24, %v3398_v24 }
  0x2f   : > { %614 = vadd.xlane.f32.xlu1 %v613_v27  ;;  %609 = vadd.xlane.f32.xlu0 %v608_v29  ;;  %v671_v27 = vsel %vm555_vm0, %v3393_v59, 0.0  ;;  %v3399_v29 = vld.sshfl [vmem:[%s3452_s17 + $0x74] sm:$0x33 pattern:$0x76325410]  ;;  %v682_v41 = vsel %vm555_vm0, %v442_v28, 0.0  ;;  %v466_v55 = vcombine.high %v3400_v36, %v3400_v36 }
  0x30   : > { %v673_v39 = vadd.f32 %v672_v32, %v671_v27  ;;  %v676_v43 = vsel %vm555_vm0, %v3396_v11, 0.0  ;;  %v3401_v46 = vld.sshfl [vmem:[%s3452_s17 + $0x7c] sm:$0x33 pattern:$0x76325410]  ;;  %v683_v48 = vadd.f32 %v682_v41, %v681_v38  ;;  %v691_v49 = vsel %vm555_vm0, %v3397_v23, 0.0 }
  0x31   : > { %v3402_v47 = vld.sshfl [vmem:[%s3452_s17 + $0x78] sm:$0x33 pattern:$0x76325410]  ;;  %v686_v52 = vsel %vm555_vm0, %v3398_v24, 0.0  ;;  %v474_v53 = vcombine.high %v3399_v29, %v3399_v29  ;;  %v687_v54 = vsel %vm555_vm0, %v450_v45, 0.0 }
  0x32   : > { %v688_v58 = vadd.f32 %v687_v54, %v686_v52  ;;  %v701_v59 = vsel %vm555_vm0, %v3399_v29, 0.0  ;;  %v697_v62 = vsel %vm555_vm0, %v466_v55, 0.0  ;;  %v482_v0 = vcombine.high %v3402_v47, %v3402_v47  ;;  %v1966_v19 = vld [vmem:[%s4671_s1] sm:$0x3]  ;;  %v1969_v20 = vld [vmem:[%s4671_s1 + $0x6] sm:$0x3] }
  0x33   : > { %624 = vadd.xlane.f32.xlu1 %v623_v40  ;;  %619 = vadd.xlane.f32.xlu0 %v618_v44  ;;  %v668_v40 = vadd.f32 %v667_v34, %v666_v33  ;;  %v677_v44 = vsel %vm555_vm0, %v434_v35, 0.0  ;;  %v702_v60 = vsel %vm555_vm0, %v474_v53, 0.0  ;;  %v711_v3 = vsel %vm555_vm0, %v3401_v46, 0.0  ;;  %v1975_v21 = vld [vmem:[%s4671_s1 + $0x12] sm:$0x3] }
  0x34   : > { %v703_v1 = vadd.f32 %v702_v60, %v701_v59  ;;  %v706_v10 = vsel %vm555_vm0, %v3402_v47, 0.0  ;;  %v707_v11 = vsel %vm555_vm0, %v482_v0, 0.0  ;;  %v1970_v22 = vld [vmem:[%s4671_s1 + $0x8] sm:$0x3]  ;;  %v1977_v23 = vld [vmem:[%s4671_s1 + $0x16] sm:$0x3] }
  0x35   : > { %v708_v16 = vadd.f32 %v707_v11, %v706_v10  ;;  %v1971_v24 = vld [vmem:[%s4671_s1 + $0xa] sm:$0x3]  ;;  %v1981_v27 = vld [vmem:[%s4671_s1 + $0x1e] sm:$0x3]  ;;  %v1973_v28 = vld [vmem:[%s4671_s1 + $0xe] sm:$0x3] }
  0x36   : > { %v1974_v29 = vld [vmem:[%s4671_s1 + $0x10] sm:$0x3]  ;;  %v1976_v32 = vld [vmem:[%s4671_s1 + $0x14] sm:$0x3]  ;;  %v1978_v33 = vld [vmem:[%s4671_s1 + $0x18] sm:$0x3] }
  0x37   : > { %634 = vadd.xlane.f32.xlu1 %v633_v50  ;;  %629 = vadd.xlane.f32.xlu0 %v628_v51  ;;  %v678_v50 = vadd.f32 %v677_v44, %v676_v43  ;;  %v692_v51 = vsel %vm555_vm0, %v458_v42, 0.0  ;;  %v1980_v34 = vld [vmem:[%s4671_s1 + $0x1c] sm:$0x3] }
  0x38   : > { %v693_v56 = vadd.f32 %v692_v51, %v691_v49 }
  0x3b   : > { %644 = vadd.xlane.f32.xlu1 %v643_v61  ;;  %639 = vadd.xlane.f32.xlu0 %v638_v63  ;;  %v696_v61 = vsel %vm555_vm0, %v3400_v36, 0.0  ;;  %v490_v63 = vcombine.high %v3401_v46, %v3401_v46 }
  0x3c   : > { %v698_v2 = vadd.f32 %v697_v62, %v696_v61 }
  0x3d   : > { %v712_v5 = vsel %vm555_vm0, %v490_v63, 0.0 }
  0x3f   : > { %654 = vadd.xlane.f32.xlu1 %v653_v12  ;;  %649 = vadd.xlane.f32.xlu0 %v648_v18  ;;  %v713_v12 = vadd.f32 %v712_v5, %v711_v3  ;;  %v1968_v18 = vld [vmem:[%s4671_s1 + $0x4] sm:$0x3] }
  0x43   : > { %664 = vadd.xlane.f32.xlu1 %v663_v25  ;;  %659 = vadd.xlane.f32.xlu0 %v658_v26  ;;  %v1979_v25 = vld [vmem:[%s4671_s1 + $0x1a] sm:$0x3]  ;;  %v1972_v26 = vld [vmem:[%s4671_s1 + $0xc] sm:$0x3] }
  0x47   : > { %674 = vadd.xlane.f32.xlu1 %v673_v39  ;;  %669 = vadd.xlane.f32.xlu0 %v668_v40 }
  0x4b   : > { %684 = vadd.xlane.f32.xlu1 %v683_v48  ;;  %679 = vadd.xlane.f32.xlu0 %v678_v50 }
  0x4f   : > { %694 = vadd.xlane.f32.xlu1 %v693_v56  ;;  %689 = vadd.xlane.f32.xlu0 %v688_v58 }
  0x53   : > { %704 = vadd.xlane.f32.xlu1 %v703_v1  ;;  %699 = vadd.xlane.f32.xlu0 %v698_v2 }
  0x57   : > { %714 = vadd.xlane.f32.xlu1 %v713_v12  ;;  %709 = vadd.xlane.f32.xlu0 %v708_v16 }
  0x68   : > { %2004 = vperm.xlu1 %3166, %v1967_v17  }
  0x6c   : > { %2008 = vperm.xlu1 %3166, %v1968_v18  }
  0x6d   : > { %2000 = vperm.xlu0 %3165, %v1966_v19  }
  0x70   : > { %2012 = vperm.xlu1 %3166, %v1969_v20  }
  0x71   : > { %2036 = vperm.xlu0 %3165, %v1975_v21  }
  0x74   : > { %2016 = vperm.xlu1 %3166, %v1970_v22  }
  0x75   : > { %2044 = vperm.xlu0 %3165, %v1977_v23  }
  0x78   : > { %2020 = vperm.xlu1 %3166, %v1971_v24  }
  0x79   : > { %2052 = vperm.xlu0 %3165, %v1979_v25  }
  0x7c   : > { %2024 = vperm.xlu1 %3166, %v1972_v26  }
  0x7d   : > { %2060 = vperm.xlu0 %3165, %v1981_v27  }
  0x80   : > { %2028 = vperm.xlu1 %3166, %v1973_v28  }
  0x84   : > { %2032 = vperm.xlu1 %3166, %v1974_v29  }
  0x88   : > { %2040 = vperm.xlu1 %3166, %v1976_v32  }
  0x8c   : > { %2048 = vperm.xlu1 %3166, %v1978_v33  }
  0x90   : > { %2056 = vperm.xlu1 %3166, %v1980_v34  }
  0xa8   : > { %v570_v35 = vpop.xlane.xlu1 %569  ;;  %v560_v36 = vpop.xlane.xlu0 %559 }
  0xa9   : > { %v719_v38 = vmul.f32 0.00390625, %v570_v35  ;;  %v717_v39 = vmul.f32 0.00390625, %v560_v36 }
  0xab   : > { %v763_v40 = vsel %vm555_vm0, %v719_v38, 0.0  ;;  %v749_v41 = vsel %vm555_vm0, %v717_v39, 0.0 }
  0xac   : > { %v764_v42 = vrot.slane %v763_v40, 4  ;;  %v750_v43 = vrot.slane %v749_v41, 4  ;;  %v575_v44 = vpop.xlane.xlu1 %574  ;;  %v565_v45 = vpop.xlane.xlu0 %564 }
  0xad   : > { %v720_v46 = vmul.f32 0.00390625, %v575_v44  ;;  %v718_v47 = vmul.f32 0.00390625, %v565_v45 }
  0xae   : > { %v765_v48 = vadd.f32 %v764_v42, %v763_v40  ;;  %v751_v49 = vadd.f32 %v750_v43, %v749_v41 }
  0xaf   : > { %v770_v50 = vsel %vm555_vm0, %v720_v46, 0.0  ;;  %v756_v51 = vsel %vm555_vm0, %v718_v47, 0.0 }
  0xb0   : > { %v766_v52 = vrot.slane %v765_v48, 2  ;;  %v752_v53 = vrot.slane %v751_v49, 2  ;;  %v771_v54 = vrot.slane %v770_v50, 4  ;;  %v757_v55 = vrot.slane %v756_v51, 4  ;;  %v585_v56 = vpop.xlane.xlu1 %584  ;;  %v580_v58 = vpop.xlane.xlu0 %579 }
  0xb1   : > { %v722_v59 = vmul.f32 0.00390625, %v585_v56  ;;  %v721_v60 = vmul.f32 0.00390625, %v580_v58 }
  0xb2   : > { %v767_v61 = vadd.f32 %v766_v52, %v765_v48  ;;  %v772_v62 = vadd.f32 %v771_v54, %v770_v50  ;;  %v758_v63 = vadd.f32 %v757_v55, %v756_v51  ;;  %v753_v2 = vadd.f32 %v752_v53, %v751_v49 }
  0xb3   : > { %v784_v0 = vsel %vm555_vm0, %v722_v59, 0.0  ;;  %v777_v1 = vsel %vm555_vm0, %v721_v60, 0.0 }
  0xb4   : > { %v773_v3 = vrot.slane %v772_v62, 2  ;;  %v759_v5 = vrot.slane %v758_v63, 2  ;;  %v595_v10 = vpop.xlane.xlu1 %594  ;;  %v590_v11 = vpop.xlane.xlu0 %589  ;;  %v785_v12 = vrot.slane %v784_v0, 4  ;;  %v778_v16 = vrot.slane %v777_v1, 4 }
  0xb5   : > { %v724_v17 = vmul.f32 0.00390625, %v595_v10  ;;  %v723_v18 = vmul.f32 0.00390625, %v590_v11  ;;  %v768_v19 = vrot.slane %v767_v61, 1  ;;  %v754_v25 = vrot.slane %v753_v2, 1 }
  0xb6   : > { %v774_v20 = vadd.f32 %v773_v3, %v772_v62  ;;  %v786_v21 = vadd.f32 %v785_v12, %v784_v0  ;;  %v779_v22 = vadd.f32 %v778_v16, %v777_v1  ;;  %v760_v26 = vadd.f32 %v759_v5, %v758_v63 }
  0xb7   : > { %v798_v23 = vsel %vm555_vm0, %v724_v17, 0.0  ;;  %v791_v24 = vsel %vm555_vm0, %v723_v18, 0.0  ;;  %v769_v35 = vadd.f32 %v768_v19, %v767_v61  ;;  %v755_v48 = vadd.f32 %v754_v25, %v753_v2 }
  0xb8   : > { %v605_v27 = vpop.xlane.xlu1 %604  ;;  %v600_v28 = vpop.xlane.xlu0 %599  ;;  %v787_v29 = vrot.slane %v786_v21, 2  ;;  %v780_v32 = vrot.slane %v779_v22, 2  ;;  %v799_v33 = vrot.slane %v798_v23, 4  ;;  %v792_v34 = vrot.slane %v791_v24, 4 }
  0xb9   : > { %v775_v36 = vrot.slane %v774_v20, 1  ;;  %v726_v38 = vmul.f32 0.00390625, %v605_v27  ;;  %v725_v39 = vmul.f32 0.00390625, %v600_v28  ;;  %v761_v49 = vrot.slane %v760_v26, 1 }
  0xba   : > { %v788_v40 = vadd.f32 %v787_v29, %v786_v21  ;;  %v781_v41 = vadd.f32 %v780_v32, %v779_v22  ;;  %v800_v42 = vadd.f32 %v799_v33, %v798_v23  ;;  %v793_v43 = vadd.f32 %v792_v34, %v791_v24 }
  0xbb   : > { %v812_v44 = vsel %vm555_vm0, %v726_v38, 0.0  ;;  %v805_v45 = vsel %vm555_vm0, %v725_v39, 0.0  ;;  %v3651_v56 = vmul.f32 0.5, %v769_v35  ;;  %v776_v58 = vadd.f32 %v775_v36, %v774_v20 }
  0xbc   : > { %v615_v46 = vpop.xlane.xlu1 %614  ;;  %v610_v47 = vpop.xlane.xlu0 %609  ;;  %v801_v50 = vrot.slane %v800_v42, 2  ;;  %v794_v51 = vrot.slane %v793_v43, 2  ;;  %v813_v52 = vrot.slane %v812_v44, 4  ;;  %v806_v53 = vrot.slane %v805_v45, 4 }
  0xbd   : > { %v728_v54 = vmul.f32 0.00390625, %v615_v46  ;;  %v727_v55 = vmul.f32 0.00390625, %v610_v47  ;;  %v789_v59 = vrot.slane %v788_v40, 1  ;;  %v782_v60 = vrot.slane %v781_v41, 1 }
  0xbe   : > { %v814_v61 = vadd.f32 %v813_v52, %v812_v44  ;;  %v807_v62 = vadd.f32 %v806_v53, %v805_v45  ;;  %v974_v3 = vmul.f32 0.5, %v755_v48  ;;  %v762_v5 = vadd.f32 %v761_v49, %v760_v26 }
  0xbf   : > { %v826_v63 = vsel %vm555_vm0, %v728_v54, 0.0  ;;  %v819_v0 = vsel %vm555_vm0, %v727_v55, 0.0  ;;  %v802_v10 = vadd.f32 %v801_v50, %v800_v42  ;;  %v795_v11 = vadd.f32 %v794_v51, %v793_v43 }
  0xc0   : > { %v625_v1 = vpop.xlane.xlu1 %624  ;;  %v620_v2 = vpop.xlane.xlu0 %619  ;;  %v815_v12 = vrot.slane %v814_v61, 2  ;;  %v808_v16 = vrot.slane %v807_v62, 2  ;;  %v827_v17 = vrot.slane %v826_v63, 4  ;;  %v820_v18 = vrot.slane %v819_v0, 4 }
  0xc1   : > { %v3655_v19 = vmul.f32 0.5, %v776_v58  ;;  %v790_v20 = vadd.f32 %v789_v59, %v788_v40  ;;  %v730_v21 = vmul.f32 0.00390625, %v625_v1  ;;  %v729_v22 = vmul.f32 0.00390625, %v620_v2 }
  0xc2   : > { %v783_v23 = vadd.f32 %v782_v60, %v781_v41  ;;  %v816_v24 = vadd.f32 %v815_v12, %v814_v61  ;;  %v828_v25 = vadd.f32 %v827_v17, %v826_v63  ;;  %v821_v27 = vadd.f32 %v820_v18, %v819_v0 }
  0xc3   : > { %v3657_v32 = vmul.f32 0.5, %v762_v5  ;;  %v803_v26 = vrot.slane %v802_v10, 1  ;;  %v840_v33 = vsel %vm555_vm0, %v730_v21, 0.0  ;;  %v833_v34 = vsel %vm555_vm0, %v729_v22, 0.0 }
  0xc4   : > { %v635_v28 = vpop.xlane.xlu1 %634  ;;  %v630_v29 = vpop.xlane.xlu0 %629  ;;  %v796_v35 = vrot.slane %v795_v11, 1  ;;  %v809_v36 = vadd.f32 %v808_v16, %v807_v62  ;;  %v829_v38 = vrot.slane %v828_v25, 2  ;;  %v822_v39 = vrot.slane %v821_v27, 2 }
  0xc5   : > { %v841_v40 = vrot.slane %v840_v33, 4  ;;  %v834_v42 = vrot.slane %v833_v34, 4  ;;  %v732_v43 = vmul.f32 0.00390625, %v635_v28  ;;  %v731_v41 = vmul.f32 0.00390625, %v630_v29 }
  0xc6   : > { %v3661_v44 = vmul.f32 0.5, %v790_v20  ;;  %v3663_v45 = vmul.f32 0.5, %v783_v23  ;;  %v817_v46 = vrot.slane %v816_v24, 1  ;;  %v830_v47 = vadd.f32 %v829_v38, %v828_v25 }
  0xc7   : > { %v842_v48 = vadd.f32 %v841_v40, %v840_v33  ;;  %v835_v49 = vadd.f32 %v834_v42, %v833_v34  ;;  %v854_v50 = vsel %vm555_vm0, %v732_v43, 0.0  ;;  %v847_v51 = vsel %vm555_vm0, %v731_v41, 0.0 }
  0xc8   : > { %v645_v52 = vpop.xlane.xlu1 %644  ;;  %v804_v53 = vadd.f32 %v803_v26, %v802_v10  ;;  %v797_v54 = vadd.f32 %v796_v35, %v795_v11  ;;  %v810_v55 = vrot.slane %v809_v36, 1  ;;  %v823_v58 = vadd.f32 %v822_v39, %v821_v27  ;;  %v640_v18 = vpop.xlane.xlu0 %639 }
  0xc9   : > { %v843_v59 = vrot.slane %v842_v48, 2  ;;  %v836_v60 = vrot.slane %v835_v49, 2  ;;  %v855_v61 = vrot.slane %v854_v50, 4  ;;  %v848_v62 = vrot.slane %v847_v51, 4 }
  0xca   : > { %v818_v63 = vadd.f32 %v817_v46, %v816_v24  ;;  %v831_v0 = vrot.slane %v830_v47, 1  ;;  %v3668_v1 = vsub.f32 %v3461_v8, %v974_v3  ;;  %v734_v2 = vmul.f32 0.00390625, %v645_v52 }
  0xcb   : > { %v844_v5 = vadd.f32 %v843_v59, %v842_v48  ;;  %v837_v12 = vadd.f32 %v836_v60, %v835_v49  ;;  %v856_v16 = vadd.f32 %v855_v61, %v854_v50  ;;  %v849_v17 = vadd.f32 %v848_v62, %v847_v51 }
  0xcc   : > { %v3670_v20 = vmul.f32 0.5, %v804_v53  ;;  %v824_v10 = vrot.slane %v823_v58, 1  ;;  %v1038_v11 = vmul.f32 %v3668_v1, %v3668_v1  ;;  %v868_v21 = vsel %vm555_vm0, %v734_v2, 0.0  ;;  %v655_v48 = vpop.xlane.xlu1 %654 }
  0xcd   : > { %v845_v22 = vrot.slane %v844_v5, 1  ;;  %v838_v23 = vrot.slane %v837_v12, 1  ;;  %v857_v24 = vrot.slane %v856_v16, 2  ;;  %v850_v25 = vrot.slane %v849_v17, 2 }
  0xce   : > { %v1108_v8 = vrot.slane %v1038_v11, %v3455_v6  ;;  %v869_v3 = vrot.slane %v868_v21, 4  ;;  %v733_v27 = vmul.f32 0.00390625, %v640_v18  ;;  %v3678_v28 = vsub.f32 %v3458_v7, %v3651_v56 }
  0xcf   : > { %v3680_v29 = vmul.f32 0.5, %v797_v54  ;;  %v3682_v26 = vmul.f32 0.5, %v818_v63  ;;  %v811_v33 = vadd.f32 %v810_v55, %v809_v36  ;;  %v832_v34 = vadd.f32 %v831_v0, %v830_v47  ;;  %v650_v36 = vpop.xlane.xlu0 %649 }
  0xd0   : > { %4686 = vst [vmem:[#allocation2_spill] sm:$0xff] %v3678_v28  ;;  %v825_v35 = vadd.f32 %v824_v10, %v823_v58  ;;  %v858_v38 = vadd.f32 %v857_v24, %v856_v16  ;;  %v1109_v39 = vcombine.high %v1108_v8, %v1108_v8  ;;  %v861_v40 = vsel %vm555_vm0, %v733_v27, 0.0 }
  0xd1   : > { %v846_v42 = vadd.f32 %v845_v22, %v844_v5  ;;  %v839_v43 = vadd.f32 %v838_v23, %v837_v12  ;;  %v851_v41 = vadd.f32 %v850_v25, %v849_v17  ;;  %v870_v46 = vadd.f32 %v869_v3, %v868_v21  ;;  %v665_v22 = vpop.xlane.xlu1 %664 }
  0xd2   : > { %v1422_v49 = vsel %vm555_vm0, %v1108_v8, 0.0  ;;  %v1423_v7 = vsel %vm555_vm0, %v1109_v39, 0.0  ;;  %v862_v56 = vrot.slane %v861_v40, 4  ;;  %v1040_v50 = vmul.f32 %v3678_v28, %v3678_v28 }
  0xd3   : > { %v3689_v47 = vmul.f32 0.5, %v811_v33  ;;  %v3691_v51 = vmul.f32 0.5, %v832_v34  ;;  %v1424_v52 = vadd.f32 %v1423_v7, %v1422_v49  ;;  %v3695_v53 = vsub.f32 %v3473_v13, %v3657_v32 }
  0xd4   : > { %v3697_v54 = vmul.f32 0.5, %v825_v35  ;;  %v859_v55 = vrot.slane %v858_v38, 1  ;;  %v1124_v58 = vrot.slane %v1040_v50, %v3455_v6  ;;  %v736_v59 = vmul.f32 0.00390625, %v655_v48 }
  0xd5   : > { %4687 = vst [vmem:[#allocation3_spill] sm:$0xff] %v3695_v53  ;;  %v3700_v60 = vmul.f32 0.5, %v846_v42  ;;  %1425 = vadd.xlane.f32.xlu0 %v1424_v52  ;;  %v871_v61 = vrot.slane %v870_v46, 2  ;;  %v1039_v62 = vmul.f32 %v3695_v53, %v3695_v53  ;;  %v735_v63 = vmul.f32 0.00390625, %v650_v36 }
  0xd6   : > { %v3704_v0 = vmul.f32 0.5, %v839_v43  ;;  %v852_v2 = vrot.slane %v851_v41, 1  ;;  %v863_v5 = vadd.f32 %v862_v56, %v861_v40  ;;  %v1125_v13 = vcombine.high %v1124_v58, %v1124_v58 }
  0xd7   : > { %v1116_v32 = vrot.slane %v1039_v62, %v3455_v6  ;;  %v882_v12 = vsel %vm555_vm0, %v736_v59, 0.0  ;;  %v875_v16 = vsel %vm555_vm0, %v735_v63, 0.0  ;;  %v3711_v17 = vsub.f32 %v3464_v9, %v3655_v19  ;;  %v660_v9 = vpop.xlane.xlu0 %659 }
  0xd8   : > { %v860_v18 = vadd.f32 %v859_v55, %v858_v38  ;;  %v1432_v10 = vsel %vm555_vm0, %v1124_v58, 0.0  ;;  %v1433_v11 = vsel %vm555_vm0, %v1125_v13, 0.0  ;;  %v883_v21 = vrot.slane %v882_v12, 4 }
  0xd9   : > { %v872_v23 = vadd.f32 %v871_v61, %v870_v46  ;;  %v1434_v24 = vadd.f32 %v1433_v11, %v1432_v10  ;;  %v1117_v25 = vcombine.high %v1116_v32, %v1116_v32  ;;  %v876_v8 = vrot.slane %v875_v16, 4 }
  0xda   : > { %v864_v3 = vrot.slane %v863_v5, 2  ;;  %v1427_v27 = vsel %vm555_vm0, %v1116_v32, 0.0  ;;  %v884_v33 = vadd.f32 %v883_v21, %v882_v12  ;;  %v1041_v34 = vmul.f32 %v3711_v17, %v3711_v17 }
  0xdb   : > { %1435 = vadd.xlane.f32.xlu0 %v1434_v24  ;;  %v1428_v19 = vsel %vm555_vm0, %v1117_v25, 0.0  ;;  %v877_v35 = vadd.f32 %v876_v8, %v875_v16  ;;  %v3721_v38 = vsub.f32 %v3479_v15, %v3663_v45  ;;  %v738_v39 = vmul.f32 0.00390625, %v665_v22  ;;  %v670_v24 = vpop.xlane.xlu0 %669 }
  0xdc   : > { %v853_v40 = vadd.f32 %v852_v2, %v851_v41  ;;  %v1429_v42 = vadd.f32 %v1428_v19, %v1427_v27  ;;  %v885_v43 = vrot.slane %v884_v33, 2  ;;  %v1132_v46 = vrot.slane %v1041_v34, %v3455_v6  ;;  %v675_v2 = vpop.xlane.xlu1 %674 }
  0xdd   : > { %4688 = vst [vmem:[#allocation4_spill] sm:$0xff] %v3721_v38  ;;  %v873_v48 = vrot.slane %v872_v23, 1  ;;  %v1042_v49 = vmul.f32 %v3721_v38, %v3721_v38  ;;  %v896_v7 = vsel %vm555_vm0, %v738_v39, 0.0  ;;  %v737_v56 = vmul.f32 0.00390625, %v660_v9 }
  0xde   : > { %v3727_v50 = vmul.f32 0.5, %v860_v18  ;;  %v865_v36 = vadd.f32 %v864_v3, %v863_v5  ;;  %1430 = vadd.xlane.f32.xlu1 %v1429_v42  ;;  %v878_v52 = vrot.slane %v877_v35, 2  ;;  %v1133_v15 = vcombine.high %v1132_v46, %v1132_v46 }
  0xdf   : > { %v886_v45 = vadd.f32 %v885_v43, %v884_v33  ;;  %v1140_v41 = vrot.slane %v1042_v49, %v3455_v6  ;;  %v897_v55 = vrot.slane %v896_v7, 4  ;;  %v889_v58 = vsel %vm555_vm0, %v737_v56, 0.0 }
  0xe0   : > { %v1437_v59 = vsel %vm555_vm0, %v1132_v46, 0.0  ;;  %v1438_v61 = vsel %vm555_vm0, %v1133_v15, 0.0  ;;  %v890_v62 = vrot.slane %v889_v58, 4  ;;  %v3735_v63 = vsub.f32 %v3476_v14, %v3661_v44 }
  0xe1   : > { %v3737_v5 = vmul.f32 0.5, %v853_v40  ;;  %v874_v13 = vadd.f32 %v873_v48, %v872_v23  ;;  %v1439_v32 = vadd.f32 %v1438_v61, %v1437_v59  ;;  %v1141_v12 = vcombine.high %v1140_v41, %v1140_v41  ;;  %v685_v61 = vpop.xlane.xlu1 %684 }
  0xe2   : > { %v866_v16 = vrot.slane %v865_v36, 1  ;;  %v898_v18 = vadd.f32 %v897_v55, %v896_v7  ;;  %v891_v10 = vadd.f32 %v890_v62, %v889_v58  ;;  %v1043_v11 = vmul.f32 %v3735_v63, %v3735_v63 }
  0xe3   : > { %1440 = vadd.xlane.f32.xlu1 %v1439_v32  ;;  %v1442_v21 = vsel %vm555_vm0, %v1140_v41, 0.0  ;;  %v1443_v22 = vsel %vm555_vm0, %v1141_v12, 0.0  ;;  %v3745_v14 = vsub.f32 %v3497_v31, %v3680_v29  ;;  %v740_v44 = vmul.f32 0.00390625, %v675_v2  ;;  %v680_v2 = vpop.xlane.xlu0 %679 }
  0xe4   : > { %v887_v23 = vrot.slane %v886_v45, 1  ;;  %v879_v25 = vadd.f32 %v878_v52, %v877_v35  ;;  %v1444_v8 = vadd.f32 %v1443_v22, %v1442_v21  ;;  %v899_v3 = vrot.slane %v898_v18, 2 }
  0xe5   : > { %4689 = vst [vmem:[#allocation5_spill] sm:$0xff] %v3745_v14  ;;  %v3747_v27 = vmul.f32 0.5, %v874_v13  ;;  %v1148_v33 = vrot.slane %v1043_v11, %v3455_v6  ;;  %v1044_v34 = vmul.f32 %v3745_v14, %v3745_v14  ;;  %v910_v9 = vsel %vm555_vm0, %v740_v44, 0.0 }
  0xe6   : > { %1445 = vadd.xlane.f32.xlu0 %v1444_v8  ;;  %v900_v19 = vadd.f32 %v899_v3, %v898_v18  ;;  %v892_v39 = vrot.slane %v891_v10, 2  ;;  %v911_v31 = vrot.slane %v910_v9, 4  ;;  %v739_v29 = vmul.f32 0.00390625, %v670_v24 }
  0xe7   : > { %v867_v40 = vadd.f32 %v866_v16, %v865_v36  ;;  %v1149_v42 = vcombine.high %v1148_v33, %v1148_v33  ;;  %v1156_v35 = vrot.slane %v1044_v34, %v3455_v6  ;;  %v3756_v43 = vsub.f32 %v3494_v30, %v3670_v20 }
  0xe8   : > { %v888_v46 = vadd.f32 %v887_v23, %v886_v45  ;;  %v880_v48 = vrot.slane %v879_v25, 1  ;;  %v912_v49 = vadd.f32 %v911_v31, %v910_v9  ;;  %v903_v7 = vsel %vm555_vm0, %v739_v29, 0.0 }
  0xe9   : > { %v1447_v56 = vsel %vm555_vm0, %v1148_v33, 0.0  ;;  %v1448_v52 = vsel %vm555_vm0, %v1149_v42, 0.0  ;;  %v1157_v15 = vcombine.high %v1156_v35, %v1156_v35  ;;  %v904_v41 = vrot.slane %v903_v7, 4 }
  0xea   : > { %v901_v55 = vrot.slane %v900_v19, 1  ;;  %v893_v36 = vadd.f32 %v892_v39, %v891_v10  ;;  %v1449_v58 = vadd.f32 %v1448_v52, %v1447_v56  ;;  %v1452_v59 = vsel %vm555_vm0, %v1156_v35, 0.0  ;;  %v690_v56 = vpop.xlane.xlu0 %689 }
  0xeb   : > { %v1453_v30 = vsel %vm555_vm0, %v1157_v15, 0.0  ;;  %v905_v20 = vadd.f32 %v904_v41, %v903_v7  ;;  %v1045_v45 = vmul.f32 %v3756_v43, %v3756_v43  ;;  %v3767_v62 = vsub.f32 %v3503_v37, %v3689_v47  ;;  %v3359_v47 = vld [vmem:[%s3452_s17 + $0x24] sm:$0xf] }
  0xec   : > { %v3769_v13 = vmul.f32 0.5, %v867_v40  ;;  %v3771_v32 = vadd.f32 %v880_v48, %v879_v25  ;;  %1450 = vadd.xlane.f32.xlu1 %v1449_v58  ;;  %v1454_v12 = vadd.f32 %v1453_v30, %v1452_v59  ;;  %v913_v16 = vrot.slane %v912_v49, 2  ;;  %v695_v40 = vpop.xlane.xlu1 %694 }
  0xed   : > { %4690 = vst [vmem:[#allocation6_spill] sm:$0xff] %v3767_v62  ;;  %v906_v18 = vrot.slane %v905_v20, 2  ;;  %v1164_v10 = vrot.slane %v1045_v45, %v3455_v6  ;;  %v1046_v11 = vmul.f32 %v3767_v62, %v3767_v62  ;;  %v742_v21 = vmul.f32 0.00390625, %v685_v61 }
  0xee   : > { %v3776_v22 = vmul.f32 0.5, %v888_v46  ;;  %v894_v44 = vrot.slane %v893_v36, 1  ;;  %1455 = vadd.xlane.f32.xlu0 %v1454_v12  ;;  %v741_v37 = vmul.f32 0.00390625, %v680_v2  ;;  %v3780_v24 = vsub.f32 %v3359_v47, %v3682_v26 }
  0xef   : > { %v3782_v23 = vadd.f32 %v901_v55, %v900_v19  ;;  %v1165_v25 = vcombine.high %v1164_v10, %v1164_v10  ;;  %v1172_v8 = vrot.slane %v1046_v11, %v3455_v6  ;;  %v3787_v3 = vsub.f32 %v3519_v57, %v3697_v54 }
  0xf0   : > { %v914_v33 = vadd.f32 %v913_v16, %v912_v49  ;;  %v924_v34 = vsel %vm555_vm0, %v742_v21, 0.0  ;;  %v917_v9 = vsel %vm555_vm0, %v741_v37, 0.0  ;;  %v1047_v39 = vmul.f32 %v3780_v24, %v3780_v24  ;;  %v705_v47 = vpop.xlane.xlu1 %704 }
  0xf1   : > { %4691 = vst [vmem:[#allocation7_spill] sm:$0xff] %v3787_v3  ;;  %v907_v31 = vadd.f32 %v906_v18, %v905_v20  ;;  %v1457_v26 = vsel %vm555_vm0, %v1164_v10, 0.0  ;;  %v1458_v19 = vsel %vm555_vm0, %v1165_v25, 0.0  ;;  %v1173_v29 = vcombine.high %v1172_v8, %v1172_v8 }
  0xf2   : > { %v895_v42 = vadd.f32 %v894_v44, %v893_v36  ;;  %v1459_v35 = vadd.f32 %v1458_v19, %v1457_v26  ;;  %v925_v46 = vrot.slane %v924_v34, 4  ;;  %v918_v57 = vrot.slane %v917_v9, 4  ;;  %v700_v26 = vpop.xlane.xlu0 %699 }
  0xf3   : > { %v1462_v54 = vsel %vm555_vm0, %v1172_v8, 0.0  ;;  %v1463_v48 = vsel %vm555_vm0, %v1173_v29, 0.0  ;;  %v1180_v49 = vrot.slane %v1047_v39, %v3455_v6  ;;  %v1048_v7 = vmul.f32 %v3787_v3, %v3787_v3 }
  0xf4   : > { %1460 = vadd.xlane.f32.xlu1 %v1459_v35  ;;  %v1464_v52 = vadd.f32 %v1463_v48, %v1462_v54  ;;  %v926_v15 = vadd.f32 %v925_v46, %v924_v34  ;;  %v919_v41 = vadd.f32 %v918_v57, %v917_v9  ;;  %v744_v55 = vmul.f32 0.00390625, %v695_v40  ;;  %v3360_v9 = vld [vmem:[%s3452_s17 + $0x2c] sm:$0xf]  ;;  %v3361_v35 = vld [vmem:[%s3452_s17 + $0x30] sm:$0xf] }
  0xf5   : > { %v915_v58 = vrot.slane %v914_v33, 1  ;;  %v908_v36 = vrot.slane %v907_v31, 1  ;;  %v1181_v59 = vcombine.high %v1180_v49, %v1180_v49  ;;  %v1188_v61 = vrot.slane %v1048_v7, %v3455_v6 }
  0xf6   : > { %1465 = vadd.xlane.f32.xlu0 %v1464_v52  ;;  %v927_v30 = vrot.slane %v926_v15, 2  ;;  %v1467_v20 = vsel %vm555_vm0, %v1180_v49, 0.0  ;;  %v938_v45 = vsel %vm555_vm0, %v744_v55, 0.0  ;;  %v743_v2 = vmul.f32 0.00390625, %v690_v56 }
  0xf7   : > { %v920_v12 = vrot.slane %v919_v41, 2  ;;  %v1468_v16 = vsel %vm555_vm0, %v1181_v59, 0.0  ;;  %v1189_v18 = vcombine.high %v1188_v61, %v1188_v61  ;;  %v939_v10 = vrot.slane %v938_v45, 4 }
  0xf8   : > { %v928_v11 = vadd.f32 %v927_v30, %v926_v15  ;;  %v1469_v21 = vadd.f32 %v1468_v16, %v1467_v20  ;;  %v1472_v44 = vsel %vm555_vm0, %v1188_v61, 0.0  ;;  %v931_v37 = vsel %vm555_vm0, %v743_v2, 0.0 }
  0xf9   : > { %v1473_v25 = vsel %vm555_vm0, %v1189_v18, 0.0  ;;  %v940_v8 = vadd.f32 %v939_v10, %v938_v45  ;;  %v932_v34 = vrot.slane %v931_v37, 4  ;;  %v3809_v39 = vsub.f32 %v3360_v9, %v3691_v51  ;;  %v715_v10 = vpop.xlane.xlu1 %714 }
  0xfa   : > { %v916_v19 = vadd.f32 %v915_v58, %v914_v33  ;;  %v909_v29 = vadd.f32 %v908_v36, %v907_v31  ;;  %1470 = vadd.xlane.f32.xlu1 %v1469_v21  ;;  %v1474_v40 = vadd.f32 %v1473_v25, %v1472_v44  ;;  %v3813_v46 = vsub.f32 %v3361_v35, %v3704_v0  ;;  %v710_v25 = vpop.xlane.xlu0 %709 }
  0xfb   : > { %v929_v57 = vrot.slane %v928_v11, 1  ;;  %v921_v54 = vadd.f32 %v920_v12, %v919_v41  ;;  %v1049_v48 = vmul.f32 %v3809_v39, %v3809_v39  ;;  %v746_v49 = vmul.f32 0.00390625, %v705_v47 }
  0xfc   : > { %v3818_v7 = vmul.f32 0.5, %v3771_v32  ;;  %1475 = vadd.xlane.f32.xlu0 %v1474_v40  ;;  %v933_v51 = vadd.f32 %v932_v34, %v931_v37  ;;  %v1050_v33 = vmul.f32 %v3813_v46, %v3813_v46  ;;  %v745_v31 = vmul.f32 0.00390625, %v700_v26  ;;  %v3362_v37 = vld [vmem:[%s3452_s17 + $0x34] sm:$0xf]  ;;  %v3363_v40 = vld [vmem:[%s3452_s17 + $0x38] sm:$0xf] }
  0xfd   : > { %v3823_v56 = vmul.f32 0.5, %v3782_v23  ;;  %v941_v0 = vrot.slane %v940_v8, 2  ;;  %v1196_v52 = vrot.slane %v1049_v48, %v3455_v6  ;;  %v952_v15 = vsel %vm555_vm0, %v746_v49, 0.0 }
  0xfe   : > { %v3827_v41 = vmul.f32 0.5, %v895_v42  ;;  %v3829_v55 = vmul.f32 0.5, %v916_v19  ;;  %v1204_v32 = vrot.slane %v1050_v33, %v3455_v6  ;;  %v953_v58 = vrot.slane %v952_v15, 4  ;;  %v3364_v33 = vld [vmem:[%s3452_s17 + $0x3c] sm:$0xf] }
  0xff   : > { %v3832_v36 = vmul.f32 0.5, %v909_v29  ;;  %v930_v59 = vadd.f32 %v929_v57, %v928_v11  ;;  %v922_v61 = vrot.slane %v921_v54, 1  ;;  %v1197_v30 = vcombine.high %v1196_v52, %v1196_v52 }
 0x100   : > { %v934_v23 = vrot.slane %v933_v51, 2  ;;  %v1205_v20 = vcombine.high %v1204_v32, %v1204_v32  ;;  %v954_v45 = vadd.f32 %v953_v58, %v952_v15  ;;  %v945_v2 = vsel %vm555_vm0, %v745_v31, 0.0 }
 0x101   : > { %v942_v12 = vadd.f32 %v941_v0, %v940_v8  ;;  %v1477_v42 = vsel %vm555_vm0, %v1196_v52, 0.0  ;;  %v1478_v16 = vsel %vm555_vm0, %v1197_v30, 0.0  ;;  %v946_v18 = vrot.slane %v945_v2, 4 }
 0x102   : > { %v1479_v21 = vadd.f32 %v1478_v16, %v1477_v42  ;;  %v1482_v44 = vsel %vm555_vm0, %v1204_v32, 0.0  ;;  %v1483_v11 = vsel %vm555_vm0, %v1205_v20, 0.0  ;;  %v3841_v47 = vsub.f32 %v3362_v37, %v3700_v60 }
 0x103   : > { %v923_v34 = vadd.f32 %v922_v61, %v921_v54  ;;  %v1484_v8 = vadd.f32 %v1483_v11, %v1482_v44  ;;  %v955_v9 = vrot.slane %v954_v45, 2  ;;  %v947_v26 = vadd.f32 %v946_v18, %v945_v2 }
 0x104   : > { %v935_v19 = vadd.f32 %v934_v23, %v933_v51  ;;  %1480 = vadd.xlane.f32.xlu1 %v1479_v21  ;;  %v1051_v29 = vmul.f32 %v3841_v47, %v3841_v47  ;;  %v3847_v35 = vsub.f32 %v3363_v40, %v3737_v5  ;;  %v748_v57 = vmul.f32 0.00390625, %v715_v10 }
 0x105   : > { %v3849_v48 = vmul.f32 0.5, %v930_v59  ;;  %1485 = vadd.xlane.f32.xlu0 %v1484_v8  ;;  %v948_v60 = vrot.slane %v947_v26, 2  ;;  %v747_v49 = vmul.f32 0.00390625, %v710_v25  ;;  %v3853_v54 = vsub.f32 %v3364_v33, %v3727_v50 }
 0x106   : > { %v943_v31 = vrot.slane %v942_v12, 1  ;;  %v1212_v51 = vrot.slane %v1051_v29, %v3455_v6  ;;  %v1052_v0 = vmul.f32 %v3847_v35, %v3847_v35  ;;  %v966_v52 = vsel %vm555_vm0, %v748_v57, 0.0 }
 0x107   : > { %v956_v5 = vadd.f32 %v955_v9, %v954_v45  ;;  %v967_v15 = vrot.slane %v966_v52, 4  ;;  %v959_v32 = vsel %vm555_vm0, %v747_v49, 0.0  ;;  %v1053_v58 = vmul.f32 %v3853_v54, %v3853_v54  ;;  %v3365_v9 = vld [vmem:[%s3452_s17 + $0x40] sm:$0xf] }
 0x108   : > { %v3862_v59 = vmul.f32 0.5, %v923_v34  ;;  %v936_v61 = vrot.slane %v935_v19, 1  ;;  %v1213_v50 = vcombine.high %v1212_v51, %v1212_v51  ;;  %v1220_v30 = vrot.slane %v1052_v0, %v3455_v6 }
 0x109   : > { %v949_v23 = vadd.f32 %v948_v60, %v947_v26  ;;  %v968_v20 = vadd.f32 %v967_v15, %v966_v52  ;;  %v960_v2 = vrot.slane %v959_v32, 4  ;;  %v1228_v42 = vrot.slane %v1053_v58, %v3455_v6  ;;  %v3367_v52 = vld [vmem:[%s3452_s17 + $0x48] sm:$0xf] }
 0x10a   : > { %v944_v16 = vadd.f32 %v943_v31, %v942_v12  ;;  %v1487_v45 = vsel %vm555_vm0, %v1212_v51, 0.0  ;;  %v1488_v18 = vsel %vm555_vm0, %v1213_v50, 0.0  ;;  %v1221_v10 = vcombine.high %v1220_v30, %v1220_v30  ;;  %v3366_v31 = vld [vmem:[%s3452_s17 + $0x44] sm:$0xf]  ;;  %v3368_v50 = vld [vmem:[%s3452_s17 + $0x4c] sm:$0xf] }
 0x10b   : > { %v957_v21 = vrot.slane %v956_v5, 1  ;;  %v1489_v44 = vadd.f32 %v1488_v18, %v1487_v45  ;;  %v969_v11 = vrot.slane %v968_v20, 2  ;;  %v961_v37 = vadd.f32 %v960_v2, %v959_v32  ;;  %v3369_v2 = vld [vmem:[%s3452_s17 + $0x50] sm:$0xf] }
 0x10c   : > { %v1492_v25 = vsel %vm555_vm0, %v1220_v30, 0.0  ;;  %v1493_v34 = vsel %vm555_vm0, %v1221_v10, 0.0  ;;  %v1229_v8 = vcombine.high %v1228_v42, %v1228_v42  ;;  %v3872_v26 = vsub.f32 %v3365_v9, %v3769_v13 }
 0x10d   : > { %v937_v12 = vadd.f32 %v936_v61, %v935_v19  ;;  %v950_v29 = vrot.slane %v949_v23, 1  ;;  %1490 = vadd.xlane.f32.xlu1 %v1489_v44  ;;  %v1494_v40 = vadd.f32 %v1493_v34, %v1492_v25  ;;  %v970_v57 = vadd.f32 %v969_v11, %v968_v20 }
 0x10e   : > { %4692 = vst [vmem:[#allocation8_spill] sm:$0xff] %v3872_v26  ;;  %v1497_v60 = vsel %vm555_vm0, %v1228_v42, 0.0  ;;  %v1498_v49 = vsel %vm555_vm0, %v1229_v8, 0.0  ;;  %v1054_v33 = vmul.f32 %v3872_v26, %v3872_v26  ;;  %v3880_v51 = vsub.f32 %v3366_v31, %v3747_v27 }
 0x10f   : > { %v958_v13 = vadd.f32 %v957_v21, %v956_v5  ;;  %1495 = vadd.xlane.f32.xlu0 %v1494_v40  ;;  %v962_v19 = vrot.slane %v961_v37, 2  ;;  %v1499_v0 = vadd.f32 %v1498_v49, %v1497_v60  ;;  %v3884_v15 = vsub.f32 %v3367_v52, %v3818_v7 }
 0x110   : > { %4693 = vst [vmem:[#allocation9_spill] sm:$0xff] %v3880_v51  ;;  %v3886_v32 = vmul.f32 0.5, %v944_v16  ;;  %v1236_v58 = vrot.slane %v1054_v33, %v3455_v6  ;;  %v1055_v61 = vmul.f32 %v3880_v51, %v3880_v51  ;;  %v3893_v27 = vsub.f32 %v3368_v50, %v3776_v22 }
 0x111   : > { %v951_v30 = vadd.f32 %v950_v29, %v949_v23  ;;  %v971_v5 = vrot.slane %v970_v57, 1  ;;  %1500 = vadd.xlane.f32.xlu1 %v1499_v0  ;;  %v1056_v20 = vmul.f32 %v3884_v15, %v3884_v15  ;;  %v3899_v7 = vsub.f32 %v3369_v2, %v3827_v41 }
 0x112   : > { %v1000_v42 = vmul.f32 0.5, %v937_v12  ;;  %v1237_v16 = vcombine.high %v1236_v58, %v1236_v58  ;;  %v1244_v45 = vrot.slane %v1055_v61, %v3455_v6  ;;  %v1057_v18 = vmul.f32 %v3893_v27, %v3893_v27 }
 0x113   : > { %v3904_v10 = vmul.f32 0.5, %v958_v13  ;;  %v963_v22 = vadd.f32 %v962_v19, %v961_v37  ;;  %v1252_v23 = vrot.slane %v1056_v20, %v3455_v6  ;;  %v1058_v21 = vmul.f32 %v3899_v7, %v3899_v7  ;;  %v3370_v13 = vld [vmem:[%s3452_s17 + $0x54] sm:$0xf] }
 0x114   : > { %v1502_v44 = vsel %vm555_vm0, %v1236_v58, 0.0  ;;  %v1503_v41 = vsel %vm555_vm0, %v1237_v16, 0.0  ;;  %v1245_v11 = vcombine.high %v1244_v45, %v1244_v45  ;;  %v1260_v25 = vrot.slane %v1057_v18, %v3455_v6  ;;  %v3372_v16 = vld [vmem:[%s3452_s17 + $0x5c] sm:$0xf]  ;;  %v3373_v18 = vld [vmem:[%s3452_s17 + $0x60] sm:$0xf] }
 0x115   : > { %v3912_v34 = vmul.f32 0.5, %v951_v30  ;;  %v972_v8 = vadd.f32 %v971_v5, %v970_v57  ;;  %v1504_v9 = vadd.f32 %v1503_v41, %v1502_v44  ;;  %v1253_v12 = vcombine.high %v1252_v23, %v1252_v23  ;;  %v3371_v5 = vld [vmem:[%s3452_s17 + $0x58] sm:$0xf]  ;;  %v3374_v41 = vld [vmem:[%s3452_s17 + $0x64] sm:$0xf] }
 0x116   : > { %v1507_v37 = vsel %vm555_vm0, %v1244_v45, 0.0  ;;  %v1508_v29 = vsel %vm555_vm0, %v1245_v11, 0.0  ;;  %v1261_v40 = vcombine.high %v1260_v25, %v1260_v25  ;;  %v1268_v60 = vrot.slane %v1058_v21, %v3455_v6 }
 0x117   : > { %1505 = vadd.xlane.f32.xlu0 %v1504_v9  ;;  %v1509_v49 = vadd.f32 %v1508_v29, %v1507_v37  ;;  %v1512_v33 = vsel %vm555_vm0, %v1252_v23, 0.0  ;;  %v1513_v31 = vsel %vm555_vm0, %v1253_v12, 0.0  ;;  %v3921_v57 = vsub.f32 %v3370_v13, %v3823_v56  ;;  %v3376_v13 = vld [vmem:[%s3452_s17 + $0x6c] sm:$0xf] }
 0x118   : > { %v964_v19 = vrot.slane %v963_v22, 1  ;;  %v1514_v0 = vadd.f32 %v1513_v31, %v1512_v33  ;;  %v1518_v52 = vsel %vm555_vm0, %v1261_v40, 0.0  ;;  %v1269_v58 = vcombine.high %v1268_v60, %v1268_v60 }
 0x119   : > { %1510 = vadd.xlane.f32.xlu1 %v1509_v49  ;;  %v1517_v61 = vsel %vm555_vm0, %v1260_v25, 0.0  ;;  %v1522_v50 = vsel %vm555_vm0, %v1268_v60, 0.0  ;;  %v1059_v30 = vmul.f32 %v3921_v57, %v3921_v57  ;;  %v3930_v20 = vsub.f32 %v3371_v5, %v3832_v36 }
 0x11a   : > { %v1519_v56 = vadd.f32 %v1518_v52, %v1517_v61  ;;  %v1523_v2 = vsel %vm555_vm0, %v1269_v58, 0.0  ;;  %v3935_v45 = vsub.f32 %v3372_v16, %v3829_v55  ;;  %v3939_v23 = vsub.f32 %v3373_v18, %v3862_v59  ;;  %v3375_v59 = vld [vmem:[%s3452_s17 + $0x68] sm:$0xf] }
 0x11b   : > { %1515 = vadd.xlane.f32.xlu0 %v1514_v0  ;;  %v1524_v21 = vadd.f32 %v1523_v2, %v1522_v50  ;;  %v1276_v44 = vrot.slane %v1059_v30, %v3455_v6  ;;  %v1060_v36 = vmul.f32 %v3930_v20, %v3930_v20  ;;  %v3946_v11 = vsub.f32 %v3374_v41, %v3849_v48 }
 0x11c   : > { %v965_v25 = vadd.f32 %v964_v19, %v963_v22  ;;  %v1061_v55 = vmul.f32 %v3935_v45, %v3935_v45  ;;  %v1062_v9 = vmul.f32 %v3939_v23, %v3939_v23  ;;  %v3953_v12 = vsub.f32 %v3375_v59, %v1000_v42 }
 0x11d   : > { %v1005_v37 = vmul.f32 0.5, %v972_v8  ;;  %1520 = vadd.xlane.f32.xlu1 %v1519_v56  ;;  %v1277_v29 = vcombine.high %v1276_v44, %v1276_v44  ;;  %v1284_v40 = vrot.slane %v1060_v36, %v3455_v6  ;;  %v1063_v48 = vmul.f32 %v3946_v11, %v3946_v11 }
 0x11e   : > { %v1527_v22 = vsel %vm555_vm0, %v1276_v44, 0.0  ;;  %v1292_v60 = vrot.slane %v1061_v55, %v3455_v6  ;;  %v1300_v49 = vrot.slane %v1062_v9, %v3455_v6  ;;  %v1064_v33 = vmul.f32 %v3953_v12, %v3953_v12  ;;  %v3377_v9 = vld [vmem:[%s3452_s17 + $0x70] sm:$0xf] }
 0x11f   : > { %1525 = vadd.xlane.f32.xlu0 %v1524_v21  ;;  %v1528_v42 = vsel %vm555_vm0, %v1277_v29, 0.0  ;;  %v1285_v8 = vcombine.high %v1284_v40, %v1284_v40  ;;  %v1308_v31 = vrot.slane %v1063_v48, %v3455_v6  ;;  %v3967_v19 = vsub.f32 %v3376_v13, %v3886_v32 }
 0x120   : > { %v1004_v0 = vmul.f32 0.5, %v965_v25  ;;  %v1529_v52 = vadd.f32 %v1528_v42, %v1527_v22  ;;  %v1293_v58 = vcombine.high %v1292_v60, %v1292_v60  ;;  %v1301_v61 = vcombine.high %v1300_v49, %v1300_v49  ;;  %v3379_v22 = vld [vmem:[%s3452_s17 + $0x78] sm:$0xf] }
 0x121   : > { %v1532_v50 = vsel %vm555_vm0, %v1284_v40, 0.0  ;;  %v1533_v30 = vsel %vm555_vm0, %v1285_v8, 0.0  ;;  %v1537_v5 = vsel %vm555_vm0, %v1292_v60, 0.0  ;;  %v1309_v56 = vcombine.high %v1308_v31, %v1308_v31  ;;  %v3378_v40 = vld [vmem:[%s3452_s17 + $0x74] sm:$0xf] }
 0x122   : > { %1530 = vadd.xlane.f32.xlu1 %v1529_v52  ;;  %v1534_v2 = vadd.f32 %v1533_v30, %v1532_v50  ;;  %v1538_v16 = vsel %vm555_vm0, %v1293_v58, 0.0  ;;  %v1543_v32 = vsel %vm555_vm0, %v1301_v61, 0.0  ;;  %v1316_v18 = vrot.slane %v1064_v33, %v3455_v6  ;;  %v3380_v8 = vld [vmem:[%s3452_s17 + $0x7c] sm:$0xf] }
 0x123   : > { %v1539_v21 = vadd.f32 %v1538_v16, %v1537_v5  ;;  %v1542_v44 = vsel %vm555_vm0, %v1300_v49, 0.0  ;;  %v1065_v36 = vmul.f32 %v3967_v19, %v3967_v19  ;;  %v1548_v25 = vsel %vm555_vm0, %v1309_v56, 0.0 }
 0x124   : > { %1535 = vadd.xlane.f32.xlu0 %v1534_v2  ;;  %v1544_v41 = vadd.f32 %v1543_v32, %v1542_v44  ;;  %v1317_v55 = vcombine.high %v1316_v18, %v1316_v18  ;;  %v3981_v59 = vsub.f32 %v3377_v9, %v3912_v34  ;;  %v3986_v48 = vsub.f32 %v3378_v40, %v3904_v10  ;;  %v4009_v2 = vpop.permute.xlu1 %2004 }
 0x125   : > { %v1324_v29 = vrot.slane %v1065_v36, %v3455_v6  ;;  %v3989_v60 = vsub.f32 %v3379_v22, %v1004_v0  ;;  %v1547_v49 = vsel %vm555_vm0, %v1308_v31, 0.0  ;;  %v3996_v34 = vsub.f32 %v3380_v8, %v1005_v37 }
 0x126   : > { %4694 = vst [vmem:[#allocation10_spill] sm:$0xff] %v3981_v59  ;;  %4695 = vst [vmem:[#allocation11_spill] sm:$0xff] %v3986_v48  ;;  %1540 = vadd.xlane.f32.xlu1 %v1539_v21  ;;  %v1553_v33 = vsel %vm555_vm0, %v1317_v55, 0.0  ;;  %v1066_v42 = vmul.f32 %v3981_v59, %v3981_v59  ;;  %v1549_v13 = vadd.f32 %v1548_v25, %v1547_v49  ;;  %v1552_v52 = vsel %vm555_vm0, %v1316_v18, 0.0 }
 0x127   : > { %4696 = vst [vmem:[#allocation12_spill] sm:$0xff] %v3989_v60  ;;  %4697 = vst [vmem:[#allocation13_spill] sm:$0xff] %v3996_v34  ;;  %v1325_v58 = vcombine.high %v1324_v29, %v1324_v29  ;;  %v1067_v10 = vmul.f32 %v3986_v48, %v3986_v48  ;;  %v1554_v0 = vadd.f32 %v1553_v33, %v1552_v52  ;;  %v1557_v16 = vsel %vm555_vm0, %v1324_v29, 0.0 }
 0x128   : > { %1545 = vadd.xlane.f32.xlu0 %v1544_v41  ;;  %v1332_v61 = vrot.slane %v1066_v42, %v3455_v6  ;;  %v1068_v31 = vmul.f32 %v3989_v60, %v3989_v60  ;;  %v1069_v50 = vmul.f32 %v3996_v34, %v3996_v34  ;;  %v4019_v33 = vpop.permute.xlu1 %2008 }
 0x129   : > { %v1558_v37 = vsel %vm555_vm0, %v1325_v58, 0.0  ;;  %v1340_v30 = vrot.slane %v1067_v10, %v3455_v6  ;;  %4698 = vst [vmem:[#allocation14_spill] sm:$0xff] %v4019_v33 }
 0x12a   : > { %1550 = vadd.xlane.f32.xlu1 %v1549_v13  ;;  %v1333_v5 = vcombine.high %v1332_v61, %v1332_v61  ;;  %v1348_v56 = vrot.slane %v1068_v31, %v3455_v6  ;;  %v1356_v18 = vrot.slane %v1069_v50, %v3455_v6  ;;  %v1559_v21 = vadd.f32 %v1558_v37, %v1557_v16  ;;  %v1984_v31 = vld [vmem:[%s4671_s1 + $0x24] sm:$0x3]  ;;  %v1985_v37 = vld [vmem:[%s4671_s1 + $0x26] sm:$0x3]  ;;  %v1988_v16 = vld [vmem:[%s4671_s1 + $0x2c] sm:$0x3] }
 0x12b   : > { %v1341_v32 = vcombine.high %v1340_v30, %v1340_v30  ;;  %v1562_v44 = vsel %vm555_vm0, %v1332_v61, 0.0  ;;  %v1567_v22 = vsel %vm555_vm0, %v1340_v30, 0.0  ;;  %v1983_v61 = vld [vmem:[%s4671_s1 + $0x22] sm:$0x3]  ;;  %v1986_v30 = vld [vmem:[%s4671_s1 + $0x28] sm:$0x3] }
 0x12c   : > { %1555 = vadd.xlane.f32.xlu0 %v1554_v0  ;;  %v1563_v36 = vsel %vm555_vm0, %v1333_v5, 0.0  ;;  %v1349_v41 = vcombine.high %v1348_v56, %v1348_v56  ;;  %v1357_v9 = vcombine.high %v1356_v18, %v1356_v18  ;;  %v1572_v29 = vsel %vm555_vm0, %v1348_v56, 0.0  ;;  %v4023_v52 = vpop.permute.xlu1 %2012  ;;  %v1982_v0 = vld [vmem:[%s4671_s1 + $0x20] sm:$0x3]  ;;  %v1987_v56 = vld [vmem:[%s4671_s1 + $0x2a] sm:$0x3] }
 0x12d   : > { %v1564_v25 = vadd.f32 %v1563_v36, %v1562_v44  ;;  %v1568_v55 = vsel %vm555_vm0, %v1341_v32, 0.0  ;;  %v1577_v8 = vsel %vm555_vm0, %v1356_v18, 0.0  ;;  %v4054_v32 = vpop.permute.xlu0 %2000  ;;  %v1989_v18 = vld [vmem:[%s4671_s1 + $0x2e] sm:$0x3]  ;;  %v1991_v36 = vld [vmem:[%s4671_s1 + $0x32] sm:$0x3] }
 0x12e   : > { %1560 = vadd.xlane.f32.xlu1 %v1559_v21  ;;  %v1573_v40 = vsel %vm555_vm0, %v1349_v41, 0.0  ;;  %v1569_v6 = vadd.f32 %v1568_v55, %v1567_v22  ;;  %v1578_v42 = vsel %vm555_vm0, %v1357_v9, 0.0  ;;  %4701 = vst [vmem:[#allocation17_spill] sm:$0xff] %v4054_v32  ;;  %v1990_v21 = vld [vmem:[%s4671_s1 + $0x30] sm:$0x3] }
 0x12f   : > { %v1574_v49 = vadd.f32 %v1573_v40, %v1572_v29  ;;  %v1579_v13 = vadd.f32 %v1578_v42, %v1577_v8  ;;  %v1993_v9 = vld [vmem:[%s4671_s1 + $0x36] sm:$0x3]  ;;  %v1994_v40 = vld [vmem:[%s4671_s1 + $0x38] sm:$0x3]  ;;  %v1995_v29 = vld [vmem:[%s4671_s1 + $0x3a] sm:$0x3] }
 0x130   : > { %1565 = vadd.xlane.f32.xlu0 %v1564_v25  ;;  %v4025_v58 = vpop.permute.xlu1 %2016  ;;  %v1992_v25 = vld [vmem:[%s4671_s1 + $0x34] sm:$0x3]  ;;  %v1997_v42 = vld [vmem:[%s4671_s1 + $0x3e] sm:$0x3] }
 0x131   : > { %4699 = vst [vmem:[#allocation15_spill] sm:$0xff] %v4025_v58  ;;  %v4067_v41 = vpop.permute.xlu0 %2036 }
 0x132   : > { %1570 = vadd.xlane.f32.xlu1 %v1569_v6  ;;  %v1996_v6 = vld [vmem:[%s4671_s1 + $0x3c] sm:$0x3] }
 0x134   : > { %1575 = vadd.xlane.f32.xlu0 %v1574_v49  ;;  %v4027_v10 = vpop.permute.xlu1 %2020 }
 0x135   : > { %v4080_v22 = vpop.permute.xlu0 %2044 }
 0x136   : > { %1580 = vadd.xlane.f32.xlu1 %v1579_v13  ;;  %v2414_v13 = vld [vmem:[%s4672_s2] sm:$0x3] }
 0x138   : > { %v4038_v50 = vpop.permute.xlu1 %2024 }
 0x139   : > { %4700 = vst [vmem:[#allocation16_spill] sm:$0xff] %v4038_v50  ;;  %v4093_v8 = vpop.permute.xlu0 %2052 }
 0x13c   : > { %v4046_v5 = vpop.permute.xlu1 %2028 }
 0x140   : > { %v4062_v44 = vpop.permute.xlu1 %2032 }
 0x141   : > { %4702 = vst [vmem:[#allocation18_spill] sm:$0xff] %v4062_v44 }
 0x144   : > { %v4072_v55 = vpop.permute.xlu1 %2040 }
 0x145   : > { %4703 = vst [vmem:[#allocation19_spill] sm:$0xff] %v4072_v55  ;;  %v2428_v55 = vld [vmem:[%s4672_s2 + $0x1c] sm:$0x3] }
 0x147   : > { %2064 = vperm.xlu1 %3166, %v1982_v0  }
 0x148   : > { %v4088_v49 = vpop.permute.xlu1 %2048 }
 0x14a   : > { %2068 = vperm.xlu0 %3165, %v1983_v61   ;;  %v2415_v61 = vld [vmem:[%s4672_s2 + $0x2] sm:$0x3] }
 0x14b   : > { %2072 = vperm.xlu1 %3166, %v1984_v31   ;;  %v2416_v31 = vld [vmem:[%s4672_s2 + $0x4] sm:$0x3] }
 0x14c   : > { %v4098_v0 = vpop.permute.xlu1 %2056 }
 0x14e   : > { %2076 = vperm.xlu0 %3165, %v1985_v37   ;;  %v4106_v37 = vpop.permute.xlu0 %2060 }
 0x14f   : > { %2080 = vperm.xlu1 %3166, %v1986_v30   ;;  %v2417_v30 = vld [vmem:[%s4672_s2 + $0x6] sm:$0x3] }
 0x152   : > { %2084 = vperm.xlu0 %3165, %v1987_v56  }
 0x153   : > { %2088 = vperm.xlu1 %3166, %v1988_v16   ;;  %v2418_v16 = vld [vmem:[%s4672_s2 + $0x8] sm:$0x3] }
 0x156   : > { %2092 = vperm.xlu0 %3165, %v1989_v18  }
 0x157   : > { %2096 = vperm.xlu1 %3166, %v1990_v21   ;;  %v2419_v21 = vld [vmem:[%s4672_s2 + $0xa] sm:$0x3] }
 0x15a   : > { %2100 = vperm.xlu0 %3165, %v1991_v36   ;;  %v2420_v36 = vld [vmem:[%s4672_s2 + $0xc] sm:$0x3] }
 0x15b   : > { %2104 = vperm.xlu1 %3166, %v1992_v25  }
 0x15e   : > { %2108 = vperm.xlu0 %3165, %v1993_v9  }
 0x15f   : > { %2112 = vperm.xlu1 %3166, %v1994_v40   ;;  %v2421_v40 = vld [vmem:[%s4672_s2 + $0xe] sm:$0x3] }
 0x162   : > { %2116 = vperm.xlu0 %3165, %v1995_v29   ;;  %v1426_v18 = vpop.xlane.xlu0 %1425 }
 0x163   : > { %2120 = vperm.xlu1 %3166, %v1996_v6   ;;  %v2422_v6 = vld [vmem:[%s4672_s2 + $0x10] sm:$0x3] }
 0x166   : > { %2124 = vperm.xlu0 %3165, %v1997_v42  }
 0x167   : > { %2448 = vperm.xlu1 %3166, %v2414_v13  }
 0x168   : > { %v1436_v42 = vpop.xlane.xlu0 %1435 }
 0x16a   : > { %2452 = vperm.xlu0 %3165, %v2415_v61  }
 0x16b   : > { %2456 = vperm.xlu1 %3166, %v2416_v31   ;;  %v1431_v56 = vpop.xlane.xlu1 %1430  ;;  %v2423_v31 = vld [vmem:[%s4672_s2 + $0x12] sm:$0x3] }
 0x16c   : > { %v1583_v44 = vmul.f32 0.00390625, %v1431_v56 }
 0x16e   : > { %2460 = vperm.xlu0 %3165, %v2417_v30   ;;  %v2424_v30 = vld [vmem:[%s4672_s2 + $0x14] sm:$0x3] }
 0x16f   : > { %2464 = vperm.xlu1 %3166, %v2418_v16  }
 0x170   : > { %v1441_v25 = vpop.xlane.xlu1 %1440 }
 0x171   : > { %v1585_v9 = vmul.f32 0.00390625, %v1441_v25 }
 0x172   : > { %2468 = vperm.xlu0 %3165, %v2419_v21  }
 0x173   : > { %2472 = vperm.xlu1 %3166, %v2420_v36   ;;  %v1635_v29 = vsel %vm555_vm0, %v1585_v9, 0.0  ;;  %v1446_v25 = vpop.xlane.xlu0 %1445 }
 0x174   : > { %v1636_v13 = vrot.slane %v1635_v29, 4 }
 0x176   : > { %2476 = vperm.xlu0 %3165, %v2421_v40   ;;  %v1637_v61 = vadd.f32 %v1636_v13, %v1635_v29  ;;  %v2425_v40 = vld [vmem:[%s4672_s2 + $0x16] sm:$0x3]  ;;  %v1582_v29 = vmul.f32 0.00390625, %v1426_v18  ;;  %v3413_v18 = vmov 269488144  }
 0x177   : > { %2480 = vperm.xlu1 %3166, %v2422_v6   ;;  %v2426_v6 = vld [vmem:[%s4672_s2 + $0x18] sm:$0x3] }
 0x178   : > { %v1638_v16 = vrot.slane %v1637_v61, 2 }
 0x179   : > { %v1451_v21 = vpop.xlane.xlu1 %1450 }
 0x17a   : > { %2484 = vperm.xlu0 %3165, %v2423_v31   ;;  %v1639_v36 = vadd.f32 %v1638_v16, %v1637_v61  ;;  %v1587_v9 = vmul.f32 0.00390625, %v1451_v21  ;;  %v2427_v61 = vld [vmem:[%s4672_s2 + $0x1a] sm:$0x3]  ;;  %v1614_v31 = vsel %vm555_vm0, %v1582_v29, 0.0  ;;  %v2127_v21 = vunpack.c.l.s4 %v3413_v18 }
 0x17b   : > { %2488 = vperm.xlu1 %3166, %v2424_v30   ;;  %v1584_v30 = vmul.f32 0.00390625, %v1436_v42 }
 0x17c   : > { %v1640_v13 = vrot.slane %v1639_v36, 1  ;;  %v1649_v59 = vsel %vm555_vm0, %v1587_v9, 0.0  ;;  %v1456_v9 = vpop.xlane.xlu0 %1455  ;;  %v2128_v18 = vunpack.c.0.s8 %v2127_v21 }
 0x17d   : > { %v1650_v51 = vrot.slane %v1649_v59, 4  ;;  %v1588_v29 = vmul.f32 0.00390625, %v1456_v9 }
 0x17e   : > { %2492 = vperm.xlu0 %3165, %v2425_v40   ;;  %v1641_v26 = vadd.f32 %v1640_v13, %v1639_v36  ;;  %v1586_v40 = vmul.f32 0.00390625, %v1446_v25  ;;  %v1615_v13 = vrot.slane %v1614_v31, 4 }
 0x17f   : > { %2496 = vperm.xlu1 %3166, %v2426_v6   ;;  %v1651_v16 = vadd.f32 %v1650_v51, %v1649_v59  ;;  %v2429_v51 = vld [vmem:[%s4672_s2 + $0x1e] sm:$0x3]  ;;  %v1628_v59 = vsel %vm555_vm0, %v1584_v30, 0.0 }
 0x180   : > { %v1841_v3 = vmul.f32 0.5, %v1641_v26  ;;  %v2430_v26 = vld [vmem:[%s4672_s2 + $0x20] sm:$0x3]  ;;  %v1629_v14 = vrot.slane %v1628_v59, 4 }
 0x181   : > { %v1652_v36 = vrot.slane %v1651_v16, 2  ;;  %v1461_v6 = vpop.xlane.xlu1 %1460 }
 0x182   : > { %2500 = vperm.xlu0 %3165, %v2427_v61   ;;  %v1873_v62 = vadd.f32 1e-05, %v1841_v3  ;;  %v1589_v50 = vmul.f32 0.00390625, %v1461_v6  ;;  %v1621_v3 = vsel %vm555_vm0, %v1583_v44, 0.0  ;;  %v1616_v6 = vadd.f32 %v1615_v13, %v1614_v31  ;;  %v2432_v44 = vld [vmem:[%s4672_s2 + $0x24] sm:$0x3] }
 0x183   : > { %2504 = vperm.xlu1 %3166, %v2428_v55   ;;  %v1653_v42 = vadd.f32 %v1652_v36, %v1651_v16  ;;  %v1642_v55 = vsel %vm555_vm0, %v1586_v40, 0.0  ;;  %v1466_v30 = vpop.xlane.xlu0 %1465  ;;  %v2431_v16 = vld [vmem:[%s4672_s2 + $0x22] sm:$0x3]  ;;  %v1622_v36 = vrot.slane %v1621_v3, 4  ;;  %v4165_v13 = vsub.s32 %v2128_v18, %v3444_v4  ;;  %v2434_v4 = vld [vmem:[%s4672_s2 + $0x28] sm:$0x3] }
 0x184   : > { %3167 = vrsqrt.f32 %v1873_v62  ;;  %v1663_v56 = vsel %vm555_vm0, %v1589_v50, 0.0  ;;  %v1656_v62 = vsel %vm555_vm0, %v1588_v29, 0.0  ;;  %v1643_v40 = vrot.slane %v1642_v55, 4 }
 0x185   : > { %v1654_v25 = vrot.slane %v1653_v42, 1  ;;  %v1664_v61 = vrot.slane %v1663_v56, 4  ;;  %v1617_v58 = vrot.slane %v1616_v6, 2  ;;  %v1630_v38 = vadd.f32 %v1629_v14, %v1628_v59 }
 0x186   : > { %2508 = vperm.xlu0 %3165, %v2429_v51   ;;  %v1644_v33 = vadd.f32 %v1643_v40, %v1642_v55 }
 0x187   : > { %2512 = vperm.xlu1 %3166, %v2430_v26   ;;  %v1655_v21 = vadd.f32 %v1654_v25, %v1653_v42  ;;  %v1665_v9 = vadd.f32 %v1664_v61, %v1663_v56  ;;  %v1471_v50 = vpop.xlane.xlu1 %1470  ;;  %v1657_v42 = vrot.slane %v1656_v62, 4  ;;  %v2433_v56 = vld [vmem:[%s4672_s2 + $0x26] sm:$0x3] }
 0x188   : > { %v1591_v31 = vmul.f32 0.00390625, %v1471_v50  ;;  %v1623_v50 = vadd.f32 %v1622_v36, %v1621_v3  ;;  %v2435_v3 = vld [vmem:[%s4672_s2 + $0x2a] sm:$0x3] }
 0x189   : > { %v1843_v51 = vmul.f32 0.5, %v1655_v21  ;;  %v1666_v26 = vrot.slane %v1665_v9, 2  ;;  %v1476_v18 = vpop.xlane.xlu0 %1475  ;;  %v2153_v21 = vrot.slane %v4023_v52, %v4165_v13  ;;  %v2436_v52 = vld [vmem:[%s4672_s2 + $0x2c] sm:$0x3] }
 0x18a   : > { %2516 = vperm.xlu0 %3165, %v2431_v16   ;;  %v1677_v29 = vsel %vm555_vm0, %v1591_v31, 0.0  ;;  %v1631_v31 = vrot.slane %v1630_v38, 2 }
 0x18b   : > { %2520 = vperm.xlu1 %3166, %v2432_v44   ;;  %v1875_v25 = vadd.f32 1e-05, %v1843_v51  ;;  %v1667_v61 = vadd.f32 %v1666_v26, %v1665_v9  ;;  %v1678_v34 = vrot.slane %v1677_v29, 4  ;;  %v1618_v44 = vadd.f32 %v1617_v58, %v1616_v6 }
 0x18c   : > { %v1658_v51 = vadd.f32 %v1657_v42, %v1656_v62  ;;  %v1590_v9 = vmul.f32 0.00390625, %v1466_v30  ;;  %v1624_v26 = vrot.slane %v1623_v50, 2  ;;  %v2437_v30 = vld [vmem:[%s4672_s2 + $0x2e] sm:$0x3] }
 0x18d   : > { %3169 = vrsqrt.f32 %v1875_v25  ;;  %v1668_v14 = vrot.slane %v1667_v61, 1  ;;  %v1679_v59 = vadd.f32 %v1678_v34, %v1677_v29  ;;  %v1645_v34 = vrot.slane %v1644_v33, 2 }
 0x18e   : > { %v3168_v16 = vpop.eup %3167  ;;  %2524 = vperm.xlu0 %3165, %v2433_v56   ;;  %v1619_v42 = vrot.slane %v1618_v44, 1  ;;  %v1632_v56 = vadd.f32 %v1631_v31, %v1630_v38  ;;  %v1659_v25 = vrot.slane %v1658_v51, 2  ;;  %v2438_v38 = vld [vmem:[%s4672_s2 + $0x30] sm:$0x3] }
 0x18f   : > { %2528 = vperm.xlu1 %3166, %v2434_v4   ;;  %v1669_v55 = vadd.f32 %v1668_v14, %v1667_v61  ;;  %v1680_v36 = vrot.slane %v1679_v59, 2  ;;  %v1937_v40 = vmul.f32 %v3168_v16, %v3711_v17  ;;  %v1670_v14 = vsel %vm555_vm0, %v1590_v9, 0.0 }
 0x191   : > { %v1845_v58 = vmul.f32 0.5, %v1669_v55  ;;  %v1681_v6 = vadd.f32 %v1680_v36, %v1679_v59  ;;  %v1481_v29 = vpop.xlane.xlu1 %1480  ;;  %v4183_v62 = vmul.f32 %v2153_v21, %v1937_v40  ;;  %v1625_v59 = vadd.f32 %v1624_v26, %v1623_v50 }
 0x192   : > { %2532 = vperm.xlu0 %3165, %v2435_v3   ;;  %v1593_v17 = vmul.f32 0.00390625, %v1481_v29  ;;  %v1486_v61 = vpop.xlane.xlu0 %1485  ;;  %v1646_v36 = vadd.f32 %v1645_v34, %v1644_v33  ;;  %v1592_v21 = vmul.f32 0.00390625, %v1476_v18  ;;  %v2167_v33 = vrot.slane %v4027_v10, %v4165_v13  ;;  %v2439_v18 = vld [vmem:[%s4672_s2 + $0x32] sm:$0x3] }
 0x193   : > { %4704 = vst [vmem:[#allocation20_spill] sm:$0xff] %v4183_v62  ;;  %2536 = vperm.xlu1 %3166, %v2436_v52   ;;  %v1877_v4 = vadd.f32 1e-05, %v1845_v58  ;;  %v1682_v16 = vrot.slane %v1681_v6, 1  ;;  %v1594_v55 = vmul.f32 0.00390625, %v1486_v61  ;;  %v1660_v52 = vadd.f32 %v1659_v25, %v1658_v51 }
 0x194   : > { %v1691_v31 = vsel %vm555_vm0, %v1593_v17, 0.0  ;;  %v1671_v58 = vrot.slane %v1670_v14, 4  ;;  %v1620_v50 = vadd.f32 %v1619_v42, %v1618_v44  ;;  %v1684_v17 = vsel %vm555_vm0, %v1592_v21, 0.0  ;;  %v2440_v51 = vld [vmem:[%s4672_s2 + $0x34] sm:$0x3] }
 0x195   : > { %3171 = vrsqrt.f32 %v1877_v4  ;;  %v1683_v3 = vadd.f32 %v1682_v16, %v1681_v6  ;;  %v1692_v40 = vrot.slane %v1691_v31, 4  ;;  %v1698_v29 = vsel %vm555_vm0, %v1594_v55, 0.0 }
 0x196   : > { %2540 = vperm.xlu0 %3165, %v2437_v30   ;;  %v1699_v9 = vrot.slane %v1698_v29, 4  ;;  %v1633_v6 = vrot.slane %v1632_v56, 1  ;;  %v1626_v61 = vrot.slane %v1625_v59, 1  ;;  %v1647_v10 = vrot.slane %v1646_v36, 1 }
 0x197   : > { %v3170_v62 = vpop.eup %3169  ;;  %2544 = vperm.xlu1 %3166, %v2438_v38   ;;  %v1847_v26 = vmul.f32 0.5, %v1683_v3  ;;  %v1693_v34 = vadd.f32 %v1692_v40, %v1691_v31  ;;  %v1661_v4 = vrot.slane %v1660_v52, 1  ;;  %v1672_v16 = vadd.f32 %v1671_v58, %v1670_v14  ;;  %v2441_v40 = vld [vmem:[%s4672_s2 + $0x36] sm:$0x3]  ;;  %v2442_v14 = vld [vmem:[%s4672_s2 + $0x38] sm:$0x3] }
 0x198   : > { %v1700_v25 = vadd.f32 %v1699_v9, %v1698_v29  ;;  %v1939_v30 = vmul.f32 %v3170_v62, %v3735_v63  ;;  %v1685_v21 = vrot.slane %v1684_v17, 4  ;;  %v2181_v62 = vrot.slane %v4046_v5, %v4165_v13 }
 0x199   : > { %v1879_v44 = vadd.f32 1e-05, %v1847_v26  ;;  %v1694_v42 = vrot.slane %v1693_v34, 2  ;;  %v1838_v29 = vmul.f32 0.5, %v1620_v50  ;;  %v1634_v26 = vadd.f32 %v1633_v6, %v1632_v56 }
 0x19a   : > { %2548 = vperm.xlu0 %3165, %v2439_v18   ;;  %v1701_v55 = vrot.slane %v1700_v25, 2  ;;  %v1491_v38 = vpop.xlane.xlu1 %1490  ;;  %v4204_v31 = vmul.f32 %v2167_v33, %v1939_v30  ;;  %v1627_v33 = vadd.f32 %v1626_v61, %v1625_v59  ;;  %v1673_v30 = vrot.slane %v1672_v16, 2  ;;  %v2443_v59 = vld [vmem:[%s4672_s2 + $0x3a] sm:$0x3] }
 0x19b   : > { %3173 = vrsqrt.f32 %v1879_v44  ;;  %2552 = vperm.xlu1 %3166, %v2440_v51   ;;  %v1695_v3 = vadd.f32 %v1694_v42, %v1693_v34  ;;  %v1595_v63 = vmul.f32 0.00390625, %v1491_v38  ;;  %v1648_v51 = vadd.f32 %v1647_v10, %v1646_v36  ;;  %v2444_v36 = vld [vmem:[%s4672_s2 + $0x3c] sm:$0x3] }
 0x19c   : > { %4705 = vst [vmem:[#allocation21_spill] sm:$0xff] %v4204_v31  ;;  %v1702_v9 = vadd.f32 %v1701_v55, %v1700_v25  ;;  %v1496_v58 = vpop.xlane.xlu0 %1495  ;;  %v1662_v5 = vadd.f32 %v1661_v4, %v1660_v52  ;;  %v1686_v50 = vadd.f32 %v1685_v21, %v1684_v17  ;;  %v2195_v52 = vrot.slane %v4067_v41, %v4165_v13 }
 0x19d   : > { %v1705_v18 = vsel %vm555_vm0, %v1595_v63, 0.0  ;;  %v1596_v34 = vmul.f32 0.00390625, %v1496_v58  ;;  %v1696_v44 = vrot.slane %v1695_v3, 1  ;;  %v1840_v21 = vmul.f32 0.5, %v1634_v26 }
 0x19e   : > { %2556 = vperm.xlu0 %3165, %v2441_v40   ;;  %v1706_v42 = vrot.slane %v1705_v18, 4  ;;  %v1501_v38 = vpop.xlane.xlu1 %1500  ;;  %v1703_v6 = vrot.slane %v1702_v9, 1  ;;  %v1839_v40 = vmul.f32 0.5, %v1627_v33  ;;  %v1674_v63 = vadd.f32 %v1673_v30, %v1672_v16 }
 0x19f   : > { %v3172_v31 = vpop.eup %3171  ;;  %2560 = vperm.xlu1 %3166, %v2442_v14   ;;  %v1712_v25 = vsel %vm555_vm0, %v1596_v34, 0.0  ;;  %v1597_v56 = vmul.f32 0.00390625, %v1501_v38  ;;  %v1697_v14 = vadd.f32 %v1696_v44, %v1695_v3  ;;  %v1842_v34 = vmul.f32 0.5, %v1648_v51 }
 0x1a0   : > { %v1707_v61 = vadd.f32 %v1706_v42, %v1705_v18  ;;  %v1713_v55 = vrot.slane %v1712_v25, 4  ;;  %v1941_v10 = vmul.f32 %v3172_v31, %v3756_v43  ;;  %v1870_v18 = vadd.f32 1e-05, %v1838_v29  ;;  %v2445_v43 = vld [vmem:[%s4672_s2 + $0x3e] sm:$0x3] }
 0x1a1   : > { %v1719_v58 = vsel %vm555_vm0, %v1597_v56, 0.0  ;;  %v1844_v31 = vmul.f32 0.5, %v1662_v5  ;;  %v1687_v38 = vrot.slane %v1686_v50, 2  ;;  %v1704_v17 = vadd.f32 %v1703_v6, %v1702_v9 }
 0x1a2   : > { %2564 = vperm.xlu0 %3165, %v2443_v59   ;;  %v1708_v42 = vrot.slane %v1707_v61, 2  ;;  %v4233_v41 = vmul.f32 %v2181_v62, %v1941_v10  ;;  %v1714_v26 = vadd.f32 %v1713_v55, %v1712_v25  ;;  %v1872_v51 = vadd.f32 1e-05, %v1840_v21 }
 0x1a3   : > { %2568 = vperm.xlu1 %3166, %v2444_v36   ;;  %v1720_v30 = vrot.slane %v1719_v58, 4  ;;  %v1871_v59 = vadd.f32 1e-05, %v1839_v40  ;;  %v1675_v62 = vrot.slane %v1674_v63, 1  ;;  %v1849_v56 = vmul.f32 0.5, %v1697_v14 }
 0x1a4   : > { %4706 = vst [vmem:[#allocation22_spill] sm:$0xff] %v4233_v41  ;;  %v1506_v33 = vpop.xlane.xlu0 %1505  ;;  %3175 = vrsqrt.f32 %v1870_v18  ;;  %v1874_v9 = vadd.f32 1e-05, %v1842_v34  ;;  %v1709_v25 = vadd.f32 %v1708_v42, %v1707_v61  ;;  %v1876_v55 = vadd.f32 1e-05, %v1844_v31 }
 0x1a5   : > { %v3174_v16 = vpop.eup %3173  ;;  %v1688_v36 = vadd.f32 %v1687_v38, %v1686_v50  ;;  %v1850_v10 = vmul.f32 0.5, %v1704_v17  ;;  %v1715_v3 = vrot.slane %v1714_v26, 2  ;;  %3177 = vrsqrt.f32 %v1872_v51 }
 0x1a6   : > { %2572 = vperm.xlu0 %3165, %v2445_v43   ;;  %v1511_v5 = vpop.xlane.xlu1 %1510  ;;  %v1943_v6 = vmul.f32 %v3174_v16, %v3780_v24  ;;  %v1721_v21 = vadd.f32 %v1720_v30, %v1719_v58  ;;  %3179 = vrsqrt.f32 %v1871_v59  ;;  %v1676_v40 = vadd.f32 %v1675_v62, %v1674_v63 }
 0x1a7   : > { %v1881_v14 = vadd.f32 1e-05, %v1849_v56  ;;  %v1598_v43 = vmul.f32 0.00390625, %v1506_v33  ;;  %3181 = vrsqrt.f32 %v1874_v9  ;;  %v1710_v18 = vrot.slane %v1709_v25, 1 }
 0x1a8   : > { %v1516_v29 = vpop.xlane.xlu0 %1515  ;;  %v4242_v41 = vmul.f32 %v2195_v52, %v1943_v6  ;;  %3183 = vrsqrt.f32 %v1876_v55  ;;  %v1689_v50 = vrot.slane %v1688_v36, 1  ;;  %v1882_v17 = vadd.f32 1e-05, %v1850_v10 }
 0x1a9   : > { %v1600_v4 = vmul.f32 0.00390625, %v1516_v29  ;;  %v1716_v34 = vadd.f32 %v1715_v3, %v1714_v26  ;;  %v1722_v31 = vrot.slane %v1721_v21, 2  ;;  %v4246_v16 = vmul.f32 0.5, %v1676_v40 }
 0x1aa   : > { %4707 = vst [vmem:[#allocation23_spill] sm:$0xff] %v4242_v41  ;;  %v1521_v44 = vpop.xlane.xlu1 %1520  ;;  %3185 = vrsqrt.f32 %v1881_v14  ;;  %v1726_v63 = vsel %vm555_vm0, %v1598_v43, 0.0  ;;  %v1599_v33 = vmul.f32 0.00390625, %v1511_v5  ;;  %v1711_v29 = vadd.f32 %v1710_v18, %v1709_v25 }
 0x1ab   : > { %v1740_v61 = vsel %vm555_vm0, %v1600_v4, 0.0  ;;  %v1601_v24 = vmul.f32 0.00390625, %v1521_v44  ;;  %v4250_v59 = vadd.f32 %v1689_v50, %v1688_v36  ;;  %3187 = vrsqrt.f32 %v1882_v17 }
 0x1ac   : > { %v1526_v42 = vpop.xlane.xlu0 %1525  ;;  %v1741_v58 = vrot.slane %v1740_v61, 4  ;;  %v1717_v26 = vrot.slane %v1716_v34, 1  ;;  %v1723_v56 = vadd.f32 %v1722_v31, %v1721_v21  ;;  %v1727_v40 = vrot.slane %v1726_v63, 4 }
 0x1ad   : > { %v1747_v52 = vsel %vm555_vm0, %v1601_v24, 0.0  ;;  %v1602_v38 = vmul.f32 0.00390625, %v1526_v42  ;;  %v1733_v5 = vsel %vm555_vm0, %v1599_v33, 0.0  ;;  %v1851_v18 = vmul.f32 0.5, %v1711_v29 }
 0x1ae   : > { %v1742_v51 = vadd.f32 %v1741_v58, %v1740_v61  ;;  %v1748_v4 = vrot.slane %v1747_v52, 4  ;;  %v4252_v62 = vpop.eup %3175  ;;  %v1718_v21 = vadd.f32 %v1717_v26, %v1716_v34 }
 0x1af   : > { %v1754_v30 = vsel %vm555_vm0, %v1602_v38, 0.0  ;;  %v1531_v44 = vpop.xlane.xlu1 %1530  ;;  %v4255_v43 = vpop.eup %3177  ;;  %v1724_v38 = vrot.slane %v1723_v56, 1 }
 0x1b0   : > { %v1755_v3 = vrot.slane %v1754_v30, 4  ;;  %v1743_v9 = vrot.slane %v1742_v51, 2  ;;  %v1749_v6 = vadd.f32 %v1748_v4, %v1747_v52  ;;  %v1603_v55 = vmul.f32 0.00390625, %v1531_v44  ;;  %4708 = vst [vmem:[#allocation24_spill] sm:$0xff] %v4255_v43  ;;  %v4258_v17 = vpop.eup %3179 }
 0x1b1   : > { %v1536_v10 = vpop.xlane.xlu0 %1535  ;;  %4709 = vst [vmem:[#allocation25_spill] sm:$0xff] %v4258_v17  ;;  %v4261_v52 = vpop.eup %3181  ;;  %v1725_v32 = vadd.f32 %v1724_v38, %v1723_v56 }
 0x1b2   : > { %v1756_v25 = vadd.f32 %v1755_v3, %v1754_v30  ;;  %v1604_v14 = vmul.f32 0.00390625, %v1536_v10  ;;  %v1744_v36 = vadd.f32 %v1743_v9, %v1742_v51  ;;  %v1750_v61 = vrot.slane %v1749_v6, 2  ;;  %4710 = vst [vmem:[#allocation26_spill] sm:$0xff] %v4261_v52  ;;  %v4263_v29 = vpop.eup %3183 }
 0x1b3   : > { %v1761_v24 = vsel %vm555_vm0, %v1603_v55, 0.0  ;;  %v1541_v50 = vpop.xlane.xlu1 %1540  ;;  %4711 = vst [vmem:[#allocation27_spill] sm:$0xff] %v4263_v29  ;;  %v4265_v51 = vadd.f32 %v1727_v40, %v1726_v63  ;;  %v1734_v10 = vrot.slane %v1733_v5, 4  ;;  %v1883_v52 = vadd.f32 1e-05, %v1851_v18 }
 0x1b4   : > { %v1757_v42 = vrot.slane %v1756_v25, 2  ;;  %v1762_v31 = vrot.slane %v1761_v24, 4  ;;  %v1768_v58 = vsel %vm555_vm0, %v1604_v14, 0.0  ;;  %v1745_v33 = vrot.slane %v1744_v36, 1  ;;  %v4267_v14 = vpop.eup %3185 }
 0x1b5   : > { %v1751_v4 = vadd.f32 %v1750_v61, %v1749_v6  ;;  %v1769_v30 = vrot.slane %v1768_v58, 4  ;;  %v1546_v44 = vpop.xlane.xlu0 %1545  ;;  %v1605_v55 = vmul.f32 0.00390625, %v1541_v50  ;;  %v1852_v61 = vmul.f32 0.5, %v1718_v21 }
 0x1b6   : > { %v1758_v3 = vadd.f32 %v1757_v42, %v1756_v25  ;;  %v1763_v9 = vadd.f32 %v1762_v31, %v1761_v24  ;;  %v1746_v34 = vadd.f32 %v1745_v33, %v1744_v36  ;;  %v4270_v25 = vpop.eup %3187  ;;  %v1606_v42 = vmul.f32 0.00390625, %v1546_v44 }
 0x1b7   : > { %v1752_v26 = vrot.slane %v1751_v4, 1  ;;  %v1770_v41 = vadd.f32 %v1769_v30, %v1768_v58  ;;  %v1551_v60 = vpop.xlane.xlu1 %1550  ;;  %v1775_v6 = vsel %vm555_vm0, %v1605_v55, 0.0  ;;  %v4273_v58 = vadd.f32 %v1734_v10, %v1733_v5 }
 0x1b8   : > { %v1759_v43 = vrot.slane %v1758_v3, 1  ;;  %v1764_v28 = vrot.slane %v1763_v9, 2  ;;  %v1776_v36 = vrot.slane %v1775_v6, 4  ;;  %v1856_v18 = vmul.f32 0.5, %v1746_v34 }
 0x1b9   : > { %v1753_v29 = vadd.f32 %v1752_v26, %v1751_v4  ;;  %v1771_v63 = vrot.slane %v1770_v41, 2  ;;  %v1556_v40 = vpop.xlane.xlu0 %1555  ;;  %v1782_v56 = vsel %vm555_vm0, %v1606_v42, 0.0  ;;  %3189 = vrsqrt.f32 %v1883_v52 }
 0x1ba   : > { %v1760_v24 = vadd.f32 %v1759_v43, %v1758_v3  ;;  %v1765_v50 = vadd.f32 %v1764_v28, %v1763_v9  ;;  %v1777_v21 = vadd.f32 %v1776_v36, %v1775_v6  ;;  %v1783_v26 = vrot.slane %v1782_v56, 4 }
 0x1bb   : > { %v1772_v33 = vadd.f32 %v1771_v63, %v1770_v41  ;;  %v1561_v30 = vpop.xlane.xlu1 %1560  ;;  %v1857_v17 = vmul.f32 0.5, %v1753_v29  ;;  %v4276_v43 = vadd.f32 1e-05, %v1852_v61  ;;  %v1607_v3 = vmul.f32 0.00390625, %v1551_v60 }
 0x1bc   : > { %v1766_v55 = vrot.slane %v1765_v50, 1  ;;  %v1858_v38 = vmul.f32 0.5, %v1760_v24  ;;  %v1778_v44 = vrot.slane %v1777_v21, 2  ;;  %v1888_v9 = vadd.f32 1e-05, %v1856_v18 }
 0x1bd   : > { %v1773_v4 = vrot.slane %v1772_v33, 1  ;;  %v1784_v10 = vadd.f32 %v1783_v26, %v1782_v56  ;;  %v1608_v34 = vmul.f32 0.00390625, %v1556_v40  ;;  %v1566_v41 = vpop.xlane.xlu0 %1565  ;;  %v1853_v29 = vmul.f32 0.5, %v1725_v32 }
 0x1be   : > { %v1767_v28 = vadd.f32 %v1766_v55, %v1765_v50  ;;  %v1889_v31 = vadd.f32 1e-05, %v1857_v17  ;;  %v1779_v6 = vadd.f32 %v1778_v44, %v1777_v21  ;;  %v1789_v36 = vsel %vm555_vm0, %v1607_v3, 0.0 }
 0x1bf   : > { %v1774_v5 = vadd.f32 %v1773_v4, %v1772_v33  ;;  %v1571_v63 = vpop.xlane.xlu1 %1570  ;;  %v1890_v52 = vadd.f32 1e-05, %v1858_v38  ;;  %v1785_v24 = vrot.slane %v1784_v10, 2  ;;  %v1790_v42 = vrot.slane %v1789_v36, 4 }
 0x1c0   : > { %v1796_v61 = vsel %vm555_vm0, %v1608_v34, 0.0  ;;  %v1859_v53 = vmul.f32 0.5, %v1767_v28  ;;  %v1780_v50 = vrot.slane %v1779_v6, 1  ;;  %v1609_v60 = vmul.f32 0.00390625, %v1561_v30 }
 0x1c1   : > { %v1797_v55 = vrot.slane %v1796_v61, 4  ;;  %3191 = vrsqrt.f32 %v1888_v9  ;;  %v1860_v18 = vmul.f32 0.5, %v1774_v5  ;;  %v1786_v33 = vadd.f32 %v1785_v24, %v1784_v10  ;;  %v1576_v44 = vpop.xlane.xlu0 %1575 }
 0x1c2   : > { %v1791_v40 = vadd.f32 %v1790_v42, %v1789_v36  ;;  %3193 = vrsqrt.f32 %v1889_v31  ;;  %v1781_v32 = vadd.f32 %v1780_v50, %v1779_v6  ;;  %v1803_v21 = vsel %vm555_vm0, %v1609_v60, 0.0 }
 0x1c3   : > { %v1581_v56 = vpop.xlane.xlu1 %1580  ;;  %v1798_v17 = vadd.f32 %v1797_v55, %v1796_v61  ;;  %3195 = vrsqrt.f32 %v1890_v52  ;;  %v1787_v38 = vrot.slane %v1786_v33, 1  ;;  %v1804_v26 = vrot.slane %v1803_v21, 4  ;;  %v4281_v30 = vpop.eup %3189 }
 0x1c4   : > { %v1792_v4 = vrot.slane %v1791_v40, 2  ;;  %v1891_v3 = vadd.f32 1e-05, %v1859_v53  ;;  %v1861_v28 = vmul.f32 0.5, %v1781_v32  ;;  %v1611_v48 = vmul.f32 0.00390625, %v1571_v63 }
 0x1c5   : > { %v1799_v34 = vrot.slane %v1798_v17, 2  ;;  %v1892_v9 = vadd.f32 1e-05, %v1860_v18  ;;  %v1788_v5 = vadd.f32 %v1787_v38, %v1786_v33  ;;  %v1805_v36 = vadd.f32 %v1804_v26, %v1803_v21 }
 0x1c6   : > { %v1793_v10 = vadd.f32 %v1792_v4, %v1791_v40  ;;  %v1610_v24 = vmul.f32 0.00390625, %v1566_v41  ;;  %v1817_v52 = vsel %vm555_vm0, %v1611_v48, 0.0  ;;  %v1612_v42 = vmul.f32 0.00390625, %v1576_v44 }
 0x1c7   : > { %v4283_v31 = vpop.permute.xlu1 %2064  ;;  %v1800_v6 = vadd.f32 %v1799_v34, %v1798_v17  ;;  %v1893_v61 = vadd.f32 1e-05, %v1861_v28  ;;  %v1862_v50 = vmul.f32 0.5, %v1788_v5  ;;  %v1806_v53 = vrot.slane %v1805_v36, 2 }
 0x1c8   : > { %4712 = vst [vmem:[#allocation28_spill] sm:$0xff] %v4283_v31  ;;  %v1794_v55 = vrot.slane %v1793_v10, 1  ;;  %3197 = vrsqrt.f32 %v1891_v3  ;;  %v1818_v32 = vrot.slane %v1817_v52, 4  ;;  %v1824_v18 = vsel %vm555_vm0, %v1612_v42, 0.0 }
 0x1c9   : > { %v4286_v60 = vpop.permute.xlu0 %2068  ;;  %v1801_v63 = vrot.slane %v1800_v6, 1  ;;  %3199 = vrsqrt.f32 %v1892_v9  ;;  %v1894_v33 = vadd.f32 1e-05, %v1862_v50  ;;  %v1807_v21 = vadd.f32 %v1806_v53, %v1805_v36 }
 0x1ca   : > { %4713 = vst [vmem:[#allocation29_spill] sm:$0xff] %v4286_v60  ;;  %v1795_v40 = vadd.f32 %v1794_v55, %v1793_v10  ;;  %v1819_v48 = vadd.f32 %v1818_v32, %v1817_v52  ;;  %v1825_v38 = vrot.slane %v1824_v18, 4  ;;  %v1613_v4 = vmul.f32 0.00390625, %v1581_v56 }
 0x1cb   : > { %v4289_v17 = vpop.permute.xlu1 %2072  ;;  %v1802_v41 = vadd.f32 %v1801_v63, %v1800_v6  ;;  %v3192_v26 = vpop.eup %3191  ;;  %v1885_v44 = vadd.f32 1e-05, %v1853_v29  ;;  %3201 = vrsqrt.f32 %v1893_v61  ;;  %v1808_v34 = vrot.slane %v1807_v21, 1 }
 0x1cc   : > { %v1863_v28 = vmul.f32 0.5, %v1795_v40  ;;  %v3194_v5 = vpop.eup %3193  ;;  %v1820_v31 = vrot.slane %v1819_v48, 2  ;;  %v1826_v42 = vadd.f32 %v1825_v38, %v1824_v18  ;;  %v1831_v9 = vsel %vm555_vm0, %v1613_v4, 0.0 }
 0x1cd   : > { %v2077_v3 = vpop.permute.xlu0 %2076  ;;  %v1864_v60 = vmul.f32 0.5, %v1802_v41  ;;  %v3196_v10 = vpop.eup %3195  ;;  %3203 = vrsqrt.f32 %v1894_v33  ;;  %v1809_v50 = vadd.f32 %v1808_v34, %v1807_v21  ;;  %v1832_v6 = vrot.slane %v1831_v9, 4 }
 0x1ce   : > { %v1895_v36 = vadd.f32 1e-05, %v1863_v28  ;;  %v1810_v56 = vsel %vm555_vm0, %v1610_v24, 0.0  ;;  %v1821_v29 = vadd.f32 %v1820_v31, %v1819_v48  ;;  %v1827_v61 = vrot.slane %v1826_v42, 2 }
 0x1cf   : > { %v2081_v52 = vpop.permute.xlu1 %2080  ;;  %v1896_v55 = vadd.f32 1e-05, %v1864_v60  ;;  %v4714_v53 = vrot.slane %v4265_v51, 2  ;;  %v1865_v32 = vmul.f32 0.5, %v1809_v50  ;;  %v1833_v18 = vadd.f32 %v1832_v6, %v1831_v9 }
 0x1d0   : > { %3205 = vrsqrt.f32 %v1895_v36  ;;  %v4299_v33 = vadd.f32 1e-05, %v4246_v16  ;;  %v1822_v21 = vrot.slane %v1821_v29, 1  ;;  %v1828_v41 = vadd.f32 %v1827_v61, %v1826_v42 }
 0x1d1   : > { %v4296_v63 = vadd.f32 %v4714_v53, %v4265_v51  ;;  %v2085_v40 = vpop.permute.xlu0 %2084  ;;  %3207 = vrsqrt.f32 %v1896_v55  ;;  %v1897_v24 = vadd.f32 1e-05, %v1865_v32  ;;  %v1811_v31 = vrot.slane %v1810_v56, 4 }
 0x1d2   : > { %3209 = vrsqrt.f32 %v4276_v43  ;;  %v1834_v60 = vrot.slane %v1833_v18, 2  ;;  %v3198_v38 = vpop.eup %3197  ;;  %v4303_v51 = vmul.f32 0.5, %v4250_v59  ;;  %v1823_v4 = vadd.f32 %v1822_v21, %v1821_v29 }
 0x1d3   : > { %v2089_v48 = vpop.permute.xlu1 %2088  ;;  %3211 = vrsqrt.f32 %v1885_v44  ;;  %v1829_v28 = vrot.slane %v1828_v41, 1  ;;  %v3200_v34 = vpop.eup %3199  ;;  %v1731_v16 = vrot.slane %v4296_v63, 1  ;;  %v1736_v9 = vrot.slane %v4273_v58, 2 }
 0x1d4   : > { %3213 = vrsqrt.f32 %v1897_v24  ;;  %v1835_v42 = vadd.f32 %v1834_v60, %v1833_v18  ;;  %v1867_v43 = vmul.f32 0.5, %v1823_v4  ;;  %v1952_v6 = vmul.f32 %v3192_v26, %v3884_v15 }
 0x1d5   : > { %v2093_v36 = vpop.permute.xlu0 %2092  ;;  %v1830_v50 = vadd.f32 %v1829_v28, %v1828_v41  ;;  %v2258_v55 = vrot.slane %v4289_v17, %v4165_v13  ;;  %v3202_v59 = vpop.eup %3201  ;;  %v4310_v61 = vadd.f32 %v1811_v31, %v1810_v56  ;;  %v1953_v29 = vmul.f32 %v3194_v5, %v3893_v27 }
 0x1d6   : > { %v1836_v44 = vrot.slane %v1835_v42, 1  ;;  %v2265_v53 = vrot.slane %v2077_v3, %v4165_v13  ;;  %v1899_v21 = vadd.f32 1e-05, %v1867_v43  ;;  %v1954_v41 = vmul.f32 %v3196_v10, %v3899_v7 }
 0x1d7   : > { %v2097_v32 = vpop.permute.xlu1 %2096  ;;  %v1868_v24 = vmul.f32 0.5, %v1830_v50  ;;  %v4314_v18 = vmul.f32 %v2258_v55, %v1952_v6  ;;  %v3204_v60 = vpop.eup %3203  ;;  %v2272_v17 = vrot.slane %v2081_v52, %v4165_v13  ;;  %v1955_v56 = vmul.f32 %v3198_v38, %v3921_v57 }
 0x1d8   : > { %v1837_v15 = vadd.f32 %v1836_v44, %v1835_v42  ;;  %v4317_v26 = vmul.f32 %v2265_v53, %v1953_v29  ;;  %3215 = vrsqrt.f32 %v1899_v21  ;;  %v2279_v3 = vrot.slane %v2085_v40, %v4165_v13 }
 0x1d9   : > { %v2101_v31 = vpop.permute.xlu0 %2100  ;;  %v1900_v27 = vadd.f32 1e-05, %v1868_v24  ;;  %v1956_v5 = vmul.f32 %v3200_v34, %v3930_v20  ;;  %v4323_v43 = vmul.f32 %v2272_v17, %v1954_v41  ;;  %v2286_v7 = vrot.slane %v2089_v48, %v4165_v13 }
 0x1da   : > { %v3206_v4 = vpop.eup %3205  ;;  %v1869_v28 = vmul.f32 0.5, %v1837_v15  ;;  %v1957_v10 = vmul.f32 %v3202_v59, %v3935_v45  ;;  %v4327_v52 = vmul.f32 %v2279_v3, %v1955_v56  ;;  %v2293_v57 = vrot.slane %v2093_v36, %v4165_v13 }
 0x1db   : > { %v2105_v42 = vpop.permute.xlu1 %2104  ;;  %v3208_v50 = vpop.eup %3207  ;;  %3217 = vrsqrt.f32 %v1900_v27  ;;  %v1958_v38 = vmul.f32 %v3204_v60, %v3939_v23  ;;  %v4331_v20 = vmul.f32 %v2286_v7, %v1956_v5  ;;  %v2300_v34 = vrot.slane %v2097_v32, %v4165_v13 }
 0x1dc   : > { %v3210_v40 = vpop.eup %3209  ;;  %v1901_v6 = vadd.f32 1e-05, %v1869_v28  ;;  %v1959_v55 = vmul.f32 %v3206_v4, %v3946_v11  ;;  %v4335_v45 = vmul.f32 %v2293_v57, %v1957_v10  ;;  %v2307_v59 = vrot.slane %v2101_v31, %v4165_v13  ;;  %v4720_v28 = vld [vmem:[#allocation11_spill] sm:$0xff] }
 0x1dd   : > { %v2109_v48 = vpop.permute.xlu0 %2108  ;;  %v3212_v44 = vpop.eup %3211  ;;  %v1960_v29 = vmul.f32 %v3208_v50, %v3953_v12  ;;  %v2314_v36 = vrot.slane %v2105_v42, %v4165_v13  ;;  %v4340_v23 = vmul.f32 %v2300_v34, %v1958_v38  ;;  %v1945_v11 = vmul.f32 %v4267_v14, %v3809_v39  ;;  %v4721_v42 = vld [vmem:[#allocation3_spill] sm:$0xff]  ;;  %v4722_v50 = vld [vmem:[#allocation25_spill] sm:$0xff] }
 0x1de   : > { %v3214_v53 = vpop.eup %3213  ;;  %3219 = vrsqrt.f32 %v1901_v6  ;;  %v2321_v21 = vrot.slane %v2109_v48, %v4165_v13  ;;  %v1737_v32 = vadd.f32 %v1736_v9, %v4273_v58  ;;  %v4348_v41 = vmul.f32 %v2307_v59, %v1959_v55 }
 0x1df   : > { %v4343_v24 = vpop.permute.xlu1 %2112  ;;  %v4350_v60 = vmul.f32 %v2314_v36, %v1960_v29  ;;  %v1961_v12 = vmul.f32 %v3214_v53, %v3967_v19  ;;  %v4715_v17 = vrot.slane %v4080_v22, %v4165_v13  ;;  %v1946_v31 = vmul.f32 %v4270_v25, %v3813_v46 }
 0x1e0   : > { %v1947_v39 = vmul.f32 %v4281_v30, %v3841_v47  ;;  %v1948_v14 = vmul.f32 %v3210_v40, %v3847_v35  ;;  %v1732_v58 = vadd.f32 %v1731_v16, %v4296_v63  ;;  %v1813_v19 = vrot.slane %v4310_v61, 2 }
 0x1e1   : > { %v2117_v15 = vpop.permute.xlu0 %2116  ;;  %v4356_v56 = vmul.f32 %v4715_v17, %v1945_v11  ;;  %v4367_v9 = vmul.f32 %v2321_v21, %v1961_v12  ;;  %v1949_v22 = vmul.f32 %v3212_v44, %v3853_v54  ;;  %v4716_v46 = vrot.slane %v4088_v49, %v4165_v13  ;;  %v4726_v44 = vld [vmem:[#allocation12_spill] sm:$0xff] }
 0x1e2   : > { %v2335_v27 = vrot.slane %v2117_v15, %v4165_v13  ;;  %v4717_v47 = vrot.slane %v4093_v8, %v4165_v13  ;;  %v4718_v30 = vrot.slane %v4098_v0, %v4165_v13  ;;  %v3216_v16 = vpop.eup %3215  ;;  %v2139_v54 = vrot.slane %v4009_v2, %v4165_v13  ;;  %v4723_v2 = vld [vmem:[#allocation17_spill] sm:$0xff] }
 0x1e3   : > { %v2121_v3 = vpop.permute.xlu1 %2120  ;;  %v4374_v25 = vmul.f32 %v4716_v46, %v1946_v31  ;;  %v1934_v5 = vmul.f32 %v4252_v62, %v3668_v1  ;;  %v4719_v49 = vrot.slane %v4106_v37, %v4165_v13  ;;  %v1738_v8 = vrot.slane %v1737_v32, 1  ;;  %v4724_v37 = vld [vmem:[#allocation2_spill] sm:$0xff]  ;;  %v4725_v62 = vld [vmem:[#allocation24_spill] sm:$0xff] }
 0x1e4   : > { %v4379_v35 = vmul.f32 %v4717_v47, %v1947_v39  ;;  %v4384_v63 = vmul.f32 %v4718_v30, %v1948_v14  ;;  %v1963_v7 = vmul.f32 %v3216_v16, %v4720_v28  ;;  %v2342_v10 = vrot.slane %v2121_v3, %v4165_v13 }
 0x1e5   : > { %v4393_v4 = vmul.f32 %v4719_v49, %v1949_v22  ;;  %v2125_v0 = vpop.permute.xlu0 %2124  ;;  %v1935_v57 = vmul.f32 %v4722_v50, %v4721_v42  ;;  %v3218_v38 = vpop.eup %3217  ;;  %v2132_v40 = vrot.slane %v4723_v2, %v4165_v13  ;;  %3221 = vrsqrt.f32 %v4299_v33  ;;  %v4727_v33 = vld [vmem:[#allocation14_spill] sm:$0xff]  ;;  %v4731_v42 = vld [vmem:[#allocation15_spill] sm:$0xff]  ;;  %v4732_v2 = vld [vmem:[#allocation5_spill] sm:$0xff] }
 0x1e6   : > { %v1880_v1 = vadd.f32 1e-05, %v4303_v51  ;;  %v1936_v6 = vmul.f32 %v4725_v62, %v4724_v37  ;;  %v1854_v34 = vmul.f32 0.5, %v1732_v58  ;;  %v1814_v55 = vadd.f32 %v1813_v19, %v4310_v61  ;;  %v4728_v61 = vld [vmem:[#allocation13_spill] sm:$0xff]  ;;  %v4730_v49 = vld [vmem:[#allocation26_spill] sm:$0xff] }
 0x1e7   : > { %v4406_v48 = vmul.f32 %v2335_v27, %v1963_v7  ;;  %v1964_v59 = vmul.f32 %v3218_v38, %v4726_v44  ;;  %v2449_v29 = vpop.permute.xlu1 %2448  ;;  %v2349_v36 = vrot.slane %v2125_v0, %v4165_v13  ;;  %v2382_v53 = vmul.f32 %v2132_v40, %v1934_v5  ;;  %v4729_v5 = vld [vmem:[#allocation4_spill] sm:$0xff]  ;;  %v4733_v40 = vld [vmem:[#allocation27_spill] sm:$0xff] }
 0x1e8   : > { %v2580_v21 = vrot.slane %v2449_v29, %v4165_v13  ;;  %v3220_v11 = vpop.eup %3219  ;;  %v2146_v51 = vrot.slane %v4727_v33, %v4165_v13  ;;  %v1739_v12 = vadd.f32 %v1738_v8, %v1737_v32  ;;  %v2383_v17 = vmul.f32 %v2139_v54, %v1935_v57 }
 0x1e9   : > { %v4413_v15 = vmul.f32 %v2342_v10, %v1964_v59  ;;  %v2453_v31 = vpop.permute.xlu0 %2452  ;;  %3223 = vrsqrt.f32 %v1880_v1  ;;  %v1965_v39 = vmul.f32 %v3220_v11, %v4728_v61  ;;  %v1886_v19 = vadd.f32 1e-05, %v1854_v34  ;;  %v4734_v34 = vld [vmem:[#allocation20_spill] sm:$0xff] }
 0x1ea   : > { %v4416_v14 = vadd.f32 %v2580_v21, %v2382_v53  ;;  %v2587_v58 = vrot.slane %v2453_v31, %v4165_v13  ;;  %v1815_v22 = vrot.slane %v1814_v55, 1  ;;  %v2384_v3 = vmul.f32 %v2146_v51, %v1936_v6  ;;  %v4735_v59 = vld [vmem:[#allocation16_spill] sm:$0xff] }
 0x1eb   : > { %v2457_v27 = vpop.permute.xlu1 %2456  ;;  %v4419_v46 = vmul.f32 %v2349_v36, %v1965_v39  ;;  %v1855_v16 = vmul.f32 0.5, %v1739_v12  ;;  %v1938_v8 = vmul.f32 %v4730_v49, %v4729_v5  ;;  %v2160_v50 = vrot.slane %v4731_v42, %v4165_v13  ;;  %v4736_v39 = vld [vmem:[#allocation6_spill] sm:$0xff] }
 0x1ec   : > { %v2862_v47 = vsub.f32 0.0, %v4416_v14  ;;  %v4422_v32 = vadd.f32 %v2587_v58, %v2383_v17  ;;  %v2594_v30 = vrot.slane %v2457_v27, %v4165_v13  ;;  %3225 = vrsqrt.f32 %v1886_v19  ;;  %v4737_v27 = vld [vmem:[#allocation21_spill] sm:$0xff] }
 0x1ed   : > { %v2461_v54 = vpop.permute.xlu0 %2460  ;;  %v1816_v57 = vadd.f32 %v1815_v22, %v1814_v55  ;;  %v1940_v1 = vmul.f32 %v4733_v40, %v4732_v2  ;;  %v2174_v29 = vrot.slane %v4735_v59, %v4165_v13  ;;  %v1887_v36 = vadd.f32 1e-05, %v1855_v16 }
 0x1ee   : > { %v2894_v28 = vmul.f32 1.442695, %v2862_v47  ;;  %v2863_v7 = vsub.f32 0.0, %v4422_v32  ;;  %v4428_v10 = vadd.f32 %v2594_v30, %v2384_v3  ;;  %v2601_v0 = vrot.slane %v2461_v54, %v4165_v13  ;;  %v4738_v30 = vld [vmem:[#allocation18_spill] sm:$0xff] }
 0x1ef   : > { %v2465_v38 = vpop.permute.xlu1 %2464  ;;  %v3222_v37 = vpop.eup %3221  ;;  %v2386_v53 = vmul.f32 %v2160_v50, %v1938_v8  ;;  %v1866_v12 = vmul.f32 0.5, %v1816_v57  ;;  %v2388_v61 = vmul.f32 %v2174_v29, %v1940_v1  ;;  %v2188_v16 = vrot.slane %v4738_v30, %v4165_v13  ;;  %v4739_v57 = vld [vmem:[#allocation7_spill] sm:$0xff]  ;;  %v4740_v1 = vld [vmem:[#allocation22_spill] sm:$0xff] }
 0x1f0   : > { %3227 = vpow2.f32 %v2894_v28  ;;  %v2896_v62 = vmul.f32 1.442695, %v2863_v7  ;;  %v2864_v6 = vsub.f32 0.0, %v4428_v10  ;;  %v4437_v44 = vadd.f32 %v2601_v0, %v4734_v34  ;;  %v4741_v34 = vld [vmem:[#allocation19_spill] sm:$0xff] }
 0x1f1   : > { %v2608_v21 = vrot.slane %v2465_v38, %v4165_v13  ;;  %v2469_v55 = vpop.permute.xlu0 %2468  ;;  %v1942_v58 = vmul.f32 %v3222_v37, %v4736_v39  ;;  %v1898_v7 = vadd.f32 1e-05, %v1866_v12  ;;  %v2202_v59 = vrot.slane %v4741_v34, %v4165_v13 }
 0x1f2   : > { %3229 = vpow2.f32 %v2896_v62  ;;  %v2898_v11 = vmul.f32 1.442695, %v2864_v6  ;;  %v2865_v33 = vsub.f32 0.0, %v4437_v44  ;;  %v2615_v51 = vrot.slane %v2469_v55, %v4165_v13 }
 0x1f3   : > { %v4444_v17 = vadd.f32 %v2608_v21, %v2386_v53  ;;  %v2473_v31 = vpop.permute.xlu1 %2472  ;;  %v3224_v19 = vpop.eup %3223  ;;  %v2390_v50 = vmul.f32 %v2188_v16, %v1942_v58 }
 0x1f4   : > { %3231 = vpow2.f32 %v2898_v11  ;;  %v2900_v22 = vmul.f32 1.442695, %v2865_v33  ;;  %v4448_v3 = vadd.f32 %v2615_v51, %v4737_v27  ;;  %v2622_v47 = vrot.slane %v2473_v31, %v4165_v13 }
 0x1f5   : > { %3233 = vrsqrt.f32 %v1887_v36  ;;  %v2866_v54 = vsub.f32 0.0, %v4444_v17  ;;  %v2477_v5 = vpop.permute.xlu0 %2476  ;;  %v1944_v38 = vmul.f32 %v3224_v19, %v4739_v57  ;;  %v4742_v19 = vld [vmem:[#allocation8_spill] sm:$0xff] }
 0x1f6   : > { %3235 = vpow2.f32 %v2900_v22  ;;  %v2867_v49 = vsub.f32 0.0, %v4448_v3  ;;  %v4455_v8 = vadd.f32 %v2622_v47, %v2388_v61  ;;  %v2629_v28 = vrot.slane %v2477_v5, %v4165_v13  ;;  %v3226_v6 = vpop.eup %3225  ;;  %v4743_v47 = vld [vmem:[#allocation23_spill] sm:$0xff] }
 0x1f7   : > { %v2902_v0 = vmul.f32 1.442695, %v2866_v54  ;;  %v2481_v42 = vpop.permute.xlu1 %2480  ;;  %v2392_v12 = vmul.f32 %v2202_v59, %v1944_v38  ;;  %v1950_v22 = vmul.f32 %v3226_v6, %v4742_v19  ;;  %v4745_v6 = vld [vmem:[#allocation29_spill] sm:$0xff] }
 0x1f8   : > { %v2904_v2 = vmul.f32 1.442695, %v2867_v49  ;;  %v2868_v40 = vsub.f32 0.0, %v4455_v8  ;;  %v4461_v37 = vadd.f32 %v2629_v28, %v4740_v1  ;;  %v2636_v62 = vrot.slane %v2481_v42, %v4165_v13 }
 0x1f9   : > { %3237 = vpow2.f32 %v2902_v0  ;;  %v2485_v29 = vpop.permute.xlu0 %2484  ;;  %v4744_v0 = vld [vmem:[#allocation28_spill] sm:$0xff]  ;;  %v2251_v34 = vrot.slane %v4745_v6, %v4165_v13 }
 0x1fa   : > { %v3228_v36 = vpop.eup %3227  ;;  %3239 = vpow2.f32 %v2904_v2  ;;  %v2906_v53 = vmul.f32 1.442695, %v2868_v40  ;;  %v2869_v21 = vsub.f32 0.0, %v4461_v37  ;;  %v4467_v55 = vadd.f32 %v2636_v62, %v2390_v50 }
 0x1fb   : > { %3241 = vrsqrt.f32 %v1898_v7  ;;  %v2958_v11 = vadd.f32 1.0, %v3228_v36  ;;  %v2643_v33 = vrot.slane %v2485_v29, %v4165_v13  ;;  %v2489_v51 = vpop.permute.xlu1 %2488  ;;  %v2244_v42 = vrot.slane %v4744_v0, %v4165_v13 }
 0x1fc   : > { %v3230_v31 = vpop.eup %3229  ;;  %3243 = vpow2.f32 %v2906_v53  ;;  %v2908_v61 = vmul.f32 1.442695, %v2869_v21  ;;  %v2870_v39 = vsub.f32 0.0, %v4467_v55  ;;  %v2650_v58 = vrot.slane %v2489_v51, %v4165_v13 }
 0x1fd   : > { %3245 = vrcp.f32 %v2958_v11  ;;  %v2959_v27 = vadd.f32 1.0, %v3230_v31  ;;  %v4474_v30 = vadd.f32 %v2643_v33, %v4743_v47  ;;  %v2493_v16 = vpop.permute.xlu0 %2492 }
 0x1fe   : > { %v3232_v54 = vpop.eup %3231  ;;  %3247 = vpow2.f32 %v2908_v61  ;;  %v2910_v5 = vmul.f32 1.442695, %v2870_v39  ;;  %v4476_v49 = vadd.f32 %v2650_v58, %v2392_v12  ;;  %v2657_v28 = vrot.slane %v2493_v16, %v4165_v13  ;;  %v4746_v12 = vld [vmem:[#allocation9_spill] sm:$0xff] }
 0x1ff   : > { %v3234_v7 = vpop.eup %3233  ;;  %3249 = vrcp.f32 %v2959_v27  ;;  %v2960_v50 = vadd.f32 1.0, %v3232_v54  ;;  %v2871_v57 = vsub.f32 0.0, %v4474_v30  ;;  %v2497_v38 = vpop.permute.xlu1 %2496 }
 0x200   : > { %v3236_v2 = vpop.eup %3235  ;;  %3251 = vpow2.f32 %v2910_v5  ;;  %v2872_v40 = vsub.f32 0.0, %v4476_v49  ;;  %v4484_v1 = vadd.f32 %v2657_v28, %v4356_v56  ;;  %v2664_v62 = vrot.slane %v2497_v38, %v4165_v13 }
 0x201   : > { %3253 = vrcp.f32 %v2960_v50  ;;  %v2961_v59 = vadd.f32 1.0, %v3236_v2  ;;  %v2912_v29 = vmul.f32 1.442695, %v2871_v57  ;;  %v2501_v36 = vpop.permute.xlu0 %2500  ;;  %v2398_v56 = vmul.f32 %v2244_v42, %v1950_v22 }
 0x202   : > { %v2914_v53 = vmul.f32 1.442695, %v2872_v40  ;;  %v2873_v21 = vsub.f32 0.0, %v4484_v1  ;;  %v4491_v11 = vadd.f32 %v2664_v62, %v4374_v25  ;;  %v2671_v33 = vrot.slane %v2501_v36, %v4165_v13 }
 0x203   : > { %v3238_v51 = vpop.eup %3237  ;;  %v1951_v31 = vmul.f32 %v3234_v7, %v4746_v12  ;;  %3255 = vrcp.f32 %v2961_v59  ;;  %v2505_v61 = vpop.permute.xlu1 %2504 }
 0x204   : > { %v3240_v39 = vpop.eup %3239  ;;  %v2962_v58 = vadd.f32 1.0, %v3238_v51  ;;  %3257 = vpow2.f32 %v2912_v29  ;;  %v2916_v19 = vmul.f32 1.442695, %v2873_v21  ;;  %v2874_v27 = vsub.f32 0.0, %v4491_v11 }
 0x205   : > { %v4496_v47 = vpop.eup %3241  ;;  %v2963_v16 = vadd.f32 1.0, %v3240_v39  ;;  %3259 = vpow2.f32 %v2914_v53  ;;  %v4499_v25 = vadd.f32 %v2671_v33, %v4379_v35  ;;  %v2678_v22 = vrot.slane %v2505_v61, %v4165_v13  ;;  %v2509_v54 = vpop.permute.xlu0 %2508 }
 0x206   : > { %v3244_v5 = vpop.eup %3243  ;;  %v2399_v28 = vmul.f32 %v2251_v34, %v1951_v31  ;;  %3261 = vrcp.f32 %v2962_v58  ;;  %v2918_v7 = vmul.f32 1.442695, %v2874_v27  ;;  %v2685_v0 = vrot.slane %v2509_v54, %v4165_v13 }
 0x207   : > { %v3246_v42 = vpop.eup %3245  ;;  %3263 = vrcp.f32 %v2963_v16  ;;  %v2964_v50 = vadd.f32 1.0, %v3244_v5  ;;  %v2875_v35 = vsub.f32 0.0, %v4499_v25  ;;  %v4512_v57 = vadd.f32 %v2678_v22, %v4384_v63  ;;  %v2513_v38 = vpop.permute.xlu1 %2512 }
 0x208   : > { %v3248_v2 = vpop.eup %3247  ;;  %v3022_v40 = vmul.f32 %v3246_v42, %v4416_v14  ;;  %3265 = vpow2.f32 %v2916_v19  ;;  %v4516_v62 = vadd.f32 %v2685_v0, %v4393_v4  ;;  %v2692_v6 = vrot.slane %v2513_v38, %v4165_v13 }
 0x209   : > { %v3250_v34 = vpop.eup %3249  ;;  %3267 = vrcp.f32 %v2964_v50  ;;  %v2965_v59 = vadd.f32 1.0, %v3248_v2  ;;  %v2920_v29 = vmul.f32 1.442695, %v2875_v35  ;;  %v2876_v36 = vsub.f32 0.0, %v4512_v57  ;;  %v2517_v53 = vpop.permute.xlu0 %2516 }
 0x20a   : > { %v3252_v63 = vpop.eup %3251  ;;  %3054 = vst [vmem:[%s4508_s28] sm:$0xf] %v3022_v40  ;;  %v3023_v21 = vmul.f32 %v3250_v34, %v4422_v32  ;;  %3269 = vpow2.f32 %v2918_v7  ;;  %v2877_v14 = vsub.f32 0.0, %v4516_v62  ;;  %v4523_v33 = vadd.f32 %v2692_v6, %v2398_v56 }
 0x20b   : > { %v3254_v4 = vpop.eup %3253  ;;  %3271 = vrcp.f32 %v2965_v59  ;;  %v2966_v51 = vadd.f32 1.0, %v3252_v63  ;;  %v2922_v12 = vmul.f32 1.442695, %v2876_v36  ;;  %v2699_v31 = vrot.slane %v2517_v53, %v4165_v13  ;;  %v2521_v61 = vpop.permute.xlu1 %2520 }
 0x20c   : > { %3055 = vst [vmem:[%s4508_s28 + $0x4] sm:$0xf] %v3023_v21  ;;  %v3024_v39 = vmul.f32 %v3254_v4, %v4428_v10  ;;  %3273 = vpow2.f32 %v2920_v29  ;;  %v2924_v58 = vmul.f32 1.442695, %v2877_v14  ;;  %v2878_v32 = vsub.f32 0.0, %v4523_v33 }
 0x20d   : > { %v3256_v19 = vpop.eup %3255  ;;  %v2328_v56 = vrot.slane %v4343_v24, %v4165_v13  ;;  %3275 = vrcp.f32 %v2966_v51  ;;  %v4531_v27 = vadd.f32 %v2699_v31, %v2399_v28  ;;  %v2706_v16 = vrot.slane %v2521_v61, %v4165_v13  ;;  %v2525_v22 = vpop.permute.xlu0 %2524 }
 0x20e   : > { %v3258_v54 = vpop.eup %3257  ;;  %3056 = vst [vmem:[%s4508_s28 + $0x8] sm:$0xf] %v3024_v39  ;;  %v3025_v5 = vmul.f32 %v3256_v19, %v4437_v44  ;;  %3277 = vpow2.f32 %v2922_v12  ;;  %v2926_v10 = vmul.f32 1.442695, %v2878_v32  ;;  %v2713_v7 = vrot.slane %v2525_v22, %v4165_v13 }
 0x20f   : > { %v3260_v0 = vpop.eup %3259  ;;  %v2967_v42 = vadd.f32 1.0, %v3258_v54  ;;  %3279 = vpow2.f32 %v2924_v58  ;;  %v2879_v50 = vsub.f32 0.0, %v4531_v27  ;;  %v4539_v28 = vadd.f32 %v2706_v16, %v4314_v18  ;;  %v2529_v35 = vpop.permute.xlu1 %2528  ;;  %v4747_v58 = vld [vmem:[#allocation10_spill] sm:$0xff] }
 0x210   : > { %v3262_v38 = vpop.eup %3261  ;;  %3057 = vst [vmem:[%s4508_s28 + $0xc] sm:$0xf] %v3025_v5  ;;  %v2968_v2 = vadd.f32 1.0, %v3260_v0  ;;  %3281 = vpow2.f32 %v2926_v10  ;;  %v4543_v44 = vadd.f32 %v2713_v7, %v4317_v26  ;;  %v2720_v40 = vrot.slane %v2529_v35, %v4165_v13 }
 0x211   : > { %v3264_v6 = vpop.eup %3263  ;;  %v3026_v34 = vmul.f32 %v3262_v38, %v4444_v17  ;;  %3283 = vrcp.f32 %v2967_v42  ;;  %v2928_v59 = vmul.f32 1.442695, %v2879_v50  ;;  %v2880_v18 = vsub.f32 0.0, %v4539_v28  ;;  %v2533_v29 = vpop.permute.xlu0 %2532 }
 0x212   : > { %v3266_v36 = vpop.eup %3265  ;;  %v3027_v53 = vmul.f32 %v3264_v6, %v4448_v3  ;;  %3285 = vrcp.f32 %v2968_v2  ;;  %v2881_v63 = vsub.f32 0.0, %v4543_v44  ;;  %v4551_v26 = vadd.f32 %v2720_v40, %v4323_v43 }
 0x213   : > { %v3268_v21 = vpop.eup %3267  ;;  %3058 = vst [vmem:[%s4508_s28 + $0x10] sm:$0xf] %v3026_v34  ;;  %v2969_v14 = vadd.f32 1.0, %v3266_v36  ;;  %3287 = vpow2.f32 %v2928_v59  ;;  %v2930_v17 = vmul.f32 1.442695, %v2880_v18  ;;  %v2727_v4 = vrot.slane %v2533_v29, %v4165_v13  ;;  %v2537_v51 = vpop.permute.xlu1 %2536 }
 0x214   : > { %v3270_v12 = vpop.eup %3269  ;;  %3059 = vst [vmem:[%s4508_s28 + $0x14] sm:$0xf] %v3027_v53  ;;  %v3028_v31 = vmul.f32 %v3268_v21, %v4455_v8  ;;  %v2932_v3 = vmul.f32 1.442695, %v2881_v63  ;;  %v2882_v61 = vsub.f32 0.0, %v4551_v26  ;;  %v2734_v39 = vrot.slane %v2537_v51, %v4165_v13 }
 0x215   : > { %v3272_v43 = vpop.eup %3271  ;;  %v1962_v32 = vmul.f32 %v4496_v47, %v4747_v58  ;;  %3289 = vrcp.f32 %v2969_v14  ;;  %v2970_v19 = vadd.f32 1.0, %v3270_v12  ;;  %v4562_v16 = vadd.f32 %v2727_v4, %v4327_v52  ;;  %v2541_v22 = vpop.permute.xlu0 %2540 }
 0x216   : > { %v3274_v54 = vpop.eup %3273  ;;  %3060 = vst [vmem:[%s4508_s28 + $0x18] sm:$0xf] %v3028_v31  ;;  %v3029_v8 = vmul.f32 %v3272_v43, %v4461_v37  ;;  %3291 = vpow2.f32 %v2930_v17  ;;  %v2934_v5 = vmul.f32 1.442695, %v2882_v61  ;;  %v4567_v10 = vadd.f32 %v2734_v39, %v4331_v20 }
 0x217   : > { %v3276_v7 = vpop.eup %3275  ;;  %3293 = vrcp.f32 %v2970_v19  ;;  %v2971_v0 = vadd.f32 1.0, %v3274_v54  ;;  %v2883_v47 = vsub.f32 0.0, %v4562_v16  ;;  %v2741_v42 = vrot.slane %v2541_v22, %v4165_v13  ;;  %v2545_v52 = vpop.permute.xlu1 %2544 }
 0x218   : > { %v3278_v50 = vpop.eup %3277  ;;  %3061 = vst [vmem:[%s4508_s28 + $0x1c] sm:$0xf] %v3029_v8  ;;  %v3030_v35 = vmul.f32 %v3276_v7, %v4467_v55  ;;  %3295 = vpow2.f32 %v2932_v3  ;;  %v2884_v37 = vsub.f32 0.0, %v4567_v10  ;;  %v2748_v38 = vrot.slane %v2545_v52, %v4165_v13 }
 0x219   : > { %v3280_v20 = vpop.eup %3279  ;;  %3297 = vrcp.f32 %v2971_v0  ;;  %v2972_v2 = vadd.f32 1.0, %v3278_v50  ;;  %v2936_v40 = vmul.f32 1.442695, %v2883_v47  ;;  %v4576_v6 = vadd.f32 %v2741_v42, %v4335_v45  ;;  %v2549_v34 = vpop.permute.xlu0 %2548 }
 0x21a   : > { %v3282_v59 = vpop.eup %3281  ;;  %3062 = vst [vmem:[%s4508_s28 + $0x20] sm:$0xf] %v3030_v35  ;;  %v2973_v18 = vadd.f32 1.0, %v3280_v20  ;;  %3299 = vpow2.f32 %v2934_v5  ;;  %v2938_v29 = vmul.f32 1.442695, %v2884_v37  ;;  %v4580_v55 = vadd.f32 %v2748_v38, %v4340_v23 }
 0x21b   : > { %v3284_v36 = vpop.eup %3283  ;;  %3301 = vrcp.f32 %v2972_v2  ;;  %v2974_v53 = vadd.f32 1.0, %v3282_v59  ;;  %v2885_v63 = vsub.f32 0.0, %v4576_v6  ;;  %v2755_v21 = vrot.slane %v2549_v34, %v4165_v13  ;;  %v2553_v14 = vpop.permute.xlu1 %2552 }
 0x21c   : > { %v3286_v45 = vpop.eup %3285  ;;  %v3031_v17 = vmul.f32 %v3284_v36, %v4474_v30  ;;  %3303 = vrcp.f32 %v2973_v18  ;;  %v2886_v4 = vsub.f32 0.0, %v4580_v55  ;;  %v2762_v51 = vrot.slane %v2553_v14, %v4165_v13 }
 0x21d   : > { %v3288_v23 = vpop.eup %3287  ;;  %v3032_v12 = vmul.f32 %v3286_v45, %v4476_v49  ;;  %3305 = vrcp.f32 %v2974_v53  ;;  %v2940_v31 = vmul.f32 1.442695, %v2885_v63  ;;  %v4589_v3 = vadd.f32 %v2755_v21, %v4348_v41  ;;  %v2557_v61 = vpop.permute.xlu0 %2556 }
 0x21e   : > { %3063 = vst [vmem:[%s4508_s28 + $0x24] sm:$0xf] %v3031_v17  ;;  %v2975_v39 = vadd.f32 1.0, %v3288_v23  ;;  %3307 = vpow2.f32 %v2936_v40  ;;  %v2942_v43 = vmul.f32 1.442695, %v2886_v4  ;;  %v4593_v30 = vadd.f32 %v2762_v51, %v4350_v60 }
 0x21f   : > { %v3290_v58 = vpop.eup %3289  ;;  %v2410_v19 = vmul.f32 %v2328_v56, %v1962_v32  ;;  %3064 = vst [vmem:[%s4508_s28 + $0x28] sm:$0xf] %v3032_v12  ;;  %3309 = vpow2.f32 %v2938_v29  ;;  %v2887_v49 = vsub.f32 0.0, %v4589_v3  ;;  %v2769_v41 = vrot.slane %v2557_v61, %v4165_v13  ;;  %v2561_v22 = vpop.permute.xlu1 %2560 }
 0x220   : > { %v3292_v54 = vpop.eup %3291  ;;  %v3033_v8 = vmul.f32 %v3290_v58, %v4484_v1  ;;  %3311 = vrcp.f32 %v2975_v39  ;;  %v2888_v60 = vsub.f32 0.0, %v4593_v30  ;;  %v2776_v5 = vrot.slane %v2561_v22, %v4165_v13 }
 0x221   : > { %v3294_v7 = vpop.eup %3293  ;;  %v2976_v0 = vadd.f32 1.0, %v3292_v54  ;;  %3313 = vpow2.f32 %v2940_v31  ;;  %v2944_v24 = vmul.f32 1.442695, %v2887_v49  ;;  %v4605_v56 = vadd.f32 %v2769_v41, %v4367_v9  ;;  %v2565_v32 = vpop.permute.xlu0 %2564 }
 0x222   : > { %v3296_v47 = vpop.eup %3295  ;;  %3065 = vst [vmem:[%s4508_s28 + $0x2c] sm:$0xf] %v3033_v8  ;;  %v3034_v42 = vmul.f32 %v3294_v7, %v4491_v11  ;;  %3315 = vpow2.f32 %v2942_v43  ;;  %v2946_v1 = vmul.f32 1.442695, %v2888_v60  ;;  %v4609_v52 = vadd.f32 %v2776_v5, %v2410_v19 }
 0x223   : > { %v3298_v50 = vpop.eup %3297  ;;  %3317 = vrcp.f32 %v2976_v0  ;;  %v2977_v35 = vadd.f32 1.0, %v3296_v47  ;;  %v2889_v37 = vsub.f32 0.0, %v4605_v56  ;;  %v2783_v38 = vrot.slane %v2565_v32, %v4165_v13  ;;  %v2569_v20 = vpop.permute.xlu1 %2568 }
 0x224   : > { %v3300_v9 = vpop.eup %3299  ;;  %3066 = vst [vmem:[%s4508_s28 + $0x30] sm:$0xf] %v3034_v42  ;;  %v3035_v2 = vmul.f32 %v3298_v50, %v4499_v25  ;;  %3319 = vpow2.f32 %v2944_v24  ;;  %v2890_v11 = vsub.f32 0.0, %v4609_v52  ;;  %v2790_v40 = vrot.slane %v2569_v20, %v4165_v13 }
 0x225   : > { %v3302_v34 = vpop.eup %3301  ;;  %3321 = vrcp.f32 %v2977_v35  ;;  %v2978_v59 = vadd.f32 1.0, %v3300_v9  ;;  %v2948_v18 = vmul.f32 1.442695, %v2889_v37  ;;  %v4618_v29 = vadd.f32 %v2783_v38, %v4406_v48  ;;  %v2573_v36 = vpop.permute.xlu0 %2572 }
 0x226   : > { %v3304_v53 = vpop.eup %3303  ;;  %3067 = vst [vmem:[%s4508_s28 + $0x34] sm:$0xf] %v3035_v2  ;;  %v3036_v63 = vmul.f32 %v3302_v34, %v4512_v57  ;;  %3323 = vpow2.f32 %v2946_v1  ;;  %v2950_v25 = vmul.f32 1.442695, %v2890_v11  ;;  %v4623_v21 = vadd.f32 %v2790_v40, %v4413_v15 }
 0x227   : > { %v3306_v14 = vpop.eup %3305  ;;  %v3037_v45 = vmul.f32 %v3304_v53, %v4516_v62  ;;  %3325 = vrcp.f32 %v2978_v59  ;;  %v2891_v17 = vsub.f32 0.0, %v4618_v29  ;;  %v2797_v48 = vrot.slane %v2573_v36, %v4165_v13 }
 0x228   : > { %v3308_v4 = vpop.eup %3307  ;;  %3068 = vst [vmem:[%s4508_s28 + $0x38] sm:$0xf] %v3036_v63  ;;  %v3038_v51 = vmul.f32 %v3306_v14, %v4523_v33  ;;  %3327 = vpow2.f32 %v2948_v18  ;;  %v2892_v57 = vsub.f32 0.0, %v4623_v21 }
 0x229   : > { %v3310_v23 = vpop.eup %3309  ;;  %3069 = vst [vmem:[%s4508_s28 + $0x3c] sm:$0xf] %v3037_v45  ;;  %v2979_v15 = vadd.f32 1.0, %v3308_v4  ;;  %3329 = vpow2.f32 %v2950_v25  ;;  %v2952_v12 = vmul.f32 1.442695, %v2891_v17  ;;  %v4633_v62 = vadd.f32 %v2797_v48, %v4419_v46 }
 0x22a   : > { %v3312_v31 = vpop.eup %3311  ;;  %3070 = vst [vmem:[%s4508_s28 + $0x40] sm:$0xf] %v3038_v51  ;;  %v2980_v61 = vadd.f32 1.0, %v3310_v23  ;;  %v2954_v19 = vmul.f32 1.442695, %v2892_v57 }
 0x22b   : > { %v3314_v13 = vpop.eup %3313  ;;  %v3039_v39 = vmul.f32 %v3312_v31, %v4531_v27  ;;  %3331 = vrcp.f32 %v2979_v15  ;;  %v2893_v33 = vsub.f32 0.0, %v4633_v62 }
 0x22c   : > { %v3316_v43 = vpop.eup %3315  ;;  %3333 = vrcp.f32 %v2980_v61  ;;  %v2981_v58 = vadd.f32 1.0, %v3314_v13 }
 0x22d   : > { %v3318_v49 = vpop.eup %3317  ;;  %3071 = vst [vmem:[%s4508_s28 + $0x44] sm:$0xf] %v3039_v39  ;;  %v2982_v41 = vadd.f32 1.0, %v3316_v43  ;;  %3335 = vpow2.f32 %v2952_v12  ;;  %v2956_v54 = vmul.f32 1.442695, %v2893_v33 }
 0x22e   : > { %v3320_v46 = vpop.eup %3319  ;;  %v3040_v22 = vmul.f32 %v3318_v49, %v4539_v28  ;;  %3337 = vrcp.f32 %v2981_v58 }
 0x22f   : > { %v3322_v8 = vpop.eup %3321  ;;  %3339 = vrcp.f32 %v2982_v41  ;;  %v2983_v27 = vadd.f32 1.0, %v3320_v46 }
 0x230   : > { %v3324_v60 = vpop.eup %3323  ;;  %3072 = vst [vmem:[%s4508_s28 + $0x48] sm:$0xf] %v3040_v22  ;;  %v3041_v5 = vmul.f32 %v3322_v8, %v4543_v44  ;;  %3341 = vpow2.f32 %v2954_v19 }
 0x231   : > { %v3326_v7 = vpop.eup %3325  ;;  %3343 = vrcp.f32 %v2983_v27  ;;  %v2984_v0 = vadd.f32 1.0, %v3324_v60 }
 0x232   : > { %v3328_v24 = vpop.eup %3327  ;;  %3073 = vst [vmem:[%s4508_s28 + $0x4c] sm:$0xf] %v3041_v5  ;;  %v3042_v32 = vmul.f32 %v3326_v7, %v4551_v26  ;;  %3345 = vpow2.f32 %v2956_v54 }
 0x233   : > { %v3330_v28 = vpop.eup %3329  ;;  %3347 = vrcp.f32 %v2984_v0  ;;  %v2985_v47 = vadd.f32 1.0, %v3328_v24 }
 0x234   : > { %3074 = vst [vmem:[%s4508_s28 + $0x50] sm:$0xf] %v3042_v32  ;;  %v2986_v42 = vadd.f32 1.0, %v3330_v28 }
 0x235   : > { %v3332_v1 = vpop.eup %3331  ;;  %3349 = vrcp.f32 %v2985_v47 }
 0x236   : > { %v3334_v44 = vpop.eup %3333  ;;  %v3043_v50 = vmul.f32 %v3332_v1, %v4562_v16  ;;  %3351 = vrcp.f32 %v2986_v42 }
 0x237   : > { %v3336_v35 = vpop.eup %3335  ;;  %v3044_v37 = vmul.f32 %v3334_v44, %v4567_v10 }
 0x238   : > { %v3338_v38 = vpop.eup %3337  ;;  %3075 = vst [vmem:[%s4508_s28 + $0x54] sm:$0xf] %v3043_v50  ;;  %v2987_v26 = vadd.f32 1.0, %v3336_v35 }
 0x239   : > { %v3340_v20 = vpop.eup %3339  ;;  %3076 = vst [vmem:[%s4508_s28 + $0x58] sm:$0xf] %v3044_v37  ;;  %v3045_v9 = vmul.f32 %v3338_v38, %v4576_v6 }
 0x23a   : > { %v3342_v2 = vpop.eup %3341  ;;  %v3046_v11 = vmul.f32 %v3340_v20, %v4580_v55  ;;  %3353 = vrcp.f32 %v2987_v26 }
 0x23b   : > { %v3344_v40 = vpop.eup %3343  ;;  %3077 = vst [vmem:[%s4508_s28 + $0x5c] sm:$0xf] %v3045_v9  ;;  %v2988_v16 = vadd.f32 1.0, %v3342_v2 }
 0x23c   : > { %v3346_v34 = vpop.eup %3345  ;;  %3078 = vst [vmem:[%s4508_s28 + $0x60] sm:$0xf] %v3046_v11  ;;  %v3047_v10 = vmul.f32 %v3344_v40, %v4589_v3 }
 0x23d   : > { %v3348_v59 = vpop.eup %3347  ;;  %3355 = vrcp.f32 %v2988_v16  ;;  %v2989_v18 = vadd.f32 1.0, %v3346_v34 }
 0x23e   : > { %3079 = vst [vmem:[%s4508_s28 + $0x64] sm:$0xf] %v3047_v10  ;;  %v3048_v6 = vmul.f32 %v3348_v59, %v4593_v30 }
 0x23f   : > { %v3350_v55 = vpop.eup %3349  ;;  %3357 = vrcp.f32 %v2989_v18 }
 0x240   : > { %v3352_v36 = vpop.eup %3351  ;;  %3080 = vst [vmem:[%s4508_s28 + $0x68] sm:$0xf] %v3048_v6  ;;  %v3049_v53 = vmul.f32 %v3350_v55, %v4605_v56 }
 0x241   : > { %v3050_v63 = vmul.f32 %v3352_v36, %v4609_v52 }
 0x242   : > { %3081 = vst [vmem:[%s4508_s28 + $0x6c] sm:$0xf] %v3049_v53 }
 0x243   : > { %3082 = vst [vmem:[%s4508_s28 + $0x70] sm:$0xf] %v3050_v63 }
 0x244   : > { %v3354_v3 = vpop.eup %3353 }
 0x245   : > { %v3051_v25 = vmul.f32 %v3354_v3, %v4618_v29 }
 0x247   : > { %v3356_v14 = vpop.eup %3355  ;;  %3083 = vst [vmem:[%s4508_s28 + $0x74] sm:$0xf] %v3051_v25 }
 0x248   : > { %v3052_v45 = vmul.f32 %v3356_v14, %v4623_v21 }
 0x249   : > { %v3358_v17 = vpop.eup %3357 }
 0x24a   : > { %3084 = vst [vmem:[%s4508_s28 + $0x78] sm:$0xf] %v3052_v45  ;;  %v3053_v30 = vmul.f32 %v3358_v17, %v4633_v62 }
 0x24c   : > { %3085 = vst [vmem:[%s4508_s28 + $0x7c] sm:$0xf] %v3053_v30 }
 0x24d PF: > { %s13_s12 = sadd.s32 1, %s3409_s12  }
 0x24e   : > { %p10_p4 = scmp.ge.s32.totalorder %s13_s12, 4  }
 0x250   :  { %12 = sbr.rel (!%p10_p4) target bundleno = 1 (0x1), region = 62 }

// kernel: residual_block_forward.10
= control target key start
LH: loop header
LB: loop body
LE: loop exit
PB: predicated region body
PF: predicated region fallthrough
CT: control target
= control target key end

     0   :  { %s611_s12 = smov 0   ;;  %s613_s13 = smov 0   ;;  %s702_s0 = inlined_call_operand.vmem [shape: bf16[2,32,256], index: 0, kind: input, shape index: {}]   ;;  %s703_s1 = inlined_call_operand.vmem [shape: bf16[64,32], index: 1, kind: input, shape index: {}]   ;;  %s704_s2 = inlined_call_operand.vmem [shape: f32[64,1], index: 2, kind: input, shape index: {}]   ;;  %s705_s3 = inlined_call_operand.vmem [shape: f32[2,64,256], index: 3, kind: output, shape index: {}]  }
   0x1   :  { %s615_s14 = smov 0  }
   0x2 LB: > { %s25_s15 = sadd.s32 1, %s584_s13  ;;  %p504_p0 = scmp.ge.s32.totalorder %s588_s14, 1  ;;  %s588_s14 = sphi %s615_s14, %s13_s14   ;;  %s584_s13 = sphi %s613_s13, %s707_s13   ;;  %s580_s12 = sphi %s611_s12, %s706_s12  }
   0x3   : > { %p27_p1 = scmp.ge.s32.totalorder %s25_s15, 2  ;;  %p158_p2 = scmp.lt.s32.totalorder %s588_s14, 3 }
   0x5   : > { %s709_s15 = smov (%p27_p1, %s25_s15), 0  ;;  %p159_p3 = pnand %p504_p0, %p158_p2 }
   0x6   : > { %p191_p4 = scmp.lt.s32.totalorder (!%p159_p3), %s580_s12, 1  ;;  %v590_v0 = vmov (!%p159_p3), 0   ;;  %v225_v1 = vld [vmem:[%s704_s2 + $0x10] sm:$0xff] (!%p159_p3)  ;;  %v223_v2 = vld [vmem:[%s704_s2] sm:$0xff] (!%p159_p3)  ;;  %v226_v6 = vld [vmem:[%s704_s2 + $0x18] sm:$0xff] (!%p159_p3)  ;;  %vm311_vm0 = vcmask (!%p159_p3), 261120  }
   0x7   : > { %162 = sbr.rel (%p159_p3) target bundleno = 252 (0xfc), region = 32  ;;  %356 = vmatprep.mubr.bf16.mxu0 (!%p159_p3), %v590_v0  ;;  %376 = vmatprep.mubr.bf16.mxu1 (!%p159_p3), %v590_v0  ;;  %v224_v7 = vld [vmem:[%s704_s2 + $0x8] sm:$0xff] (!%p159_p3)  ;;  %v562_v9 = vld [vmem:[%s703_s1] sm:$0xff] (!%p159_p3)   ;;  %v563_v10 = vld [vmem:[%s703_s1 + $0x10] sm:$0xff] (!%p159_p3)  }
   0x8   : > { %555 = vset.pattern.permute.xlu1 (!%p159_p3), %v590_v0  ;;  %554 = vset.pattern.permute.xlu0 (!%p159_p3), %v590_v0  ;;  %v228_v11 = vld [vmem:[%s704_s2 + $0x28] sm:$0xff] (!%p159_p3)  ;;  %v227_v12 = vld [vmem:[%s704_s2 + $0x20] sm:$0xff] (!%p159_p3)  ;;  %v230_v13 = vld [vmem:[%s704_s2 + $0x38] sm:$0xff] (!%p159_p3) }
   0x9   : > { %243 = vperm.xlu1 (!%p159_p3), %555, %v225_v1   ;;  %233 = vperm.xlu0 (!%p159_p3), %554, %v223_v2   ;;  %v229_v14 = vld [vmem:[%s704_s2 + $0x30] sm:$0xff] (!%p159_p3)  ;;  %v564_v15 = vld [vmem:[%s703_s1 + $0x8] sm:$0xff] (!%p159_p3)   ;;  %v565_v16 = vld [vmem:[%s703_s1 + $0x18] sm:$0xff] (!%p159_p3)  }
   0xd   : > { %248 = vperm.xlu1 (!%p159_p3), %555, %v226_v6   ;;  %238 = vperm.xlu0 (!%p159_p3), %554, %v224_v7  }
   0xe   : > { %s711_s12 = smov (!%p191_p4, %s580_s12), 1 }
   0xf   : > { %s523_s16 = sshll.u32 %s711_s12, 5  ;;  %s524_s21 = sshll.u32 %s711_s12, 7 }
  0x10   : > { %s198_s23 = scalar_lea.vmem %s702_s0, %s523_s16  ;;  %s675_s24 = scalar_lea.vmem %s705_s3, %s524_s21 }
  0x11   : > { %v556_v3 = vld [vmem:[%s198_s23 + $0x4] ss:$8 sps:$4 sm:$0xff]   ;;  %v558_v4 = vld [vmem:[%s198_s23] ss:$8 sps:$4 sm:$0xff]   ;;  %v559_v5 = vld [vmem:[%s198_s23 + $0x14] ss:$8 sps:$4 sm:$0xff]   ;;  %258 = vperm.xlu1 %555, %v228_v11   ;;  %253 = vperm.xlu0 %554, %v227_v12  }
  0x12   : > { %324 = vmatprep.subr.bf16.mxu0 %v556_v3  ;;  %525 = vmatprep.subr.bf16.mxu1 %v556_v3  ;;  %v561_v8 = vld [vmem:[%s198_s23 + $0x10] ss:$8 sps:$4 sm:$0xff]  }
  0x13   : > { %325 = vmatpush1.bf16.msra.mxu0 %v558_v4  ;;  %527 = vmatpush1.bf16.msra.mxu1 %v558_v4 }
  0x14   : > { %326 = vmatprep.subr.bf16.mxu0 %v559_v5  ;;  %526 = vmatprep.subr.bf16.mxu1 %v559_v5 }
  0x15   : > { %268 = vperm.xlu1 %555, %v230_v13   ;;  %263 = vperm.xlu0 %554, %v229_v14  }
  0x17   : > { %327 = vmatpush1.bf16.msra.mxu0 %v561_v8  ;;  %528 = vmatpush1.bf16.msra.mxu1 %v561_v8 }
  0x1a   : > { %517 = vmatmul.mubr.msk.bf16.vlgmr.msra.gmra.mrb[0].mxu0 %vm311_vm0, %v562_v9  ;;  %519 = vmatmul.mubr.msk.bf16.vlgmr.msra.gmra.mrb[0].mxu1 %vm311_vm0, %v563_v10 }
  0x1b   : > { %366 = vmatprep.mubr.bf16.mxu0 %v590_v0  ;;  %386 = vmatprep.mubr.bf16.mxu1 %v590_v0 }
  0x22   : > { %518 = vmatmul.mubr.msk.bf16.gmra.mrb[4].mxu0 %vm311_vm0, %v564_v15  ;;  %520 = vmatmul.mubr.msk.bf16.gmra.mrb[4].mxu1 %vm311_vm0, %v565_v16 }
  0x88   : > { %v244_v17 = vpop.permute.xlu1 %243  ;;  %v234_v18 = vpop.permute.xlu0 %233 }
  0x8c   : > { %v249_v19 = vpop.permute.xlu1 %248  ;;  %v239_v20 = vpop.permute.xlu0 %238 }
  0x90   : > { %v259_v21 = vpop.permute.xlu1 %258  ;;  %v254_v22 = vpop.permute.xlu0 %253 }
  0x94   : > { %v269_v39 = vpop.permute.xlu1 %268  ;;  %v264_v40 = vpop.permute.xlu0 %263 }
  0xed   : > { %v358_v23 = vpop.f32.mrb[0].mxu0  ;;  %v378_v24 = vpop.f32.mrb[0].mxu1 }
  0xee   : > { %v359_v25 = vadd.f32 %v358_v23, %v234_v18  ;;  %v379_v26 = vadd.f32 %v378_v24, %v254_v22  ;;  %v360_v27 = vpop.f32.mrb[1].mxu0  ;;  %v380_v28 = vpop.f32.mrb[1].mxu1 }
  0xef   : > { %v361_v29 = vadd.f32 %v360_v27, %v234_v18  ;;  %v381_v30 = vadd.f32 %v380_v28, %v254_v22  ;;  %v362_v31 = vpop.f32.mrb[2].mxu0  ;;  %v382_v32 = vpop.f32.mrb[2].mxu1 }
  0xf0   : > { %397 = vst [vmem:[%s675_s24] sm:$0xff] %v359_v25  ;;  %405 = vst [vmem:[%s675_s24 + $0x40] sm:$0xff] %v379_v26  ;;  %v363_v33 = vadd.f32 %v362_v31, %v239_v20  ;;  %v383_v34 = vadd.f32 %v382_v32, %v259_v21  ;;  %v364_v35 = vpop.f32.mrb[3].mxu0  ;;  %v384_v36 = vpop.f32.mrb[3].mxu1 }
  0xf1   : > { %398 = vst [vmem:[%s675_s24 + $0x8] sm:$0xff] %v361_v29  ;;  %406 = vst [vmem:[%s675_s24 + $0x48] sm:$0xff] %v381_v30  ;;  %v365_v37 = vadd.f32 %v364_v35, %v239_v20  ;;  %v385_v38 = vadd.f32 %v384_v36, %v259_v21 }
  0xf2   : > { %399 = vst [vmem:[%s675_s24 + $0x10] sm:$0xff] %v363_v33  ;;  %407 = vst [vmem:[%s675_s24 + $0x50] sm:$0xff] %v383_v34 }
  0xf3   : > { %400 = vst [vmem:[%s675_s24 + $0x18] sm:$0xff] %v365_v37  ;;  %408 = vst [vmem:[%s675_s24 + $0x58] sm:$0xff] %v385_v38 }
  0xf5   : > { %v368_v41 = vpop.f32.mrb[4].mxu0  ;;  %v388_v42 = vpop.f32.mrb[4].mxu1 }
  0xf6   : > { %v369_v43 = vadd.f32 %v368_v41, %v244_v17  ;;  %v389_v44 = vadd.f32 %v388_v42, %v264_v40  ;;  %v370_v45 = vpop.f32.mrb[5].mxu0  ;;  %v390_v46 = vpop.f32.mrb[5].mxu1 }
  0xf7   : > { %v371_v47 = vadd.f32 %v370_v45, %v244_v17  ;;  %v391_v48 = vadd.f32 %v390_v46, %v264_v40  ;;  %v372_v49 = vpop.f32.mrb[6].mxu0  ;;  %v392_v50 = vpop.f32.mrb[6].mxu1 }
  0xf8   : > { %401 = vst [vmem:[%s675_s24 + $0x20] sm:$0xff] %v369_v43  ;;  %409 = vst [vmem:[%s675_s24 + $0x60] sm:$0xff] %v389_v44  ;;  %v373_v51 = vadd.f32 %v372_v49, %v249_v19  ;;  %v393_v52 = vadd.f32 %v392_v50, %v269_v39  ;;  %v374_v53 = vpop.f32.mrb[7].mxu0  ;;  %v394_v54 = vpop.f32.mrb[7].mxu1 }
  0xf9   : > { %402 = vst [vmem:[%s675_s24 + $0x28] sm:$0xff] %v371_v47  ;;  %410 = vst [vmem:[%s675_s24 + $0x68] sm:$0xff] %v391_v48  ;;  %v375_v55 = vadd.f32 %v374_v53, %v249_v19  ;;  %v395_v56 = vadd.f32 %v394_v54, %v269_v39 }
  0xfa   : > { %403 = vst [vmem:[%s675_s24 + $0x30] sm:$0xff] %v373_v51  ;;  %411 = vst [vmem:[%s675_s24 + $0x70] sm:$0xff] %v393_v52 }
  0xfb   : > { %404 = vst [vmem:[%s675_s24 + $0x38] sm:$0xff] %v375_v55  ;;  %412 = vst [vmem:[%s675_s24 + $0x78] sm:$0xff] %v395_v56 }
  0xfc PF: > { %s13_s14 = sadd.s32 1, %s588_s14   ;;  %s706_s12 = smov %s584_s13 }
  0xfd   : > { %p10_p5 = scmp.ge.s32.totalorder %s13_s14, 4   ;;  %s707_s13 = smov %s709_s15 }
  0xff   :  { %12 = sbr.rel (!%p10_p5) target bundleno = 2 (0x2), region = 62 }

// kernel: residual_block_forward.11
= control target key start
LH: loop header
LB: loop body
LE: loop exit
PB: predicated region body
PF: predicated region fallthrough
CT: control target
= control target key end

     0   :  { %s980_s15 = smov 0   ;;  %s982_s16 = smov 0   ;;  %s1119_s0 = inlined_call_operand.vmem [shape: bf16[2,9,64,256], index: 0, kind: input, shape index: {}]   ;;  %s1120_s1 = inlined_call_operand.vmem [shape: bf16[9,64,64], index: 1, kind: input, shape index: {}]   ;;  %s1121_s2 = inlined_call_operand.vmem [shape: f32[64,1], index: 2, kind: input, shape index: {}]   ;;  %s1122_s3 = inlined_call_operand.vmem [shape: f32[2,64,256], index: 3, kind: input, shape index: {}]   ;;  %s1123_s4 = inlined_call_operand.vmem [shape: f32[2,64,256], index: 4, kind: output, shape index: {}]  }
   0x1   :  { %s984_s17 = smov 0   ;;  %s986_s18 = smov 0  }
   0x2   :  { %s988_s19 = smov 0  }
   0x3 LB: > { %s26_s20 = sadd.s32 1, %s942_s17  ;;  %s33_s21 = sadd.s32 1, %s946_s18  ;;  %s950_s19 = sphi %s988_s19, %s14_s19   ;;  %s946_s18 = sphi %s986_s18, %s1127_s18   ;;  %s942_s17 = sphi %s984_s17, %s1126_s17   ;;  %s938_s16 = sphi %s982_s16, %s1125_s16   ;;  %s934_s15 = sphi %s980_s15, %s1124_s15  }
   0x4   : > { %p27_p0 = scmp.ge.s32.totalorder %s26_s20, 9  ;;  %p810_p1 = scmp.ge.s32.totalorder %s950_s19, 1 }
   0x5   : > { %p223_p2 = scmp.lt.s32.totalorder %s950_s19, 19 }
   0x6   : > { %s1129_s20 = smov (%p27_p0, %s26_s20), 0  ;;  %s1131_s21 = smov (!%p27_p0, %s33_s21), %s946_s18 }
   0x7   : > { %p224_p3 = pnand %p810_p1, %p223_p2  ;;  %p35_p4 = scmp.ge.s32.totalorder %s1131_s21, 2 }
   0x8   : > { %p276_p5 = scmp.lt.s32.totalorder (!%p224_p3), %s938_s16, 1  ;;  %p278_p6 = scmp.lt.s32.totalorder (!%p224_p3), %s934_s15, 8 }
   0x9   : > { %s1133_s21 = smov (%p35_p4, %s1131_s21), 0  ;;  %227 = sbr.rel (%p224_p3) target bundleno = 284 (0x11c), region = 36 }
   0xa   : > { %p819_p7 = scmp.ne.s32.totalorder (!%p224_p3), %s934_s15, 0 }
  0x10   : > { %s1135_s16 = smov (!%p276_p5, %s938_s16), 1  ;;  %318 = sbr.rel (%p819_p7) target bundleno = 27 (0x1b), region = 40 }
  0x11   : > { %s279_s22 = scalar_select %p278_p6, %s934_s15, 8 }
  0x12   : > { %s850_s23 = smul.u32 144, %s1135_s16  ;;  %s840_s24 = sshll.u32 %s1135_s16, 7  ;;  %v952_v0 = vmov (!%p819_p7), 0.0  }
  0x13   : > { %s811_s25 = sshll.u32 %s279_s22, 4  ;;  %s839_s26 = sshll.u32 %s279_s22, 5  ;;  %319 = vst [vmem:[#allocation2] sm:$0xff] (!%p819_p7), %v952_v0  ;;  %320 = vst [vmem:[#allocation2 + $0x8] sm:$0xff] (!%p819_p7), %v952_v0 }
  0x14   : > { %s285_s27 = sadd.s32 %s850_s23, %s811_s25  ;;  %s1017_s30 = scalar_lea.vmem %s1120_s1, %s839_s26  ;;  %321 = vst [vmem:[#allocation2 + $0x10] sm:$0xff] (!%p819_p7), %v952_v0  ;;  %322 = vst [vmem:[#allocation2 + $0x18] sm:$0xff] (!%p819_p7), %v952_v0 }
  0x15   : > { %s812_s5 = sshll.u32 %s285_s27, 2  ;;  %s1022_s8 = scalar_lea.vmem %s1122_s3, %s840_s24  ;;  %323 = vst [vmem:[#allocation2 + $0x20] sm:$0xff] (!%p819_p7), %v952_v0  ;;  %324 = vst [vmem:[#allocation2 + $0x28] sm:$0xff] (!%p819_p7), %v952_v0 }
  0x16   : > { %s1027_s11 = scalar_lea.vmem %s1119_s0, %s812_s5  ;;  %s1032_s14 = scalar_lea.vmem %s1123_s4, %s840_s24  ;;  %325 = vst [vmem:[#allocation2 + $0x30] sm:$0xff] (!%p819_p7), %v952_v0  ;;  %326 = vst [vmem:[#allocation2 + $0x38] sm:$0xff] (!%p819_p7), %v952_v0 }
  0x17   : > { %327 = vst [vmem:[#allocation2 + $0x40] sm:$0xff] %v952_v0  ;;  %328 = vst [vmem:[#allocation2 + $0x48] sm:$0xff] %v952_v0 }
  0x18   : > { %329 = vst [vmem:[#allocation2 + $0x50] sm:$0xff] %v952_v0  ;;  %330 = vst [vmem:[#allocation2 + $0x58] sm:$0xff] %v952_v0 }
  0x19   : > { %331 = vst [vmem:[#allocation2 + $0x60] sm:$0xff] %v952_v0  ;;  %332 = vst [vmem:[#allocation2 + $0x68] sm:$0xff] %v952_v0 }
  0x1a   : > { %333 = vst [vmem:[#allocation2 + $0x70] sm:$0xff] %v952_v0  ;;  %334 = vst [vmem:[#allocation2 + $0x78] sm:$0xff] %v952_v0 }
  0x1b PF: > { %v894_v1 = vld [vmem:[%s1027_s11 + $0x4] ss:$8 sps:$4 sm:$0xff]   ;;  %v896_v2 = vld [vmem:[%s1027_s11] ss:$8 sps:$4 sm:$0xff]   ;;  %v953_v3 = vmov 0   ;;  %v907_v11 = vld [vmem:[%s1017_s30 + $0x10] sm:$0xff]  }
  0x1c   : > { %472 = vmatprep.mubr.bf16.mxu0 %v953_v3  ;;  %492 = vmatprep.mubr.bf16.mxu1 %v953_v3  ;;  %v897_v4 = vld [vmem:[%s1027_s11 + $0x14] ss:$8 sps:$4 sm:$0xff]   ;;  %v899_v5 = vld [vmem:[%s1027_s11 + $0x10] ss:$8 sps:$4 sm:$0xff]   ;;  %v900_v6 = vld [vmem:[%s1027_s11 + $0x24] ss:$8 sps:$4 sm:$0xff]  }
  0x1d   : > { %440 = vmatprep.subr.bf16.mxu0 %v894_v1  ;;  %842 = vmatprep.subr.bf16.mxu1 %v894_v1  ;;  %v902_v7 = vld [vmem:[%s1027_s11 + $0x20] ss:$8 sps:$4 sm:$0xff]   ;;  %v903_v8 = vld [vmem:[%s1027_s11 + $0x34] ss:$8 sps:$4 sm:$0xff]   ;;  %v905_v9 = vld [vmem:[%s1027_s11 + $0x30] ss:$8 sps:$4 sm:$0xff]  }
  0x1e   : > { %441 = vmatpush1.bf16.msra.mxu0 %v896_v2  ;;  %846 = vmatpush1.bf16.msra.mxu1 %v896_v2  ;;  %v906_v10 = vld [vmem:[%s1017_s30] sm:$0xff]   ;;  %vm427_vm0 = vcmask 523264   ;;  %v908_v12 = vld [vmem:[%s1017_s30 + $0x8] sm:$0xff]   ;;  %v909_v13 = vld [vmem:[%s1017_s30 + $0x18] sm:$0xff]   ;;  %p836_p8 = scmp.ne.s32.totalorder %s934_s15, 8 }
  0x1f   : > { %442 = vmatprep.subr.bf16.mxu0 %v897_v4  ;;  %843 = vmatprep.subr.bf16.mxu1 %v897_v4  ;;  %v335_v14 = vld [vmem:[#allocation2] sm:$0xff]  ;;  %v336_v16 = vld [vmem:[#allocation2 + $0x8] sm:$0xff]  ;;  %v337_v20 = vld [vmem:[#allocation2 + $0x10] sm:$0xff]  ;;  %v954_v0 = vmov (!%p836_p8), 0  }
  0x20   : > { %v345_v21 = vld [vmem:[#allocation2 + $0x50] sm:$0xff]  ;;  %v338_v26 = vld [vmem:[#allocation2 + $0x18] sm:$0xff]  ;;  %v339_v38 = vld [vmem:[#allocation2 + $0x20] sm:$0xff]  ;;  %911 = vset.pattern.permute.xlu1 (!%p836_p8), %v954_v0  ;;  %910 = vset.pattern.permute.xlu0 (!%p836_p8), %v954_v0 }
  0x21   : > { %v346_v27 = vld [vmem:[#allocation2 + $0x58] sm:$0xff]  ;;  %v347_v39 = vld [vmem:[#allocation2 + $0x60] sm:$0xff]  ;;  %v340_v40 = vld [vmem:[#allocation2 + $0x28] sm:$0xff] }
  0x22   : > { %443 = vmatpush1.bf16.msra.mxu0 %v899_v5  ;;  %847 = vmatpush1.bf16.msra.mxu1 %v899_v5  ;;  %v343_v15 = vld [vmem:[#allocation2 + $0x40] sm:$0xff]  ;;  %v344_v17 = vld [vmem:[#allocation2 + $0x48] sm:$0xff]  ;;  %v341_v44 = vld [vmem:[#allocation2 + $0x30] sm:$0xff] }
  0x23   : > { %444 = vmatprep.subr.bf16.mxu0 %v900_v6  ;;  %844 = vmatprep.subr.bf16.mxu1 %v900_v6  ;;  %v348_v41 = vld [vmem:[#allocation2 + $0x68] sm:$0xff]  ;;  %v349_v45 = vld [vmem:[#allocation2 + $0x70] sm:$0xff]  ;;  %v342_v50 = vld [vmem:[#allocation2 + $0x38] sm:$0xff] }
  0x24   : > { %v350_v51 = vld [vmem:[#allocation2 + $0x78] sm:$0xff]  ;;  %v567_v62 = vld [vmem:[%s1121_s2 + $0x10] sm:$0xff] (!%p836_p8)  ;;  %v565_v63 = vld [vmem:[%s1121_s2] sm:$0xff] (!%p836_p8) }
  0x25   : > { %585 = vperm.xlu1 (!%p836_p8), %911, %v567_v62   ;;  %575 = vperm.xlu0 (!%p836_p8), %910, %v565_v63   ;;  %v568_v1 = vld [vmem:[%s1121_s2 + $0x18] sm:$0xff] (!%p836_p8)  ;;  %v566_v2 = vld [vmem:[%s1121_s2 + $0x8] sm:$0xff] (!%p836_p8)  ;;  %v569_v4 = vld [vmem:[%s1121_s2 + $0x20] sm:$0xff] (!%p836_p8) }
  0x26   : > { %445 = vmatpush1.bf16.msra.mxu0 %v902_v7  ;;  %848 = vmatpush1.bf16.msra.mxu1 %v902_v7  ;;  %v572_v5 = vld [vmem:[%s1121_s2 + $0x38] sm:$0xff] (!%p836_p8)  ;;  %v571_v6 = vld [vmem:[%s1121_s2 + $0x30] sm:$0xff] (!%p836_p8) }
  0x27   : > { %446 = vmatprep.subr.bf16.mxu0 %v903_v8  ;;  %845 = vmatprep.subr.bf16.mxu1 %v903_v8 }
  0x29   : > { %590 = vperm.xlu1 (!%p836_p8), %911, %v568_v1   ;;  %580 = vperm.xlu0 (!%p836_p8), %910, %v566_v2   ;;  %v643_v1 = vld [vmem:[%s1022_s8 + $0x70] sm:$0xff] (!%p836_p8)  ;;  %v644_v2 = vld [vmem:[%s1022_s8 + $0x78] sm:$0xff] (!%p836_p8) }
  0x2a   : > { %447 = vmatpush1.bf16.msra.mxu0 %v905_v9  ;;  %849 = vmatpush1.bf16.msra.mxu1 %v905_v9 }
  0x2d   : > { %832 = vmatmul.mubr.msk.bf16.vlgmr.msra.gmra.mrb[0].mxu0 %vm427_vm0, %v906_v10  ;;  %834 = vmatmul.mubr.msk.bf16.vlgmr.msra.gmra.mrb[0].mxu1 %vm427_vm0, %v907_v11  ;;  %v633_v11 = vld [vmem:[%s1022_s8 + $0x20] sm:$0xff] (!%p836_p8) }
  0x2e   : > { %482 = vmatprep.mubr.bf16.mxu0 %v953_v3  ;;  %502 = vmatprep.mubr.bf16.mxu1 %v953_v3  ;;  %v570_v3 = vld [vmem:[%s1121_s2 + $0x28] sm:$0xff] (!%p836_p8) }
  0x2f   : > { %600 = vperm.xlu1 (!%p836_p8), %911, %v570_v3   ;;  %595 = vperm.xlu0 (!%p836_p8), %910, %v569_v4   ;;  %v641_v4 = vld [vmem:[%s1022_s8 + $0x60] sm:$0xff] (!%p836_p8) }
  0x33   : > { %610 = vperm.xlu1 (!%p836_p8), %911, %v572_v5   ;;  %605 = vperm.xlu0 (!%p836_p8), %910, %v571_v6   ;;  %v642_v5 = vld [vmem:[%s1022_s8 + $0x68] sm:$0xff] (!%p836_p8) }
  0x35   : > { %833 = vmatmul.mubr.msk.bf16.gmra.mrb[4].mxu0 %vm427_vm0, %v908_v12  ;;  %835 = vmatmul.mubr.msk.bf16.gmra.mrb[4].mxu1 %vm427_vm0, %v909_v13  ;;  %v634_v12 = vld [vmem:[%s1022_s8 + $0x28] sm:$0xff] (!%p836_p8) }
  0xa4   : > { %v586_v13 = vpop.permute.xlu1 (!%p836_p8), %585 }
 0x100   : > { %v474_v18 = vpop.f32.mrb[0].mxu0  ;;  %v494_v19 = vpop.f32.mrb[0].mxu1 }
 0x101   : > { %v513_v22 = vadd.f32 %v474_v18, %v335_v14  ;;  %v521_v23 = vadd.f32 %v494_v19, %v343_v15  ;;  %v476_v24 = vpop.f32.mrb[1].mxu0  ;;  %v496_v25 = vpop.f32.mrb[1].mxu1  ;;  %v629_v14 = vld [vmem:[%s1022_s8] sm:$0xff] (!%p836_p8)  ;;  %v630_v15 = vld [vmem:[%s1022_s8 + $0x8] sm:$0xff] (!%p836_p8) }
 0x102   : > { %v514_v28 = vadd.f32 %v476_v24, %v336_v16  ;;  %v522_v29 = vadd.f32 %v496_v25, %v344_v17  ;;  %v478_v30 = vpop.f32.mrb[2].mxu0  ;;  %v498_v31 = vpop.f32.mrb[2].mxu1 }
 0x103   : > { %529 = vst [vmem:[#allocation2] sm:$0xff] %v513_v22  ;;  %537 = vst [vmem:[#allocation2 + $0x40] sm:$0xff] %v521_v23  ;;  %v515_v32 = vadd.f32 %v478_v30, %v337_v20  ;;  %v523_v33 = vadd.f32 %v498_v31, %v345_v21  ;;  %v480_v34 = vpop.f32.mrb[3].mxu0  ;;  %v500_v35 = vpop.f32.mrb[3].mxu1  ;;  %v636_v30 = vld [vmem:[%s1022_s8 + $0x38] sm:$0xff] (!%p836_p8) }
 0x104   : > { %530 = vst [vmem:[#allocation2 + $0x8] sm:$0xff] %v514_v28  ;;  %538 = vst [vmem:[#allocation2 + $0x48] sm:$0xff] %v522_v29  ;;  %v516_v36 = vadd.f32 %v480_v34, %v338_v26  ;;  %v524_v37 = vadd.f32 %v500_v35, %v346_v27  ;;  %v576_v16 = vpop.permute.xlu0 (!%p836_p8), %575  ;;  %v635_v29 = vld [vmem:[%s1022_s8 + $0x30] sm:$0xff] (!%p836_p8)  ;;  %v591_v31 = vpop.permute.xlu1 (!%p836_p8), %590 }
 0x105   : > { %531 = vst [vmem:[#allocation2 + $0x10] sm:$0xff] %v515_v32  ;;  %539 = vst [vmem:[#allocation2 + $0x50] sm:$0xff] %v523_v33  ;;  %v631_v32 = vld [vmem:[%s1022_s8 + $0x10] sm:$0xff] (!%p836_p8)  ;;  %v632_v33 = vld [vmem:[%s1022_s8 + $0x18] sm:$0xff] (!%p836_p8) }
 0x106   : > { %532 = vst [vmem:[#allocation2 + $0x18] sm:$0xff] %v516_v36  ;;  %540 = vst [vmem:[#allocation2 + $0x58] sm:$0xff] %v524_v37 }
 0x108   : > { %v484_v42 = vpop.f32.mrb[4].mxu0  ;;  %v504_v43 = vpop.f32.mrb[4].mxu1  ;;  %548 = sbr.rel (%p836_p8) target bundleno = 284 (0x11c), region = 44 }
 0x109   : > { %v517_v46 = vadd.f32 %v484_v42, %v339_v38  ;;  %v525_v47 = vadd.f32 %v504_v43, %v347_v39  ;;  %v486_v48 = vpop.f32.mrb[5].mxu0  ;;  %v506_v49 = vpop.f32.mrb[5].mxu1 }
 0x10a   : > { %v518_v52 = vadd.f32 %v486_v48, %v340_v40  ;;  %v526_v53 = vadd.f32 %v506_v49, %v348_v41  ;;  %v488_v54 = vpop.f32.mrb[6].mxu0  ;;  %v508_v55 = vpop.f32.mrb[6].mxu1  ;;  %v549_v9 = vld [vmem:[#allocation2] sm:$0xff] (!%p836_p8)  ;;  %v640_v48 = vld [vmem:[%s1022_s8 + $0x58] sm:$0xff] (!%p836_p8) }
 0x10b   : > { %533 = vst [vmem:[#allocation2 + $0x20] sm:$0xff] %v517_v46  ;;  %541 = vst [vmem:[#allocation2 + $0x60] sm:$0xff] %v525_v47  ;;  %v519_v56 = vadd.f32 %v488_v54, %v341_v44  ;;  %v527_v57 = vadd.f32 %v508_v55, %v349_v45  ;;  %v490_v58 = vpop.f32.mrb[7].mxu0  ;;  %v510_v59 = vpop.f32.mrb[7].mxu1  ;;  %v550_v10 = vld [vmem:[#allocation2 + $0x8] sm:$0xff] (!%p836_p8)  ;;  %v613_v19 = vadd.f32 (!%p836_p8), %v576_v16, %v549_v9  ;;  %v557_v41 = vld [vmem:[#allocation2 + $0x40] sm:$0xff] (!%p836_p8) }
 0x10c   : > { %534 = vst [vmem:[#allocation2 + $0x28] sm:$0xff] %v518_v52  ;;  %542 = vst [vmem:[#allocation2 + $0x68] sm:$0xff] %v526_v53  ;;  %v520_v60 = vadd.f32 %v490_v58, %v342_v50  ;;  %v528_v61 = vadd.f32 %v510_v59, %v350_v51  ;;  %v614_v20 = vadd.f32 (!%p836_p8), %v576_v16, %v550_v10  ;;  %v551_v23 = vld [vmem:[#allocation2 + $0x10] sm:$0xff] (!%p836_p8)  ;;  %v581_v34 = vpop.permute.xlu0 (!%p836_p8), %580  ;;  %v558_v42 = vld [vmem:[#allocation2 + $0x48] sm:$0xff] (!%p836_p8)  ;;  %v601_v49 = vpop.permute.xlu1 (!%p836_p8), %600 }
 0x10d   : > { %535 = vst [vmem:[#allocation2 + $0x30] sm:$0xff] %v519_v56  ;;  %543 = vst [vmem:[#allocation2 + $0x70] sm:$0xff] %v527_v57  ;;  %v552_v24 = vld [vmem:[#allocation2 + $0x18] sm:$0xff] (!%p836_p8)  ;;  %v645_v27 = vadd.f32 (!%p836_p8), %v629_v14, %v613_v19  ;;  %v615_v37 = vadd.f32 (!%p836_p8), %v581_v34, %v551_v23  ;;  %v559_v39 = vld [vmem:[#allocation2 + $0x50] sm:$0xff] (!%p836_p8) }
 0x10e   : > { %536 = vst [vmem:[#allocation2 + $0x38] sm:$0xff] %v520_v60  ;;  %544 = vst [vmem:[#allocation2 + $0x78] sm:$0xff] %v528_v61  ;;  %v646_v28 = vadd.f32 (!%p836_p8), %v630_v15, %v614_v20  ;;  %v616_v38 = vadd.f32 (!%p836_p8), %v581_v34, %v552_v24  ;;  %v560_v40 = vld [vmem:[#allocation2 + $0x58] sm:$0xff] (!%p836_p8)  ;;  %v639_v47 = vld [vmem:[%s1022_s8 + $0x50] sm:$0xff] (!%p836_p8)  ;;  %v623_v53 = vadd.f32 (!%p836_p8), %v601_v49, %v559_v39 }
 0x10f   : > { %661 = vst [vmem:[%s1032_s14] sm:$0xff] %v645_v27  ;;  %v647_v45 = vadd.f32 %v631_v32, %v615_v37  ;;  %v637_v50 = vld [vmem:[%s1022_s8 + $0x40] sm:$0xff]  ;;  %v638_v51 = vld [vmem:[%s1022_s8 + $0x48] sm:$0xff]  ;;  %v624_v54 = vadd.f32 %v601_v49, %v560_v40 }
 0x110   : > { %662 = vst [vmem:[%s1032_s14 + $0x8] sm:$0xff] %v646_v28  ;;  %v648_v46 = vadd.f32 %v632_v33, %v616_v38  ;;  %v596_v52 = vpop.permute.xlu0 %595  ;;  %v655_v61 = vadd.f32 %v639_v47, %v623_v53  ;;  %v611_v3 = vpop.permute.xlu1 %610 }
 0x111   : > { %663 = vst [vmem:[%s1032_s14 + $0x10] sm:$0xff] %v647_v45  ;;  %v621_v55 = vadd.f32 %v596_v52, %v557_v41  ;;  %v622_v56 = vadd.f32 %v596_v52, %v558_v42  ;;  %v656_v62 = vadd.f32 %v640_v48, %v624_v54 }
 0x112   : > { %v553_v7 = vld [vmem:[#allocation2 + $0x20] sm:$0xff]  ;;  %664 = vst [vmem:[%s1032_s14 + $0x18] sm:$0xff] %v648_v46  ;;  %671 = vst [vmem:[%s1032_s14 + $0x50] sm:$0xff] %v655_v61 }
 0x113   : > { %v554_v8 = vld [vmem:[#allocation2 + $0x28] sm:$0xff]  ;;  %v617_v17 = vadd.f32 %v586_v13, %v553_v7  ;;  %v561_v59 = vld [vmem:[#allocation2 + $0x60] sm:$0xff]  ;;  %v653_v63 = vadd.f32 %v637_v50, %v621_v55  ;;  %v654_v0 = vadd.f32 %v638_v51, %v622_v56  ;;  %672 = vst [vmem:[%s1032_s14 + $0x58] sm:$0xff] %v656_v62 }
 0x114   : > { %v618_v18 = vadd.f32 %v586_v13, %v554_v8  ;;  %v555_v21 = vld [vmem:[#allocation2 + $0x30] sm:$0xff]  ;;  %v562_v60 = vld [vmem:[#allocation2 + $0x68] sm:$0xff]  ;;  %v606_v6 = vpop.permute.xlu0 %605 }
 0x115   : > { %v556_v22 = vld [vmem:[#allocation2 + $0x38] sm:$0xff]  ;;  %v649_v25 = vadd.f32 %v633_v11, %v617_v17  ;;  %v619_v35 = vadd.f32 %v591_v31, %v555_v21  ;;  %v563_v57 = vld [vmem:[#allocation2 + $0x70] sm:$0xff]  ;;  %669 = vst [vmem:[%s1032_s14 + $0x40] sm:$0xff] %v653_v63  ;;  %670 = vst [vmem:[%s1032_s14 + $0x48] sm:$0xff] %v654_v0  ;;  %v625_v9 = vadd.f32 %v606_v6, %v561_v59 }
 0x116   : > { %v650_v26 = vadd.f32 %v634_v12, %v618_v18  ;;  %v620_v36 = vadd.f32 %v591_v31, %v556_v22  ;;  %v564_v58 = vld [vmem:[#allocation2 + $0x78] sm:$0xff]  ;;  %v627_v7 = vadd.f32 %v611_v3, %v563_v57  ;;  %v626_v10 = vadd.f32 %v606_v6, %v562_v60 }
 0x117   : > { %665 = vst [vmem:[%s1032_s14 + $0x20] sm:$0xff] %v649_v25  ;;  %v651_v43 = vadd.f32 %v635_v29, %v619_v35  ;;  %v628_v8 = vadd.f32 %v611_v3, %v564_v58  ;;  %v657_v13 = vadd.f32 %v641_v4, %v625_v9 }
 0x118   : > { %666 = vst [vmem:[%s1032_s14 + $0x28] sm:$0xff] %v650_v26  ;;  %v652_v44 = vadd.f32 %v636_v30, %v620_v36  ;;  %v659_v11 = vadd.f32 %v643_v1, %v627_v7  ;;  %v658_v14 = vadd.f32 %v642_v5, %v626_v10 }
 0x119   : > { %667 = vst [vmem:[%s1032_s14 + $0x30] sm:$0xff] %v651_v43  ;;  %v660_v12 = vadd.f32 %v644_v2, %v628_v8  ;;  %673 = vst [vmem:[%s1032_s14 + $0x60] sm:$0xff] %v657_v13 }
 0x11a   : > { %668 = vst [vmem:[%s1032_s14 + $0x38] sm:$0xff] %v652_v44  ;;  %675 = vst [vmem:[%s1032_s14 + $0x70] sm:$0xff] %v659_v11 }
 0x11b   : > { %676 = vst [vmem:[%s1032_s14 + $0x78] sm:$0xff] %v660_v12  ;;  %674 = vst [vmem:[%s1032_s14 + $0x68] sm:$0xff] %v658_v14 }
 0x11c PF: > { %s14_s19 = sadd.s32 1, %s950_s19   ;;  %s1124_s15 = smov %s942_s17 }
 0x11d   : > { %p11_p9 = scmp.ge.s32.totalorder %s14_s19, 20   ;;  %s1125_s16 = smov %s946_s18 }
 0x11e   : > { %s1126_s17 = smov %s1129_s20  ;;  %s1127_s18 = smov %s1133_s21 }
 0x11f   :  { %13 = sbr.rel (!%p11_p9) target bundleno = 3 (0x3), region = 80 }

</bundles_post_ra>
